<compile_context>
chip_gen: v6e
topology: v6e:2x2x1
jax: 0.10.0
libtpu: 0.0.40
codegen_flags: <defaults>
</compile_context>

<pallas_src>
import jax
import jax.numpy as jnp
from jax.experimental import pallas as pl
from jax.experimental.pallas import tpu as pltpu


# ---------------------------------------------------------------------------
# Fused Pallas kernel: Conv3x3 + bias + ReLU + MaxPool2x2 + Flatten + Linear
# ---------------------------------------------------------------------------

def _cnn_fused_kernel(xp_ref, wc_ref, bc_ref, wf_ref, bf_ref, out_ref,
                      conv_scr, flat_scr):
    """All-in-VMEM fused forward pass.

    xp_ref:  [B, H+2, W+2, Cin]   spatially padded NHWC input
    wc_ref:  [9, Cin, Cout]       conv taps, index = kh*3 + kw
    bc_ref:  [1, Cout]            conv bias
    wf_ref:  [Ho*Wo*Cout, NCls]   FC weight (pre-permuted to NHWC flatten order)
    bf_ref:  [1, NCls]            FC bias
    out_ref: [B, NCls]            logits
    conv_scr: VMEM [B, H, W, Cout] f32   conv+ReLU activations
    flat_scr: VMEM [B, Ho*Wo*Cout] f32   lane-dense pooled/flattened features
    """
    B, Hp, Wp, Cin = xp_ref.shape
    H, W = Hp - 2, Wp - 2
    Ho, Wo = H // 2, W // 2
    Cout = wc_ref.shape[-1]

    # ---- Conv2d(3x3, pad=1) as 9 accumulated shifted matmuls (in-kernel
    #      im2col), contraction over Cin, f32 accumulation on the MXU. -------
    acc = jnp.zeros((B * H * W, Cout), dtype=jnp.float32)
    for kh in range(3):
        for kw in range(3):
            patch = xp_ref[:, kh:kh + H, kw:kw + W, :]        # [B, H, W, Cin]
            p2 = patch.reshape(B * H * W, Cin)                # rows = (b, h, w)
            acc = acc + jnp.dot(p2, wc_ref[kh * 3 + kw],
                                preferred_element_type=jnp.float32)

    # Bias + ReLU epilogue in f32, result kept in VMEM scratch.
    conv = jnp.maximum(acc + bc_ref[...], 0.0)                # [B*H*W, Cout]
    conv_scr[...] = conv.reshape(B, H, W, Cout)

    # ---- MaxPool2d(2) + Flatten, written lane-dense as [B, Ho*Wo*Cout].
    #      Uses only integer-indexed VMEM reads and contiguous lane-slice
    #      stores (no strided slices / lane-merging reshapes). --------------
    for ho in range(Ho):
        for wo in range(Wo):
            a = conv_scr[:, 2 * ho,     2 * wo,     :]        # [B, Cout]
            b = conv_scr[:, 2 * ho,     2 * wo + 1, :]
            c = conv_scr[:, 2 * ho + 1, 2 * wo,     :]
            d = conv_scr[:, 2 * ho + 1, 2 * wo + 1, :]
            m = jnp.maximum(jnp.maximum(a, b), jnp.maximum(c, d))
            off = (ho * Wo + wo) * Cout
            flat_scr[:, off:off + Cout] = m

    # ---- Linear: [B, F] @ [F, NCls] + bias (K=512 lane-dense on the MXU). ---
    logits = jnp.dot(flat_scr[...], wf_ref[...],
                     preferred_element_type=jnp.float32) + bf_ref[...]
    out_ref[...] = logits.astype(out_ref.dtype)


def _cnn_fused_call(xp_nhwc, wc, bc, wf, bf):
    B, Hp, Wp, _ = xp_nhwc.shape
    H, W = Hp - 2, Wp - 2
    Ho, Wo = H // 2, W // 2
    Cout = wc.shape[-1]
    nclass = wf.shape[-1]
    vmem = pl.BlockSpec(memory_space=pltpu.MemorySpace.VMEM)
    return pl.pallas_call(
        _cnn_fused_kernel,
        out_shape=jax.ShapeDtypeStruct((B, nclass), jnp.float32),
        in_specs=[vmem, vmem, vmem, vmem, vmem],
        out_specs=vmem,
        scratch_shapes=[
            pltpu.VMEM((B, H, W, Cout), jnp.float32),          # conv activations
            pltpu.VMEM((B, Ho * Wo * Cout), jnp.float32),      # pooled, flattened
        ],
    )(xp_nhwc, wc, bc, wf, bf)


# ---------------------------------------------------------------------------
# Parameter prep (done ONCE, outside the forward path)
# ---------------------------------------------------------------------------

def prepare_params(params, H, W):
    """Relayout PyTorch-style weights for the fused kernel (one-time cost)."""
    conv_w = params["conv_w"]                                  # [Cout, Cin, 3, 3]
    Cout, Cin, KH, KW = conv_w.shape
    Ho, Wo = H // 2, W // 2
    fc_w = params["fc_w"]                                      # [NCls, Cout*Ho*Wo]
    nclass = fc_w.shape[0]

    # Conv taps: [kh, kw, ci, co] flattened over (kh, kw) -> [9, Cin, Cout].
    wc = jnp.transpose(conv_w, (2, 3, 1, 0)).reshape(KH * KW, Cin, Cout)
    bc = params["conv_b"].reshape(1, Cout)

    # FC weight: PyTorch flattens NCHW as (c, ho, wo); the kernel flattens the
    # NHWC-pooled activations as (ho, wo, c).  Fold that permutation (and the
    # transpose) into the weight once: result is [Ho*Wo*Cout, NCls].
    wf = (fc_w.reshape(nclass, Cout, Ho, Wo)
              .transpose(2, 3, 1, 0)
              .reshape(Ho * Wo * Cout, nclass))
    bf = params["fc_b"].reshape(1, nclass)
    return {"wc": wc, "bc": bc, "wf": wf, "bf": bf}


@jax.jit
def cnn_forward(x, prepped):
    """CNN.forward on NCHW input x: [B, Cin, H, W] -> logits [B, NCls]."""
    # Minimal host-side glue: pad + NHWC relayout of a ~4 KB input; everything
    # else happens inside the single fused Pallas kernel.
    xp = jnp.pad(x, ((0, 0), (0, 0), (1, 1), (1, 1)))
    xp_nhwc = jnp.transpose(xp, (0, 2, 3, 1))                  # [B, H+2, W+2, Cin]
    return _cnn_fused_call(xp_nhwc, prepped["wc"], prepped["bc"],
                           prepped["wf"], prepped["bf"])


# ---------------------------------------------------------------------------
# Main
# ---------------------------------------------------------------------------

if __name__ == "__main__":
    key = jax.random.PRNGKey(0)
    k_x, k_cw, k_cb, k_fw, k_fb = jax.random.split(key, 5)

    B, Cin, H, W = 2, 4, 16, 16
    Cout = 8
    num_classes = 10
    flat_features = Cout * (H // 2) * (W // 2)                 # 8 * 8 * 8 = 512

    x = jax.random.normal(k_x, (B, Cin, H, W), dtype=jnp.float32)

    # Deterministic synthetic parameters (shapes follow nn.Conv2d / nn.Linear).
    params = {
        "conv_w": 0.1 * jax.random.normal(k_cw, (Cout, Cin, 3, 3), jnp.float32),
        "conv_b": 0.1 * jax.random.normal(k_cb, (Cout,), jnp.float32),
        "fc_w": 0.05 * jax.random.normal(k_fw, (num_classes, flat_features),
                                         jnp.float32),
        "fc_b": 0.05 * jax.random.normal(k_fb, (num_classes,), jnp.float32),
    }

    prepped = prepare_params(params, H, W)                     # one-time relayout

    out = cnn_forward(x, prepped)
    out = jax.block_until_ready(out)

    # Sanity check against a pure-JAX reference of the same layer stack
    # (PyTorch semantics: NCHW conv, 2x2 pool, NCHW flatten, Linear).
    ref = jax.lax.conv_general_dilated(
        x, params["conv_w"], window_strides=(1, 1), padding="SAME",
        dimension_numbers=("NCHW", "OIHW", "NCHW"))
    ref = jnp.maximum(ref + params["conv_b"][None, :, None, None], 0.0)
    ref = jax.lax.reduce_window(ref, -jnp.inf, jax.lax.max,
                                (1, 1, 2, 2), (1, 1, 2, 2), "VALID")
    ref = ref.reshape(B, -1) @ params["fc_w"].T + params["fc_b"]
    assert out.shape == (B, num_classes)
    assert jnp.allclose(out, ref, atol=1e-3, rtol=1e-3)

    print("KERNEL_OK")
</pallas_src>

<mosaic_0001>
module attributes {stable_mosaic.version = 11 : i64} {
  func.func @_cnn_fused_kernel(%arg0: memref<2x18x18x4xf32, #tpu.memory_space<vmem>>, %arg1: memref<9x4x8xf32, #tpu.memory_space<vmem>>, %arg2: memref<1x8xf32, #tpu.memory_space<vmem>>, %arg3: memref<512x10xf32, #tpu.memory_space<vmem>>, %arg4: memref<1x10xf32, #tpu.memory_space<vmem>>, %arg5: memref<2x10xf32, #tpu.memory_space<vmem>>, %arg6: memref<2x16x16x8xf32, #tpu.memory_space<vmem>>, %arg7: memref<2x512xf32, #tpu.memory_space<vmem>>) attributes {dimension_semantics = [], scalar_prefetch = 0 : i64, scratch_operands = 2 : i64, tpu.core_type = #tpu.core_type<tc>} {
    %cst = arith.constant 0.000000e+00 : f32
    %0 = vector.broadcast %cst : f32 to vector<512x8xf32>
    %c0 = arith.constant 0 : index
    %c0_0 = arith.constant 0 : index
    %c0_1 = arith.constant 0 : index
    %c0_2 = arith.constant 0 : index
    %1 = vector.load %arg0[%c0, %c0_0, %c0_1, %c0_2] : memref<2x18x18x4xf32, #tpu.memory_space<vmem>>, vector<2x16x16x4xf32>
    %2 = vector.shape_cast %1 : vector<2x16x16x4xf32> to vector<512x4xf32>
    %c0_3 = arith.constant 0 : index
    %c0_4 = arith.constant 0 : index
    %c0_5 = arith.constant 0 : index
    %3 = vector.load %arg1[%c0_3, %c0_4, %c0_5] : memref<9x4x8xf32, #tpu.memory_space<vmem>>, vector<1x4x8xf32>
    %4 = vector.shape_cast %3 : vector<1x4x8xf32> to vector<4x8xf32>
    %cst_6 = arith.constant dense<0.000000e+00> : vector<512x8xf32>
    %5 = tpu.matmul %2, %4, %cst_6 {dimension_numbers = #tpu.dot_dimension_numbers<[1], [0], [0], [1], [0, 0, 1, 1], [], []>} : vector<512x4xf32>, vector<4x8xf32>, vector<512x8xf32> -> vector<512x8xf32>
    %6 = arith.addf %0, %5 : vector<512x8xf32>
    %c0_7 = arith.constant 0 : index
    %c0_8 = arith.constant 0 : index
    %c1 = arith.constant 1 : index
    %c0_9 = arith.constant 0 : index
    %7 = vector.load %arg0[%c0_7, %c0_8, %c1, %c0_9] : memref<2x18x18x4xf32, #tpu.memory_space<vmem>>, vector<2x16x16x4xf32>
    %8 = vector.shape_cast %7 : vector<2x16x16x4xf32> to vector<512x4xf32>
    %c1_10 = arith.constant 1 : index
    %c0_11 = arith.constant 0 : index
    %c0_12 = arith.constant 0 : index
    %9 = vector.load %arg1[%c1_10, %c0_11, %c0_12] : memref<9x4x8xf32, #tpu.memory_space<vmem>>, vector<1x4x8xf32>
    %10 = vector.shape_cast %9 : vector<1x4x8xf32> to vector<4x8xf32>
    %cst_13 = arith.constant dense<0.000000e+00> : vector<512x8xf32>
    %11 = tpu.matmul %8, %10, %cst_13 {dimension_numbers = #tpu.dot_dimension_numbers<[1], [0], [0], [1], [0, 0, 1, 1], [], []>} : vector<512x4xf32>, vector<4x8xf32>, vector<512x8xf32> -> vector<512x8xf32>
    %12 = arith.addf %6, %11 : vector<512x8xf32>
    %c0_14 = arith.constant 0 : index
    %c0_15 = arith.constant 0 : index
    %c2 = arith.constant 2 : index
    %c0_16 = arith.constant 0 : index
    %13 = vector.load %arg0[%c0_14, %c0_15, %c2, %c0_16] : memref<2x18x18x4xf32, #tpu.memory_space<vmem>>, vector<2x16x16x4xf32>
    %14 = vector.shape_cast %13 : vector<2x16x16x4xf32> to vector<512x4xf32>
    %c2_17 = arith.constant 2 : index
    %c0_18 = arith.constant 0 : index
    %c0_19 = arith.constant 0 : index
    %15 = vector.load %arg1[%c2_17, %c0_18, %c0_19] : memref<9x4x8xf32, #tpu.memory_space<vmem>>, vector<1x4x8xf32>
    %16 = vector.shape_cast %15 : vector<1x4x8xf32> to vector<4x8xf32>
    %cst_20 = arith.constant dense<0.000000e+00> : vector<512x8xf32>
    %17 = tpu.matmul %14, %16, %cst_20 {dimension_numbers = #tpu.dot_dimension_numbers<[1], [0], [0], [1], [0, 0, 1, 1], [], []>} : vector<512x4xf32>, vector<4x8xf32>, vector<512x8xf32> -> vector<512x8xf32>
    %18 = arith.addf %12, %17 : vector<512x8xf32>
    %c0_21 = arith.constant 0 : index
    %c1_22 = arith.constant 1 : index
    %c0_23 = arith.constant 0 : index
    %c0_24 = arith.constant 0 : index
    %19 = vector.load %arg0[%c0_21, %c1_22, %c0_23, %c0_24] : memref<2x18x18x4xf32, #tpu.memory_space<vmem>>, vector<2x16x16x4xf32>
    %20 = vector.shape_cast %19 : vector<2x16x16x4xf32> to vector<512x4xf32>
    %c3 = arith.constant 3 : index
    %c0_25 = arith.constant 0 : index
    %c0_26 = arith.constant 0 : index
    %21 = vector.load %arg1[%c3, %c0_25, %c0_26] : memref<9x4x8xf32, #tpu.memory_space<vmem>>, vector<1x4x8xf32>
    %22 = vector.shape_cast %21 : vector<1x4x8xf32> to vector<4x8xf32>
    %cst_27 = arith.constant dense<0.000000e+00> : vector<512x8xf32>
    %23 = tpu.matmul %20, %22, %cst_27 {dimension_numbers = #tpu.dot_dimension_numbers<[1], [0], [0], [1], [0, 0, 1, 1], [], []>} : vector<512x4xf32>, vector<4x8xf32>, vector<512x8xf32> -> vector<512x8xf32>
    %24 = arith.addf %18, %23 : vector<512x8xf32>
    %c0_28 = arith.constant 0 : index
    %c1_29 = arith.constant 1 : index
    %c1_30 = arith.constant 1 : index
    %c0_31 = arith.constant 0 : index
    %25 = vector.load %arg0[%c0_28, %c1_29, %c1_30, %c0_31] : memref<2x18x18x4xf32, #tpu.memory_space<vmem>>, vector<2x16x16x4xf32>
    %26 = vector.shape_cast %25 : vector<2x16x16x4xf32> to vector<512x4xf32>
    %c4 = arith.constant 4 : index
    %c0_32 = arith.constant 0 : index
    %c0_33 = arith.constant 0 : index
    %27 = vector.load %arg1[%c4, %c0_32, %c0_33] : memref<9x4x8xf32, #tpu.memory_space<vmem>>, vector<1x4x8xf32>
    %28 = vector.shape_cast %27 : vector<1x4x8xf32> to vector<4x8xf32>
    %cst_34 = arith.constant dense<0.000000e+00> : vector<512x8xf32>
    %29 = tpu.matmul %26, %28, %cst_34 {dimension_numbers = #tpu.dot_dimension_numbers<[1], [0], [0], [1], [0, 0, 1, 1], [], []>} : vector<512x4xf32>, vector<4x8xf32>, vector<512x8xf32> -> vector<512x8xf32>
    %30 = arith.addf %24, %29 : vector<512x8xf32>
    %c0_35 = arith.constant 0 : index
    %c1_36 = arith.constant 1 : index
    %c2_37 = arith.constant 2 : index
    %c0_38 = arith.constant 0 : index
    %31 = vector.load %arg0[%c0_35, %c1_36, %c2_37, %c0_38] : memref<2x18x18x4xf32, #tpu.memory_space<vmem>>, vector<2x16x16x4xf32>
    %32 = vector.shape_cast %31 : vector<2x16x16x4xf32> to vector<512x4xf32>
    %c5 = arith.constant 5 : index
    %c0_39 = arith.constant 0 : index
    %c0_40 = arith.constant 0 : index
    %33 = vector.load %arg1[%c5, %c0_39, %c0_40] : memref<9x4x8xf32, #tpu.memory_space<vmem>>, vector<1x4x8xf32>
    %34 = vector.shape_cast %33 : vector<1x4x8xf32> to vector<4x8xf32>
    %cst_41 = arith.constant dense<0.000000e+00> : vector<512x8xf32>
    %35 = tpu.matmul %32, %34, %cst_41 {dimension_numbers = #tpu.dot_dimension_numbers<[1], [0], [0], [1], [0, 0, 1, 1], [], []>} : vector<512x4xf32>, vector<4x8xf32>, vector<512x8xf32> -> vector<512x8xf32>
    %36 = arith.addf %30, %35 : vector<512x8xf32>
    %c0_42 = arith.constant 0 : index
    %c2_43 = arith.constant 2 : index
    %c0_44 = arith.constant 0 : index
    %c0_45 = arith.constant 0 : index
    %37 = vector.load %arg0[%c0_42, %c2_43, %c0_44, %c0_45] : memref<2x18x18x4xf32, #tpu.memory_space<vmem>>, vector<2x16x16x4xf32>
    %38 = vector.shape_cast %37 : vector<2x16x16x4xf32> to vector<512x4xf32>
    %c6 = arith.constant 6 : index
    %c0_46 = arith.constant 0 : index
    %c0_47 = arith.constant 0 : index
    %39 = vector.load %arg1[%c6, %c0_46, %c0_47] : memref<9x4x8xf32, #tpu.memory_space<vmem>>, vector<1x4x8xf32>
    %40 = vector.shape_cast %39 : vector<1x4x8xf32> to vector<4x8xf32>
    %cst_48 = arith.constant dense<0.000000e+00> : vector<512x8xf32>
    %41 = tpu.matmul %38, %40, %cst_48 {dimension_numbers = #tpu.dot_dimension_numbers<[1], [0], [0], [1], [0, 0, 1, 1], [], []>} : vector<512x4xf32>, vector<4x8xf32>, vector<512x8xf32> -> vector<512x8xf32>
    %42 = arith.addf %36, %41 : vector<512x8xf32>
    %c0_49 = arith.constant 0 : index
    %c2_50 = arith.constant 2 : index
    %c1_51 = arith.constant 1 : index
    %c0_52 = arith.constant 0 : index
    %43 = vector.load %arg0[%c0_49, %c2_50, %c1_51, %c0_52] : memref<2x18x18x4xf32, #tpu.memory_space<vmem>>, vector<2x16x16x4xf32>
    %44 = vector.shape_cast %43 : vector<2x16x16x4xf32> to vector<512x4xf32>
    %c7 = arith.constant 7 : index
    %c0_53 = arith.constant 0 : index
    %c0_54 = arith.constant 0 : index
    %45 = vector.load %arg1[%c7, %c0_53, %c0_54] : memref<9x4x8xf32, #tpu.memory_space<vmem>>, vector<1x4x8xf32>
    %46 = vector.shape_cast %45 : vector<1x4x8xf32> to vector<4x8xf32>
    %cst_55 = arith.constant dense<0.000000e+00> : vector<512x8xf32>
    %47 = tpu.matmul %44, %46, %cst_55 {dimension_numbers = #tpu.dot_dimension_numbers<[1], [0], [0], [1], [0, 0, 1, 1], [], []>} : vector<512x4xf32>, vector<4x8xf32>, vector<512x8xf32> -> vector<512x8xf32>
    %48 = arith.addf %42, %47 : vector<512x8xf32>
    %c0_56 = arith.constant 0 : index
    %c2_57 = arith.constant 2 : index
    %c2_58 = arith.constant 2 : index
    %c0_59 = arith.constant 0 : index
    %49 = vector.load %arg0[%c0_56, %c2_57, %c2_58, %c0_59] : memref<2x18x18x4xf32, #tpu.memory_space<vmem>>, vector<2x16x16x4xf32>
    %50 = vector.shape_cast %49 : vector<2x16x16x4xf32> to vector<512x4xf32>
    %c8 = arith.constant 8 : index
    %c0_60 = arith.constant 0 : index
    %c0_61 = arith.constant 0 : index
    %51 = vector.load %arg1[%c8, %c0_60, %c0_61] : memref<9x4x8xf32, #tpu.memory_space<vmem>>, vector<1x4x8xf32>
    %52 = vector.shape_cast %51 : vector<1x4x8xf32> to vector<4x8xf32>
    %cst_62 = arith.constant dense<0.000000e+00> : vector<512x8xf32>
    %53 = tpu.matmul %50, %52, %cst_62 {dimension_numbers = #tpu.dot_dimension_numbers<[1], [0], [0], [1], [0, 0, 1, 1], [], []>} : vector<512x4xf32>, vector<4x8xf32>, vector<512x8xf32> -> vector<512x8xf32>
    %54 = arith.addf %48, %53 : vector<512x8xf32>
    %c0_63 = arith.constant 0 : index
    %c0_64 = arith.constant 0 : index
    %55 = vector.load %arg2[%c0_63, %c0_64] : memref<1x8xf32, #tpu.memory_space<vmem>>, vector<1x8xf32>
    %56 = vector.broadcast %55 : vector<1x8xf32> to vector<512x8xf32>
    %57 = arith.addf %54, %56 : vector<512x8xf32>
    %cst_65 = arith.constant 0.000000e+00 : f32
    %58 = vector.broadcast %cst_65 : f32 to vector<512x8xf32>
    %59 = arith.maximumf %57, %58 : vector<512x8xf32>
    %60 = vector.shape_cast %59 : vector<512x8xf32> to vector<2x16x16x8xf32>
    %c0_66 = arith.constant 0 : index
    %c0_67 = arith.constant 0 : index
    %c0_68 = arith.constant 0 : index
    %c0_69 = arith.constant 0 : index
    %61 = vector.load %arg6[%c0_66, %c0_67, %c0_68, %c0_69] : memref<2x16x16x8xf32, #tpu.memory_space<vmem>>, vector<2x16x16x8xf32>
    tpu.vector_store %arg6[%c0_66, %c0_67, %c0_68, %c0_69], %60 {strides = array<i32>} : memref<2x16x16x8xf32, #tpu.memory_space<vmem>>, vector<2x16x16x8xf32>,
    %c0_70 = arith.constant 0 : index
    %c0_71 = arith.constant 0 : index
    %c0_72 = arith.constant 0 : index
    %c0_73 = arith.constant 0 : index
    %62 = vector.load %arg6[%c0_70, %c0_71, %c0_72, %c0_73] : memref<2x16x16x8xf32, #tpu.memory_space<vmem>>, vector<2x1x1x8xf32>
    %63 = vector.shape_cast %62 : vector<2x1x1x8xf32> to vector<2x8xf32>
    %c0_74 = arith.constant 0 : index
    %c0_75 = arith.constant 0 : index
    %c1_76 = arith.constant 1 : index
    %c0_77 = arith.constant 0 : index
    %64 = vector.load %arg6[%c0_74, %c0_75, %c1_76, %c0_77] : memref<2x16x16x8xf32, #tpu.memory_space<vmem>>, vector<2x1x1x8xf32>
    %65 = vector.shape_cast %64 : vector<2x1x1x8xf32> to vector<2x8xf32>
    %c0_78 = arith.constant 0 : index
    %c1_79 = arith.constant 1 : index
    %c0_80 = arith.constant 0 : index
    %c0_81 = arith.constant 0 : index
    %66 = vector.load %arg6[%c0_78, %c1_79, %c0_80, %c0_81] : memref<2x16x16x8xf32, #tpu.memory_space<vmem>>, vector<2x1x1x8xf32>
    %67 = vector.shape_cast %66 : vector<2x1x1x8xf32> to vector<2x8xf32>
    %c0_82 = arith.constant 0 : index
    %c1_83 = arith.constant 1 : index
    %c1_84 = arith.constant 1 : index
    %c0_85 = arith.constant 0 : index
    %68 = vector.load %arg6[%c0_82, %c1_83, %c1_84, %c0_85] : memref<2x16x16x8xf32, #tpu.memory_space<vmem>>, vector<2x1x1x8xf32>
    %69 = vector.shape_cast %68 : vector<2x1x1x8xf32> to vector<2x8xf32>
    %70 = arith.maximumf %63, %65 : vector<2x8xf32>
    %71 = arith.maximumf %67, %69 : vector<2x8xf32>
    %72 = arith.maximumf %70, %71 : vector<2x8xf32>
    %c0_86 = arith.constant 0 : index
    %c0_87 = arith.constant 0 : index
    %73 = vector.load %arg7[%c0_86, %c0_87] : memref<2x512xf32, #tpu.memory_space<vmem>>, vector<2x8xf32>
    tpu.vector_store %arg7[%c0_86, %c0_87], %72 {strides = array<i32>} : memref<2x512xf32, #tpu.memory_space<vmem>>, vector<2x8xf32>,
    %c0_88 = arith.constant 0 : index
    %c0_89 = arith.constant 0 : index
    %c2_90 = arith.constant 2 : index
    %c0_91 = arith.constant 0 : index
    %74 = vector.load %arg6[%c0_88, %c0_89, %c2_90, %c0_91] : memref<2x16x16x8xf32, #tpu.memory_space<vmem>>, vector<2x1x1x8xf32>
    %75 = vector.shape_cast %74 : vector<2x1x1x8xf32> to vector<2x8xf32>
    %c0_92 = arith.constant 0 : index
    %c0_93 = arith.constant 0 : index
    %c3_94 = arith.constant 3 : index
    %c0_95 = arith.constant 0 : index
    %76 = vector.load %arg6[%c0_92, %c0_93, %c3_94, %c0_95] : memref<2x16x16x8xf32, #tpu.memory_space<vmem>>, vector<2x1x1x8xf32>
    %77 = vector.shape_cast %76 : vector<2x1x1x8xf32> to vector<2x8xf32>
    %c0_96 = arith.constant 0 : index
    %c1_97 = arith.constant 1 : index
    %c2_98 = arith.constant 2 : index
    %c0_99 = arith.constant 0 : index
    %78 = vector.load %arg6[%c0_96, %c1_97, %c2_98, %c0_99] : memref<2x16x16x8xf32, #tpu.memory_space<vmem>>, vector<2x1x1x8xf32>
    %79 = vector.shape_cast %78 : vector<2x1x1x8xf32> to vector<2x8xf32>
    %c0_100 = arith.constant 0 : index
    %c1_101 = arith.constant 1 : index
    %c3_102 = arith.constant 3 : index
    %c0_103 = arith.constant 0 : index
    %80 = vector.load %arg6[%c0_100, %c1_101, %c3_102, %c0_103] : memref<2x16x16x8xf32, #tpu.memory_space<vmem>>, vector<2x1x1x8xf32>
    %81 = vector.shape_cast %80 : vector<2x1x1x8xf32> to vector<2x8xf32>
    %82 = arith.maximumf %75, %77 : vector<2x8xf32>
    %83 = arith.maximumf %79, %81 : vector<2x8xf32>
    %84 = arith.maximumf %82, %83 : vector<2x8xf32>
    %c0_104 = arith.constant 0 : index
    %c8_105 = arith.constant 8 : index
    %85 = vector.load %arg7[%c0_104, %c8_105] : memref<2x512xf32, #tpu.memory_space<vmem>>, vector<2x8xf32>
    tpu.vector_store %arg7[%c0_104, %c8_105], %84 {strides = array<i32>} : memref<2x512xf32, #tpu.memory_space<vmem>>, vector<2x8xf32>,
    %c0_106 = arith.constant 0 : index
    %c0_107 = arith.constant 0 : index
    %c4_108 = arith.constant 4 : index
    %c0_109 = arith.constant 0 : index
    %86 = vector.load %arg6[%c0_106, %c0_107, %c4_108, %c0_109] : memref<2x16x16x8xf32, #tpu.memory_space<vmem>>, vector<2x1x1x8xf32>
    %87 = vector.shape_cast %86 : vector<2x1x1x8xf32> to vector<2x8xf32>
    %c0_110 = arith.constant 0 : index
    %c0_111 = arith.constant 0 : index
    %c5_112 = arith.constant 5 : index
    %c0_113 = arith.constant 0 : index
    %88 = vector.load %arg6[%c0_110, %c0_111, %c5_112, %c0_113] : memref<2x16x16x8xf32, #tpu.memory_space<vmem>>, vector<2x1x1x8xf32>
    %89 = vector.shape_cast %88 : vector<2x1x1x8xf32> to vector<2x8xf32>
    %c0_114 = arith.constant 0 : index
    %c1_115 = arith.constant 1 : index
    %c4_116 = arith.constant 4 : index
    %c0_117 = arith.constant 0 : index
    %90 = vector.load %arg6[%c0_114, %c1_115, %c4_116, %c0_117] : memref<2x16x16x8xf32, #tpu.memory_space<vmem>>, vector<2x1x1x8xf32>
    %91 = vector.shape_cast %90 : vector<2x1x1x8xf32> to vector<2x8xf32>
    %c0_118 = arith.constant 0 : index
    %c1_119 = arith.constant 1 : index
    %c5_120 = arith.constant 5 : index
    %c0_121 = arith.constant 0 : index
    %92 = vector.load %arg6[%c0_118, %c1_119, %c5_120, %c0_121] : memref<2x16x16x8xf32, #tpu.memory_space<vmem>>, vector<2x1x1x8xf32>
    %93 = vector.shape_cast %92 : vector<2x1x1x8xf32> to vector<2x8xf32>
    %94 = arith.maximumf %87, %89 : vector<2x8xf32>
    %95 = arith.maximumf %91, %93 : vector<2x8xf32>
    %96 = arith.maximumf %94, %95 : vector<2x8xf32>
    %c0_122 = arith.constant 0 : index
    %c16 = arith.constant 16 : index
    %97 = vector.load %arg7[%c0_122, %c16] : memref<2x512xf32, #tpu.memory_space<vmem>>, vector<2x8xf32>
    tpu.vector_store %arg7[%c0_122, %c16], %96 {strides = array<i32>} : memref<2x512xf32, #tpu.memory_space<vmem>>, vector<2x8xf32>,
    %c0_123 = arith.constant 0 : index
    %c0_124 = arith.constant 0 : index
    %c6_125 = arith.constant 6 : index
    %c0_126 = arith.constant 0 : index
    %98 = vector.load %arg6[%c0_123, %c0_124, %c6_125, %c0_126] : memref<2x16x16x8xf32, #tpu.memory_space<vmem>>, vector<2x1x1x8xf32>
    %99 = vector.shape_cast %98 : vector<2x1x1x8xf32> to vector<2x8xf32>
    %c0_127 = arith.constant 0 : index
    %c0_128 = arith.constant 0 : index
    %c7_129 = arith.constant 7 : index
    %c0_130 = arith.constant 0 : index
    %100 = vector.load %arg6[%c0_127, %c0_128, %c7_129, %c0_130] : memref<2x16x16x8xf32, #tpu.memory_space<vmem>>, vector<2x1x1x8xf32>
    %101 = vector.shape_cast %100 : vector<2x1x1x8xf32> to vector<2x8xf32>
    %c0_131 = arith.constant 0 : index
    %c1_132 = arith.constant 1 : index
    %c6_133 = arith.constant 6 : index
    %c0_134 = arith.constant 0 : index
    %102 = vector.load %arg6[%c0_131, %c1_132, %c6_133, %c0_134] : memref<2x16x16x8xf32, #tpu.memory_space<vmem>>, vector<2x1x1x8xf32>
    %103 = vector.shape_cast %102 : vector<2x1x1x8xf32> to vector<2x8xf32>
    %c0_135 = arith.constant 0 : index
    %c1_136 = arith.constant 1 : index
    %c7_137 = arith.constant 7 : index
    %c0_138 = arith.constant 0 : index
    %104 = vector.load %arg6[%c0_135, %c1_136, %c7_137, %c0_138] : memref<2x16x16x8xf32, #tpu.memory_space<vmem>>, vector<2x1x1x8xf32>
    %105 = vector.shape_cast %104 : vector<2x1x1x8xf32> to vector<2x8xf32>
    %106 = arith.maximumf %99, %101 : vector<2x8xf32>
    %107 = arith.maximumf %103, %105 : vector<2x8xf32>
    %108 = arith.maximumf %106, %107 : vector<2x8xf32>
    %c0_139 = arith.constant 0 : index
    %c24 = arith.constant 24 : index
    %109 = vector.load %arg7[%c0_139, %c24] : memref<2x512xf32, #tpu.memory_space<vmem>>, vector<2x8xf32>
    tpu.vector_store %arg7[%c0_139, %c24], %108 {strides = array<i32>} : memref<2x512xf32, #tpu.memory_space<vmem>>, vector<2x8xf32>,
    %c0_140 = arith.constant 0 : index
    %c0_141 = arith.constant 0 : index
    %c8_142 = arith.constant 8 : index
    %c0_143 = arith.constant 0 : index
    %110 = vector.load %arg6[%c0_140, %c0_141, %c8_142, %c0_143] : memref<2x16x16x8xf32, #tpu.memory_space<vmem>>, vector<2x1x1x8xf32>
    %111 = vector.shape_cast %110 : vector<2x1x1x8xf32> to vector<2x8xf32>
    %c0_144 = arith.constant 0 : index
    %c0_145 = arith.constant 0 : index
    %c9 = arith.constant 9 : index
    %c0_146 = arith.constant 0 : index
    %112 = vector.load %arg6[%c0_144, %c0_145, %c9, %c0_146] : memref<2x16x16x8xf32, #tpu.memory_space<vmem>>, vector<2x1x1x8xf32>
    %113 = vector.shape_cast %112 : vector<2x1x1x8xf32> to vector<2x8xf32>
    %c0_147 = arith.constant 0 : index
    %c1_148 = arith.constant 1 : index
    %c8_149 = arith.constant 8 : index
    %c0_150 = arith.constant 0 : index
    %114 = vector.load %arg6[%c0_147, %c1_148, %c8_149, %c0_150] : memref<2x16x16x8xf32, #tpu.memory_space<vmem>>, vector<2x1x1x8xf32>
    %115 = vector.shape_cast %114 : vector<2x1x1x8xf32> to vector<2x8xf32>
    %c0_151 = arith.constant 0 : index
    %c1_152 = arith.constant 1 : index
    %c9_153 = arith.constant 9 : index
    %c0_154 = arith.constant 0 : index
    %116 = vector.load %arg6[%c0_151, %c1_152, %c9_153, %c0_154] : memref<2x16x16x8xf32, #tpu.memory_space<vmem>>, vector<2x1x1x8xf32>
    %117 = vector.shape_cast %116 : vector<2x1x1x8xf32> to vector<2x8xf32>
    %118 = arith.maximumf %111, %113 : vector<2x8xf32>
    %119 = arith.maximumf %115, %117 : vector<2x8xf32>
    %120 = arith.maximumf %118, %119 : vector<2x8xf32>
    %c0_155 = arith.constant 0 : index
    %c32 = arith.constant 32 : index
    %121 = vector.load %arg7[%c0_155, %c32] : memref<2x512xf32, #tpu.memory_space<vmem>>, vector<2x8xf32>
    tpu.vector_store %arg7[%c0_155, %c32], %120 {strides = array<i32>} : memref<2x512xf32, #tpu.memory_space<vmem>>, vector<2x8xf32>,
    %c0_156 = arith.constant 0 : index
    %c0_157 = arith.constant 0 : index
    %c10 = arith.constant 10 : index
    %c0_158 = arith.constant 0 : index
    %122 = vector.load %arg6[%c0_156, %c0_157, %c10, %c0_158] : memref<2x16x16x8xf32, #tpu.memory_space<vmem>>, vector<2x1x1x8xf32>
    %123 = vector.shape_cast %122 : vector<2x1x1x8xf32> to vector<2x8xf32>
    %c0_159 = arith.constant 0 : index
    %c0_160 = arith.constant 0 : index
    %c11 = arith.constant 11 : index
    %c0_161 = arith.constant 0 : index
    %124 = vector.load %arg6[%c0_159, %c0_160, %c11, %c0_161] : memref<2x16x16x8xf32, #tpu.memory_space<vmem>>, vector<2x1x1x8xf32>
    %125 = vector.shape_cast %124 : vector<2x1x1x8xf32> to vector<2x8xf32>
    %c0_162 = arith.constant 0 : index
    %c1_163 = arith.constant 1 : index
    %c10_164 = arith.constant 10 : index
    %c0_165 = arith.constant 0 : index
    %126 = vector.load %arg6[%c0_162, %c1_163, %c10_164, %c0_165] : memref<2x16x16x8xf32, #tpu.memory_space<vmem>>, vector<2x1x1x8xf32>
    %127 = vector.shape_cast %126 : vector<2x1x1x8xf32> to vector<2x8xf32>
    %c0_166 = arith.constant 0 : index
    %c1_167 = arith.constant 1 : index
    %c11_168 = arith.constant 11 : index
    %c0_169 = arith.constant 0 : index
    %128 = vector.load %arg6[%c0_166, %c1_167, %c11_168, %c0_169] : memref<2x16x16x8xf32, #tpu.memory_space<vmem>>, vector<2x1x1x8xf32>
    %129 = vector.shape_cast %128 : vector<2x1x1x8xf32> to vector<2x8xf32>
    %130 = arith.maximumf %123, %125 : vector<2x8xf32>
    %131 = arith.maximumf %127, %129 : vector<2x8xf32>
    %132 = arith.maximumf %130, %131 : vector<2x8xf32>
    %c0_170 = arith.constant 0 : index
    %c40 = arith.constant 40 : index
    %133 = vector.load %arg7[%c0_170, %c40] : memref<2x512xf32, #tpu.memory_space<vmem>>, vector<2x8xf32>
    tpu.vector_store %arg7[%c0_170, %c40], %132 {strides = array<i32>} : memref<2x512xf32, #tpu.memory_space<vmem>>, vector<2x8xf32>,
    %c0_171 = arith.constant 0 : index
    %c0_172 = arith.constant 0 : index
    %c12 = arith.constant 12 : index
    %c0_173 = arith.constant 0 : index
    %134 = vector.load %arg6[%c0_171, %c0_172, %c12, %c0_173] : memref<2x16x16x8xf32, #tpu.memory_space<vmem>>, vector<2x1x1x8xf32>
    %135 = vector.shape_cast %134 : vector<2x1x1x8xf32> to vector<2x8xf32>
    %c0_174 = arith.constant 0 : index
    %c0_175 = arith.constant 0 : index
    %c13 = arith.constant 13 : index
    %c0_176 = arith.constant 0 : index
    %136 = vector.load %arg6[%c0_174, %c0_175, %c13, %c0_176] : memref<2x16x16x8xf32, #tpu.memory_space<vmem>>, vector<2x1x1x8xf32>
    %137 = vector.shape_cast %136 : vector<2x1x1x8xf32> to vector<2x8xf32>
    %c0_177 = arith.constant 0 : index
    %c1_178 = arith.constant 1 : index
    %c12_179 = arith.constant 12 : index
    %c0_180 = arith.constant 0 : index
    %138 = vector.load %arg6[%c0_177, %c1_178, %c12_179, %c0_180] : memref<2x16x16x8xf32, #tpu.memory_space<vmem>>, vector<2x1x1x8xf32>
    %139 = vector.shape_cast %138 : vector<2x1x1x8xf32> to vector<2x8xf32>
    %c0_181 = arith.constant 0 : index
    %c1_182 = arith.constant 1 : index
    %c13_183 = arith.constant 13 : index
    %c0_184 = arith.constant 0 : index
    %140 = vector.load %arg6[%c0_181, %c1_182, %c13_183, %c0_184] : memref<2x16x16x8xf32, #tpu.memory_space<vmem>>, vector<2x1x1x8xf32>
    %141 = vector.shape_cast %140 : vector<2x1x1x8xf32> to vector<2x8xf32>
    %142 = arith.maximumf %135, %137 : vector<2x8xf32>
    %143 = arith.maximumf %139, %141 : vector<2x8xf32>
    %144 = arith.maximumf %142, %143 : vector<2x8xf32>
    %c0_185 = arith.constant 0 : index
    %c48 = arith.constant 48 : index
    %145 = vector.load %arg7[%c0_185, %c48] : memref<2x512xf32, #tpu.memory_space<vmem>>, vector<2x8xf32>
    tpu.vector_store %arg7[%c0_185, %c48], %144 {strides = array<i32>} : memref<2x512xf32, #tpu.memory_space<vmem>>, vector<2x8xf32>,
    %c0_186 = arith.constant 0 : index
    %c0_187 = arith.constant 0 : index
    %c14 = arith.constant 14 : index
    %c0_188 = arith.constant 0 : index
    %146 = vector.load %arg6[%c0_186, %c0_187, %c14, %c0_188] : memref<2x16x16x8xf32, #tpu.memory_space<vmem>>, vector<2x1x1x8xf32>
    %147 = vector.shape_cast %146 : vector<2x1x1x8xf32> to vector<2x8xf32>
    %c0_189 = arith.constant 0 : index
    %c0_190 = arith.constant 0 : index
    %c15 = arith.constant 15 : index
    %c0_191 = arith.constant 0 : index
    %148 = vector.load %arg6[%c0_189, %c0_190, %c15, %c0_191] : memref<2x16x16x8xf32, #tpu.memory_space<vmem>>, vector<2x1x1x8xf32>
    %149 = vector.shape_cast %148 : vector<2x1x1x8xf32> to vector<2x8xf32>
    %c0_192 = arith.constant 0 : index
    %c1_193 = arith.constant 1 : index
    %c14_194 = arith.constant 14 : index
    %c0_195 = arith.constant 0 : index
    %150 = vector.load %arg6[%c0_192, %c1_193, %c14_194, %c0_195] : memref<2x16x16x8xf32, #tpu.memory_space<vmem>>, vector<2x1x1x8xf32>
    %151 = vector.shape_cast %150 : vector<2x1x1x8xf32> to vector<2x8xf32>
    %c0_196 = arith.constant 0 : index
    %c1_197 = arith.constant 1 : index
    %c15_198 = arith.constant 15 : index
    %c0_199 = arith.constant 0 : index
    %152 = vector.load %arg6[%c0_196, %c1_197, %c15_198, %c0_199] : memref<2x16x16x8xf32, #tpu.memory_space<vmem>>, vector<2x1x1x8xf32>
    %153 = vector.shape_cast %152 : vector<2x1x1x8xf32> to vector<2x8xf32>
    %154 = arith.maximumf %147, %149 : vector<2x8xf32>
    %155 = arith.maximumf %151, %153 : vector<2x8xf32>
    %156 = arith.maximumf %154, %155 : vector<2x8xf32>
    %c0_200 = arith.constant 0 : index
    %c56 = arith.constant 56 : index
    %157 = vector.load %arg7[%c0_200, %c56] : memref<2x512xf32, #tpu.memory_space<vmem>>, vector<2x8xf32>
    tpu.vector_store %arg7[%c0_200, %c56], %156 {strides = array<i32>} : memref<2x512xf32, #tpu.memory_space<vmem>>, vector<2x8xf32>,
    %c0_201 = arith.constant 0 : index
    %c2_202 = arith.constant 2 : index
    %c0_203 = arith.constant 0 : index
    %c0_204 = arith.constant 0 : index
    %158 = vector.load %arg6[%c0_201, %c2_202, %c0_203, %c0_204] : memref<2x16x16x8xf32, #tpu.memory_space<vmem>>, vector<2x1x1x8xf32>
    %159 = vector.shape_cast %158 : vector<2x1x1x8xf32> to vector<2x8xf32>
    %c0_205 = arith.constant 0 : index
    %c2_206 = arith.constant 2 : index
    %c1_207 = arith.constant 1 : index
    %c0_208 = arith.constant 0 : index
    %160 = vector.load %arg6[%c0_205, %c2_206, %c1_207, %c0_208] : memref<2x16x16x8xf32, #tpu.memory_space<vmem>>, vector<2x1x1x8xf32>
    %161 = vector.shape_cast %160 : vector<2x1x1x8xf32> to vector<2x8xf32>
    %c0_209 = arith.constant 0 : index
    %c3_210 = arith.constant 3 : index
    %c0_211 = arith.constant 0 : index
    %c0_212 = arith.constant 0 : index
    %162 = vector.load %arg6[%c0_209, %c3_210, %c0_211, %c0_212] : memref<2x16x16x8xf32, #tpu.memory_space<vmem>>, vector<2x1x1x8xf32>
    %163 = vector.shape_cast %162 : vector<2x1x1x8xf32> to vector<2x8xf32>
    %c0_213 = arith.constant 0 : index
    %c3_214 = arith.constant 3 : index
    %c1_215 = arith.constant 1 : index
    %c0_216 = arith.constant 0 : index
    %164 = vector.load %arg6[%c0_213, %c3_214, %c1_215, %c0_216] : memref<2x16x16x8xf32, #tpu.memory_space<vmem>>, vector<2x1x1x8xf32>
    %165 = vector.shape_cast %164 : vector<2x1x1x8xf32> to vector<2x8xf32>
    %166 = arith.maximumf %159, %161 : vector<2x8xf32>
    %167 = arith.maximumf %163, %165 : vector<2x8xf32>
    %168 = arith.maximumf %166, %167 : vector<2x8xf32>
    %c0_217 = arith.constant 0 : index
    %c64 = arith.constant 64 : index
    %169 = vector.load %arg7[%c0_217, %c64] : memref<2x512xf32, #tpu.memory_space<vmem>>, vector<2x8xf32>
    tpu.vector_store %arg7[%c0_217, %c64], %168 {strides = array<i32>} : memref<2x512xf32, #tpu.memory_space<vmem>>, vector<2x8xf32>,
    %c0_218 = arith.constant 0 : index
    %c2_219 = arith.constant 2 : index
    %c2_220 = arith.constant 2 : index
    %c0_221 = arith.constant 0 : index
    %170 = vector.load %arg6[%c0_218, %c2_219, %c2_220, %c0_221] : memref<2x16x16x8xf32, #tpu.memory_space<vmem>>, vector<2x1x1x8xf32>
    %171 = vector.shape_cast %170 : vector<2x1x1x8xf32> to vector<2x8xf32>
    %c0_222 = arith.constant 0 : index
    %c2_223 = arith.constant 2 : index
    %c3_224 = arith.constant 3 : index
    %c0_225 = arith.constant 0 : index
    %172 = vector.load %arg6[%c0_222, %c2_223, %c3_224, %c0_225] : memref<2x16x16x8xf32, #tpu.memory_space<vmem>>, vector<2x1x1x8xf32>
    %173 = vector.shape_cast %172 : vector<2x1x1x8xf32> to vector<2x8xf32>
    %c0_226 = arith.constant 0 : index
    %c3_227 = arith.constant 3 : index
    %c2_228 = arith.constant 2 : index
    %c0_229 = arith.constant 0 : index
    %174 = vector.load %arg6[%c0_226, %c3_227, %c2_228, %c0_229] : memref<2x16x16x8xf32, #tpu.memory_space<vmem>>, vector<2x1x1x8xf32>
    %175 = vector.shape_cast %174 : vector<2x1x1x8xf32> to vector<2x8xf32>
    %c0_230 = arith.constant 0 : index
    %c3_231 = arith.constant 3 : index
    %c3_232 = arith.constant 3 : index
    %c0_233 = arith.constant 0 : index
    %176 = vector.load %arg6[%c0_230, %c3_231, %c3_232, %c0_233] : memref<2x16x16x8xf32, #tpu.memory_space<vmem>>, vector<2x1x1x8xf32>
    %177 = vector.shape_cast %176 : vector<2x1x1x8xf32> to vector<2x8xf32>
    %178 = arith.maximumf %171, %173 : vector<2x8xf32>
    %179 = arith.maximumf %175, %177 : vector<2x8xf32>
    %180 = arith.maximumf %178, %179 : vector<2x8xf32>
    %c0_234 = arith.constant 0 : index
    %c72 = arith.constant 72 : index
    %181 = vector.load %arg7[%c0_234, %c72] : memref<2x512xf32, #tpu.memory_space<vmem>>, vector<2x8xf32>
    tpu.vector_store %arg7[%c0_234, %c72], %180 {strides = array<i32>} : memref<2x512xf32, #tpu.memory_space<vmem>>, vector<2x8xf32>,
    %c0_235 = arith.constant 0 : index
    %c2_236 = arith.constant 2 : index
    %c4_237 = arith.constant 4 : index
    %c0_238 = arith.constant 0 : index
    %182 = vector.load %arg6[%c0_235, %c2_236, %c4_237, %c0_238] : memref<2x16x16x8xf32, #tpu.memory_space<vmem>>, vector<2x1x1x8xf32>
    %183 = vector.shape_cast %182 : vector<2x1x1x8xf32> to vector<2x8xf32>
    %c0_239 = arith.constant 0 : index
    %c2_240 = arith.constant 2 : index
    %c5_241 = arith.constant 5 : index
    %c0_242 = arith.constant 0 : index
    %184 = vector.load %arg6[%c0_239, %c2_240, %c5_241, %c0_242] : memref<2x16x16x8xf32, #tpu.memory_space<vmem>>, vector<2x1x1x8xf32>
    %185 = vector.shape_cast %184 : vector<2x1x1x8xf32> to vector<2x8xf32>
    %c0_243 = arith.constant 0 : index
    %c3_244 = arith.constant 3 : index
    %c4_245 = arith.constant 4 : index
    %c0_246 = arith.constant 0 : index
    %186 = vector.load %arg6[%c0_243, %c3_244, %c4_245, %c0_246] : memref<2x16x16x8xf32, #tpu.memory_space<vmem>>, vector<2x1x1x8xf32>
    %187 = vector.shape_cast %186 : vector<2x1x1x8xf32> to vector<2x8xf32>
    %c0_247 = arith.constant 0 : index
    %c3_248 = arith.constant 3 : index
    %c5_249 = arith.constant 5 : index
    %c0_250 = arith.constant 0 : index
    %188 = vector.load %arg6[%c0_247, %c3_248, %c5_249, %c0_250] : memref<2x16x16x8xf32, #tpu.memory_space<vmem>>, vector<2x1x1x8xf32>
    %189 = vector.shape_cast %188 : vector<2x1x1x8xf32> to vector<2x8xf32>
    %190 = arith.maximumf %183, %185 : vector<2x8xf32>
    %191 = arith.maximumf %187, %189 : vector<2x8xf32>
    %192 = arith.maximumf %190, %191 : vector<2x8xf32>
    %c0_251 = arith.constant 0 : index
    %c80 = arith.constant 80 : index
    %193 = vector.load %arg7[%c0_251, %c80] : memref<2x512xf32, #tpu.memory_space<vmem>>, vector<2x8xf32>
    tpu.vector_store %arg7[%c0_251, %c80], %192 {strides = array<i32>} : memref<2x512xf32, #tpu.memory_space<vmem>>, vector<2x8xf32>,
    %c0_252 = arith.constant 0 : index
    %c2_253 = arith.constant 2 : index
    %c6_254 = arith.constant 6 : index
    %c0_255 = arith.constant 0 : index
    %194 = vector.load %arg6[%c0_252, %c2_253, %c6_254, %c0_255] : memref<2x16x16x8xf32, #tpu.memory_space<vmem>>, vector<2x1x1x8xf32>
    %195 = vector.shape_cast %194 : vector<2x1x1x8xf32> to vector<2x8xf32>
    %c0_256 = arith.constant 0 : index
    %c2_257 = arith.constant 2 : index
    %c7_258 = arith.constant 7 : index
    %c0_259 = arith.constant 0 : index
    %196 = vector.load %arg6[%c0_256, %c2_257, %c7_258, %c0_259] : memref<2x16x16x8xf32, #tpu.memory_space<vmem>>, vector<2x1x1x8xf32>
    %197 = vector.shape_cast %196 : vector<2x1x1x8xf32> to vector<2x8xf32>
    %c0_260 = arith.constant 0 : index
    %c3_261 = arith.constant 3 : index
    %c6_262 = arith.constant 6 : index
    %c0_263 = arith.constant 0 : index
    %198 = vector.load %arg6[%c0_260, %c3_261, %c6_262, %c0_263] : memref<2x16x16x8xf32, #tpu.memory_space<vmem>>, vector<2x1x1x8xf32>
    %199 = vector.shape_cast %198 : vector<2x1x1x8xf32> to vector<2x8xf32>
    %c0_264 = arith.constant 0 : index
    %c3_265 = arith.constant 3 : index
    %c7_266 = arith.constant 7 : index
    %c0_267 = arith.constant 0 : index
    %200 = vector.load %arg6[%c0_264, %c3_265, %c7_266, %c0_267] : memref<2x16x16x8xf32, #tpu.memory_space<vmem>>, vector<2x1x1x8xf32>
    %201 = vector.shape_cast %200 : vector<2x1x1x8xf32> to vector<2x8xf32>
    %202 = arith.maximumf %195, %197 : vector<2x8xf32>
    %203 = arith.maximumf %199, %201 : vector<2x8xf32>
    %204 = arith.maximumf %202, %203 : vector<2x8xf32>
    %c0_268 = arith.constant 0 : index
    %c88 = arith.constant 88 : index
    %205 = vector.load %arg7[%c0_268, %c88] : memref<2x512xf32, #tpu.memory_space<vmem>>, vector<2x8xf32>
    tpu.vector_store %arg7[%c0_268, %c88], %204 {strides = array<i32>} : memref<2x512xf32, #tpu.memory_space<vmem>>, vector<2x8xf32>,
    %c0_269 = arith.constant 0 : index
    %c2_270 = arith.constant 2 : index
    %c8_271 = arith.constant 8 : index
    %c0_272 = arith.constant 0 : index
    %206 = vector.load %arg6[%c0_269, %c2_270, %c8_271, %c0_272] : memref<2x16x16x8xf32, #tpu.memory_space<vmem>>, vector<2x1x1x8xf32>
    %207 = vector.shape_cast %206 : vector<2x1x1x8xf32> to vector<2x8xf32>
    %c0_273 = arith.constant 0 : index
    %c2_274 = arith.constant 2 : index
    %c9_275 = arith.constant 9 : index
    %c0_276 = arith.constant 0 : index
    %208 = vector.load %arg6[%c0_273, %c2_274, %c9_275, %c0_276] : memref<2x16x16x8xf32, #tpu.memory_space<vmem>>, vector<2x1x1x8xf32>
    %209 = vector.shape_cast %208 : vector<2x1x1x8xf32> to vector<2x8xf32>
    %c0_277 = arith.constant 0 : index
    %c3_278 = arith.constant 3 : index
    %c8_279 = arith.constant 8 : index
    %c0_280 = arith.constant 0 : index
    %210 = vector.load %arg6[%c0_277, %c3_278, %c8_279, %c0_280] : memref<2x16x16x8xf32, #tpu.memory_space<vmem>>, vector<2x1x1x8xf32>
    %211 = vector.shape_cast %210 : vector<2x1x1x8xf32> to vector<2x8xf32>
    %c0_281 = arith.constant 0 : index
    %c3_282 = arith.constant 3 : index
    %c9_283 = arith.constant 9 : index
    %c0_284 = arith.constant 0 : index
    %212 = vector.load %arg6[%c0_281, %c3_282, %c9_283, %c0_284] : memref<2x16x16x8xf32, #tpu.memory_space<vmem>>, vector<2x1x1x8xf32>
    %213 = vector.shape_cast %212 : vector<2x1x1x8xf32> to vector<2x8xf32>
    %214 = arith.maximumf %207, %209 : vector<2x8xf32>
    %215 = arith.maximumf %211, %213 : vector<2x8xf32>
    %216 = arith.maximumf %214, %215 : vector<2x8xf32>
    %c0_285 = arith.constant 0 : index
    %c96 = arith.constant 96 : index
    %217 = vector.load %arg7[%c0_285, %c96] : memref<2x512xf32, #tpu.memory_space<vmem>>, vector<2x8xf32>
    tpu.vector_store %arg7[%c0_285, %c96], %216 {strides = array<i32>} : memref<2x512xf32, #tpu.memory_space<vmem>>, vector<2x8xf32>,
    %c0_286 = arith.constant 0 : index
    %c2_287 = arith.constant 2 : index
    %c10_288 = arith.constant 10 : index
    %c0_289 = arith.constant 0 : index
    %218 = vector.load %arg6[%c0_286, %c2_287, %c10_288, %c0_289] : memref<2x16x16x8xf32, #tpu.memory_space<vmem>>, vector<2x1x1x8xf32>
    %219 = vector.shape_cast %218 : vector<2x1x1x8xf32> to vector<2x8xf32>
    %c0_290 = arith.constant 0 : index
    %c2_291 = arith.constant 2 : index
    %c11_292 = arith.constant 11 : index
    %c0_293 = arith.constant 0 : index
    %220 = vector.load %arg6[%c0_290, %c2_291, %c11_292, %c0_293] : memref<2x16x16x8xf32, #tpu.memory_space<vmem>>, vector<2x1x1x8xf32>
    %221 = vector.shape_cast %220 : vector<2x1x1x8xf32> to vector<2x8xf32>
    %c0_294 = arith.constant 0 : index
    %c3_295 = arith.constant 3 : index
    %c10_296 = arith.constant 10 : index
    %c0_297 = arith.constant 0 : index
    %222 = vector.load %arg6[%c0_294, %c3_295, %c10_296, %c0_297] : memref<2x16x16x8xf32, #tpu.memory_space<vmem>>, vector<2x1x1x8xf32>
    %223 = vector.shape_cast %222 : vector<2x1x1x8xf32> to vector<2x8xf32>
    %c0_298 = arith.constant 0 : index
    %c3_299 = arith.constant 3 : index
    %c11_300 = arith.constant 11 : index
    %c0_301 = arith.constant 0 : index
    %224 = vector.load %arg6[%c0_298, %c3_299, %c11_300, %c0_301] : memref<2x16x16x8xf32, #tpu.memory_space<vmem>>, vector<2x1x1x8xf32>
    %225 = vector.shape_cast %224 : vector<2x1x1x8xf32> to vector<2x8xf32>
    %226 = arith.maximumf %219, %221 : vector<2x8xf32>
    %227 = arith.maximumf %223, %225 : vector<2x8xf32>
    %228 = arith.maximumf %226, %227 : vector<2x8xf32>
    %c0_302 = arith.constant 0 : index
    %c104 = arith.constant 104 : index
    %229 = vector.load %arg7[%c0_302, %c104] : memref<2x512xf32, #tpu.memory_space<vmem>>, vector<2x8xf32>
    tpu.vector_store %arg7[%c0_302, %c104], %228 {strides = array<i32>} : memref<2x512xf32, #tpu.memory_space<vmem>>, vector<2x8xf32>,
    %c0_303 = arith.constant 0 : index
    %c2_304 = arith.constant 2 : index
    %c12_305 = arith.constant 12 : index
    %c0_306 = arith.constant 0 : index
    %230 = vector.load %arg6[%c0_303, %c2_304, %c12_305, %c0_306] : memref<2x16x16x8xf32, #tpu.memory_space<vmem>>, vector<2x1x1x8xf32>
    %231 = vector.shape_cast %230 : vector<2x1x1x8xf32> to vector<2x8xf32>
    %c0_307 = arith.constant 0 : index
    %c2_308 = arith.constant 2 : index
    %c13_309 = arith.constant 13 : index
    %c0_310 = arith.constant 0 : index
    %232 = vector.load %arg6[%c0_307, %c2_308, %c13_309, %c0_310] : memref<2x16x16x8xf32, #tpu.memory_space<vmem>>, vector<2x1x1x8xf32>
    %233 = vector.shape_cast %232 : vector<2x1x1x8xf32> to vector<2x8xf32>
    %c0_311 = arith.constant 0 : index
    %c3_312 = arith.constant 3 : index
    %c12_313 = arith.constant 12 : index
    %c0_314 = arith.constant 0 : index
    %234 = vector.load %arg6[%c0_311, %c3_312, %c12_313, %c0_314] : memref<2x16x16x8xf32, #tpu.memory_space<vmem>>, vector<2x1x1x8xf32>
    %235 = vector.shape_cast %234 : vector<2x1x1x8xf32> to vector<2x8xf32>
    %c0_315 = arith.constant 0 : index
    %c3_316 = arith.constant 3 : index
    %c13_317 = arith.constant 13 : index
    %c0_318 = arith.constant 0 : index
    %236 = vector.load %arg6[%c0_315, %c3_316, %c13_317, %c0_318] : memref<2x16x16x8xf32, #tpu.memory_space<vmem>>, vector<2x1x1x8xf32>
    %237 = vector.shape_cast %236 : vector<2x1x1x8xf32> to vector<2x8xf32>
    %238 = arith.maximumf %231, %233 : vector<2x8xf32>
    %239 = arith.maximumf %235, %237 : vector<2x8xf32>
    %240 = arith.maximumf %238, %239 : vector<2x8xf32>
    %c0_319 = arith.constant 0 : index
    %c112 = arith.constant 112 : index
    %241 = vector.load %arg7[%c0_319, %c112] : memref<2x512xf32, #tpu.memory_space<vmem>>, vector<2x8xf32>
    tpu.vector_store %arg7[%c0_319, %c112], %240 {strides = array<i32>} : memref<2x512xf32, #tpu.memory_space<vmem>>, vector<2x8xf32>,
    %c0_320 = arith.constant 0 : index
    %c2_321 = arith.constant 2 : index
    %c14_322 = arith.constant 14 : index
    %c0_323 = arith.constant 0 : index
    %242 = vector.load %arg6[%c0_320, %c2_321, %c14_322, %c0_323] : memref<2x16x16x8xf32, #tpu.memory_space<vmem>>, vector<2x1x1x8xf32>
    %243 = vector.shape_cast %242 : vector<2x1x1x8xf32> to vector<2x8xf32>
    %c0_324 = arith.constant 0 : index
    %c2_325 = arith.constant 2 : index
    %c15_326 = arith.constant 15 : index
    %c0_327 = arith.constant 0 : index
    %244 = vector.load %arg6[%c0_324, %c2_325, %c15_326, %c0_327] : memref<2x16x16x8xf32, #tpu.memory_space<vmem>>, vector<2x1x1x8xf32>
    %245 = vector.shape_cast %244 : vector<2x1x1x8xf32> to vector<2x8xf32>
    %c0_328 = arith.constant 0 : index
    %c3_329 = arith.constant 3 : index
    %c14_330 = arith.constant 14 : index
    %c0_331 = arith.constant 0 : index
    %246 = vector.load %arg6[%c0_328, %c3_329, %c14_330, %c0_331] : memref<2x16x16x8xf32, #tpu.memory_space<vmem>>, vector<2x1x1x8xf32>
    %247 = vector.shape_cast %246 : vector<2x1x1x8xf32> to vector<2x8xf32>
    %c0_332 = arith.constant 0 : index
    %c3_333 = arith.constant 3 : index
    %c15_334 = arith.constant 15 : index
    %c0_335 = arith.constant 0 : index
    %248 = vector.load %arg6[%c0_332, %c3_333, %c15_334, %c0_335] : memref<2x16x16x8xf32, #tpu.memory_space<vmem>>, vector<2x1x1x8xf32>
    %249 = vector.shape_cast %248 : vector<2x1x1x8xf32> to vector<2x8xf32>
    %250 = arith.maximumf %243, %245 : vector<2x8xf32>
    %251 = arith.maximumf %247, %249 : vector<2x8xf32>
    %252 = arith.maximumf %250, %251 : vector<2x8xf32>
    %c0_336 = arith.constant 0 : index
    %c120 = arith.constant 120 : index
    %253 = vector.load %arg7[%c0_336, %c120] : memref<2x512xf32, #tpu.memory_space<vmem>>, vector<2x8xf32>
    tpu.vector_store %arg7[%c0_336, %c120], %252 {strides = array<i32>} : memref<2x512xf32, #tpu.memory_space<vmem>>, vector<2x8xf32>,
    %c0_337 = arith.constant 0 : index
    %c4_338 = arith.constant 4 : index
    %c0_339 = arith.constant 0 : index
    %c0_340 = arith.constant 0 : index
    %254 = vector.load %arg6[%c0_337, %c4_338, %c0_339, %c0_340] : memref<2x16x16x8xf32, #tpu.memory_space<vmem>>, vector<2x1x1x8xf32>
    %255 = vector.shape_cast %254 : vector<2x1x1x8xf32> to vector<2x8xf32>
    %c0_341 = arith.constant 0 : index
    %c4_342 = arith.constant 4 : index
    %c1_343 = arith.constant 1 : index
    %c0_344 = arith.constant 0 : index
    %256 = vector.load %arg6[%c0_341, %c4_342, %c1_343, %c0_344] : memref<2x16x16x8xf32, #tpu.memory_space<vmem>>, vector<2x1x1x8xf32>
    %257 = vector.shape_cast %256 : vector<2x1x1x8xf32> to vector<2x8xf32>
    %c0_345 = arith.constant 0 : index
    %c5_346 = arith.constant 5 : index
    %c0_347 = arith.constant 0 : index
    %c0_348 = arith.constant 0 : index
    %258 = vector.load %arg6[%c0_345, %c5_346, %c0_347, %c0_348] : memref<2x16x16x8xf32, #tpu.memory_space<vmem>>, vector<2x1x1x8xf32>
    %259 = vector.shape_cast %258 : vector<2x1x1x8xf32> to vector<2x8xf32>
    %c0_349 = arith.constant 0 : index
    %c5_350 = arith.constant 5 : index
    %c1_351 = arith.constant 1 : index
    %c0_352 = arith.constant 0 : index
    %260 = vector.load %arg6[%c0_349, %c5_350, %c1_351, %c0_352] : memref<2x16x16x8xf32, #tpu.memory_space<vmem>>, vector<2x1x1x8xf32>
    %261 = vector.shape_cast %260 : vector<2x1x1x8xf32> to vector<2x8xf32>
    %262 = arith.maximumf %255, %257 : vector<2x8xf32>
    %263 = arith.maximumf %259, %261 : vector<2x8xf32>
    %264 = arith.maximumf %262, %263 : vector<2x8xf32>
    %c0_353 = arith.constant 0 : index
    %c128 = arith.constant 128 : index
    %265 = vector.load %arg7[%c0_353, %c128] : memref<2x512xf32, #tpu.memory_space<vmem>>, vector<2x8xf32>
    tpu.vector_store %arg7[%c0_353, %c128], %264 {strides = array<i32>} : memref<2x512xf32, #tpu.memory_space<vmem>>, vector<2x8xf32>,
    %c0_354 = arith.constant 0 : index
    %c4_355 = arith.constant 4 : index
    %c2_356 = arith.constant 2 : index
    %c0_357 = arith.constant 0 : index
    %266 = vector.load %arg6[%c0_354, %c4_355, %c2_356, %c0_357] : memref<2x16x16x8xf32, #tpu.memory_space<vmem>>, vector<2x1x1x8xf32>
    %267 = vector.shape_cast %266 : vector<2x1x1x8xf32> to vector<2x8xf32>
    %c0_358 = arith.constant 0 : index
    %c4_359 = arith.constant 4 : index
    %c3_360 = arith.constant 3 : index
    %c0_361 = arith.constant 0 : index
    %268 = vector.load %arg6[%c0_358, %c4_359, %c3_360, %c0_361] : memref<2x16x16x8xf32, #tpu.memory_space<vmem>>, vector<2x1x1x8xf32>
    %269 = vector.shape_cast %268 : vector<2x1x1x8xf32> to vector<2x8xf32>
    %c0_362 = arith.constant 0 : index
    %c5_363 = arith.constant 5 : index
    %c2_364 = arith.constant 2 : index
    %c0_365 = arith.constant 0 : index
    %270 = vector.load %arg6[%c0_362, %c5_363, %c2_364, %c0_365] : memref<2x16x16x8xf32, #tpu.memory_space<vmem>>, vector<2x1x1x8xf32>
    %271 = vector.shape_cast %270 : vector<2x1x1x8xf32> to vector<2x8xf32>
    %c0_366 = arith.constant 0 : index
    %c5_367 = arith.constant 5 : index
    %c3_368 = arith.constant 3 : index
    %c0_369 = arith.constant 0 : index
    %272 = vector.load %arg6[%c0_366, %c5_367, %c3_368, %c0_369] : memref<2x16x16x8xf32, #tpu.memory_space<vmem>>, vector<2x1x1x8xf32>
    %273 = vector.shape_cast %272 : vector<2x1x1x8xf32> to vector<2x8xf32>
    %274 = arith.maximumf %267, %269 : vector<2x8xf32>
    %275 = arith.maximumf %271, %273 : vector<2x8xf32>
    %276 = arith.maximumf %274, %275 : vector<2x8xf32>
    %c0_370 = arith.constant 0 : index
    %c136 = arith.constant 136 : index
    %277 = vector.load %arg7[%c0_370, %c136] : memref<2x512xf32, #tpu.memory_space<vmem>>, vector<2x8xf32>
    tpu.vector_store %arg7[%c0_370, %c136], %276 {strides = array<i32>} : memref<2x512xf32, #tpu.memory_space<vmem>>, vector<2x8xf32>,
    %c0_371 = arith.constant 0 : index
    %c4_372 = arith.constant 4 : index
    %c4_373 = arith.constant 4 : index
    %c0_374 = arith.constant 0 : index
    %278 = vector.load %arg6[%c0_371, %c4_372, %c4_373, %c0_374] : memref<2x16x16x8xf32, #tpu.memory_space<vmem>>, vector<2x1x1x8xf32>
    %279 = vector.shape_cast %278 : vector<2x1x1x8xf32> to vector<2x8xf32>
    %c0_375 = arith.constant 0 : index
    %c4_376 = arith.constant 4 : index
    %c5_377 = arith.constant 5 : index
    %c0_378 = arith.constant 0 : index
    %280 = vector.load %arg6[%c0_375, %c4_376, %c5_377, %c0_378] : memref<2x16x16x8xf32, #tpu.memory_space<vmem>>, vector<2x1x1x8xf32>
    %281 = vector.shape_cast %280 : vector<2x1x1x8xf32> to vector<2x8xf32>
    %c0_379 = arith.constant 0 : index
    %c5_380 = arith.constant 5 : index
    %c4_381 = arith.constant 4 : index
    %c0_382 = arith.constant 0 : index
    %282 = vector.load %arg6[%c0_379, %c5_380, %c4_381, %c0_382] : memref<2x16x16x8xf32, #tpu.memory_space<vmem>>, vector<2x1x1x8xf32>
    %283 = vector.shape_cast %282 : vector<2x1x1x8xf32> to vector<2x8xf32>
    %c0_383 = arith.constant 0 : index
    %c5_384 = arith.constant 5 : index
    %c5_385 = arith.constant 5 : index
    %c0_386 = arith.constant 0 : index
    %284 = vector.load %arg6[%c0_383, %c5_384, %c5_385, %c0_386] : memref<2x16x16x8xf32, #tpu.memory_space<vmem>>, vector<2x1x1x8xf32>
    %285 = vector.shape_cast %284 : vector<2x1x1x8xf32> to vector<2x8xf32>
    %286 = arith.maximumf %279, %281 : vector<2x8xf32>
    %287 = arith.maximumf %283, %285 : vector<2x8xf32>
    %288 = arith.maximumf %286, %287 : vector<2x8xf32>
    %c0_387 = arith.constant 0 : index
    %c144 = arith.constant 144 : index
    %289 = vector.load %arg7[%c0_387, %c144] : memref<2x512xf32, #tpu.memory_space<vmem>>, vector<2x8xf32>
    tpu.vector_store %arg7[%c0_387, %c144], %288 {strides = array<i32>} : memref<2x512xf32, #tpu.memory_space<vmem>>, vector<2x8xf32>,
    %c0_388 = arith.constant 0 : index
    %c4_389 = arith.constant 4 : index
    %c6_390 = arith.constant 6 : index
    %c0_391 = arith.constant 0 : index
    %290 = vector.load %arg6[%c0_388, %c4_389, %c6_390, %c0_391] : memref<2x16x16x8xf32, #tpu.memory_space<vmem>>, vector<2x1x1x8xf32>
    %291 = vector.shape_cast %290 : vector<2x1x1x8xf32> to vector<2x8xf32>
    %c0_392 = arith.constant 0 : index
    %c4_393 = arith.constant 4 : index
    %c7_394 = arith.constant 7 : index
    %c0_395 = arith.constant 0 : index
    %292 = vector.load %arg6[%c0_392, %c4_393, %c7_394, %c0_395] : memref<2x16x16x8xf32, #tpu.memory_space<vmem>>, vector<2x1x1x8xf32>
    %293 = vector.shape_cast %292 : vector<2x1x1x8xf32> to vector<2x8xf32>
    %c0_396 = arith.constant 0 : index
    %c5_397 = arith.constant 5 : index
    %c6_398 = arith.constant 6 : index
    %c0_399 = arith.constant 0 : index
    %294 = vector.load %arg6[%c0_396, %c5_397, %c6_398, %c0_399] : memref<2x16x16x8xf32, #tpu.memory_space<vmem>>, vector<2x1x1x8xf32>
    %295 = vector.shape_cast %294 : vector<2x1x1x8xf32> to vector<2x8xf32>
    %c0_400 = arith.constant 0 : index
    %c5_401 = arith.constant 5 : index
    %c7_402 = arith.constant 7 : index
    %c0_403 = arith.constant 0 : index
    %296 = vector.load %arg6[%c0_400, %c5_401, %c7_402, %c0_403] : memref<2x16x16x8xf32, #tpu.memory_space<vmem>>, vector<2x1x1x8xf32>
    %297 = vector.shape_cast %296 : vector<2x1x1x8xf32> to vector<2x8xf32>
    %298 = arith.maximumf %291, %293 : vector<2x8xf32>
    %299 = arith.maximumf %295, %297 : vector<2x8xf32>
    %300 = arith.maximumf %298, %299 : vector<2x8xf32>
    %c0_404 = arith.constant 0 : index
    %c152 = arith.constant 152 : index
    %301 = vector.load %arg7[%c0_404, %c152] : memref<2x512xf32, #tpu.memory_space<vmem>>, vector<2x8xf32>
    tpu.vector_store %arg7[%c0_404, %c152], %300 {strides = array<i32>} : memref<2x512xf32, #tpu.memory_space<vmem>>, vector<2x8xf32>,
    %c0_405 = arith.constant 0 : index
    %c4_406 = arith.constant 4 : index
    %c8_407 = arith.constant 8 : index
    %c0_408 = arith.constant 0 : index
    %302 = vector.load %arg6[%c0_405, %c4_406, %c8_407, %c0_408] : memref<2x16x16x8xf32, #tpu.memory_space<vmem>>, vector<2x1x1x8xf32>
    %303 = vector.shape_cast %302 : vector<2x1x1x8xf32> to vector<2x8xf32>
    %c0_409 = arith.constant 0 : index
    %c4_410 = arith.constant 4 : index
    %c9_411 = arith.constant 9 : index
    %c0_412 = arith.constant 0 : index
    %304 = vector.load %arg6[%c0_409, %c4_410, %c9_411, %c0_412] : memref<2x16x16x8xf32, #tpu.memory_space<vmem>>, vector<2x1x1x8xf32>
    %305 = vector.shape_cast %304 : vector<2x1x1x8xf32> to vector<2x8xf32>
    %c0_413 = arith.constant 0 : index
    %c5_414 = arith.constant 5 : index
    %c8_415 = arith.constant 8 : index
    %c0_416 = arith.constant 0 : index
    %306 = vector.load %arg6[%c0_413, %c5_414, %c8_415, %c0_416] : memref<2x16x16x8xf32, #tpu.memory_space<vmem>>, vector<2x1x1x8xf32>
    %307 = vector.shape_cast %306 : vector<2x1x1x8xf32> to vector<2x8xf32>
    %c0_417 = arith.constant 0 : index
    %c5_418 = arith.constant 5 : index
    %c9_419 = arith.constant 9 : index
    %c0_420 = arith.constant 0 : index
    %308 = vector.load %arg6[%c0_417, %c5_418, %c9_419, %c0_420] : memref<2x16x16x8xf32, #tpu.memory_space<vmem>>, vector<2x1x1x8xf32>
    %309 = vector.shape_cast %308 : vector<2x1x1x8xf32> to vector<2x8xf32>
    %310 = arith.maximumf %303, %305 : vector<2x8xf32>
    %311 = arith.maximumf %307, %309 : vector<2x8xf32>
    %312 = arith.maximumf %310, %311 : vector<2x8xf32>
    %c0_421 = arith.constant 0 : index
    %c160 = arith.constant 160 : index
    %313 = vector.load %arg7[%c0_421, %c160] : memref<2x512xf32, #tpu.memory_space<vmem>>, vector<2x8xf32>
    tpu.vector_store %arg7[%c0_421, %c160], %312 {strides = array<i32>} : memref<2x512xf32, #tpu.memory_space<vmem>>, vector<2x8xf32>,
    %c0_422 = arith.constant 0 : index
    %c4_423 = arith.constant 4 : index
    %c10_424 = arith.constant 10 : index
    %c0_425 = arith.constant 0 : index
    %314 = vector.load %arg6[%c0_422, %c4_423, %c10_424, %c0_425] : memref<2x16x16x8xf32, #tpu.memory_space<vmem>>, vector<2x1x1x8xf32>
    %315 = vector.shape_cast %314 : vector<2x1x1x8xf32> to vector<2x8xf32>
    %c0_426 = arith.constant 0 : index
    %c4_427 = arith.constant 4 : index
    %c11_428 = arith.constant 11 : index
    %c0_429 = arith.constant 0 : index
    %316 = vector.load %arg6[%c0_426, %c4_427, %c11_428, %c0_429] : memref<2x16x16x8xf32, #tpu.memory_space<vmem>>, vector<2x1x1x8xf32>
    %317 = vector.shape_cast %316 : vector<2x1x1x8xf32> to vector<2x8xf32>
    %c0_430 = arith.constant 0 : index
    %c5_431 = arith.constant 5 : index
    %c10_432 = arith.constant 10 : index
    %c0_433 = arith.constant 0 : index
    %318 = vector.load %arg6[%c0_430, %c5_431, %c10_432, %c0_433] : memref<2x16x16x8xf32, #tpu.memory_space<vmem>>, vector<2x1x1x8xf32>
    %319 = vector.shape_cast %318 : vector<2x1x1x8xf32> to vector<2x8xf32>
    %c0_434 = arith.constant 0 : index
    %c5_435 = arith.constant 5 : index
    %c11_436 = arith.constant 11 : index
    %c0_437 = arith.constant 0 : index
    %320 = vector.load %arg6[%c0_434, %c5_435, %c11_436, %c0_437] : memref<2x16x16x8xf32, #tpu.memory_space<vmem>>, vector<2x1x1x8xf32>
    %321 = vector.shape_cast %320 : vector<2x1x1x8xf32> to vector<2x8xf32>
    %322 = arith.maximumf %315, %317 : vector<2x8xf32>
    %323 = arith.maximumf %319, %321 : vector<2x8xf32>
    %324 = arith.maximumf %322, %323 : vector<2x8xf32>
    %c0_438 = arith.constant 0 : index
    %c168 = arith.constant 168 : index
    %325 = vector.load %arg7[%c0_438, %c168] : memref<2x512xf32, #tpu.memory_space<vmem>>, vector<2x8xf32>
    tpu.vector_store %arg7[%c0_438, %c168], %324 {strides = array<i32>} : memref<2x512xf32, #tpu.memory_space<vmem>>, vector<2x8xf32>,
    %c0_439 = arith.constant 0 : index
    %c4_440 = arith.constant 4 : index
    %c12_441 = arith.constant 12 : index
    %c0_442 = arith.constant 0 : index
    %326 = vector.load %arg6[%c0_439, %c4_440, %c12_441, %c0_442] : memref<2x16x16x8xf32, #tpu.memory_space<vmem>>, vector<2x1x1x8xf32>
    %327 = vector.shape_cast %326 : vector<2x1x1x8xf32> to vector<2x8xf32>
    %c0_443 = arith.constant 0 : index
    %c4_444 = arith.constant 4 : index
    %c13_445 = arith.constant 13 : index
    %c0_446 = arith.constant 0 : index
    %328 = vector.load %arg6[%c0_443, %c4_444, %c13_445, %c0_446] : memref<2x16x16x8xf32, #tpu.memory_space<vmem>>, vector<2x1x1x8xf32>
    %329 = vector.shape_cast %328 : vector<2x1x1x8xf32> to vector<2x8xf32>
    %c0_447 = arith.constant 0 : index
    %c5_448 = arith.constant 5 : index
    %c12_449 = arith.constant 12 : index
    %c0_450 = arith.constant 0 : index
    %330 = vector.load %arg6[%c0_447, %c5_448, %c12_449, %c0_450] : memref<2x16x16x8xf32, #tpu.memory_space<vmem>>, vector<2x1x1x8xf32>
    %331 = vector.shape_cast %330 : vector<2x1x1x8xf32> to vector<2x8xf32>
    %c0_451 = arith.constant 0 : index
    %c5_452 = arith.constant 5 : index
    %c13_453 = arith.constant 13 : index
    %c0_454 = arith.constant 0 : index
    %332 = vector.load %arg6[%c0_451, %c5_452, %c13_453, %c0_454] : memref<2x16x16x8xf32, #tpu.memory_space<vmem>>, vector<2x1x1x8xf32>
    %333 = vector.shape_cast %332 : vector<2x1x1x8xf32> to vector<2x8xf32>
    %334 = arith.maximumf %327, %329 : vector<2x8xf32>
    %335 = arith.maximumf %331, %333 : vector<2x8xf32>
    %336 = arith.maximumf %334, %335 : vector<2x8xf32>
    %c0_455 = arith.constant 0 : index
    %c176 = arith.constant 176 : index
    %337 = vector.load %arg7[%c0_455, %c176] : memref<2x512xf32, #tpu.memory_space<vmem>>, vector<2x8xf32>
    tpu.vector_store %arg7[%c0_455, %c176], %336 {strides = array<i32>} : memref<2x512xf32, #tpu.memory_space<vmem>>, vector<2x8xf32>,
    %c0_456 = arith.constant 0 : index
    %c4_457 = arith.constant 4 : index
    %c14_458 = arith.constant 14 : index
    %c0_459 = arith.constant 0 : index
    %338 = vector.load %arg6[%c0_456, %c4_457, %c14_458, %c0_459] : memref<2x16x16x8xf32, #tpu.memory_space<vmem>>, vector<2x1x1x8xf32>
    %339 = vector.shape_cast %338 : vector<2x1x1x8xf32> to vector<2x8xf32>
    %c0_460 = arith.constant 0 : index
    %c4_461 = arith.constant 4 : index
    %c15_462 = arith.constant 15 : index
    %c0_463 = arith.constant 0 : index
    %340 = vector.load %arg6[%c0_460, %c4_461, %c15_462, %c0_463] : memref<2x16x16x8xf32, #tpu.memory_space<vmem>>, vector<2x1x1x8xf32>
    %341 = vector.shape_cast %340 : vector<2x1x1x8xf32> to vector<2x8xf32>
    %c0_464 = arith.constant 0 : index
    %c5_465 = arith.constant 5 : index
    %c14_466 = arith.constant 14 : index
    %c0_467 = arith.constant 0 : index
    %342 = vector.load %arg6[%c0_464, %c5_465, %c14_466, %c0_467] : memref<2x16x16x8xf32, #tpu.memory_space<vmem>>, vector<2x1x1x8xf32>
    %343 = vector.shape_cast %342 : vector<2x1x1x8xf32> to vector<2x8xf32>
    %c0_468 = arith.constant 0 : index
    %c5_469 = arith.constant 5 : index
    %c15_470 = arith.constant 15 : index
    %c0_471 = arith.constant 0 : index
    %344 = vector.load %arg6[%c0_468, %c5_469, %c15_470, %c0_471] : memref<2x16x16x8xf32, #tpu.memory_space<vmem>>, vector<2x1x1x8xf32>
    %345 = vector.shape_cast %344 : vector<2x1x1x8xf32> to vector<2x8xf32>
    %346 = arith.maximumf %339, %341 : vector<2x8xf32>
    %347 = arith.maximumf %343, %345 : vector<2x8xf32>
    %348 = arith.maximumf %346, %347 : vector<2x8xf32>
    %c0_472 = arith.constant 0 : index
    %c184 = arith.constant 184 : index
    %349 = vector.load %arg7[%c0_472, %c184] : memref<2x512xf32, #tpu.memory_space<vmem>>, vector<2x8xf32>
    tpu.vector_store %arg7[%c0_472, %c184], %348 {strides = array<i32>} : memref<2x512xf32, #tpu.memory_space<vmem>>, vector<2x8xf32>,
    %c0_473 = arith.constant 0 : index
    %c6_474 = arith.constant 6 : index
    %c0_475 = arith.constant 0 : index
    %c0_476 = arith.constant 0 : index
    %350 = vector.load %arg6[%c0_473, %c6_474, %c0_475, %c0_476] : memref<2x16x16x8xf32, #tpu.memory_space<vmem>>, vector<2x1x1x8xf32>
    %351 = vector.shape_cast %350 : vector<2x1x1x8xf32> to vector<2x8xf32>
    %c0_477 = arith.constant 0 : index
    %c6_478 = arith.constant 6 : index
    %c1_479 = arith.constant 1 : index
    %c0_480 = arith.constant 0 : index
    %352 = vector.load %arg6[%c0_477, %c6_478, %c1_479, %c0_480] : memref<2x16x16x8xf32, #tpu.memory_space<vmem>>, vector<2x1x1x8xf32>
    %353 = vector.shape_cast %352 : vector<2x1x1x8xf32> to vector<2x8xf32>
    %c0_481 = arith.constant 0 : index
    %c7_482 = arith.constant 7 : index
    %c0_483 = arith.constant 0 : index
    %c0_484 = arith.constant 0 : index
    %354 = vector.load %arg6[%c0_481, %c7_482, %c0_483, %c0_484] : memref<2x16x16x8xf32, #tpu.memory_space<vmem>>, vector<2x1x1x8xf32>
    %355 = vector.shape_cast %354 : vector<2x1x1x8xf32> to vector<2x8xf32>
    %c0_485 = arith.constant 0 : index
    %c7_486 = arith.constant 7 : index
    %c1_487 = arith.constant 1 : index
    %c0_488 = arith.constant 0 : index
    %356 = vector.load %arg6[%c0_485, %c7_486, %c1_487, %c0_488] : memref<2x16x16x8xf32, #tpu.memory_space<vmem>>, vector<2x1x1x8xf32>
    %357 = vector.shape_cast %356 : vector<2x1x1x8xf32> to vector<2x8xf32>
    %358 = arith.maximumf %351, %353 : vector<2x8xf32>
    %359 = arith.maximumf %355, %357 : vector<2x8xf32>
    %360 = arith.maximumf %358, %359 : vector<2x8xf32>
    %c0_489 = arith.constant 0 : index
    %c192 = arith.constant 192 : index
    %361 = vector.load %arg7[%c0_489, %c192] : memref<2x512xf32, #tpu.memory_space<vmem>>, vector<2x8xf32>
    tpu.vector_store %arg7[%c0_489, %c192], %360 {strides = array<i32>} : memref<2x512xf32, #tpu.memory_space<vmem>>, vector<2x8xf32>,
    %c0_490 = arith.constant 0 : index
    %c6_491 = arith.constant 6 : index
    %c2_492 = arith.constant 2 : index
    %c0_493 = arith.constant 0 : index
    %362 = vector.load %arg6[%c0_490, %c6_491, %c2_492, %c0_493] : memref<2x16x16x8xf32, #tpu.memory_space<vmem>>, vector<2x1x1x8xf32>
    %363 = vector.shape_cast %362 : vector<2x1x1x8xf32> to vector<2x8xf32>
    %c0_494 = arith.constant 0 : index
    %c6_495 = arith.constant 6 : index
    %c3_496 = arith.constant 3 : index
    %c0_497 = arith.constant 0 : index
    %364 = vector.load %arg6[%c0_494, %c6_495, %c3_496, %c0_497] : memref<2x16x16x8xf32, #tpu.memory_space<vmem>>, vector<2x1x1x8xf32>
    %365 = vector.shape_cast %364 : vector<2x1x1x8xf32> to vector<2x8xf32>
    %c0_498 = arith.constant 0 : index
    %c7_499 = arith.constant 7 : index
    %c2_500 = arith.constant 2 : index
    %c0_501 = arith.constant 0 : index
    %366 = vector.load %arg6[%c0_498, %c7_499, %c2_500, %c0_501] : memref<2x16x16x8xf32, #tpu.memory_space<vmem>>, vector<2x1x1x8xf32>
    %367 = vector.shape_cast %366 : vector<2x1x1x8xf32> to vector<2x8xf32>
    %c0_502 = arith.constant 0 : index
    %c7_503 = arith.constant 7 : index
    %c3_504 = arith.constant 3 : index
    %c0_505 = arith.constant 0 : index
    %368 = vector.load %arg6[%c0_502, %c7_503, %c3_504, %c0_505] : memref<2x16x16x8xf32, #tpu.memory_space<vmem>>, vector<2x1x1x8xf32>
    %369 = vector.shape_cast %368 : vector<2x1x1x8xf32> to vector<2x8xf32>
    %370 = arith.maximumf %363, %365 : vector<2x8xf32>
    %371 = arith.maximumf %367, %369 : vector<2x8xf32>
    %372 = arith.maximumf %370, %371 : vector<2x8xf32>
    %c0_506 = arith.constant 0 : index
    %c200 = arith.constant 200 : index
    %373 = vector.load %arg7[%c0_506, %c200] : memref<2x512xf32, #tpu.memory_space<vmem>>, vector<2x8xf32>
    tpu.vector_store %arg7[%c0_506, %c200], %372 {strides = array<i32>} : memref<2x512xf32, #tpu.memory_space<vmem>>, vector<2x8xf32>,
    %c0_507 = arith.constant 0 : index
    %c6_508 = arith.constant 6 : index
    %c4_509 = arith.constant 4 : index
    %c0_510 = arith.constant 0 : index
    %374 = vector.load %arg6[%c0_507, %c6_508, %c4_509, %c0_510] : memref<2x16x16x8xf32, #tpu.memory_space<vmem>>, vector<2x1x1x8xf32>
    %375 = vector.shape_cast %374 : vector<2x1x1x8xf32> to vector<2x8xf32>
    %c0_511 = arith.constant 0 : index
    %c6_512 = arith.constant 6 : index
    %c5_513 = arith.constant 5 : index
    %c0_514 = arith.constant 0 : index
    %376 = vector.load %arg6[%c0_511, %c6_512, %c5_513, %c0_514] : memref<2x16x16x8xf32, #tpu.memory_space<vmem>>, vector<2x1x1x8xf32>
    %377 = vector.shape_cast %376 : vector<2x1x1x8xf32> to vector<2x8xf32>
    %c0_515 = arith.constant 0 : index
    %c7_516 = arith.constant 7 : index
    %c4_517 = arith.constant 4 : index
    %c0_518 = arith.constant 0 : index
    %378 = vector.load %arg6[%c0_515, %c7_516, %c4_517, %c0_518] : memref<2x16x16x8xf32, #tpu.memory_space<vmem>>, vector<2x1x1x8xf32>
    %379 = vector.shape_cast %378 : vector<2x1x1x8xf32> to vector<2x8xf32>
    %c0_519 = arith.constant 0 : index
    %c7_520 = arith.constant 7 : index
    %c5_521 = arith.constant 5 : index
    %c0_522 = arith.constant 0 : index
    %380 = vector.load %arg6[%c0_519, %c7_520, %c5_521, %c0_522] : memref<2x16x16x8xf32, #tpu.memory_space<vmem>>, vector<2x1x1x8xf32>
    %381 = vector.shape_cast %380 : vector<2x1x1x8xf32> to vector<2x8xf32>
    %382 = arith.maximumf %375, %377 : vector<2x8xf32>
    %383 = arith.maximumf %379, %381 : vector<2x8xf32>
    %384 = arith.maximumf %382, %383 : vector<2x8xf32>
    %c0_523 = arith.constant 0 : index
    %c208 = arith.constant 208 : index
    %385 = vector.load %arg7[%c0_523, %c208] : memref<2x512xf32, #tpu.memory_space<vmem>>, vector<2x8xf32>
    tpu.vector_store %arg7[%c0_523, %c208], %384 {strides = array<i32>} : memref<2x512xf32, #tpu.memory_space<vmem>>, vector<2x8xf32>,
    %c0_524 = arith.constant 0 : index
    %c6_525 = arith.constant 6 : index
    %c6_526 = arith.constant 6 : index
    %c0_527 = arith.constant 0 : index
    %386 = vector.load %arg6[%c0_524, %c6_525, %c6_526, %c0_527] : memref<2x16x16x8xf32, #tpu.memory_space<vmem>>, vector<2x1x1x8xf32>
    %387 = vector.shape_cast %386 : vector<2x1x1x8xf32> to vector<2x8xf32>
    %c0_528 = arith.constant 0 : index
    %c6_529 = arith.constant 6 : index
    %c7_530 = arith.constant 7 : index
    %c0_531 = arith.constant 0 : index
    %388 = vector.load %arg6[%c0_528, %c6_529, %c7_530, %c0_531] : memref<2x16x16x8xf32, #tpu.memory_space<vmem>>, vector<2x1x1x8xf32>
    %389 = vector.shape_cast %388 : vector<2x1x1x8xf32> to vector<2x8xf32>
    %c0_532 = arith.constant 0 : index
    %c7_533 = arith.constant 7 : index
    %c6_534 = arith.constant 6 : index
    %c0_535 = arith.constant 0 : index
    %390 = vector.load %arg6[%c0_532, %c7_533, %c6_534, %c0_535] : memref<2x16x16x8xf32, #tpu.memory_space<vmem>>, vector<2x1x1x8xf32>
    %391 = vector.shape_cast %390 : vector<2x1x1x8xf32> to vector<2x8xf32>
    %c0_536 = arith.constant 0 : index
    %c7_537 = arith.constant 7 : index
    %c7_538 = arith.constant 7 : index
    %c0_539 = arith.constant 0 : index
    %392 = vector.load %arg6[%c0_536, %c7_537, %c7_538, %c0_539] : memref<2x16x16x8xf32, #tpu.memory_space<vmem>>, vector<2x1x1x8xf32>
    %393 = vector.shape_cast %392 : vector<2x1x1x8xf32> to vector<2x8xf32>
    %394 = arith.maximumf %387, %389 : vector<2x8xf32>
    %395 = arith.maximumf %391, %393 : vector<2x8xf32>
    %396 = arith.maximumf %394, %395 : vector<2x8xf32>
    %c0_540 = arith.constant 0 : index
    %c216 = arith.constant 216 : index
    %397 = vector.load %arg7[%c0_540, %c216] : memref<2x512xf32, #tpu.memory_space<vmem>>, vector<2x8xf32>
    tpu.vector_store %arg7[%c0_540, %c216], %396 {strides = array<i32>} : memref<2x512xf32, #tpu.memory_space<vmem>>, vector<2x8xf32>,
    %c0_541 = arith.constant 0 : index
    %c6_542 = arith.constant 6 : index
    %c8_543 = arith.constant 8 : index
    %c0_544 = arith.constant 0 : index
    %398 = vector.load %arg6[%c0_541, %c6_542, %c8_543, %c0_544] : memref<2x16x16x8xf32, #tpu.memory_space<vmem>>, vector<2x1x1x8xf32>
    %399 = vector.shape_cast %398 : vector<2x1x1x8xf32> to vector<2x8xf32>
    %c0_545 = arith.constant 0 : index
    %c6_546 = arith.constant 6 : index
    %c9_547 = arith.constant 9 : index
    %c0_548 = arith.constant 0 : index
    %400 = vector.load %arg6[%c0_545, %c6_546, %c9_547, %c0_548] : memref<2x16x16x8xf32, #tpu.memory_space<vmem>>, vector<2x1x1x8xf32>
    %401 = vector.shape_cast %400 : vector<2x1x1x8xf32> to vector<2x8xf32>
    %c0_549 = arith.constant 0 : index
    %c7_550 = arith.constant 7 : index
    %c8_551 = arith.constant 8 : index
    %c0_552 = arith.constant 0 : index
    %402 = vector.load %arg6[%c0_549, %c7_550, %c8_551, %c0_552] : memref<2x16x16x8xf32, #tpu.memory_space<vmem>>, vector<2x1x1x8xf32>
    %403 = vector.shape_cast %402 : vector<2x1x1x8xf32> to vector<2x8xf32>
    %c0_553 = arith.constant 0 : index
    %c7_554 = arith.constant 7 : index
    %c9_555 = arith.constant 9 : index
    %c0_556 = arith.constant 0 : index
    %404 = vector.load %arg6[%c0_553, %c7_554, %c9_555, %c0_556] : memref<2x16x16x8xf32, #tpu.memory_space<vmem>>, vector<2x1x1x8xf32>
    %405 = vector.shape_cast %404 : vector<2x1x1x8xf32> to vector<2x8xf32>
    %406 = arith.maximumf %399, %401 : vector<2x8xf32>
    %407 = arith.maximumf %403, %405 : vector<2x8xf32>
    %408 = arith.maximumf %406, %407 : vector<2x8xf32>
    %c0_557 = arith.constant 0 : index
    %c224 = arith.constant 224 : index
    %409 = vector.load %arg7[%c0_557, %c224] : memref<2x512xf32, #tpu.memory_space<vmem>>, vector<2x8xf32>
    tpu.vector_store %arg7[%c0_557, %c224], %408 {strides = array<i32>} : memref<2x512xf32, #tpu.memory_space<vmem>>, vector<2x8xf32>,
    %c0_558 = arith.constant 0 : index
    %c6_559 = arith.constant 6 : index
    %c10_560 = arith.constant 10 : index
    %c0_561 = arith.constant 0 : index
    %410 = vector.load %arg6[%c0_558, %c6_559, %c10_560, %c0_561] : memref<2x16x16x8xf32, #tpu.memory_space<vmem>>, vector<2x1x1x8xf32>
    %411 = vector.shape_cast %410 : vector<2x1x1x8xf32> to vector<2x8xf32>
    %c0_562 = arith.constant 0 : index
    %c6_563 = arith.constant 6 : index
    %c11_564 = arith.constant 11 : index
    %c0_565 = arith.constant 0 : index
    %412 = vector.load %arg6[%c0_562, %c6_563, %c11_564, %c0_565] : memref<2x16x16x8xf32, #tpu.memory_space<vmem>>, vector<2x1x1x8xf32>
    %413 = vector.shape_cast %412 : vector<2x1x1x8xf32> to vector<2x8xf32>
    %c0_566 = arith.constant 0 : index
    %c7_567 = arith.constant 7 : index
    %c10_568 = arith.constant 10 : index
    %c0_569 = arith.constant 0 : index
    %414 = vector.load %arg6[%c0_566, %c7_567, %c10_568, %c0_569] : memref<2x16x16x8xf32, #tpu.memory_space<vmem>>, vector<2x1x1x8xf32>
    %415 = vector.shape_cast %414 : vector<2x1x1x8xf32> to vector<2x8xf32>
    %c0_570 = arith.constant 0 : index
    %c7_571 = arith.constant 7 : index
    %c11_572 = arith.constant 11 : index
    %c0_573 = arith.constant 0 : index
    %416 = vector.load %arg6[%c0_570, %c7_571, %c11_572, %c0_573] : memref<2x16x16x8xf32, #tpu.memory_space<vmem>>, vector<2x1x1x8xf32>
    %417 = vector.shape_cast %416 : vector<2x1x1x8xf32> to vector<2x8xf32>
    %418 = arith.maximumf %411, %413 : vector<2x8xf32>
    %419 = arith.maximumf %415, %417 : vector<2x8xf32>
    %420 = arith.maximumf %418, %419 : vector<2x8xf32>
    %c0_574 = arith.constant 0 : index
    %c232 = arith.constant 232 : index
    %421 = vector.load %arg7[%c0_574, %c232] : memref<2x512xf32, #tpu.memory_space<vmem>>, vector<2x8xf32>
    tpu.vector_store %arg7[%c0_574, %c232], %420 {strides = array<i32>} : memref<2x512xf32, #tpu.memory_space<vmem>>, vector<2x8xf32>,
    %c0_575 = arith.constant 0 : index
    %c6_576 = arith.constant 6 : index
    %c12_577 = arith.constant 12 : index
    %c0_578 = arith.constant 0 : index
    %422 = vector.load %arg6[%c0_575, %c6_576, %c12_577, %c0_578] : memref<2x16x16x8xf32, #tpu.memory_space<vmem>>, vector<2x1x1x8xf32>
    %423 = vector.shape_cast %422 : vector<2x1x1x8xf32> to vector<2x8xf32>
    %c0_579 = arith.constant 0 : index
    %c6_580 = arith.constant 6 : index
    %c13_581 = arith.constant 13 : index
    %c0_582 = arith.constant 0 : index
    %424 = vector.load %arg6[%c0_579, %c6_580, %c13_581, %c0_582] : memref<2x16x16x8xf32, #tpu.memory_space<vmem>>, vector<2x1x1x8xf32>
    %425 = vector.shape_cast %424 : vector<2x1x1x8xf32> to vector<2x8xf32>
    %c0_583 = arith.constant 0 : index
    %c7_584 = arith.constant 7 : index
    %c12_585 = arith.constant 12 : index
    %c0_586 = arith.constant 0 : index
    %426 = vector.load %arg6[%c0_583, %c7_584, %c12_585, %c0_586] : memref<2x16x16x8xf32, #tpu.memory_space<vmem>>, vector<2x1x1x8xf32>
    %427 = vector.shape_cast %426 : vector<2x1x1x8xf32> to vector<2x8xf32>
    %c0_587 = arith.constant 0 : index
    %c7_588 = arith.constant 7 : index
    %c13_589 = arith.constant 13 : index
    %c0_590 = arith.constant 0 : index
    %428 = vector.load %arg6[%c0_587, %c7_588, %c13_589, %c0_590] : memref<2x16x16x8xf32, #tpu.memory_space<vmem>>, vector<2x1x1x8xf32>
    %429 = vector.shape_cast %428 : vector<2x1x1x8xf32> to vector<2x8xf32>
    %430 = arith.maximumf %423, %425 : vector<2x8xf32>
    %431 = arith.maximumf %427, %429 : vector<2x8xf32>
    %432 = arith.maximumf %430, %431 : vector<2x8xf32>
    %c0_591 = arith.constant 0 : index
    %c240 = arith.constant 240 : index
    %433 = vector.load %arg7[%c0_591, %c240] : memref<2x512xf32, #tpu.memory_space<vmem>>, vector<2x8xf32>
    tpu.vector_store %arg7[%c0_591, %c240], %432 {strides = array<i32>} : memref<2x512xf32, #tpu.memory_space<vmem>>, vector<2x8xf32>,
    %c0_592 = arith.constant 0 : index
    %c6_593 = arith.constant 6 : index
    %c14_594 = arith.constant 14 : index
    %c0_595 = arith.constant 0 : index
    %434 = vector.load %arg6[%c0_592, %c6_593, %c14_594, %c0_595] : memref<2x16x16x8xf32, #tpu.memory_space<vmem>>, vector<2x1x1x8xf32>
    %435 = vector.shape_cast %434 : vector<2x1x1x8xf32> to vector<2x8xf32>
    %c0_596 = arith.constant 0 : index
    %c6_597 = arith.constant 6 : index
    %c15_598 = arith.constant 15 : index
    %c0_599 = arith.constant 0 : index
    %436 = vector.load %arg6[%c0_596, %c6_597, %c15_598, %c0_599] : memref<2x16x16x8xf32, #tpu.memory_space<vmem>>, vector<2x1x1x8xf32>
    %437 = vector.shape_cast %436 : vector<2x1x1x8xf32> to vector<2x8xf32>
    %c0_600 = arith.constant 0 : index
    %c7_601 = arith.constant 7 : index
    %c14_602 = arith.constant 14 : index
    %c0_603 = arith.constant 0 : index
    %438 = vector.load %arg6[%c0_600, %c7_601, %c14_602, %c0_603] : memref<2x16x16x8xf32, #tpu.memory_space<vmem>>, vector<2x1x1x8xf32>
    %439 = vector.shape_cast %438 : vector<2x1x1x8xf32> to vector<2x8xf32>
    %c0_604 = arith.constant 0 : index
    %c7_605 = arith.constant 7 : index
    %c15_606 = arith.constant 15 : index
    %c0_607 = arith.constant 0 : index
    %440 = vector.load %arg6[%c0_604, %c7_605, %c15_606, %c0_607] : memref<2x16x16x8xf32, #tpu.memory_space<vmem>>, vector<2x1x1x8xf32>
    %441 = vector.shape_cast %440 : vector<2x1x1x8xf32> to vector<2x8xf32>
    %442 = arith.maximumf %435, %437 : vector<2x8xf32>
    %443 = arith.maximumf %439, %441 : vector<2x8xf32>
    %444 = arith.maximumf %442, %443 : vector<2x8xf32>
    %c0_608 = arith.constant 0 : index
    %c248 = arith.constant 248 : index
    %445 = vector.load %arg7[%c0_608, %c248] : memref<2x512xf32, #tpu.memory_space<vmem>>, vector<2x8xf32>
    tpu.vector_store %arg7[%c0_608, %c248], %444 {strides = array<i32>} : memref<2x512xf32, #tpu.memory_space<vmem>>, vector<2x8xf32>,
    %c0_609 = arith.constant 0 : index
    %c8_610 = arith.constant 8 : index
    %c0_611 = arith.constant 0 : index
    %c0_612 = arith.constant 0 : index
    %446 = vector.load %arg6[%c0_609, %c8_610, %c0_611, %c0_612] : memref<2x16x16x8xf32, #tpu.memory_space<vmem>>, vector<2x1x1x8xf32>
    %447 = vector.shape_cast %446 : vector<2x1x1x8xf32> to vector<2x8xf32>
    %c0_613 = arith.constant 0 : index
    %c8_614 = arith.constant 8 : index
    %c1_615 = arith.constant 1 : index
    %c0_616 = arith.constant 0 : index
    %448 = vector.load %arg6[%c0_613, %c8_614, %c1_615, %c0_616] : memref<2x16x16x8xf32, #tpu.memory_space<vmem>>, vector<2x1x1x8xf32>
    %449 = vector.shape_cast %448 : vector<2x1x1x8xf32> to vector<2x8xf32>
    %c0_617 = arith.constant 0 : index
    %c9_618 = arith.constant 9 : index
    %c0_619 = arith.constant 0 : index
    %c0_620 = arith.constant 0 : index
    %450 = vector.load %arg6[%c0_617, %c9_618, %c0_619, %c0_620] : memref<2x16x16x8xf32, #tpu.memory_space<vmem>>, vector<2x1x1x8xf32>
    %451 = vector.shape_cast %450 : vector<2x1x1x8xf32> to vector<2x8xf32>
    %c0_621 = arith.constant 0 : index
    %c9_622 = arith.constant 9 : index
    %c1_623 = arith.constant 1 : index
    %c0_624 = arith.constant 0 : index
    %452 = vector.load %arg6[%c0_621, %c9_622, %c1_623, %c0_624] : memref<2x16x16x8xf32, #tpu.memory_space<vmem>>, vector<2x1x1x8xf32>
    %453 = vector.shape_cast %452 : vector<2x1x1x8xf32> to vector<2x8xf32>
    %454 = arith.maximumf %447, %449 : vector<2x8xf32>
    %455 = arith.maximumf %451, %453 : vector<2x8xf32>
    %456 = arith.maximumf %454, %455 : vector<2x8xf32>
    %c0_625 = arith.constant 0 : index
    %c256 = arith.constant 256 : index
    %457 = vector.load %arg7[%c0_625, %c256] : memref<2x512xf32, #tpu.memory_space<vmem>>, vector<2x8xf32>
    tpu.vector_store %arg7[%c0_625, %c256], %456 {strides = array<i32>} : memref<2x512xf32, #tpu.memory_space<vmem>>, vector<2x8xf32>,
    %c0_626 = arith.constant 0 : index
    %c8_627 = arith.constant 8 : index
    %c2_628 = arith.constant 2 : index
    %c0_629 = arith.constant 0 : index
    %458 = vector.load %arg6[%c0_626, %c8_627, %c2_628, %c0_629] : memref<2x16x16x8xf32, #tpu.memory_space<vmem>>, vector<2x1x1x8xf32>
    %459 = vector.shape_cast %458 : vector<2x1x1x8xf32> to vector<2x8xf32>
    %c0_630 = arith.constant 0 : index
    %c8_631 = arith.constant 8 : index
    %c3_632 = arith.constant 3 : index
    %c0_633 = arith.constant 0 : index
    %460 = vector.load %arg6[%c0_630, %c8_631, %c3_632, %c0_633] : memref<2x16x16x8xf32, #tpu.memory_space<vmem>>, vector<2x1x1x8xf32>
    %461 = vector.shape_cast %460 : vector<2x1x1x8xf32> to vector<2x8xf32>
    %c0_634 = arith.constant 0 : index
    %c9_635 = arith.constant 9 : index
    %c2_636 = arith.constant 2 : index
    %c0_637 = arith.constant 0 : index
    %462 = vector.load %arg6[%c0_634, %c9_635, %c2_636, %c0_637] : memref<2x16x16x8xf32, #tpu.memory_space<vmem>>, vector<2x1x1x8xf32>
    %463 = vector.shape_cast %462 : vector<2x1x1x8xf32> to vector<2x8xf32>
    %c0_638 = arith.constant 0 : index
    %c9_639 = arith.constant 9 : index
    %c3_640 = arith.constant 3 : index
    %c0_641 = arith.constant 0 : index
    %464 = vector.load %arg6[%c0_638, %c9_639, %c3_640, %c0_641] : memref<2x16x16x8xf32, #tpu.memory_space<vmem>>, vector<2x1x1x8xf32>
    %465 = vector.shape_cast %464 : vector<2x1x1x8xf32> to vector<2x8xf32>
    %466 = arith.maximumf %459, %461 : vector<2x8xf32>
    %467 = arith.maximumf %463, %465 : vector<2x8xf32>
    %468 = arith.maximumf %466, %467 : vector<2x8xf32>
    %c0_642 = arith.constant 0 : index
    %c264 = arith.constant 264 : index
    %469 = vector.load %arg7[%c0_642, %c264] : memref<2x512xf32, #tpu.memory_space<vmem>>, vector<2x8xf32>
    tpu.vector_store %arg7[%c0_642, %c264], %468 {strides = array<i32>} : memref<2x512xf32, #tpu.memory_space<vmem>>, vector<2x8xf32>,
    %c0_643 = arith.constant 0 : index
    %c8_644 = arith.constant 8 : index
    %c4_645 = arith.constant 4 : index
    %c0_646 = arith.constant 0 : index
    %470 = vector.load %arg6[%c0_643, %c8_644, %c4_645, %c0_646] : memref<2x16x16x8xf32, #tpu.memory_space<vmem>>, vector<2x1x1x8xf32>
    %471 = vector.shape_cast %470 : vector<2x1x1x8xf32> to vector<2x8xf32>
    %c0_647 = arith.constant 0 : index
    %c8_648 = arith.constant 8 : index
    %c5_649 = arith.constant 5 : index
    %c0_650 = arith.constant 0 : index
    %472 = vector.load %arg6[%c0_647, %c8_648, %c5_649, %c0_650] : memref<2x16x16x8xf32, #tpu.memory_space<vmem>>, vector<2x1x1x8xf32>
    %473 = vector.shape_cast %472 : vector<2x1x1x8xf32> to vector<2x8xf32>
    %c0_651 = arith.constant 0 : index
    %c9_652 = arith.constant 9 : index
    %c4_653 = arith.constant 4 : index
    %c0_654 = arith.constant 0 : index
    %474 = vector.load %arg6[%c0_651, %c9_652, %c4_653, %c0_654] : memref<2x16x16x8xf32, #tpu.memory_space<vmem>>, vector<2x1x1x8xf32>
    %475 = vector.shape_cast %474 : vector<2x1x1x8xf32> to vector<2x8xf32>
    %c0_655 = arith.constant 0 : index
    %c9_656 = arith.constant 9 : index
    %c5_657 = arith.constant 5 : index
    %c0_658 = arith.constant 0 : index
    %476 = vector.load %arg6[%c0_655, %c9_656, %c5_657, %c0_658] : memref<2x16x16x8xf32, #tpu.memory_space<vmem>>, vector<2x1x1x8xf32>
    %477 = vector.shape_cast %476 : vector<2x1x1x8xf32> to vector<2x8xf32>
    %478 = arith.maximumf %471, %473 : vector<2x8xf32>
    %479 = arith.maximumf %475, %477 : vector<2x8xf32>
    %480 = arith.maximumf %478, %479 : vector<2x8xf32>
    %c0_659 = arith.constant 0 : index
    %c272 = arith.constant 272 : index
    %481 = vector.load %arg7[%c0_659, %c272] : memref<2x512xf32, #tpu.memory_space<vmem>>, vector<2x8xf32>
    tpu.vector_store %arg7[%c0_659, %c272], %480 {strides = array<i32>} : memref<2x512xf32, #tpu.memory_space<vmem>>, vector<2x8xf32>,
    %c0_660 = arith.constant 0 : index
    %c8_661 = arith.constant 8 : index
    %c6_662 = arith.constant 6 : index
    %c0_663 = arith.constant 0 : index
    %482 = vector.load %arg6[%c0_660, %c8_661, %c6_662, %c0_663] : memref<2x16x16x8xf32, #tpu.memory_space<vmem>>, vector<2x1x1x8xf32>
    %483 = vector.shape_cast %482 : vector<2x1x1x8xf32> to vector<2x8xf32>
    %c0_664 = arith.constant 0 : index
    %c8_665 = arith.constant 8 : index
    %c7_666 = arith.constant 7 : index
    %c0_667 = arith.constant 0 : index
    %484 = vector.load %arg6[%c0_664, %c8_665, %c7_666, %c0_667] : memref<2x16x16x8xf32, #tpu.memory_space<vmem>>, vector<2x1x1x8xf32>
    %485 = vector.shape_cast %484 : vector<2x1x1x8xf32> to vector<2x8xf32>
    %c0_668 = arith.constant 0 : index
    %c9_669 = arith.constant 9 : index
    %c6_670 = arith.constant 6 : index
    %c0_671 = arith.constant 0 : index
    %486 = vector.load %arg6[%c0_668, %c9_669, %c6_670, %c0_671] : memref<2x16x16x8xf32, #tpu.memory_space<vmem>>, vector<2x1x1x8xf32>
    %487 = vector.shape_cast %486 : vector<2x1x1x8xf32> to vector<2x8xf32>
    %c0_672 = arith.constant 0 : index
    %c9_673 = arith.constant 9 : index
    %c7_674 = arith.constant 7 : index
    %c0_675 = arith.constant 0 : index
    %488 = vector.load %arg6[%c0_672, %c9_673, %c7_674, %c0_675] : memref<2x16x16x8xf32, #tpu.memory_space<vmem>>, vector<2x1x1x8xf32>
    %489 = vector.shape_cast %488 : vector<2x1x1x8xf32> to vector<2x8xf32>
    %490 = arith.maximumf %483, %485 : vector<2x8xf32>
    %491 = arith.maximumf %487, %489 : vector<2x8xf32>
    %492 = arith.maximumf %490, %491 : vector<2x8xf32>
    %c0_676 = arith.constant 0 : index
    %c280 = arith.constant 280 : index
    %493 = vector.load %arg7[%c0_676, %c280] : memref<2x512xf32, #tpu.memory_space<vmem>>, vector<2x8xf32>
    tpu.vector_store %arg7[%c0_676, %c280], %492 {strides = array<i32>} : memref<2x512xf32, #tpu.memory_space<vmem>>, vector<2x8xf32>,
    %c0_677 = arith.constant 0 : index
    %c8_678 = arith.constant 8 : index
    %c8_679 = arith.constant 8 : index
    %c0_680 = arith.constant 0 : index
    %494 = vector.load %arg6[%c0_677, %c8_678, %c8_679, %c0_680] : memref<2x16x16x8xf32, #tpu.memory_space<vmem>>, vector<2x1x1x8xf32>
    %495 = vector.shape_cast %494 : vector<2x1x1x8xf32> to vector<2x8xf32>
    %c0_681 = arith.constant 0 : index
    %c8_682 = arith.constant 8 : index
    %c9_683 = arith.constant 9 : index
    %c0_684 = arith.constant 0 : index
    %496 = vector.load %arg6[%c0_681, %c8_682, %c9_683, %c0_684] : memref<2x16x16x8xf32, #tpu.memory_space<vmem>>, vector<2x1x1x8xf32>
    %497 = vector.shape_cast %496 : vector<2x1x1x8xf32> to vector<2x8xf32>
    %c0_685 = arith.constant 0 : index
    %c9_686 = arith.constant 9 : index
    %c8_687 = arith.constant 8 : index
    %c0_688 = arith.constant 0 : index
    %498 = vector.load %arg6[%c0_685, %c9_686, %c8_687, %c0_688] : memref<2x16x16x8xf32, #tpu.memory_space<vmem>>, vector<2x1x1x8xf32>
    %499 = vector.shape_cast %498 : vector<2x1x1x8xf32> to vector<2x8xf32>
    %c0_689 = arith.constant 0 : index
    %c9_690 = arith.constant 9 : index
    %c9_691 = arith.constant 9 : index
    %c0_692 = arith.constant 0 : index
    %500 = vector.load %arg6[%c0_689, %c9_690, %c9_691, %c0_692] : memref<2x16x16x8xf32, #tpu.memory_space<vmem>>, vector<2x1x1x8xf32>
    %501 = vector.shape_cast %500 : vector<2x1x1x8xf32> to vector<2x8xf32>
    %502 = arith.maximumf %495, %497 : vector<2x8xf32>
    %503 = arith.maximumf %499, %501 : vector<2x8xf32>
    %504 = arith.maximumf %502, %503 : vector<2x8xf32>
    %c0_693 = arith.constant 0 : index
    %c288 = arith.constant 288 : index
    %505 = vector.load %arg7[%c0_693, %c288] : memref<2x512xf32, #tpu.memory_space<vmem>>, vector<2x8xf32>
    tpu.vector_store %arg7[%c0_693, %c288], %504 {strides = array<i32>} : memref<2x512xf32, #tpu.memory_space<vmem>>, vector<2x8xf32>,
    %c0_694 = arith.constant 0 : index
    %c8_695 = arith.constant 8 : index
    %c10_696 = arith.constant 10 : index
    %c0_697 = arith.constant 0 : index
    %506 = vector.load %arg6[%c0_694, %c8_695, %c10_696, %c0_697] : memref<2x16x16x8xf32, #tpu.memory_space<vmem>>, vector<2x1x1x8xf32>
    %507 = vector.shape_cast %506 : vector<2x1x1x8xf32> to vector<2x8xf32>
    %c0_698 = arith.constant 0 : index
    %c8_699 = arith.constant 8 : index
    %c11_700 = arith.constant 11 : index
    %c0_701 = arith.constant 0 : index
    %508 = vector.load %arg6[%c0_698, %c8_699, %c11_700, %c0_701] : memref<2x16x16x8xf32, #tpu.memory_space<vmem>>, vector<2x1x1x8xf32>
    %509 = vector.shape_cast %508 : vector<2x1x1x8xf32> to vector<2x8xf32>
    %c0_702 = arith.constant 0 : index
    %c9_703 = arith.constant 9 : index
    %c10_704 = arith.constant 10 : index
    %c0_705 = arith.constant 0 : index
    %510 = vector.load %arg6[%c0_702, %c9_703, %c10_704, %c0_705] : memref<2x16x16x8xf32, #tpu.memory_space<vmem>>, vector<2x1x1x8xf32>
    %511 = vector.shape_cast %510 : vector<2x1x1x8xf32> to vector<2x8xf32>
    %c0_706 = arith.constant 0 : index
    %c9_707 = arith.constant 9 : index
    %c11_708 = arith.constant 11 : index
    %c0_709 = arith.constant 0 : index
    %512 = vector.load %arg6[%c0_706, %c9_707, %c11_708, %c0_709] : memref<2x16x16x8xf32, #tpu.memory_space<vmem>>, vector<2x1x1x8xf32>
    %513 = vector.shape_cast %512 : vector<2x1x1x8xf32> to vector<2x8xf32>
    %514 = arith.maximumf %507, %509 : vector<2x8xf32>
    %515 = arith.maximumf %511, %513 : vector<2x8xf32>
    %516 = arith.maximumf %514, %515 : vector<2x8xf32>
    %c0_710 = arith.constant 0 : index
    %c296 = arith.constant 296 : index
    %517 = vector.load %arg7[%c0_710, %c296] : memref<2x512xf32, #tpu.memory_space<vmem>>, vector<2x8xf32>
    tpu.vector_store %arg7[%c0_710, %c296], %516 {strides = array<i32>} : memref<2x512xf32, #tpu.memory_space<vmem>>, vector<2x8xf32>,
    %c0_711 = arith.constant 0 : index
    %c8_712 = arith.constant 8 : index
    %c12_713 = arith.constant 12 : index
    %c0_714 = arith.constant 0 : index
    %518 = vector.load %arg6[%c0_711, %c8_712, %c12_713, %c0_714] : memref<2x16x16x8xf32, #tpu.memory_space<vmem>>, vector<2x1x1x8xf32>
    %519 = vector.shape_cast %518 : vector<2x1x1x8xf32> to vector<2x8xf32>
    %c0_715 = arith.constant 0 : index
    %c8_716 = arith.constant 8 : index
    %c13_717 = arith.constant 13 : index
    %c0_718 = arith.constant 0 : index
    %520 = vector.load %arg6[%c0_715, %c8_716, %c13_717, %c0_718] : memref<2x16x16x8xf32, #tpu.memory_space<vmem>>, vector<2x1x1x8xf32>
    %521 = vector.shape_cast %520 : vector<2x1x1x8xf32> to vector<2x8xf32>
    %c0_719 = arith.constant 0 : index
    %c9_720 = arith.constant 9 : index
    %c12_721 = arith.constant 12 : index
    %c0_722 = arith.constant 0 : index
    %522 = vector.load %arg6[%c0_719, %c9_720, %c12_721, %c0_722] : memref<2x16x16x8xf32, #tpu.memory_space<vmem>>, vector<2x1x1x8xf32>
    %523 = vector.shape_cast %522 : vector<2x1x1x8xf32> to vector<2x8xf32>
    %c0_723 = arith.constant 0 : index
    %c9_724 = arith.constant 9 : index
    %c13_725 = arith.constant 13 : index
    %c0_726 = arith.constant 0 : index
    %524 = vector.load %arg6[%c0_723, %c9_724, %c13_725, %c0_726] : memref<2x16x16x8xf32, #tpu.memory_space<vmem>>, vector<2x1x1x8xf32>
    %525 = vector.shape_cast %524 : vector<2x1x1x8xf32> to vector<2x8xf32>
    %526 = arith.maximumf %519, %521 : vector<2x8xf32>
    %527 = arith.maximumf %523, %525 : vector<2x8xf32>
    %528 = arith.maximumf %526, %527 : vector<2x8xf32>
    %c0_727 = arith.constant 0 : index
    %c304 = arith.constant 304 : index
    %529 = vector.load %arg7[%c0_727, %c304] : memref<2x512xf32, #tpu.memory_space<vmem>>, vector<2x8xf32>
    tpu.vector_store %arg7[%c0_727, %c304], %528 {strides = array<i32>} : memref<2x512xf32, #tpu.memory_space<vmem>>, vector<2x8xf32>,
    %c0_728 = arith.constant 0 : index
    %c8_729 = arith.constant 8 : index
    %c14_730 = arith.constant 14 : index
    %c0_731 = arith.constant 0 : index
    %530 = vector.load %arg6[%c0_728, %c8_729, %c14_730, %c0_731] : memref<2x16x16x8xf32, #tpu.memory_space<vmem>>, vector<2x1x1x8xf32>
    %531 = vector.shape_cast %530 : vector<2x1x1x8xf32> to vector<2x8xf32>
    %c0_732 = arith.constant 0 : index
    %c8_733 = arith.constant 8 : index
    %c15_734 = arith.constant 15 : index
    %c0_735 = arith.constant 0 : index
    %532 = vector.load %arg6[%c0_732, %c8_733, %c15_734, %c0_735] : memref<2x16x16x8xf32, #tpu.memory_space<vmem>>, vector<2x1x1x8xf32>
    %533 = vector.shape_cast %532 : vector<2x1x1x8xf32> to vector<2x8xf32>
    %c0_736 = arith.constant 0 : index
    %c9_737 = arith.constant 9 : index
    %c14_738 = arith.constant 14 : index
    %c0_739 = arith.constant 0 : index
    %534 = vector.load %arg6[%c0_736, %c9_737, %c14_738, %c0_739] : memref<2x16x16x8xf32, #tpu.memory_space<vmem>>, vector<2x1x1x8xf32>
    %535 = vector.shape_cast %534 : vector<2x1x1x8xf32> to vector<2x8xf32>
    %c0_740 = arith.constant 0 : index
    %c9_741 = arith.constant 9 : index
    %c15_742 = arith.constant 15 : index
    %c0_743 = arith.constant 0 : index
    %536 = vector.load %arg6[%c0_740, %c9_741, %c15_742, %c0_743] : memref<2x16x16x8xf32, #tpu.memory_space<vmem>>, vector<2x1x1x8xf32>
    %537 = vector.shape_cast %536 : vector<2x1x1x8xf32> to vector<2x8xf32>
    %538 = arith.maximumf %531, %533 : vector<2x8xf32>
    %539 = arith.maximumf %535, %537 : vector<2x8xf32>
    %540 = arith.maximumf %538, %539 : vector<2x8xf32>
    %c0_744 = arith.constant 0 : index
    %c312 = arith.constant 312 : index
    %541 = vector.load %arg7[%c0_744, %c312] : memref<2x512xf32, #tpu.memory_space<vmem>>, vector<2x8xf32>
    tpu.vector_store %arg7[%c0_744, %c312], %540 {strides = array<i32>} : memref<2x512xf32, #tpu.memory_space<vmem>>, vector<2x8xf32>,
    %c0_745 = arith.constant 0 : index
    %c10_746 = arith.constant 10 : index
    %c0_747 = arith.constant 0 : index
    %c0_748 = arith.constant 0 : index
    %542 = vector.load %arg6[%c0_745, %c10_746, %c0_747, %c0_748] : memref<2x16x16x8xf32, #tpu.memory_space<vmem>>, vector<2x1x1x8xf32>
    %543 = vector.shape_cast %542 : vector<2x1x1x8xf32> to vector<2x8xf32>
    %c0_749 = arith.constant 0 : index
    %c10_750 = arith.constant 10 : index
    %c1_751 = arith.constant 1 : index
    %c0_752 = arith.constant 0 : index
    %544 = vector.load %arg6[%c0_749, %c10_750, %c1_751, %c0_752] : memref<2x16x16x8xf32, #tpu.memory_space<vmem>>, vector<2x1x1x8xf32>
    %545 = vector.shape_cast %544 : vector<2x1x1x8xf32> to vector<2x8xf32>
    %c0_753 = arith.constant 0 : index
    %c11_754 = arith.constant 11 : index
    %c0_755 = arith.constant 0 : index
    %c0_756 = arith.constant 0 : index
    %546 = vector.load %arg6[%c0_753, %c11_754, %c0_755, %c0_756] : memref<2x16x16x8xf32, #tpu.memory_space<vmem>>, vector<2x1x1x8xf32>
    %547 = vector.shape_cast %546 : vector<2x1x1x8xf32> to vector<2x8xf32>
    %c0_757 = arith.constant 0 : index
    %c11_758 = arith.constant 11 : index
    %c1_759 = arith.constant 1 : index
    %c0_760 = arith.constant 0 : index
    %548 = vector.load %arg6[%c0_757, %c11_758, %c1_759, %c0_760] : memref<2x16x16x8xf32, #tpu.memory_space<vmem>>, vector<2x1x1x8xf32>
    %549 = vector.shape_cast %548 : vector<2x1x1x8xf32> to vector<2x8xf32>
    %550 = arith.maximumf %543, %545 : vector<2x8xf32>
    %551 = arith.maximumf %547, %549 : vector<2x8xf32>
    %552 = arith.maximumf %550, %551 : vector<2x8xf32>
    %c0_761 = arith.constant 0 : index
    %c320 = arith.constant 320 : index
    %553 = vector.load %arg7[%c0_761, %c320] : memref<2x512xf32, #tpu.memory_space<vmem>>, vector<2x8xf32>
    tpu.vector_store %arg7[%c0_761, %c320], %552 {strides = array<i32>} : memref<2x512xf32, #tpu.memory_space<vmem>>, vector<2x8xf32>,
    %c0_762 = arith.constant 0 : index
    %c10_763 = arith.constant 10 : index
    %c2_764 = arith.constant 2 : index
    %c0_765 = arith.constant 0 : index
    %554 = vector.load %arg6[%c0_762, %c10_763, %c2_764, %c0_765] : memref<2x16x16x8xf32, #tpu.memory_space<vmem>>, vector<2x1x1x8xf32>
    %555 = vector.shape_cast %554 : vector<2x1x1x8xf32> to vector<2x8xf32>
    %c0_766 = arith.constant 0 : index
    %c10_767 = arith.constant 10 : index
    %c3_768 = arith.constant 3 : index
    %c0_769 = arith.constant 0 : index
    %556 = vector.load %arg6[%c0_766, %c10_767, %c3_768, %c0_769] : memref<2x16x16x8xf32, #tpu.memory_space<vmem>>, vector<2x1x1x8xf32>
    %557 = vector.shape_cast %556 : vector<2x1x1x8xf32> to vector<2x8xf32>
    %c0_770 = arith.constant 0 : index
    %c11_771 = arith.constant 11 : index
    %c2_772 = arith.constant 2 : index
    %c0_773 = arith.constant 0 : index
    %558 = vector.load %arg6[%c0_770, %c11_771, %c2_772, %c0_773] : memref<2x16x16x8xf32, #tpu.memory_space<vmem>>, vector<2x1x1x8xf32>
    %559 = vector.shape_cast %558 : vector<2x1x1x8xf32> to vector<2x8xf32>
    %c0_774 = arith.constant 0 : index
    %c11_775 = arith.constant 11 : index
    %c3_776 = arith.constant 3 : index
    %c0_777 = arith.constant 0 : index
    %560 = vector.load %arg6[%c0_774, %c11_775, %c3_776, %c0_777] : memref<2x16x16x8xf32, #tpu.memory_space<vmem>>, vector<2x1x1x8xf32>
    %561 = vector.shape_cast %560 : vector<2x1x1x8xf32> to vector<2x8xf32>
    %562 = arith.maximumf %555, %557 : vector<2x8xf32>
    %563 = arith.maximumf %559, %561 : vector<2x8xf32>
    %564 = arith.maximumf %562, %563 : vector<2x8xf32>
    %c0_778 = arith.constant 0 : index
    %c328 = arith.constant 328 : index
    %565 = vector.load %arg7[%c0_778, %c328] : memref<2x512xf32, #tpu.memory_space<vmem>>, vector<2x8xf32>
    tpu.vector_store %arg7[%c0_778, %c328], %564 {strides = array<i32>} : memref<2x512xf32, #tpu.memory_space<vmem>>, vector<2x8xf32>,
    %c0_779 = arith.constant 0 : index
    %c10_780 = arith.constant 10 : index
    %c4_781 = arith.constant 4 : index
    %c0_782 = arith.constant 0 : index
    %566 = vector.load %arg6[%c0_779, %c10_780, %c4_781, %c0_782] : memref<2x16x16x8xf32, #tpu.memory_space<vmem>>, vector<2x1x1x8xf32>
    %567 = vector.shape_cast %566 : vector<2x1x1x8xf32> to vector<2x8xf32>
    %c0_783 = arith.constant 0 : index
    %c10_784 = arith.constant 10 : index
    %c5_785 = arith.constant 5 : index
    %c0_786 = arith.constant 0 : index
    %568 = vector.load %arg6[%c0_783, %c10_784, %c5_785, %c0_786] : memref<2x16x16x8xf32, #tpu.memory_space<vmem>>, vector<2x1x1x8xf32>
    %569 = vector.shape_cast %568 : vector<2x1x1x8xf32> to vector<2x8xf32>
    %c0_787 = arith.constant 0 : index
    %c11_788 = arith.constant 11 : index
    %c4_789 = arith.constant 4 : index
    %c0_790 = arith.constant 0 : index
    %570 = vector.load %arg6[%c0_787, %c11_788, %c4_789, %c0_790] : memref<2x16x16x8xf32, #tpu.memory_space<vmem>>, vector<2x1x1x8xf32>
    %571 = vector.shape_cast %570 : vector<2x1x1x8xf32> to vector<2x8xf32>
    %c0_791 = arith.constant 0 : index
    %c11_792 = arith.constant 11 : index
    %c5_793 = arith.constant 5 : index
    %c0_794 = arith.constant 0 : index
    %572 = vector.load %arg6[%c0_791, %c11_792, %c5_793, %c0_794] : memref<2x16x16x8xf32, #tpu.memory_space<vmem>>, vector<2x1x1x8xf32>
    %573 = vector.shape_cast %572 : vector<2x1x1x8xf32> to vector<2x8xf32>
    %574 = arith.maximumf %567, %569 : vector<2x8xf32>
    %575 = arith.maximumf %571, %573 : vector<2x8xf32>
    %576 = arith.maximumf %574, %575 : vector<2x8xf32>
    %c0_795 = arith.constant 0 : index
    %c336 = arith.constant 336 : index
    %577 = vector.load %arg7[%c0_795, %c336] : memref<2x512xf32, #tpu.memory_space<vmem>>, vector<2x8xf32>
    tpu.vector_store %arg7[%c0_795, %c336], %576 {strides = array<i32>} : memref<2x512xf32, #tpu.memory_space<vmem>>, vector<2x8xf32>,
    %c0_796 = arith.constant 0 : index
    %c10_797 = arith.constant 10 : index
    %c6_798 = arith.constant 6 : index
    %c0_799 = arith.constant 0 : index
    %578 = vector.load %arg6[%c0_796, %c10_797, %c6_798, %c0_799] : memref<2x16x16x8xf32, #tpu.memory_space<vmem>>, vector<2x1x1x8xf32>
    %579 = vector.shape_cast %578 : vector<2x1x1x8xf32> to vector<2x8xf32>
    %c0_800 = arith.constant 0 : index
    %c10_801 = arith.constant 10 : index
    %c7_802 = arith.constant 7 : index
    %c0_803 = arith.constant 0 : index
    %580 = vector.load %arg6[%c0_800, %c10_801, %c7_802, %c0_803] : memref<2x16x16x8xf32, #tpu.memory_space<vmem>>, vector<2x1x1x8xf32>
    %581 = vector.shape_cast %580 : vector<2x1x1x8xf32> to vector<2x8xf32>
    %c0_804 = arith.constant 0 : index
    %c11_805 = arith.constant 11 : index
    %c6_806 = arith.constant 6 : index
    %c0_807 = arith.constant 0 : index
    %582 = vector.load %arg6[%c0_804, %c11_805, %c6_806, %c0_807] : memref<2x16x16x8xf32, #tpu.memory_space<vmem>>, vector<2x1x1x8xf32>
    %583 = vector.shape_cast %582 : vector<2x1x1x8xf32> to vector<2x8xf32>
    %c0_808 = arith.constant 0 : index
    %c11_809 = arith.constant 11 : index
    %c7_810 = arith.constant 7 : index
    %c0_811 = arith.constant 0 : index
    %584 = vector.load %arg6[%c0_808, %c11_809, %c7_810, %c0_811] : memref<2x16x16x8xf32, #tpu.memory_space<vmem>>, vector<2x1x1x8xf32>
    %585 = vector.shape_cast %584 : vector<2x1x1x8xf32> to vector<2x8xf32>
    %586 = arith.maximumf %579, %581 : vector<2x8xf32>
    %587 = arith.maximumf %583, %585 : vector<2x8xf32>
    %588 = arith.maximumf %586, %587 : vector<2x8xf32>
    %c0_812 = arith.constant 0 : index
    %c344 = arith.constant 344 : index
    %589 = vector.load %arg7[%c0_812, %c344] : memref<2x512xf32, #tpu.memory_space<vmem>>, vector<2x8xf32>
    tpu.vector_store %arg7[%c0_812, %c344], %588 {strides = array<i32>} : memref<2x512xf32, #tpu.memory_space<vmem>>, vector<2x8xf32>,
    %c0_813 = arith.constant 0 : index
    %c10_814 = arith.constant 10 : index
    %c8_815 = arith.constant 8 : index
    %c0_816 = arith.constant 0 : index
    %590 = vector.load %arg6[%c0_813, %c10_814, %c8_815, %c0_816] : memref<2x16x16x8xf32, #tpu.memory_space<vmem>>, vector<2x1x1x8xf32>
    %591 = vector.shape_cast %590 : vector<2x1x1x8xf32> to vector<2x8xf32>
    %c0_817 = arith.constant 0 : index
    %c10_818 = arith.constant 10 : index
    %c9_819 = arith.constant 9 : index
    %c0_820 = arith.constant 0 : index
    %592 = vector.load %arg6[%c0_817, %c10_818, %c9_819, %c0_820] : memref<2x16x16x8xf32, #tpu.memory_space<vmem>>, vector<2x1x1x8xf32>
    %593 = vector.shape_cast %592 : vector<2x1x1x8xf32> to vector<2x8xf32>
    %c0_821 = arith.constant 0 : index
    %c11_822 = arith.constant 11 : index
    %c8_823 = arith.constant 8 : index
    %c0_824 = arith.constant 0 : index
    %594 = vector.load %arg6[%c0_821, %c11_822, %c8_823, %c0_824] : memref<2x16x16x8xf32, #tpu.memory_space<vmem>>, vector<2x1x1x8xf32>
    %595 = vector.shape_cast %594 : vector<2x1x1x8xf32> to vector<2x8xf32>
    %c0_825 = arith.constant 0 : index
    %c11_826 = arith.constant 11 : index
    %c9_827 = arith.constant 9 : index
    %c0_828 = arith.constant 0 : index
    %596 = vector.load %arg6[%c0_825, %c11_826, %c9_827, %c0_828] : memref<2x16x16x8xf32, #tpu.memory_space<vmem>>, vector<2x1x1x8xf32>
    %597 = vector.shape_cast %596 : vector<2x1x1x8xf32> to vector<2x8xf32>
    %598 = arith.maximumf %591, %593 : vector<2x8xf32>
    %599 = arith.maximumf %595, %597 : vector<2x8xf32>
    %600 = arith.maximumf %598, %599 : vector<2x8xf32>
    %c0_829 = arith.constant 0 : index
    %c352 = arith.constant 352 : index
    %601 = vector.load %arg7[%c0_829, %c352] : memref<2x512xf32, #tpu.memory_space<vmem>>, vector<2x8xf32>
    tpu.vector_store %arg7[%c0_829, %c352], %600 {strides = array<i32>} : memref<2x512xf32, #tpu.memory_space<vmem>>, vector<2x8xf32>,
    %c0_830 = arith.constant 0 : index
    %c10_831 = arith.constant 10 : index
    %c10_832 = arith.constant 10 : index
    %c0_833 = arith.constant 0 : index
    %602 = vector.load %arg6[%c0_830, %c10_831, %c10_832, %c0_833] : memref<2x16x16x8xf32, #tpu.memory_space<vmem>>, vector<2x1x1x8xf32>
    %603 = vector.shape_cast %602 : vector<2x1x1x8xf32> to vector<2x8xf32>
    %c0_834 = arith.constant 0 : index
    %c10_835 = arith.constant 10 : index
    %c11_836 = arith.constant 11 : index
    %c0_837 = arith.constant 0 : index
    %604 = vector.load %arg6[%c0_834, %c10_835, %c11_836, %c0_837] : memref<2x16x16x8xf32, #tpu.memory_space<vmem>>, vector<2x1x1x8xf32>
    %605 = vector.shape_cast %604 : vector<2x1x1x8xf32> to vector<2x8xf32>
    %c0_838 = arith.constant 0 : index
    %c11_839 = arith.constant 11 : index
    %c10_840 = arith.constant 10 : index
    %c0_841 = arith.constant 0 : index
    %606 = vector.load %arg6[%c0_838, %c11_839, %c10_840, %c0_841] : memref<2x16x16x8xf32, #tpu.memory_space<vmem>>, vector<2x1x1x8xf32>
    %607 = vector.shape_cast %606 : vector<2x1x1x8xf32> to vector<2x8xf32>
    %c0_842 = arith.constant 0 : index
    %c11_843 = arith.constant 11 : index
    %c11_844 = arith.constant 11 : index
    %c0_845 = arith.constant 0 : index
    %608 = vector.load %arg6[%c0_842, %c11_843, %c11_844, %c0_845] : memref<2x16x16x8xf32, #tpu.memory_space<vmem>>, vector<2x1x1x8xf32>
    %609 = vector.shape_cast %608 : vector<2x1x1x8xf32> to vector<2x8xf32>
    %610 = arith.maximumf %603, %605 : vector<2x8xf32>
    %611 = arith.maximumf %607, %609 : vector<2x8xf32>
    %612 = arith.maximumf %610, %611 : vector<2x8xf32>
    %c0_846 = arith.constant 0 : index
    %c360 = arith.constant 360 : index
    %613 = vector.load %arg7[%c0_846, %c360] : memref<2x512xf32, #tpu.memory_space<vmem>>, vector<2x8xf32>
    tpu.vector_store %arg7[%c0_846, %c360], %612 {strides = array<i32>} : memref<2x512xf32, #tpu.memory_space<vmem>>, vector<2x8xf32>,
    %c0_847 = arith.constant 0 : index
    %c10_848 = arith.constant 10 : index
    %c12_849 = arith.constant 12 : index
    %c0_850 = arith.constant 0 : index
    %614 = vector.load %arg6[%c0_847, %c10_848, %c12_849, %c0_850] : memref<2x16x16x8xf32, #tpu.memory_space<vmem>>, vector<2x1x1x8xf32>
    %615 = vector.shape_cast %614 : vector<2x1x1x8xf32> to vector<2x8xf32>
    %c0_851 = arith.constant 0 : index
    %c10_852 = arith.constant 10 : index
    %c13_853 = arith.constant 13 : index
    %c0_854 = arith.constant 0 : index
    %616 = vector.load %arg6[%c0_851, %c10_852, %c13_853, %c0_854] : memref<2x16x16x8xf32, #tpu.memory_space<vmem>>, vector<2x1x1x8xf32>
    %617 = vector.shape_cast %616 : vector<2x1x1x8xf32> to vector<2x8xf32>
    %c0_855 = arith.constant 0 : index
    %c11_856 = arith.constant 11 : index
    %c12_857 = arith.constant 12 : index
    %c0_858 = arith.constant 0 : index
    %618 = vector.load %arg6[%c0_855, %c11_856, %c12_857, %c0_858] : memref<2x16x16x8xf32, #tpu.memory_space<vmem>>, vector<2x1x1x8xf32>
    %619 = vector.shape_cast %618 : vector<2x1x1x8xf32> to vector<2x8xf32>
    %c0_859 = arith.constant 0 : index
    %c11_860 = arith.constant 11 : index
    %c13_861 = arith.constant 13 : index
    %c0_862 = arith.constant 0 : index
    %620 = vector.load %arg6[%c0_859, %c11_860, %c13_861, %c0_862] : memref<2x16x16x8xf32, #tpu.memory_space<vmem>>, vector<2x1x1x8xf32>
    %621 = vector.shape_cast %620 : vector<2x1x1x8xf32> to vector<2x8xf32>
    %622 = arith.maximumf %615, %617 : vector<2x8xf32>
    %623 = arith.maximumf %619, %621 : vector<2x8xf32>
    %624 = arith.maximumf %622, %623 : vector<2x8xf32>
    %c0_863 = arith.constant 0 : index
    %c368 = arith.constant 368 : index
    %625 = vector.load %arg7[%c0_863, %c368] : memref<2x512xf32, #tpu.memory_space<vmem>>, vector<2x8xf32>
    tpu.vector_store %arg7[%c0_863, %c368], %624 {strides = array<i32>} : memref<2x512xf32, #tpu.memory_space<vmem>>, vector<2x8xf32>,
    %c0_864 = arith.constant 0 : index
    %c10_865 = arith.constant 10 : index
    %c14_866 = arith.constant 14 : index
    %c0_867 = arith.constant 0 : index
    %626 = vector.load %arg6[%c0_864, %c10_865, %c14_866, %c0_867] : memref<2x16x16x8xf32, #tpu.memory_space<vmem>>, vector<2x1x1x8xf32>
    %627 = vector.shape_cast %626 : vector<2x1x1x8xf32> to vector<2x8xf32>
    %c0_868 = arith.constant 0 : index
    %c10_869 = arith.constant 10 : index
    %c15_870 = arith.constant 15 : index
    %c0_871 = arith.constant 0 : index
    %628 = vector.load %arg6[%c0_868, %c10_869, %c15_870, %c0_871] : memref<2x16x16x8xf32, #tpu.memory_space<vmem>>, vector<2x1x1x8xf32>
    %629 = vector.shape_cast %628 : vector<2x1x1x8xf32> to vector<2x8xf32>
    %c0_872 = arith.constant 0 : index
    %c11_873 = arith.constant 11 : index
    %c14_874 = arith.constant 14 : index
    %c0_875 = arith.constant 0 : index
    %630 = vector.load %arg6[%c0_872, %c11_873, %c14_874, %c0_875] : memref<2x16x16x8xf32, #tpu.memory_space<vmem>>, vector<2x1x1x8xf32>
    %631 = vector.shape_cast %630 : vector<2x1x1x8xf32> to vector<2x8xf32>
    %c0_876 = arith.constant 0 : index
    %c11_877 = arith.constant 11 : index
    %c15_878 = arith.constant 15 : index
    %c0_879 = arith.constant 0 : index
    %632 = vector.load %arg6[%c0_876, %c11_877, %c15_878, %c0_879] : memref<2x16x16x8xf32, #tpu.memory_space<vmem>>, vector<2x1x1x8xf32>
    %633 = vector.shape_cast %632 : vector<2x1x1x8xf32> to vector<2x8xf32>
    %634 = arith.maximumf %627, %629 : vector<2x8xf32>
    %635 = arith.maximumf %631, %633 : vector<2x8xf32>
    %636 = arith.maximumf %634, %635 : vector<2x8xf32>
    %c0_880 = arith.constant 0 : index
    %c376 = arith.constant 376 : index
    %637 = vector.load %arg7[%c0_880, %c376] : memref<2x512xf32, #tpu.memory_space<vmem>>, vector<2x8xf32>
    tpu.vector_store %arg7[%c0_880, %c376], %636 {strides = array<i32>} : memref<2x512xf32, #tpu.memory_space<vmem>>, vector<2x8xf32>,
    %c0_881 = arith.constant 0 : index
    %c12_882 = arith.constant 12 : index
    %c0_883 = arith.constant 0 : index
    %c0_884 = arith.constant 0 : index
    %638 = vector.load %arg6[%c0_881, %c12_882, %c0_883, %c0_884] : memref<2x16x16x8xf32, #tpu.memory_space<vmem>>, vector<2x1x1x8xf32>
    %639 = vector.shape_cast %638 : vector<2x1x1x8xf32> to vector<2x8xf32>
    %c0_885 = arith.constant 0 : index
    %c12_886 = arith.constant 12 : index
    %c1_887 = arith.constant 1 : index
    %c0_888 = arith.constant 0 : index
    %640 = vector.load %arg6[%c0_885, %c12_886, %c1_887, %c0_888] : memref<2x16x16x8xf32, #tpu.memory_space<vmem>>, vector<2x1x1x8xf32>
    %641 = vector.shape_cast %640 : vector<2x1x1x8xf32> to vector<2x8xf32>
    %c0_889 = arith.constant 0 : index
    %c13_890 = arith.constant 13 : index
    %c0_891 = arith.constant 0 : index
    %c0_892 = arith.constant 0 : index
    %642 = vector.load %arg6[%c0_889, %c13_890, %c0_891, %c0_892] : memref<2x16x16x8xf32, #tpu.memory_space<vmem>>, vector<2x1x1x8xf32>
    %643 = vector.shape_cast %642 : vector<2x1x1x8xf32> to vector<2x8xf32>
    %c0_893 = arith.constant 0 : index
    %c13_894 = arith.constant 13 : index
    %c1_895 = arith.constant 1 : index
    %c0_896 = arith.constant 0 : index
    %644 = vector.load %arg6[%c0_893, %c13_894, %c1_895, %c0_896] : memref<2x16x16x8xf32, #tpu.memory_space<vmem>>, vector<2x1x1x8xf32>
    %645 = vector.shape_cast %644 : vector<2x1x1x8xf32> to vector<2x8xf32>
    %646 = arith.maximumf %639, %641 : vector<2x8xf32>
    %647 = arith.maximumf %643, %645 : vector<2x8xf32>
    %648 = arith.maximumf %646, %647 : vector<2x8xf32>
    %c0_897 = arith.constant 0 : index
    %c384 = arith.constant 384 : index
    %649 = vector.load %arg7[%c0_897, %c384] : memref<2x512xf32, #tpu.memory_space<vmem>>, vector<2x8xf32>
    tpu.vector_store %arg7[%c0_897, %c384], %648 {strides = array<i32>} : memref<2x512xf32, #tpu.memory_space<vmem>>, vector<2x8xf32>,
    %c0_898 = arith.constant 0 : index
    %c12_899 = arith.constant 12 : index
    %c2_900 = arith.constant 2 : index
    %c0_901 = arith.constant 0 : index
    %650 = vector.load %arg6[%c0_898, %c12_899, %c2_900, %c0_901] : memref<2x16x16x8xf32, #tpu.memory_space<vmem>>, vector<2x1x1x8xf32>
    %651 = vector.shape_cast %650 : vector<2x1x1x8xf32> to vector<2x8xf32>
    %c0_902 = arith.constant 0 : index
    %c12_903 = arith.constant 12 : index
    %c3_904 = arith.constant 3 : index
    %c0_905 = arith.constant 0 : index
    %652 = vector.load %arg6[%c0_902, %c12_903, %c3_904, %c0_905] : memref<2x16x16x8xf32, #tpu.memory_space<vmem>>, vector<2x1x1x8xf32>
    %653 = vector.shape_cast %652 : vector<2x1x1x8xf32> to vector<2x8xf32>
    %c0_906 = arith.constant 0 : index
    %c13_907 = arith.constant 13 : index
    %c2_908 = arith.constant 2 : index
    %c0_909 = arith.constant 0 : index
    %654 = vector.load %arg6[%c0_906, %c13_907, %c2_908, %c0_909] : memref<2x16x16x8xf32, #tpu.memory_space<vmem>>, vector<2x1x1x8xf32>
    %655 = vector.shape_cast %654 : vector<2x1x1x8xf32> to vector<2x8xf32>
    %c0_910 = arith.constant 0 : index
    %c13_911 = arith.constant 13 : index
    %c3_912 = arith.constant 3 : index
    %c0_913 = arith.constant 0 : index
    %656 = vector.load %arg6[%c0_910, %c13_911, %c3_912, %c0_913] : memref<2x16x16x8xf32, #tpu.memory_space<vmem>>, vector<2x1x1x8xf32>
    %657 = vector.shape_cast %656 : vector<2x1x1x8xf32> to vector<2x8xf32>
    %658 = arith.maximumf %651, %653 : vector<2x8xf32>
    %659 = arith.maximumf %655, %657 : vector<2x8xf32>
    %660 = arith.maximumf %658, %659 : vector<2x8xf32>
    %c0_914 = arith.constant 0 : index
    %c392 = arith.constant 392 : index
    %661 = vector.load %arg7[%c0_914, %c392] : memref<2x512xf32, #tpu.memory_space<vmem>>, vector<2x8xf32>
    tpu.vector_store %arg7[%c0_914, %c392], %660 {strides = array<i32>} : memref<2x512xf32, #tpu.memory_space<vmem>>, vector<2x8xf32>,
    %c0_915 = arith.constant 0 : index
    %c12_916 = arith.constant 12 : index
    %c4_917 = arith.constant 4 : index
    %c0_918 = arith.constant 0 : index
    %662 = vector.load %arg6[%c0_915, %c12_916, %c4_917, %c0_918] : memref<2x16x16x8xf32, #tpu.memory_space<vmem>>, vector<2x1x1x8xf32>
    %663 = vector.shape_cast %662 : vector<2x1x1x8xf32> to vector<2x8xf32>
    %c0_919 = arith.constant 0 : index
    %c12_920 = arith.constant 12 : index
    %c5_921 = arith.constant 5 : index
    %c0_922 = arith.constant 0 : index
    %664 = vector.load %arg6[%c0_919, %c12_920, %c5_921, %c0_922] : memref<2x16x16x8xf32, #tpu.memory_space<vmem>>, vector<2x1x1x8xf32>
    %665 = vector.shape_cast %664 : vector<2x1x1x8xf32> to vector<2x8xf32>
    %c0_923 = arith.constant 0 : index
    %c13_924 = arith.constant 13 : index
    %c4_925 = arith.constant 4 : index
    %c0_926 = arith.constant 0 : index
    %666 = vector.load %arg6[%c0_923, %c13_924, %c4_925, %c0_926] : memref<2x16x16x8xf32, #tpu.memory_space<vmem>>, vector<2x1x1x8xf32>
    %667 = vector.shape_cast %666 : vector<2x1x1x8xf32> to vector<2x8xf32>
    %c0_927 = arith.constant 0 : index
    %c13_928 = arith.constant 13 : index
    %c5_929 = arith.constant 5 : index
    %c0_930 = arith.constant 0 : index
    %668 = vector.load %arg6[%c0_927, %c13_928, %c5_929, %c0_930] : memref<2x16x16x8xf32, #tpu.memory_space<vmem>>, vector<2x1x1x8xf32>
    %669 = vector.shape_cast %668 : vector<2x1x1x8xf32> to vector<2x8xf32>
    %670 = arith.maximumf %663, %665 : vector<2x8xf32>
    %671 = arith.maximumf %667, %669 : vector<2x8xf32>
    %672 = arith.maximumf %670, %671 : vector<2x8xf32>
    %c0_931 = arith.constant 0 : index
    %c400 = arith.constant 400 : index
    %673 = vector.load %arg7[%c0_931, %c400] : memref<2x512xf32, #tpu.memory_space<vmem>>, vector<2x8xf32>
    tpu.vector_store %arg7[%c0_931, %c400], %672 {strides = array<i32>} : memref<2x512xf32, #tpu.memory_space<vmem>>, vector<2x8xf32>,
    %c0_932 = arith.constant 0 : index
    %c12_933 = arith.constant 12 : index
    %c6_934 = arith.constant 6 : index
    %c0_935 = arith.constant 0 : index
    %674 = vector.load %arg6[%c0_932, %c12_933, %c6_934, %c0_935] : memref<2x16x16x8xf32, #tpu.memory_space<vmem>>, vector<2x1x1x8xf32>
    %675 = vector.shape_cast %674 : vector<2x1x1x8xf32> to vector<2x8xf32>
    %c0_936 = arith.constant 0 : index
    %c12_937 = arith.constant 12 : index
    %c7_938 = arith.constant 7 : index
    %c0_939 = arith.constant 0 : index
    %676 = vector.load %arg6[%c0_936, %c12_937, %c7_938, %c0_939] : memref<2x16x16x8xf32, #tpu.memory_space<vmem>>, vector<2x1x1x8xf32>
    %677 = vector.shape_cast %676 : vector<2x1x1x8xf32> to vector<2x8xf32>
    %c0_940 = arith.constant 0 : index
    %c13_941 = arith.constant 13 : index
    %c6_942 = arith.constant 6 : index
    %c0_943 = arith.constant 0 : index
    %678 = vector.load %arg6[%c0_940, %c13_941, %c6_942, %c0_943] : memref<2x16x16x8xf32, #tpu.memory_space<vmem>>, vector<2x1x1x8xf32>
    %679 = vector.shape_cast %678 : vector<2x1x1x8xf32> to vector<2x8xf32>
    %c0_944 = arith.constant 0 : index
    %c13_945 = arith.constant 13 : index
    %c7_946 = arith.constant 7 : index
    %c0_947 = arith.constant 0 : index
    %680 = vector.load %arg6[%c0_944, %c13_945, %c7_946, %c0_947] : memref<2x16x16x8xf32, #tpu.memory_space<vmem>>, vector<2x1x1x8xf32>
    %681 = vector.shape_cast %680 : vector<2x1x1x8xf32> to vector<2x8xf32>
    %682 = arith.maximumf %675, %677 : vector<2x8xf32>
    %683 = arith.maximumf %679, %681 : vector<2x8xf32>
    %684 = arith.maximumf %682, %683 : vector<2x8xf32>
    %c0_948 = arith.constant 0 : index
    %c408 = arith.constant 408 : index
    %685 = vector.load %arg7[%c0_948, %c408] : memref<2x512xf32, #tpu.memory_space<vmem>>, vector<2x8xf32>
    tpu.vector_store %arg7[%c0_948, %c408], %684 {strides = array<i32>} : memref<2x512xf32, #tpu.memory_space<vmem>>, vector<2x8xf32>,
    %c0_949 = arith.constant 0 : index
    %c12_950 = arith.constant 12 : index
    %c8_951 = arith.constant 8 : index
    %c0_952 = arith.constant 0 : index
    %686 = vector.load %arg6[%c0_949, %c12_950, %c8_951, %c0_952] : memref<2x16x16x8xf32, #tpu.memory_space<vmem>>, vector<2x1x1x8xf32>
    %687 = vector.shape_cast %686 : vector<2x1x1x8xf32> to vector<2x8xf32>
    %c0_953 = arith.constant 0 : index
    %c12_954 = arith.constant 12 : index
    %c9_955 = arith.constant 9 : index
    %c0_956 = arith.constant 0 : index
    %688 = vector.load %arg6[%c0_953, %c12_954, %c9_955, %c0_956] : memref<2x16x16x8xf32, #tpu.memory_space<vmem>>, vector<2x1x1x8xf32>
    %689 = vector.shape_cast %688 : vector<2x1x1x8xf32> to vector<2x8xf32>
    %c0_957 = arith.constant 0 : index
    %c13_958 = arith.constant 13 : index
    %c8_959 = arith.constant 8 : index
    %c0_960 = arith.constant 0 : index
    %690 = vector.load %arg6[%c0_957, %c13_958, %c8_959, %c0_960] : memref<2x16x16x8xf32, #tpu.memory_space<vmem>>, vector<2x1x1x8xf32>
    %691 = vector.shape_cast %690 : vector<2x1x1x8xf32> to vector<2x8xf32>
    %c0_961 = arith.constant 0 : index
    %c13_962 = arith.constant 13 : index
    %c9_963 = arith.constant 9 : index
    %c0_964 = arith.constant 0 : index
    %692 = vector.load %arg6[%c0_961, %c13_962, %c9_963, %c0_964] : memref<2x16x16x8xf32, #tpu.memory_space<vmem>>, vector<2x1x1x8xf32>
    %693 = vector.shape_cast %692 : vector<2x1x1x8xf32> to vector<2x8xf32>
    %694 = arith.maximumf %687, %689 : vector<2x8xf32>
    %695 = arith.maximumf %691, %693 : vector<2x8xf32>
    %696 = arith.maximumf %694, %695 : vector<2x8xf32>
    %c0_965 = arith.constant 0 : index
    %c416 = arith.constant 416 : index
    %697 = vector.load %arg7[%c0_965, %c416] : memref<2x512xf32, #tpu.memory_space<vmem>>, vector<2x8xf32>
    tpu.vector_store %arg7[%c0_965, %c416], %696 {strides = array<i32>} : memref<2x512xf32, #tpu.memory_space<vmem>>, vector<2x8xf32>,
    %c0_966 = arith.constant 0 : index
    %c12_967 = arith.constant 12 : index
    %c10_968 = arith.constant 10 : index
    %c0_969 = arith.constant 0 : index
    %698 = vector.load %arg6[%c0_966, %c12_967, %c10_968, %c0_969] : memref<2x16x16x8xf32, #tpu.memory_space<vmem>>, vector<2x1x1x8xf32>
    %699 = vector.shape_cast %698 : vector<2x1x1x8xf32> to vector<2x8xf32>
    %c0_970 = arith.constant 0 : index
    %c12_971 = arith.constant 12 : index
    %c11_972 = arith.constant 11 : index
    %c0_973 = arith.constant 0 : index
    %700 = vector.load %arg6[%c0_970, %c12_971, %c11_972, %c0_973] : memref<2x16x16x8xf32, #tpu.memory_space<vmem>>, vector<2x1x1x8xf32>
    %701 = vector.shape_cast %700 : vector<2x1x1x8xf32> to vector<2x8xf32>
    %c0_974 = arith.constant 0 : index
    %c13_975 = arith.constant 13 : index
    %c10_976 = arith.constant 10 : index
    %c0_977 = arith.constant 0 : index
    %702 = vector.load %arg6[%c0_974, %c13_975, %c10_976, %c0_977] : memref<2x16x16x8xf32, #tpu.memory_space<vmem>>, vector<2x1x1x8xf32>
    %703 = vector.shape_cast %702 : vector<2x1x1x8xf32> to vector<2x8xf32>
    %c0_978 = arith.constant 0 : index
    %c13_979 = arith.constant 13 : index
    %c11_980 = arith.constant 11 : index
    %c0_981 = arith.constant 0 : index
    %704 = vector.load %arg6[%c0_978, %c13_979, %c11_980, %c0_981] : memref<2x16x16x8xf32, #tpu.memory_space<vmem>>, vector<2x1x1x8xf32>
    %705 = vector.shape_cast %704 : vector<2x1x1x8xf32> to vector<2x8xf32>
    %706 = arith.maximumf %699, %701 : vector<2x8xf32>
    %707 = arith.maximumf %703, %705 : vector<2x8xf32>
    %708 = arith.maximumf %706, %707 : vector<2x8xf32>
    %c0_982 = arith.constant 0 : index
    %c424 = arith.constant 424 : index
    %709 = vector.load %arg7[%c0_982, %c424] : memref<2x512xf32, #tpu.memory_space<vmem>>, vector<2x8xf32>
    tpu.vector_store %arg7[%c0_982, %c424], %708 {strides = array<i32>} : memref<2x512xf32, #tpu.memory_space<vmem>>, vector<2x8xf32>,
    %c0_983 = arith.constant 0 : index
    %c12_984 = arith.constant 12 : index
    %c12_985 = arith.constant 12 : index
    %c0_986 = arith.constant 0 : index
    %710 = vector.load %arg6[%c0_983, %c12_984, %c12_985, %c0_986] : memref<2x16x16x8xf32, #tpu.memory_space<vmem>>, vector<2x1x1x8xf32>
    %711 = vector.shape_cast %710 : vector<2x1x1x8xf32> to vector<2x8xf32>
    %c0_987 = arith.constant 0 : index
    %c12_988 = arith.constant 12 : index
    %c13_989 = arith.constant 13 : index
    %c0_990 = arith.constant 0 : index
    %712 = vector.load %arg6[%c0_987, %c12_988, %c13_989, %c0_990] : memref<2x16x16x8xf32, #tpu.memory_space<vmem>>, vector<2x1x1x8xf32>
    %713 = vector.shape_cast %712 : vector<2x1x1x8xf32> to vector<2x8xf32>
    %c0_991 = arith.constant 0 : index
    %c13_992 = arith.constant 13 : index
    %c12_993 = arith.constant 12 : index
    %c0_994 = arith.constant 0 : index
    %714 = vector.load %arg6[%c0_991, %c13_992, %c12_993, %c0_994] : memref<2x16x16x8xf32, #tpu.memory_space<vmem>>, vector<2x1x1x8xf32>
    %715 = vector.shape_cast %714 : vector<2x1x1x8xf32> to vector<2x8xf32>
    %c0_995 = arith.constant 0 : index
    %c13_996 = arith.constant 13 : index
    %c13_997 = arith.constant 13 : index
    %c0_998 = arith.constant 0 : index
    %716 = vector.load %arg6[%c0_995, %c13_996, %c13_997, %c0_998] : memref<2x16x16x8xf32, #tpu.memory_space<vmem>>, vector<2x1x1x8xf32>
    %717 = vector.shape_cast %716 : vector<2x1x1x8xf32> to vector<2x8xf32>
    %718 = arith.maximumf %711, %713 : vector<2x8xf32>
    %719 = arith.maximumf %715, %717 : vector<2x8xf32>
    %720 = arith.maximumf %718, %719 : vector<2x8xf32>
    %c0_999 = arith.constant 0 : index
    %c432 = arith.constant 432 : index
    %721 = vector.load %arg7[%c0_999, %c432] : memref<2x512xf32, #tpu.memory_space<vmem>>, vector<2x8xf32>
    tpu.vector_store %arg7[%c0_999, %c432], %720 {strides = array<i32>} : memref<2x512xf32, #tpu.memory_space<vmem>>, vector<2x8xf32>,
    %c0_1000 = arith.constant 0 : index
    %c12_1001 = arith.constant 12 : index
    %c14_1002 = arith.constant 14 : index
    %c0_1003 = arith.constant 0 : index
    %722 = vector.load %arg6[%c0_1000, %c12_1001, %c14_1002, %c0_1003] : memref<2x16x16x8xf32, #tpu.memory_space<vmem>>, vector<2x1x1x8xf32>
    %723 = vector.shape_cast %722 : vector<2x1x1x8xf32> to vector<2x8xf32>
    %c0_1004 = arith.constant 0 : index
    %c12_1005 = arith.constant 12 : index
    %c15_1006 = arith.constant 15 : index
    %c0_1007 = arith.constant 0 : index
    %724 = vector.load %arg6[%c0_1004, %c12_1005, %c15_1006, %c0_1007] : memref<2x16x16x8xf32, #tpu.memory_space<vmem>>, vector<2x1x1x8xf32>
    %725 = vector.shape_cast %724 : vector<2x1x1x8xf32> to vector<2x8xf32>
    %c0_1008 = arith.constant 0 : index
    %c13_1009 = arith.constant 13 : index
    %c14_1010 = arith.constant 14 : index
    %c0_1011 = arith.constant 0 : index
    %726 = vector.load %arg6[%c0_1008, %c13_1009, %c14_1010, %c0_1011] : memref<2x16x16x8xf32, #tpu.memory_space<vmem>>, vector<2x1x1x8xf32>
    %727 = vector.shape_cast %726 : vector<2x1x1x8xf32> to vector<2x8xf32>
    %c0_1012 = arith.constant 0 : index
    %c13_1013 = arith.constant 13 : index
    %c15_1014 = arith.constant 15 : index
    %c0_1015 = arith.constant 0 : index
    %728 = vector.load %arg6[%c0_1012, %c13_1013, %c15_1014, %c0_1015] : memref<2x16x16x8xf32, #tpu.memory_space<vmem>>, vector<2x1x1x8xf32>
    %729 = vector.shape_cast %728 : vector<2x1x1x8xf32> to vector<2x8xf32>
    %730 = arith.maximumf %723, %725 : vector<2x8xf32>
    %731 = arith.maximumf %727, %729 : vector<2x8xf32>
    %732 = arith.maximumf %730, %731 : vector<2x8xf32>
    %c0_1016 = arith.constant 0 : index
    %c440 = arith.constant 440 : index
    %733 = vector.load %arg7[%c0_1016, %c440] : memref<2x512xf32, #tpu.memory_space<vmem>>, vector<2x8xf32>
    tpu.vector_store %arg7[%c0_1016, %c440], %732 {strides = array<i32>} : memref<2x512xf32, #tpu.memory_space<vmem>>, vector<2x8xf32>,
    %c0_1017 = arith.constant 0 : index
    %c14_1018 = arith.constant 14 : index
    %c0_1019 = arith.constant 0 : index
    %c0_1020 = arith.constant 0 : index
    %734 = vector.load %arg6[%c0_1017, %c14_1018, %c0_1019, %c0_1020] : memref<2x16x16x8xf32, #tpu.memory_space<vmem>>, vector<2x1x1x8xf32>
    %735 = vector.shape_cast %734 : vector<2x1x1x8xf32> to vector<2x8xf32>
    %c0_1021 = arith.constant 0 : index
    %c14_1022 = arith.constant 14 : index
    %c1_1023 = arith.constant 1 : index
    %c0_1024 = arith.constant 0 : index
    %736 = vector.load %arg6[%c0_1021, %c14_1022, %c1_1023, %c0_1024] : memref<2x16x16x8xf32, #tpu.memory_space<vmem>>, vector<2x1x1x8xf32>
    %737 = vector.shape_cast %736 : vector<2x1x1x8xf32> to vector<2x8xf32>
    %c0_1025 = arith.constant 0 : index
    %c15_1026 = arith.constant 15 : index
    %c0_1027 = arith.constant 0 : index
    %c0_1028 = arith.constant 0 : index
    %738 = vector.load %arg6[%c0_1025, %c15_1026, %c0_1027, %c0_1028] : memref<2x16x16x8xf32, #tpu.memory_space<vmem>>, vector<2x1x1x8xf32>
    %739 = vector.shape_cast %738 : vector<2x1x1x8xf32> to vector<2x8xf32>
    %c0_1029 = arith.constant 0 : index
    %c15_1030 = arith.constant 15 : index
    %c1_1031 = arith.constant 1 : index
    %c0_1032 = arith.constant 0 : index
    %740 = vector.load %arg6[%c0_1029, %c15_1030, %c1_1031, %c0_1032] : memref<2x16x16x8xf32, #tpu.memory_space<vmem>>, vector<2x1x1x8xf32>
    %741 = vector.shape_cast %740 : vector<2x1x1x8xf32> to vector<2x8xf32>
    %742 = arith.maximumf %735, %737 : vector<2x8xf32>
    %743 = arith.maximumf %739, %741 : vector<2x8xf32>
    %744 = arith.maximumf %742, %743 : vector<2x8xf32>
    %c0_1033 = arith.constant 0 : index
    %c448 = arith.constant 448 : index
    %745 = vector.load %arg7[%c0_1033, %c448] : memref<2x512xf32, #tpu.memory_space<vmem>>, vector<2x8xf32>
    tpu.vector_store %arg7[%c0_1033, %c448], %744 {strides = array<i32>} : memref<2x512xf32, #tpu.memory_space<vmem>>, vector<2x8xf32>,
    %c0_1034 = arith.constant 0 : index
    %c14_1035 = arith.constant 14 : index
    %c2_1036 = arith.constant 2 : index
    %c0_1037 = arith.constant 0 : index
    %746 = vector.load %arg6[%c0_1034, %c14_1035, %c2_1036, %c0_1037] : memref<2x16x16x8xf32, #tpu.memory_space<vmem>>, vector<2x1x1x8xf32>
    %747 = vector.shape_cast %746 : vector<2x1x1x8xf32> to vector<2x8xf32>
    %c0_1038 = arith.constant 0 : index
    %c14_1039 = arith.constant 14 : index
    %c3_1040 = arith.constant 3 : index
    %c0_1041 = arith.constant 0 : index
    %748 = vector.load %arg6[%c0_1038, %c14_1039, %c3_1040, %c0_1041] : memref<2x16x16x8xf32, #tpu.memory_space<vmem>>, vector<2x1x1x8xf32>
    %749 = vector.shape_cast %748 : vector<2x1x1x8xf32> to vector<2x8xf32>
    %c0_1042 = arith.constant 0 : index
    %c15_1043 = arith.constant 15 : index
    %c2_1044 = arith.constant 2 : index
    %c0_1045 = arith.constant 0 : index
    %750 = vector.load %arg6[%c0_1042, %c15_1043, %c2_1044, %c0_1045] : memref<2x16x16x8xf32, #tpu.memory_space<vmem>>, vector<2x1x1x8xf32>
    %751 = vector.shape_cast %750 : vector<2x1x1x8xf32> to vector<2x8xf32>
    %c0_1046 = arith.constant 0 : index
    %c15_1047 = arith.constant 15 : index
    %c3_1048 = arith.constant 3 : index
    %c0_1049 = arith.constant 0 : index
    %752 = vector.load %arg6[%c0_1046, %c15_1047, %c3_1048, %c0_1049] : memref<2x16x16x8xf32, #tpu.memory_space<vmem>>, vector<2x1x1x8xf32>
    %753 = vector.shape_cast %752 : vector<2x1x1x8xf32> to vector<2x8xf32>
    %754 = arith.maximumf %747, %749 : vector<2x8xf32>
    %755 = arith.maximumf %751, %753 : vector<2x8xf32>
    %756 = arith.maximumf %754, %755 : vector<2x8xf32>
    %c0_1050 = arith.constant 0 : index
    %c456 = arith.constant 456 : index
    %757 = vector.load %arg7[%c0_1050, %c456] : memref<2x512xf32, #tpu.memory_space<vmem>>, vector<2x8xf32>
    tpu.vector_store %arg7[%c0_1050, %c456], %756 {strides = array<i32>} : memref<2x512xf32, #tpu.memory_space<vmem>>, vector<2x8xf32>,
    %c0_1051 = arith.constant 0 : index
    %c14_1052 = arith.constant 14 : index
    %c4_1053 = arith.constant 4 : index
    %c0_1054 = arith.constant 0 : index
    %758 = vector.load %arg6[%c0_1051, %c14_1052, %c4_1053, %c0_1054] : memref<2x16x16x8xf32, #tpu.memory_space<vmem>>, vector<2x1x1x8xf32>
    %759 = vector.shape_cast %758 : vector<2x1x1x8xf32> to vector<2x8xf32>
    %c0_1055 = arith.constant 0 : index
    %c14_1056 = arith.constant 14 : index
    %c5_1057 = arith.constant 5 : index
    %c0_1058 = arith.constant 0 : index
    %760 = vector.load %arg6[%c0_1055, %c14_1056, %c5_1057, %c0_1058] : memref<2x16x16x8xf32, #tpu.memory_space<vmem>>, vector<2x1x1x8xf32>
    %761 = vector.shape_cast %760 : vector<2x1x1x8xf32> to vector<2x8xf32>
    %c0_1059 = arith.constant 0 : index
    %c15_1060 = arith.constant 15 : index
    %c4_1061 = arith.constant 4 : index
    %c0_1062 = arith.constant 0 : index
    %762 = vector.load %arg6[%c0_1059, %c15_1060, %c4_1061, %c0_1062] : memref<2x16x16x8xf32, #tpu.memory_space<vmem>>, vector<2x1x1x8xf32>
    %763 = vector.shape_cast %762 : vector<2x1x1x8xf32> to vector<2x8xf32>
    %c0_1063 = arith.constant 0 : index
    %c15_1064 = arith.constant 15 : index
    %c5_1065 = arith.constant 5 : index
    %c0_1066 = arith.constant 0 : index
    %764 = vector.load %arg6[%c0_1063, %c15_1064, %c5_1065, %c0_1066] : memref<2x16x16x8xf32, #tpu.memory_space<vmem>>, vector<2x1x1x8xf32>
    %765 = vector.shape_cast %764 : vector<2x1x1x8xf32> to vector<2x8xf32>
    %766 = arith.maximumf %759, %761 : vector<2x8xf32>
    %767 = arith.maximumf %763, %765 : vector<2x8xf32>
    %768 = arith.maximumf %766, %767 : vector<2x8xf32>
    %c0_1067 = arith.constant 0 : index
    %c464 = arith.constant 464 : index
    %769 = vector.load %arg7[%c0_1067, %c464] : memref<2x512xf32, #tpu.memory_space<vmem>>, vector<2x8xf32>
    tpu.vector_store %arg7[%c0_1067, %c464], %768 {strides = array<i32>} : memref<2x512xf32, #tpu.memory_space<vmem>>, vector<2x8xf32>,
    %c0_1068 = arith.constant 0 : index
    %c14_1069 = arith.constant 14 : index
    %c6_1070 = arith.constant 6 : index
    %c0_1071 = arith.constant 0 : index
    %770 = vector.load %arg6[%c0_1068, %c14_1069, %c6_1070, %c0_1071] : memref<2x16x16x8xf32, #tpu.memory_space<vmem>>, vector<2x1x1x8xf32>
    %771 = vector.shape_cast %770 : vector<2x1x1x8xf32> to vector<2x8xf32>
    %c0_1072 = arith.constant 0 : index
    %c14_1073 = arith.constant 14 : index
    %c7_1074 = arith.constant 7 : index
    %c0_1075 = arith.constant 0 : index
    %772 = vector.load %arg6[%c0_1072, %c14_1073, %c7_1074, %c0_1075] : memref<2x16x16x8xf32, #tpu.memory_space<vmem>>, vector<2x1x1x8xf32>
    %773 = vector.shape_cast %772 : vector<2x1x1x8xf32> to vector<2x8xf32>
    %c0_1076 = arith.constant 0 : index
    %c15_1077 = arith.constant 15 : index
    %c6_1078 = arith.constant 6 : index
    %c0_1079 = arith.constant 0 : index
    %774 = vector.load %arg6[%c0_1076, %c15_1077, %c6_1078, %c0_1079] : memref<2x16x16x8xf32, #tpu.memory_space<vmem>>, vector<2x1x1x8xf32>
    %775 = vector.shape_cast %774 : vector<2x1x1x8xf32> to vector<2x8xf32>
    %c0_1080 = arith.constant 0 : index
    %c15_1081 = arith.constant 15 : index
    %c7_1082 = arith.constant 7 : index
    %c0_1083 = arith.constant 0 : index
    %776 = vector.load %arg6[%c0_1080, %c15_1081, %c7_1082, %c0_1083] : memref<2x16x16x8xf32, #tpu.memory_space<vmem>>, vector<2x1x1x8xf32>
    %777 = vector.shape_cast %776 : vector<2x1x1x8xf32> to vector<2x8xf32>
    %778 = arith.maximumf %771, %773 : vector<2x8xf32>
    %779 = arith.maximumf %775, %777 : vector<2x8xf32>
    %780 = arith.maximumf %778, %779 : vector<2x8xf32>
    %c0_1084 = arith.constant 0 : index
    %c472 = arith.constant 472 : index
    %781 = vector.load %arg7[%c0_1084, %c472] : memref<2x512xf32, #tpu.memory_space<vmem>>, vector<2x8xf32>
    tpu.vector_store %arg7[%c0_1084, %c472], %780 {strides = array<i32>} : memref<2x512xf32, #tpu.memory_space<vmem>>, vector<2x8xf32>,
    %c0_1085 = arith.constant 0 : index
    %c14_1086 = arith.constant 14 : index
    %c8_1087 = arith.constant 8 : index
    %c0_1088 = arith.constant 0 : index
    %782 = vector.load %arg6[%c0_1085, %c14_1086, %c8_1087, %c0_1088] : memref<2x16x16x8xf32, #tpu.memory_space<vmem>>, vector<2x1x1x8xf32>
    %783 = vector.shape_cast %782 : vector<2x1x1x8xf32> to vector<2x8xf32>
    %c0_1089 = arith.constant 0 : index
    %c14_1090 = arith.constant 14 : index
    %c9_1091 = arith.constant 9 : index
    %c0_1092 = arith.constant 0 : index
    %784 = vector.load %arg6[%c0_1089, %c14_1090, %c9_1091, %c0_1092] : memref<2x16x16x8xf32, #tpu.memory_space<vmem>>, vector<2x1x1x8xf32>
    %785 = vector.shape_cast %784 : vector<2x1x1x8xf32> to vector<2x8xf32>
    %c0_1093 = arith.constant 0 : index
    %c15_1094 = arith.constant 15 : index
    %c8_1095 = arith.constant 8 : index
    %c0_1096 = arith.constant 0 : index
    %786 = vector.load %arg6[%c0_1093, %c15_1094, %c8_1095, %c0_1096] : memref<2x16x16x8xf32, #tpu.memory_space<vmem>>, vector<2x1x1x8xf32>
    %787 = vector.shape_cast %786 : vector<2x1x1x8xf32> to vector<2x8xf32>
    %c0_1097 = arith.constant 0 : index
    %c15_1098 = arith.constant 15 : index
    %c9_1099 = arith.constant 9 : index
    %c0_1100 = arith.constant 0 : index
    %788 = vector.load %arg6[%c0_1097, %c15_1098, %c9_1099, %c0_1100] : memref<2x16x16x8xf32, #tpu.memory_space<vmem>>, vector<2x1x1x8xf32>
    %789 = vector.shape_cast %788 : vector<2x1x1x8xf32> to vector<2x8xf32>
    %790 = arith.maximumf %783, %785 : vector<2x8xf32>
    %791 = arith.maximumf %787, %789 : vector<2x8xf32>
    %792 = arith.maximumf %790, %791 : vector<2x8xf32>
    %c0_1101 = arith.constant 0 : index
    %c480 = arith.constant 480 : index
    %793 = vector.load %arg7[%c0_1101, %c480] : memref<2x512xf32, #tpu.memory_space<vmem>>, vector<2x8xf32>
    tpu.vector_store %arg7[%c0_1101, %c480], %792 {strides = array<i32>} : memref<2x512xf32, #tpu.memory_space<vmem>>, vector<2x8xf32>,
    %c0_1102 = arith.constant 0 : index
    %c14_1103 = arith.constant 14 : index
    %c10_1104 = arith.constant 10 : index
    %c0_1105 = arith.constant 0 : index
    %794 = vector.load %arg6[%c0_1102, %c14_1103, %c10_1104, %c0_1105] : memref<2x16x16x8xf32, #tpu.memory_space<vmem>>, vector<2x1x1x8xf32>
    %795 = vector.shape_cast %794 : vector<2x1x1x8xf32> to vector<2x8xf32>
    %c0_1106 = arith.constant 0 : index
    %c14_1107 = arith.constant 14 : index
    %c11_1108 = arith.constant 11 : index
    %c0_1109 = arith.constant 0 : index
    %796 = vector.load %arg6[%c0_1106, %c14_1107, %c11_1108, %c0_1109] : memref<2x16x16x8xf32, #tpu.memory_space<vmem>>, vector<2x1x1x8xf32>
    %797 = vector.shape_cast %796 : vector<2x1x1x8xf32> to vector<2x8xf32>
    %c0_1110 = arith.constant 0 : index
    %c15_1111 = arith.constant 15 : index
    %c10_1112 = arith.constant 10 : index
    %c0_1113 = arith.constant 0 : index
    %798 = vector.load %arg6[%c0_1110, %c15_1111, %c10_1112, %c0_1113] : memref<2x16x16x8xf32, #tpu.memory_space<vmem>>, vector<2x1x1x8xf32>
    %799 = vector.shape_cast %798 : vector<2x1x1x8xf32> to vector<2x8xf32>
    %c0_1114 = arith.constant 0 : index
    %c15_1115 = arith.constant 15 : index
    %c11_1116 = arith.constant 11 : index
    %c0_1117 = arith.constant 0 : index
    %800 = vector.load %arg6[%c0_1114, %c15_1115, %c11_1116, %c0_1117] : memref<2x16x16x8xf32, #tpu.memory_space<vmem>>, vector<2x1x1x8xf32>
    %801 = vector.shape_cast %800 : vector<2x1x1x8xf32> to vector<2x8xf32>
    %802 = arith.maximumf %795, %797 : vector<2x8xf32>
    %803 = arith.maximumf %799, %801 : vector<2x8xf32>
    %804 = arith.maximumf %802, %803 : vector<2x8xf32>
    %c0_1118 = arith.constant 0 : index
    %c488 = arith.constant 488 : index
    %805 = vector.load %arg7[%c0_1118, %c488] : memref<2x512xf32, #tpu.memory_space<vmem>>, vector<2x8xf32>
    tpu.vector_store %arg7[%c0_1118, %c488], %804 {strides = array<i32>} : memref<2x512xf32, #tpu.memory_space<vmem>>, vector<2x8xf32>,
    %c0_1119 = arith.constant 0 : index
    %c14_1120 = arith.constant 14 : index
    %c12_1121 = arith.constant 12 : index
    %c0_1122 = arith.constant 0 : index
    %806 = vector.load %arg6[%c0_1119, %c14_1120, %c12_1121, %c0_1122] : memref<2x16x16x8xf32, #tpu.memory_space<vmem>>, vector<2x1x1x8xf32>
    %807 = vector.shape_cast %806 : vector<2x1x1x8xf32> to vector<2x8xf32>
    %c0_1123 = arith.constant 0 : index
    %c14_1124 = arith.constant 14 : index
    %c13_1125 = arith.constant 13 : index
    %c0_1126 = arith.constant 0 : index
    %808 = vector.load %arg6[%c0_1123, %c14_1124, %c13_1125, %c0_1126] : memref<2x16x16x8xf32, #tpu.memory_space<vmem>>, vector<2x1x1x8xf32>
    %809 = vector.shape_cast %808 : vector<2x1x1x8xf32> to vector<2x8xf32>
    %c0_1127 = arith.constant 0 : index
    %c15_1128 = arith.constant 15 : index
    %c12_1129 = arith.constant 12 : index
    %c0_1130 = arith.constant 0 : index
    %810 = vector.load %arg6[%c0_1127, %c15_1128, %c12_1129, %c0_1130] : memref<2x16x16x8xf32, #tpu.memory_space<vmem>>, vector<2x1x1x8xf32>
    %811 = vector.shape_cast %810 : vector<2x1x1x8xf32> to vector<2x8xf32>
    %c0_1131 = arith.constant 0 : index
    %c15_1132 = arith.constant 15 : index
    %c13_1133 = arith.constant 13 : index
    %c0_1134 = arith.constant 0 : index
    %812 = vector.load %arg6[%c0_1131, %c15_1132, %c13_1133, %c0_1134] : memref<2x16x16x8xf32, #tpu.memory_space<vmem>>, vector<2x1x1x8xf32>
    %813 = vector.shape_cast %812 : vector<2x1x1x8xf32> to vector<2x8xf32>
    %814 = arith.maximumf %807, %809 : vector<2x8xf32>
    %815 = arith.maximumf %811, %813 : vector<2x8xf32>
    %816 = arith.maximumf %814, %815 : vector<2x8xf32>
    %c0_1135 = arith.constant 0 : index
    %c496 = arith.constant 496 : index
    %817 = vector.load %arg7[%c0_1135, %c496] : memref<2x512xf32, #tpu.memory_space<vmem>>, vector<2x8xf32>
    tpu.vector_store %arg7[%c0_1135, %c496], %816 {strides = array<i32>} : memref<2x512xf32, #tpu.memory_space<vmem>>, vector<2x8xf32>,
    %c0_1136 = arith.constant 0 : index
    %c14_1137 = arith.constant 14 : index
    %c14_1138 = arith.constant 14 : index
    %c0_1139 = arith.constant 0 : index
    %818 = vector.load %arg6[%c0_1136, %c14_1137, %c14_1138, %c0_1139] : memref<2x16x16x8xf32, #tpu.memory_space<vmem>>, vector<2x1x1x8xf32>
    %819 = vector.shape_cast %818 : vector<2x1x1x8xf32> to vector<2x8xf32>
    %c0_1140 = arith.constant 0 : index
    %c14_1141 = arith.constant 14 : index
    %c15_1142 = arith.constant 15 : index
    %c0_1143 = arith.constant 0 : index
    %820 = vector.load %arg6[%c0_1140, %c14_1141, %c15_1142, %c0_1143] : memref<2x16x16x8xf32, #tpu.memory_space<vmem>>, vector<2x1x1x8xf32>
    %821 = vector.shape_cast %820 : vector<2x1x1x8xf32> to vector<2x8xf32>
    %c0_1144 = arith.constant 0 : index
    %c15_1145 = arith.constant 15 : index
    %c14_1146 = arith.constant 14 : index
    %c0_1147 = arith.constant 0 : index
    %822 = vector.load %arg6[%c0_1144, %c15_1145, %c14_1146, %c0_1147] : memref<2x16x16x8xf32, #tpu.memory_space<vmem>>, vector<2x1x1x8xf32>
    %823 = vector.shape_cast %822 : vector<2x1x1x8xf32> to vector<2x8xf32>
    %c0_1148 = arith.constant 0 : index
    %c15_1149 = arith.constant 15 : index
    %c15_1150 = arith.constant 15 : index
    %c0_1151 = arith.constant 0 : index
    %824 = vector.load %arg6[%c0_1148, %c15_1149, %c15_1150, %c0_1151] : memref<2x16x16x8xf32, #tpu.memory_space<vmem>>, vector<2x1x1x8xf32>
    %825 = vector.shape_cast %824 : vector<2x1x1x8xf32> to vector<2x8xf32>
    %826 = arith.maximumf %819, %821 : vector<2x8xf32>
    %827 = arith.maximumf %823, %825 : vector<2x8xf32>
    %828 = arith.maximumf %826, %827 : vector<2x8xf32>
    %c0_1152 = arith.constant 0 : index
    %c504 = arith.constant 504 : index
    %829 = vector.load %arg7[%c0_1152, %c504] : memref<2x512xf32, #tpu.memory_space<vmem>>, vector<2x8xf32>
    tpu.vector_store %arg7[%c0_1152, %c504], %828 {strides = array<i32>} : memref<2x512xf32, #tpu.memory_space<vmem>>, vector<2x8xf32>,
    %c0_1153 = arith.constant 0 : index
    %c0_1154 = arith.constant 0 : index
    %830 = vector.load %arg7[%c0_1153, %c0_1154] : memref<2x512xf32, #tpu.memory_space<vmem>>, vector<2x512xf32>
    %c0_1155 = arith.constant 0 : index
    %c0_1156 = arith.constant 0 : index
    %831 = vector.load %arg3[%c0_1155, %c0_1156] : memref<512x10xf32, #tpu.memory_space<vmem>>, vector<512x10xf32>
    %cst_1157 = arith.constant dense<0.000000e+00> : vector<2x10xf32>
    %832 = tpu.matmul %830, %831, %cst_1157 {dimension_numbers = #tpu.dot_dimension_numbers<[1], [0], [0], [1], [0, 0, 1, 1], [], []>} : vector<2x512xf32>, vector<512x10xf32>, vector<2x10xf32> -> vector<2x10xf32>
    %c0_1158 = arith.constant 0 : index
    %c0_1159 = arith.constant 0 : index
    %833 = vector.load %arg4[%c0_1158, %c0_1159] : memref<1x10xf32, #tpu.memory_space<vmem>>, vector<1x10xf32>
    %834 = vector.broadcast %833 : vector<1x10xf32> to vector<2x10xf32>
    %835 = arith.addf %832, %834 : vector<2x10xf32>
    %c0_1160 = arith.constant 0 : index
    %c0_1161 = arith.constant 0 : index
    %836 = vector.load %arg5[%c0_1160, %c0_1161] : memref<2x10xf32, #tpu.memory_space<vmem>>, vector<2x10xf32>
    tpu.vector_store %arg5[%c0_1160, %c0_1161], %835 {strides = array<i32>} : memref<2x10xf32, #tpu.memory_space<vmem>>, vector<2x10xf32>,
    return
  }
}

</mosaic_0001>

<bundles_post_ra>
// kernel: cnn_forward.1
= control target key start
LH: loop header
LB: loop body
LE: loop exit
PB: predicated region body
PF: predicated region fallthrough
CT: control target
= control target key end

     0   :  { %vm345_vm0 = vcmask 1043456   ;;  %vm152_vm1 = vcmask 31744   ;;  %s17272_s0 = inlined_call_operand.vmem [shape: f32[2,18,18,4], index: 0, kind: input, shape index: {}]   ;;  %s17273_s1 = inlined_call_operand.vmem [shape: f32[9,4,8], index: 1, kind: input, shape index: {}]   ;;  %s17274_s2 = inlined_call_operand.vmem [shape: f32[1,8], index: 2, kind: input, shape index: {}]   ;;  %s17275_s3 = inlined_call_operand.vmem [shape: f32[512,10], index: 3, kind: input, shape index: {}]   ;;  %s17276_s4 = inlined_call_operand.vmem [shape: f32[1,10], index: 4, kind: input, shape index: {}]   ;;  %s17277_s5 = inlined_call_operand.hbm [shape: f32[2,10], index: 5, kind: output, shape index: {}]  }
   0x1   :  { %v9389_v0 = vld [vmem:[%s17273_s1 + $0x4] sm:$0xf]  ;;  %v128_v2 = vld [vmem:[%s17272_s0 + $0x229] sm:$0xff]  ;;  %v129_v4 = vld [vmem:[%s17272_s0 + $0x231] sm:$0xff] }
   0x2   :  { %v86_v1 = vld [vmem:[%s17272_s0 + $0x1] sm:$0xff]  ;;  %11023 = vmatprep.subr.msk.mxu0 %vm345_vm0, %v9389_v0  ;;  %11905 = vmatprep.subr.msk.mxu1 %vm345_vm0, %v9389_v0  ;;  %v87_v3 = vld [vmem:[%s17272_s0 + $0x9] sm:$0xff]  ;;  %v12020_v6 = vld [vmem:[%s17272_s0 + $0x19] sm:$0xff] }
   0x3   :  { %11024 = vmatpush3.msk.msra.mxu0 %vm345_vm0, %v9389_v0  ;;  %11906 = vmatpush3.msk.msra.mxu1 %vm345_vm0, %v9389_v0  ;;  %v9520_v5 = vld [vmem:[%s17273_s1 + $0x8] sm:$0xf]  ;;  %v12045_v10 = vld [vmem:[%s17272_s0 + $0x31] sm:$0xff]  ;;  %v132_v11 = vld [vmem:[%s17272_s0 + $0x259] sm:$0xff] }
   0x4   :  { %11025 = vmatprep.mubr.msk.f32.mxu0 %vm152_vm1, %v86_v1  ;;  %11088 = vmatprep.mubr.msk.f32.mxu1 %vm152_vm1, %v128_v2  ;;  %v130_v7 = vld [vmem:[%s17272_s0 + $0x241] sm:$0xff]  ;;  %v131_v9 = vld [vmem:[%s17272_s0 + $0x249] sm:$0xff]  ;;  %v12059_v12 = vld [vmem:[%s17272_s0 + $0x39] sm:$0xff] }
   0x5   :  { %11026 = vmatmul.mubr.msk.f32.vlgmr.msra.gmra.mxu0 %vm152_vm1, %v87_v3  ;;  %11089 = vmatmul.mubr.msk.f32.vlgmr.msra.gmra.mxu1 %vm152_vm1, %v129_v4  ;;  %v12035_v8 = vld [vmem:[%s17272_s0 + $0x21] sm:$0xff]  ;;  %v12067_v14 = vld [vmem:[%s17272_s0 + $0x49] sm:$0xff]  ;;  %v134_v15 = vld [vmem:[%s17272_s0 + $0x271] sm:$0xff] }
   0x6   :  { %11219 = vmatprep.subr.msk.mxu0 %vm345_vm0, %v9520_v5  ;;  %11028 = vmatprep.mubr.msk.f32.mxu0 %vm152_vm1, %v12020_v6  ;;  %v133_v13 = vld [vmem:[%s17272_s0 + $0x261] sm:$0xff]  ;;  %v12081_v16 = vld [vmem:[%s17272_s0 + $0x51] sm:$0xff]  ;;  %v135_v17 = vld [vmem:[%s17272_s0 + $0x279] sm:$0xff] }
   0x7   :  { %11220 = vmatpush3.msk.msra.mxu0 %vm345_vm0, %v9520_v5  ;;  %11091 = vmatprep.mubr.msk.f32.mxu1 %vm152_vm1, %v130_v7  ;;  %v12089_v18 = vld [vmem:[%s17272_s0 + $0x61] sm:$0xff]  ;;  %v136_v19 = vld [vmem:[%s17272_s0 + $0x289] sm:$0xff]  ;;  %v137_v22 = vld [vmem:[%s17272_s0 + $0x291] sm:$0xff] }
   0x8   :  { %v85_v20 = vld [vmem:[%s17273_s1] sm:$0xf]  ;;  %v12107_v21 = vld [vmem:[%s17272_s0 + $0x69] sm:$0xff]  ;;  %v12138_v27 = vld [vmem:[%s17272_s0 + $0x91] sm:$0xff] }
   0x9   :  { %11029 = vmatmul.mubr.msk.f32.gmra.mxu0 %vm152_vm1, %v12035_v8  ;;  %11092 = vmatmul.mubr.msk.f32.gmra.mxu1 %vm152_vm1, %v131_v9  ;;  %v12115_v23 = vld [vmem:[%s17272_s0 + $0x79] sm:$0xff]  ;;  %v138_v24 = vld [vmem:[%s17272_s0 + $0x2a1] sm:$0xff]  ;;  %v139_v26 = vld [vmem:[%s17272_s0 + $0x2a9] sm:$0xff] }
   0xa   :  { %11031 = vmatprep.mubr.msk.f32.mxu0 %vm152_vm1, %v12045_v10  ;;  %11094 = vmatprep.mubr.msk.f32.mxu1 %vm152_vm1, %v132_v11  ;;  %v12130_v25 = vld [vmem:[%s17272_s0 + $0x81] sm:$0xff]  ;;  %v140_v28 = vld [vmem:[%s17272_s0 + $0x2b9] sm:$0xff]  ;;  %v12160_v31 = vld [vmem:[%s17272_s0 + $0xa9] sm:$0xff] }
   0xb   :  { %11121 = vmatprep.subr.msk.mxu1 %vm345_vm0, %v85_v20  ;;  %v12152_v29 = vld [vmem:[%s17272_s0 + $0x99] sm:$0xff]  ;;  %v141_v30 = vld [vmem:[%s17272_s0 + $0x2c1] sm:$0xff]  ;;  %v142_v32 = vld [vmem:[%s17272_s0 + $0x2d1] sm:$0xff] }
   0xc   :  { %11122 = vmatpush3.msk.msra.mxu1 %vm345_vm0, %v85_v20  ;;  %v12174_v33 = vld [vmem:[%s17272_s0 + $0xb1] sm:$0xff]  ;;  %v143_v34 = vld [vmem:[%s17272_s0 + $0x2d9] sm:$0xff]  ;;  %v9650_v35 = vld [vmem:[%s17273_s1 + $0xc] sm:$0xf] }
   0xd   :  { %11032 = vmatmul.mubr.msk.f32.gmra.mxu0 %vm152_vm1, %v12059_v12  ;;  %11095 = vmatmul.mubr.msk.f32.gmra.mxu1 %vm152_vm1, %v133_v13  ;;  %v12185_v36 = vld [vmem:[%s17272_s0 + $0xc1] sm:$0xff]  ;;  %v144_v37 = vld [vmem:[%s17272_s0 + $0x2e9] sm:$0xff]  ;;  %v145_v40 = vld [vmem:[%s17272_s0 + $0x2f1] sm:$0xff] }
   0xe   :  { %11034 = vmatprep.mubr.msk.f32.mxu0 %vm152_vm1, %v12067_v14  ;;  %11097 = vmatprep.mubr.msk.f32.mxu1 %vm152_vm1, %v134_v15  ;;  %v12194_v38 = vld [vmem:[%s17273_s1 + $0x10] sm:$0xf]  ;;  %v12215_v41 = vld [vmem:[%s17272_s0 + $0xd9] sm:$0xff]  ;;  %v146_v42 = vld [vmem:[%s17272_s0 + $0x301] sm:$0xff] }
   0xf   :  { %11317 = vmatprep.subr.msk.mxu1 %vm345_vm0, %v9650_v35  ;;  %11415 = vmatprep.subr.msk.mxu0 %vm345_vm0, %v12194_v38  ;;  %v12207_v39 = vld [vmem:[%s17272_s0 + $0xc9] sm:$0xff]  ;;  %v12229_v43 = vld [vmem:[%s17272_s0 + $0xe1] sm:$0xff]  ;;  %v12237_v45 = vld [vmem:[%s17272_s0 + $0xf1] sm:$0xff] }
  0x10   :  { %v147_v44 = vld [vmem:[%s17272_s0 + $0x309] sm:$0xff]  ;;  %v148_v46 = vld [vmem:[%s17272_s0 + $0x319] sm:$0xff]  ;;  %v149_v48 = vld [vmem:[%s17272_s0 + $0x321] sm:$0xff] }
  0x11   :  { %11035 = vmatmul.mubr.msk.f32.gmra.mxu0 %vm152_vm1, %v12081_v16  ;;  %11098 = vmatmul.mubr.msk.f32.gmra.mxu1 %vm152_vm1, %v135_v17  ;;  %v12251_v47 = vld [vmem:[%s17272_s0 + $0xf9] sm:$0xff]  ;;  %v12259_v49 = vld [vmem:[%s17272_s0 + $0x109] sm:$0xff]  ;;  %v12273_v51 = vld [vmem:[%s17272_s0 + $0x111] sm:$0xff] }
  0x12   :  { %11037 = vmatprep.mubr.msk.f32.mxu0 %vm152_vm1, %v12089_v18  ;;  %11100 = vmatprep.mubr.msk.f32.mxu1 %vm152_vm1, %v136_v19  ;;  %17331 = vst [vmem:[#allocation7_spill] sm:$0xff] %v12251_v47  ;;  %17332 = vst [vmem:[#allocation8_spill] sm:$0xff] %v12259_v49  ;;  %v21_v50 = vld [vmem:[%s17272_s0] sm:$0xff]  ;;  %v22_v52 = vld [vmem:[%s17272_s0 + $0x8] sm:$0xff] }
  0x13   :  { %17333 = vst [vmem:[#allocation9_spill] sm:$0xff] %v12273_v51  ;;  %v12281_v53 = vld [vmem:[%s17272_s0 + $0x121] sm:$0xff]  ;;  %v12286_v54 = vld [vmem:[%s17272_s0 + $0x18] sm:$0xff]  ;;  %v12298_v55 = vld [vmem:[%s17272_s0 + $0x129] sm:$0xff] }
  0x14   :  { %17334 = vst [vmem:[#allocation10_spill] sm:$0xff] %v12281_v53  ;;  %17335 = vst [vmem:[#allocation11_spill] sm:$0xff] %v12298_v55  ;;  %v12303_v56 = vld [vmem:[%s17272_s0 + $0x20] sm:$0xff]  ;;  %v12313_v58 = vld [vmem:[%s17272_s0 + $0x30] sm:$0xff] }
  0x15   :  { %11038 = vmatmul.mubr.msk.f32.gmra.mxu0 %vm152_vm1, %v12107_v21  ;;  %11101 = vmatmul.mubr.msk.f32.gmra.mxu1 %vm152_vm1, %v137_v22  ;;  %v12308_v57 = vld [vmem:[%s17272_s0 + $0x139] sm:$0xff]  ;;  %v113_v59 = vld [vmem:[%s17272_s0 + $0x141] sm:$0xff]  ;;  %v114_v61 = vld [vmem:[%s17272_s0 + $0x151] sm:$0xff] }
  0x16   :  { %11040 = vmatprep.mubr.msk.f32.mxu0 %vm152_vm1, %v12115_v23  ;;  %11103 = vmatprep.mubr.msk.f32.mxu1 %vm152_vm1, %v138_v24  ;;  %17336 = vst [vmem:[#allocation12_spill] sm:$0xff] %v12308_v57  ;;  %v12330_v60 = vld [vmem:[%s17272_s0 + $0x38] sm:$0xff]  ;;  %v12338_v62 = vld [vmem:[%s17272_s0 + $0x48] sm:$0xff]  ;;  %v12352_v0 = vld [vmem:[%s17272_s0 + $0x50] sm:$0xff] }
  0x17   :  { %v115_v63 = vld [vmem:[%s17272_s0 + $0x159] sm:$0xff]  ;;  %v116_v1 = vld [vmem:[%s17272_s0 + $0x169] sm:$0xff]  ;;  %v117_v3 = vld [vmem:[%s17272_s0 + $0x171] sm:$0xff] }
  0x18   :  { %v12360_v2 = vld [vmem:[%s17272_s0 + $0x60] sm:$0xff]  ;;  %v12374_v4 = vld [vmem:[%s17272_s0 + $0x68] sm:$0xff]  ;;  %v118_v5 = vld [vmem:[%s17272_s0 + $0x1b1] sm:$0xff] }
  0x19   :  { %11041 = vmatmul.mubr.msk.f32.gmra.mxu0 %vm152_vm1, %v12130_v25  ;;  %11104 = vmatmul.mubr.msk.f32.gmra.mxu1 %vm152_vm1, %v139_v26  ;;  %v12382_v7 = vld [vmem:[%s17272_s0 + $0x78] sm:$0xff] }
  0x1a   :  { %11043 = vmatprep.mubr.msk.f32.mxu0 %vm152_vm1, %v12138_v27  ;;  %11106 = vmatprep.mubr.msk.f32.mxu1 %vm152_vm1, %v140_v28 }
  0x1d   :  { %11044 = vmatmul.mubr.msk.f32.gmra.mxu0 %vm152_vm1, %v12152_v29  ;;  %11107 = vmatmul.mubr.msk.f32.gmra.mxu1 %vm152_vm1, %v141_v30 }
  0x1e   :  { %11046 = vmatprep.mubr.msk.f32.mxu0 %vm152_vm1, %v12160_v31  ;;  %11109 = vmatprep.mubr.msk.f32.mxu1 %vm152_vm1, %v142_v32 }
  0x21   :  { %11047 = vmatmul.mubr.msk.f32.gmra.mxu0 %vm152_vm1, %v12174_v33  ;;  %11110 = vmatmul.mubr.msk.f32.gmra.mxu1 %vm152_vm1, %v143_v34 }
  0x22   :  { %11049 = vmatprep.mubr.msk.f32.mxu0 %vm152_vm1, %v12185_v36  ;;  %11112 = vmatprep.mubr.msk.f32.mxu1 %vm152_vm1, %v144_v37 }
  0x25   :  { %11050 = vmatmul.mubr.msk.f32.gmra.mxu0 %vm152_vm1, %v12207_v39  ;;  %11113 = vmatmul.mubr.msk.f32.gmra.mxu1 %vm152_vm1, %v145_v40 }
  0x26   :  { %11052 = vmatprep.mubr.msk.f32.mxu0 %vm152_vm1, %v12215_v41  ;;  %11115 = vmatprep.mubr.msk.f32.mxu1 %vm152_vm1, %v146_v42 }
  0x29   :  { %11053 = vmatmul.mubr.msk.f32.gmra.mxu0 %vm152_vm1, %v12229_v43  ;;  %11116 = vmatmul.mubr.msk.f32.gmra.mxu1 %vm152_vm1, %v147_v44 }
  0x2a   :  { %11055 = vmatprep.mubr.msk.f32.mxu0 %vm152_vm1, %v12237_v45  ;;  %11118 = vmatprep.mubr.msk.f32.mxu1 %vm152_vm1, %v148_v46 }
  0x2d   :  { %11056 = vmatmul.mubr.msk.f32.gmra.mxu0 %vm152_vm1, %v12251_v47  ;;  %11119 = vmatmul.mubr.msk.f32.gmra.mxu1 %vm152_vm1, %v149_v48 }
  0x2e   :  { %11058 = vmatprep.mubr.msk.f32.mxu0 %vm152_vm1, %v12259_v49  ;;  %11123 = vmatprep.mubr.msk.f32.mxu1 %vm152_vm1, %v21_v50 }
  0x31   :  { %11059 = vmatmul.mubr.msk.f32.gmra.mxu0 %vm152_vm1, %v12273_v51  ;;  %11124 = vmatmul.mubr.msk.f32.vlgmr.msra.gmra.mxu1 %vm152_vm1, %v22_v52 }
  0x32   :  { %11061 = vmatprep.mubr.msk.f32.mxu0 %vm152_vm1, %v12281_v53  ;;  %11126 = vmatprep.mubr.msk.f32.mxu1 %vm152_vm1, %v12286_v54 }
  0x33   :  { %11318 = vmatpush3.msk.msra.mxu1 %vm345_vm0, %v9650_v35 }
  0x35   :  { %11062 = vmatmul.mubr.msk.f32.gmra.mxu0 %vm152_vm1, %v12298_v55  ;;  %11127 = vmatmul.mubr.msk.f32.gmra.mxu1 %vm152_vm1, %v12303_v56 }
  0x36   :  { %11064 = vmatprep.mubr.msk.f32.mxu0 %vm152_vm1, %v12308_v57  ;;  %11129 = vmatprep.mubr.msk.f32.mxu1 %vm152_vm1, %v12313_v58 }
  0x39   :  { %11065 = vmatmul.mubr.msk.f32.gmra.mxu0 %vm152_vm1, %v113_v59  ;;  %11130 = vmatmul.mubr.msk.f32.gmra.mxu1 %vm152_vm1, %v12330_v60 }
  0x3a   :  { %11067 = vmatprep.mubr.msk.f32.mxu0 %vm152_vm1, %v114_v61  ;;  %11132 = vmatprep.mubr.msk.f32.mxu1 %vm152_vm1, %v12338_v62 }
  0x3d   :  { %11068 = vmatmul.mubr.msk.f32.gmra.mxu0 %vm152_vm1, %v115_v63  ;;  %11133 = vmatmul.mubr.msk.f32.gmra.mxu1 %vm152_vm1, %v12352_v0 }
  0x3e   :  { %11070 = vmatprep.mubr.msk.f32.mxu0 %vm152_vm1, %v116_v1  ;;  %11135 = vmatprep.mubr.msk.f32.mxu1 %vm152_vm1, %v12360_v2 }
  0x3f   :  { %10 = vsyncpa [#allocation5], 0  ;;  %v119_v9 = vld [vmem:[%s17272_s0 + $0x1b9] sm:$0xff]  ;;  %v120_v13 = vld [vmem:[%s17272_s0 + $0x1c9] sm:$0xff]  ;;  %vm6421_vm2 = vcmask 64512   ;;  %vm6522_vm3 = vcmask 1041409  }
  0x40   :  { %v12396_v11 = vld [vmem:[%s17272_s0 + $0x80] sm:$0xff]  ;;  %v12404_v15 = vld [vmem:[%s17272_s0 + $0x90] sm:$0xff]  ;;  %v12418_v19 = vld [vmem:[%s17272_s0 + $0x98] sm:$0xff]  ;;  %vm6524_vm4 = vcmask 1043459   ;;  %vm6526_vm5 = vcmask 1045509   ;;  %vm6528_vm6 = vcmask 1047559  }
  0x41   :  { %11071 = vmatmul.mubr.msk.f32.gmra.mxu0 %vm152_vm1, %v117_v3  ;;  %11136 = vmatmul.mubr.msk.f32.gmra.mxu1 %vm152_vm1, %v12374_v4  ;;  %v121_v17 = vld [vmem:[%s17272_s0 + $0x1d1] sm:$0xff]  ;;  %v122_v20 = vld [vmem:[%s17272_s0 + $0x1e1] sm:$0xff]  ;;  %v123_v24 = vld [vmem:[%s17272_s0 + $0x1e9] sm:$0xff]  ;;  %s11950_s22 = smov 40   ;;  %s11951_s23 = smov 48   ;;  %vm6531_vm7 = vcmask 58368  }
  0x42   :  { %11073 = vmatprep.mubr.msk.f32.mxu0 %vm152_vm1, %v118_v5  ;;  %11138 = vmatprep.mubr.msk.f32.mxu1 %vm152_vm1, %v12382_v7  ;;  %v12426_v22 = vld [vmem:[%s17272_s0 + $0xa8] sm:$0xff]  ;;  %v12440_v26 = vld [vmem:[%s17272_s0 + $0xb0] sm:$0xff]  ;;  %v124_v28 = vld [vmem:[%s17272_s0 + $0x1f9] sm:$0xff]  ;;  %s11952_s24 = smov 56   ;;  %s11953_s25 = smov 8   ;;  %vm6573_vm8 = vcmask 123968  }
  0x43   :  { %v12448_v30 = vld [vmem:[%s17272_s0 + $0xc0] sm:$0xff]  ;;  %v12462_v34 = vld [vmem:[%s17272_s0 + $0xc8] sm:$0xff]  ;;  %v126_v35 = vld [vmem:[%s17272_s0 + $0x211] sm:$0xff]  ;;  %s11954_s26 = smov 16   ;;  %s11955_s27 = smov 24   ;;  %vm6615_vm9 = vcmask 189568  }
  0x44   :  { %v125_v32 = vld [vmem:[%s17272_s0 + $0x201] sm:$0xff]  ;;  %v12470_v37 = vld [vmem:[%s17272_s0 + $0xd8] sm:$0xff]  ;;  %v12489_v44 = vld [vmem:[%s17272_s0 + $0xf0] sm:$0xff]  ;;  %s11956_s28 = smov 96   ;;  %s11957_s29 = smov 104   ;;  %vm6657_vm10 = vcmask 255168  }
  0x45   :  { %11074 = vmatmul.mubr.msk.f32.gmra.mxu0 %vm152_vm1, %v119_v9  ;;  %11139 = vmatmul.mubr.msk.f32.gmra.mxu1 %vm152_vm1, %v12396_v11  ;;  %v127_v40 = vld [vmem:[%s17272_s0 + $0x219] sm:$0xff]  ;;  %v1314_v46 = vld [vmem:[%s17272_s0 + $0x2] sm:$0xff]  ;;  %v1315_v50 = vld [vmem:[%s17272_s0 + $0xa] sm:$0xff]  ;;  %s11958_s30 = smov 112   ;;  %s11959_s8 = smov 120   ;;  %vm6699_vm11 = vcmask 320768  }
  0x46   :  { %11076 = vmatprep.mubr.msk.f32.mxu0 %vm152_vm1, %v120_v13  ;;  %11141 = vmatprep.mubr.msk.f32.mxu1 %vm152_vm1, %v12404_v15  ;;  %v12484_v42 = vld [vmem:[%s17272_s0 + $0xe0] sm:$0xff]  ;;  %v12503_v48 = vld [vmem:[%s17272_s0 + $0xf8] sm:$0xff]  ;;  %v12511_v52 = vld [vmem:[%s17272_s0 + $0x108] sm:$0xff]  ;;  %s11960_s11 = smov 64   ;;  %s11962_s21 = smov 80   ;;  %vm6741_vm12 = vcmask 386368  }
  0x47   :  { %v12516_v59 = vld [vmem:[%s17273_s1 + $0x14] sm:$0xf]  ;;  %v1316_v61 = vld [vmem:[%s17272_s0 + $0x1a] sm:$0xff]  ;;  %v1317_v3 = vld [vmem:[%s17272_s0 + $0x22] sm:$0xff]  ;;  %s11963_s12 = smov 88   ;;  %vm17327_vm13 = vcmask 451968  }
  0x48   :  { %11513 = vmatprep.subr.msk.mxu1 %vm345_vm0, %v12516_v59  ;;  %v12529_v63 = vld [vmem:[%s17273_s1 + $0x18] sm:$0xf]  ;;  %v12538_v1 = vld [vmem:[%s17272_s0 + $0x110] sm:$0xff]  ;;  %v12547_v5 = vld [vmem:[%s17272_s0 + $0x120] sm:$0xff]  ;;  %vm17328_vm14 = vcmask 517568   ;;  %vm17329_vm15 = vcmask 583168  }
  0x49   :  { %11077 = vmatmul.mubr.msk.f32.gmra.mxu0 %vm152_vm1, %v121_v17  ;;  %11142 = vmatmul.mubr.msk.f32.gmra.mxu1 %vm152_vm1, %v12418_v19  ;;  %v12563_v9 = vld [vmem:[%s17272_s0 + $0x128] sm:$0xff]  ;;  %v1319_v13 = vld [vmem:[%s17272_s0 + $0x3a] sm:$0xff]  ;;  %v12719_v53 = vld [vmem:[%s17272_s0 + $0x210] sm:$0xff]  ;;  %s11964_s6 = smov [#allocation4]  }
  0x4a   :  { %11079 = vmatprep.mubr.msk.f32.mxu0 %vm152_vm1, %v122_v20  ;;  %11144 = vmatprep.mubr.msk.f32.mxu1 %vm152_vm1, %v12426_v22  ;;  %v12571_v17 = vld [vmem:[%s17272_s0 + $0x138] sm:$0xff]  ;;  %v1320_v20 = vld [vmem:[%s17272_s0 + $0x4a] sm:$0xff]  ;;  %v1333_v55 = vld [vmem:[%s17272_s0 + $0xe2] sm:$0xff]  ;;  %s9381_s7 = sshll.u32 %s11964_s6, 4  ;;  %s9382_s7 = int_to_ptr.vmem [resolvable:$true] %s9381_s7 }
  0x4b   :  { %v12697_v57 = vld [vmem:[%s17272_s0 + $0x1f8] sm:$0xff]  ;;  %v12741_v49 = vld [vmem:[%s17272_s0 + $0x228] sm:$0xff]  ;;  %p11931_p1 = scmp.lt.s32.totalorder %s9382_s7, %s9382_s7 }
  0x4c   :  { %v1335_v51 = vld [vmem:[%s17272_s0 + $0xfa] sm:$0xff]  ;;  %17338 = vst [vmem:[#allocation14_spill] sm:$0xff] %v12741_v49  ;;  %v1337_v47 = vld [vmem:[%s17272_s0 + $0x112] sm:$0xff] }
  0x4d   :  { %11080 = vmatmul.mubr.msk.f32.gmra.mxu0 %vm152_vm1, %v123_v24  ;;  %11145 = vmatmul.mubr.msk.f32.gmra.mxu1 %vm152_vm1, %v12440_v26  ;;  %v12585_v24 = vld [vmem:[%s17272_s0 + $0x140] sm:$0xff] }
  0x4e   :  { %11082 = vmatprep.mubr.msk.f32.mxu0 %vm152_vm1, %v124_v28  ;;  %11147 = vmatprep.mubr.msk.f32.mxu1 %vm152_vm1, %v12448_v30  ;;  %v1321_v28 = vld [vmem:[%s17272_s0 + $0x52] sm:$0xff] }
  0x51   :  { %11083 = vmatmul.mubr.msk.f32.gmra.mxu0 %vm152_vm1, %v125_v32  ;;  %11148 = vmatmul.mubr.msk.f32.gmra.mxu1 %vm152_vm1, %v12462_v34  ;;  %v12593_v32 = vld [vmem:[%s17272_s0 + $0x150] sm:$0xff] }
  0x52   :  { %11085 = vmatprep.mubr.msk.f32.mxu0 %vm152_vm1, %v126_v35  ;;  %11150 = vmatprep.mubr.msk.f32.mxu1 %vm152_vm1, %v12470_v37  ;;  %v1322_v35 = vld [vmem:[%s17272_s0 + $0x62] sm:$0xff] }
  0x55   :  { %11086 = vmatmul.mubr.msk.f32.gmra.mxu0 %vm152_vm1, %v127_v40  ;;  %11151 = vmatmul.mubr.msk.f32.gmra.mxu1 %vm152_vm1, %v12484_v42  ;;  %v12607_v40 = vld [vmem:[%s17272_s0 + $0x158] sm:$0xff] }
  0x56   :  { %11153 = vmatprep.mubr.msk.f32.mxu1 %vm152_vm1, %v12489_v44  ;;  %11221 = vmatprep.mubr.msk.f32.mxu0 %vm152_vm1, %v1314_v46  ;;  %v1323_v46 = vld [vmem:[%s17272_s0 + $0x6a] sm:$0xff] }
  0x59   :  { %11154 = vmatmul.mubr.msk.f32.gmra.mxu1 %vm152_vm1, %v12503_v48  ;;  %11222 = vmatmul.mubr.msk.f32.vlgmr.msra.gmra.mxu0 %vm152_vm1, %v1315_v50  ;;  %v12615_v50 = vld [vmem:[%s17272_s0 + $0x168] sm:$0xff] }
  0x5a   :  { %11416 = vmatpush3.msk.msra.mxu0 %vm345_vm0, %v12194_v38  ;;  %11156 = vmatprep.mubr.msk.f32.mxu1 %vm152_vm1, %v12511_v52  ;;  %v1318_v38 = vld [vmem:[%s17272_s0 + $0x32] sm:$0xff] }
  0x5b   :  { %11224 = vmatprep.mubr.msk.f32.mxu0 %vm152_vm1, %v1316_v61  ;;  %11611 = vmatprep.subr.msk.mxu0 %vm345_vm0, %v12529_v63  ;;  %v1324_v61 = vld [vmem:[%s17272_s0 + $0x7a] sm:$0xff] }
  0x5d   :  { %11157 = vmatmul.mubr.msk.f32.gmra.mxu1 %vm152_vm1, %v12538_v1  ;;  %11225 = vmatmul.mubr.msk.f32.gmra.mxu0 %vm152_vm1, %v1317_v3  ;;  %v12629_v3 = vld [vmem:[%s17272_s0 + $0x170] sm:$0xff] }
  0x5e   :  { %11159 = vmatprep.mubr.msk.f32.mxu1 %vm152_vm1, %v12547_v5  ;;  %11227 = vmatprep.mubr.msk.f32.mxu0 %vm152_vm1, %v1318_v38  ;;  %v1325_v38 = vld [vmem:[%s17272_s0 + $0x82] sm:$0xff] }
  0x61   :  { %11160 = vmatmul.mubr.msk.f32.gmra.mxu1 %vm152_vm1, %v12563_v9  ;;  %11228 = vmatmul.mubr.msk.f32.gmra.mxu0 %vm152_vm1, %v1319_v13  ;;  %v53_v13 = vld [vmem:[%s17272_s0 + $0x1b0] sm:$0xff] }
  0x62   :  { %11162 = vmatprep.mubr.msk.f32.mxu1 %vm152_vm1, %v12571_v17  ;;  %11230 = vmatprep.mubr.msk.f32.mxu0 %vm152_vm1, %v1320_v20  ;;  %v1326_v20 = vld [vmem:[%s17272_s0 + $0x92] sm:$0xff] }
  0x65   :  { %11163 = vmatmul.mubr.msk.f32.gmra.mxu1 %vm152_vm1, %v12585_v24  ;;  %11231 = vmatmul.mubr.msk.f32.gmra.mxu0 %vm152_vm1, %v1321_v28  ;;  %v54_v28 = vld [vmem:[%s17272_s0 + $0x1b8] sm:$0xff] }
  0x66   :  { %11165 = vmatprep.mubr.msk.f32.mxu1 %vm152_vm1, %v12593_v32  ;;  %11233 = vmatprep.mubr.msk.f32.mxu0 %vm152_vm1, %v1322_v35  ;;  %v1327_v35 = vld [vmem:[%s17272_s0 + $0x9a] sm:$0xff] }
  0x69   :  { %11166 = vmatmul.mubr.msk.f32.gmra.mxu1 %vm152_vm1, %v12607_v40  ;;  %11234 = vmatmul.mubr.msk.f32.gmra.mxu0 %vm152_vm1, %v1323_v46  ;;  %v12654_v46 = vld [vmem:[%s17272_s0 + $0x1c8] sm:$0xff] }
  0x6a   :  { %11168 = vmatprep.mubr.msk.f32.mxu1 %vm152_vm1, %v12615_v50  ;;  %11236 = vmatprep.mubr.msk.f32.mxu0 %vm152_vm1, %v1324_v61  ;;  %v1328_v61 = vld [vmem:[%s17272_s0 + $0xaa] sm:$0xff] }
  0x6d   :  { %11169 = vmatmul.mubr.msk.f32.gmra.mxu1 %vm152_vm1, %v12629_v3  ;;  %11237 = vmatmul.mubr.msk.f32.gmra.mxu0 %vm152_vm1, %v1325_v38  ;;  %v12667_v38 = vld [vmem:[%s17272_s0 + $0x1d0] sm:$0xff] }
  0x6e   :  { %11171 = vmatprep.mubr.msk.f32.mxu1 %vm152_vm1, %v53_v13  ;;  %11239 = vmatprep.mubr.msk.f32.mxu0 %vm152_vm1, %v1326_v20  ;;  %v1329_v13 = vld [vmem:[%s17272_s0 + $0xb2] sm:$0xff]  ;;  %v12675_v20 = vld [vmem:[%s17272_s0 + $0x1e0] sm:$0xff] }
  0x71   :  { %11172 = vmatmul.mubr.msk.f32.gmra.mxu1 %vm152_vm1, %v54_v28  ;;  %11240 = vmatmul.mubr.msk.f32.gmra.mxu0 %vm152_vm1, %v1327_v35  ;;  %v1330_v28 = vld [vmem:[%s17272_s0 + $0xc2] sm:$0xff] }
  0x72   :  { %11174 = vmatprep.mubr.msk.f32.mxu1 %vm152_vm1, %v12654_v46  ;;  %11242 = vmatprep.mubr.msk.f32.mxu0 %vm152_vm1, %v1328_v61  ;;  %v12689_v35 = vld [vmem:[%s17272_s0 + $0x1e8] sm:$0xff] }
  0x73   :  { %v1331_v61 = vld [vmem:[%s17272_s0 + $0xca] sm:$0xff] }
  0x75   :  { %11175 = vmatmul.mubr.msk.f32.gmra.mxu1 %vm152_vm1, %v12667_v38  ;;  %11243 = vmatmul.mubr.msk.f32.gmra.mxu0 %vm152_vm1, %v1329_v13  ;;  %v1332_v13 = vld [vmem:[%s17272_s0 + $0xda] sm:$0xff] }
  0x76   :  { %11177 = vmatprep.mubr.msk.f32.mxu1 %vm152_vm1, %v12675_v20  ;;  %11245 = vmatprep.mubr.msk.f32.mxu0 %vm152_vm1, %v1330_v28  ;;  %v12711_v28 = vld [vmem:[%s17272_s0 + $0x200] sm:$0xff] }
  0x79   :  { %11178 = vmatmul.mubr.msk.f32.gmra.mxu1 %vm152_vm1, %v12689_v35  ;;  %11246 = vmatmul.mubr.msk.f32.gmra.mxu0 %vm152_vm1, %v1331_v61  ;;  %v1334_v61 = vld [vmem:[%s17272_s0 + $0xf2] sm:$0xff] }
  0x7a   :  { %11180 = vmatprep.mubr.msk.f32.mxu1 %vm152_vm1, %v12697_v57  ;;  %11248 = vmatprep.mubr.msk.f32.mxu0 %vm152_vm1, %v1332_v13  ;;  %v12733_v13 = vld [vmem:[%s17272_s0 + $0x218] sm:$0xff] }
  0x7b   :  { %17337 = vst [vmem:[#allocation13_spill] sm:$0xff] %v12733_v13 }
  0x7d   :  { %11181 = vmatmul.mubr.msk.f32.gmra.mxu1 %vm152_vm1, %v12711_v28  ;;  %11249 = vmatmul.mubr.msk.f32.gmra.mxu0 %vm152_vm1, %v1333_v55  ;;  %v1336_v55 = vld [vmem:[%s17272_s0 + $0x10a] sm:$0xff] }
  0x7e   :  { %11183 = vmatprep.mubr.msk.f32.mxu1 %vm152_vm1, %v12719_v53  ;;  %11251 = vmatprep.mubr.msk.f32.mxu0 %vm152_vm1, %v1334_v61  ;;  %v12755_v61 = vld [vmem:[%s17272_s0 + $0x230] sm:$0xff] }
  0x7f   :  { %17339 = vst [vmem:[#allocation15_spill] sm:$0xff] %v12755_v61 }
  0x81   :  { %11184 = vmatmul.mubr.msk.f32.gmra.mxu1 %vm152_vm1, %v12733_v13  ;;  %11252 = vmatmul.mubr.msk.f32.gmra.mxu0 %vm152_vm1, %v1335_v51  ;;  %v12763_v13 = vld [vmem:[%s17272_s0 + $0x240] sm:$0xff] }
  0x82   :  { %11186 = vmatprep.mubr.msk.f32.mxu1 %vm152_vm1, %v12741_v49  ;;  %11254 = vmatprep.mubr.msk.f32.mxu0 %vm152_vm1, %v1336_v55  ;;  %17340 = vst [vmem:[#allocation16_spill] sm:$0xff] %v12763_v13  ;;  %v1338_v51 = vld [vmem:[%s17272_s0 + $0x122] sm:$0xff]  ;;  %v1339_v49 = vld [vmem:[%s17272_s0 + $0x12a] sm:$0xff] }
  0x83   :  { %v12777_v55 = vld [vmem:[%s17272_s0 + $0x248] sm:$0xff] }
  0x84   :  { %17341 = vst [vmem:[#allocation17_spill] sm:$0xff] %v12777_v55 }
  0x85   :  { %11187 = vmatmul.mubr.msk.f32.gmra.mxu1 %vm152_vm1, %v12755_v61  ;;  %11255 = vmatmul.mubr.msk.f32.gmra.mxu0 %vm152_vm1, %v1337_v47  ;;  %v12785_v61 = vld [vmem:[%s17272_s0 + $0x258] sm:$0xff] }
  0x86   :  { %11189 = vmatprep.mubr.msk.f32.mxu1 %vm152_vm1, %v12763_v13  ;;  %11257 = vmatprep.mubr.msk.f32.mxu0 %vm152_vm1, %v1338_v51  ;;  %17342 = vst [vmem:[#allocation18_spill] sm:$0xff] %v12785_v61  ;;  %v1340_v47 = vld [vmem:[%s17272_s0 + $0x13a] sm:$0xff]  ;;  %v1341_v13 = vld [vmem:[%s17272_s0 + $0x142] sm:$0xff] }
  0x87   :  { %v12799_v51 = vld [vmem:[%s17272_s0 + $0x260] sm:$0xff] }
  0x88   :  { %17343 = vst [vmem:[#allocation19_spill] sm:$0xff] %v12799_v51 }
  0x89   :  { %11190 = vmatmul.mubr.msk.f32.gmra.mxu1 %vm152_vm1, %v12777_v55  ;;  %11258 = vmatmul.mubr.msk.f32.gmra.mxu0 %vm152_vm1, %v1339_v49  ;;  %v12807_v55 = vld [vmem:[%s17272_s0 + $0x270] sm:$0xff] }
  0x8a   :  { %11192 = vmatprep.mubr.msk.f32.mxu1 %vm152_vm1, %v12785_v61  ;;  %11260 = vmatprep.mubr.msk.f32.mxu0 %vm152_vm1, %v1340_v47  ;;  %17344 = vst [vmem:[#allocation20_spill] sm:$0xff] %v12807_v55  ;;  %v1342_v49 = vld [vmem:[%s17272_s0 + $0x152] sm:$0xff]  ;;  %v1343_v61 = vld [vmem:[%s17272_s0 + $0x15a] sm:$0xff] }
  0x8b   :  { %v12821_v47 = vld [vmem:[%s17272_s0 + $0x278] sm:$0xff] }
  0x8c   :  { %17345 = vst [vmem:[#allocation21_spill] sm:$0xff] %v12821_v47 }
  0x8d   :  { %11193 = vmatmul.mubr.msk.f32.gmra.mxu1 %vm152_vm1, %v12799_v51  ;;  %11261 = vmatmul.mubr.msk.f32.gmra.mxu0 %vm152_vm1, %v1341_v13  ;;  %v12829_v51 = vld [vmem:[%s17272_s0 + $0x288] sm:$0xff] }
  0x8e   :  { %11195 = vmatprep.mubr.msk.f32.mxu1 %vm152_vm1, %v12807_v55  ;;  %11263 = vmatprep.mubr.msk.f32.mxu0 %vm152_vm1, %v1342_v49  ;;  %17346 = vst [vmem:[#allocation22_spill] sm:$0xff] %v12829_v51  ;;  %v1344_v13 = vld [vmem:[%s17272_s0 + $0x16a] sm:$0xff]  ;;  %v1345_v55 = vld [vmem:[%s17272_s0 + $0x172] sm:$0xff] }
  0x8f   :  { %v12843_v49 = vld [vmem:[%s17272_s0 + $0x290] sm:$0xff] }
  0x90   :  { %17347 = vst [vmem:[#allocation23_spill] sm:$0xff] %v12843_v49 }
  0x91   :  { %11196 = vmatmul.mubr.msk.f32.gmra.mxu1 %vm152_vm1, %v12821_v47  ;;  %11264 = vmatmul.mubr.msk.f32.gmra.mxu0 %vm152_vm1, %v1343_v61  ;;  %v12851_v47 = vld [vmem:[%s17272_s0 + $0x2a0] sm:$0xff]  ;;  %v1346_v61 = vld [vmem:[%s17272_s0 + $0x1b2] sm:$0xff] }
  0x92   :  { %11198 = vmatprep.mubr.msk.f32.mxu1 %vm152_vm1, %v12829_v51  ;;  %11266 = vmatprep.mubr.msk.f32.mxu0 %vm152_vm1, %v1344_v13  ;;  %17348 = vst [vmem:[#allocation24_spill] sm:$0xff] %v12851_v47  ;;  %v12865_v13 = vld [vmem:[%s17272_s0 + $0x2a8] sm:$0xff]  ;;  %v1347_v51 = vld [vmem:[%s17272_s0 + $0x1ba] sm:$0xff] }
  0x93   :  { %17349 = vst [vmem:[#allocation25_spill] sm:$0xff] %v12865_v13 }
  0x95   :  { %11199 = vmatmul.mubr.msk.f32.gmra.mxu1 %vm152_vm1, %v12843_v49  ;;  %11267 = vmatmul.mubr.msk.f32.gmra.mxu0 %vm152_vm1, %v1345_v55  ;;  %v12873_v49 = vld [vmem:[%s17272_s0 + $0x2b8] sm:$0xff]  ;;  %v1348_v55 = vld [vmem:[%s17272_s0 + $0x1ca] sm:$0xff] }
  0x96   :  { %11201 = vmatprep.mubr.msk.f32.mxu1 %vm152_vm1, %v12851_v47  ;;  %11269 = vmatprep.mubr.msk.f32.mxu0 %vm152_vm1, %v1346_v61  ;;  %17350 = vst [vmem:[#allocation26_spill] sm:$0xff] %v12873_v49  ;;  %v12887_v61 = vld [vmem:[%s17272_s0 + $0x2c0] sm:$0xff]  ;;  %v1349_v47 = vld [vmem:[%s17272_s0 + $0x1d2] sm:$0xff] }
  0x97   :  { %17351 = vst [vmem:[#allocation27_spill] sm:$0xff] %v12887_v61 }
  0x99   :  { %11202 = vmatmul.mubr.msk.f32.gmra.mxu1 %vm152_vm1, %v12865_v13  ;;  %11270 = vmatmul.mubr.msk.f32.gmra.mxu0 %vm152_vm1, %v1347_v51  ;;  %v12895_v13 = vld [vmem:[%s17272_s0 + $0x2d0] sm:$0xff]  ;;  %v1350_v51 = vld [vmem:[%s17272_s0 + $0x1e2] sm:$0xff] }
  0x9a   :  { %11204 = vmatprep.mubr.msk.f32.mxu1 %vm152_vm1, %v12873_v49  ;;  %11272 = vmatprep.mubr.msk.f32.mxu0 %vm152_vm1, %v1348_v55  ;;  %17352 = vst [vmem:[#allocation28_spill] sm:$0xff] %v12895_v13  ;;  %v12909_v55 = vld [vmem:[%s17272_s0 + $0x2d8] sm:$0xff]  ;;  %v1351_v49 = vld [vmem:[%s17272_s0 + $0x1ea] sm:$0xff] }
  0x9b   :  { %17353 = vst [vmem:[#allocation29_spill] sm:$0xff] %v12909_v55 }
  0x9d   :  { %11205 = vmatmul.mubr.msk.f32.gmra.mxu1 %vm152_vm1, %v12887_v61  ;;  %11273 = vmatmul.mubr.msk.f32.gmra.mxu0 %vm152_vm1, %v1349_v47  ;;  %v12917_v61 = vld [vmem:[%s17272_s0 + $0x2e8] sm:$0xff]  ;;  %v1352_v47 = vld [vmem:[%s17272_s0 + $0x1fa] sm:$0xff] }
  0x9e   :  { %11207 = vmatprep.mubr.msk.f32.mxu1 %vm152_vm1, %v12895_v13  ;;  %11275 = vmatprep.mubr.msk.f32.mxu0 %vm152_vm1, %v1350_v51  ;;  %17354 = vst [vmem:[#allocation30_spill] sm:$0xff] %v12917_v61  ;;  %v12931_v51 = vld [vmem:[%s17272_s0 + $0x2f0] sm:$0xff]  ;;  %v1353_v13 = vld [vmem:[%s17272_s0 + $0x202] sm:$0xff] }
  0x9f   :  { %17355 = vst [vmem:[#allocation31_spill] sm:$0xff] %v12931_v51 }
  0xa1   :  { %11208 = vmatmul.mubr.msk.f32.gmra.mxu1 %vm152_vm1, %v12909_v55  ;;  %11276 = vmatmul.mubr.msk.f32.gmra.mxu0 %vm152_vm1, %v1351_v49  ;;  %v12939_v55 = vld [vmem:[%s17272_s0 + $0x300] sm:$0xff]  ;;  %v1354_v49 = vld [vmem:[%s17272_s0 + $0x212] sm:$0xff] }
  0xa2   :  { %11210 = vmatprep.mubr.msk.f32.mxu1 %vm152_vm1, %v12917_v61  ;;  %11278 = vmatprep.mubr.msk.f32.mxu0 %vm152_vm1, %v1352_v47  ;;  %17356 = vst [vmem:[#allocation32_spill] sm:$0xff] %v12939_v55  ;;  %v12953_v47 = vld [vmem:[%s17272_s0 + $0x308] sm:$0xff]  ;;  %v1355_v61 = vld [vmem:[%s17272_s0 + $0x21a] sm:$0xff] }
  0xa3   :  { %17357 = vst [vmem:[#allocation33_spill] sm:$0xff] %v12953_v47 }
  0xa5   :  { %11211 = vmatmul.mubr.msk.f32.gmra.mxu1 %vm152_vm1, %v12931_v51  ;;  %11279 = vmatmul.mubr.msk.f32.gmra.mxu0 %vm152_vm1, %v1353_v13  ;;  %v12961_v51 = vld [vmem:[%s17272_s0 + $0x318] sm:$0xff]  ;;  %v1356_v13 = vld [vmem:[%s17272_s0 + $0x22a] sm:$0xff] }
  0xa6   :  { %11213 = vmatprep.mubr.msk.f32.mxu1 %vm152_vm1, %v12939_v55  ;;  %11281 = vmatprep.mubr.msk.f32.mxu0 %vm152_vm1, %v1354_v49  ;;  %v12975_v49 = vld [vmem:[%s17272_s0 + $0x320] sm:$0xff]  ;;  %v1357_v55 = vld [vmem:[%s17272_s0 + $0x232] sm:$0xff] }
  0xa9   :  { %11214 = vmatmul.mubr.msk.f32.gmra.mxu1 %vm152_vm1, %v12953_v47  ;;  %11282 = vmatmul.mubr.msk.f32.gmra.mxu0 %vm152_vm1, %v1355_v61  ;;  %v1358_v47 = vld [vmem:[%s17272_s0 + $0x242] sm:$0xff]  ;;  %v1359_v61 = vld [vmem:[%s17272_s0 + $0x24a] sm:$0xff] }
  0xaa   :  { %11216 = vmatprep.mubr.msk.f32.mxu1 %vm152_vm1, %v12961_v51  ;;  %11284 = vmatprep.mubr.msk.f32.mxu0 %vm152_vm1, %v1356_v13  ;;  %v1360_v13 = vld [vmem:[%s17272_s0 + $0x25a] sm:$0xff] }
  0xad   :  { %11217 = vmatmul.mubr.msk.f32.gmra.mxu1 %vm152_vm1, %v12975_v49  ;;  %11285 = vmatmul.mubr.msk.f32.gmra.mxu0 %vm152_vm1, %v1357_v55  ;;  %v1362_v55 = vld [vmem:[%s17272_s0 + $0x272] sm:$0xff] }
  0xae   :  { %11287 = vmatprep.mubr.msk.f32.mxu0 %vm152_vm1, %v1358_v47  ;;  %11319 = vmatprep.mubr.msk.f32.mxu1 %vm152_vm1, %v12286_v54  ;;  %v1361_v54 = vld [vmem:[%s17272_s0 + $0x262] sm:$0xff] }
  0xb1   :  { %11288 = vmatmul.mubr.msk.f32.gmra.mxu0 %vm152_vm1, %v1359_v61  ;;  %11320 = vmatmul.mubr.msk.f32.vlgmr.msra.gmra.mxu1 %vm152_vm1, %v12303_v56  ;;  %v1363_v56 = vld [vmem:[%s17272_s0 + $0x27a] sm:$0xff] }
  0xb2   :  { %11290 = vmatprep.mubr.msk.f32.mxu0 %vm152_vm1, %v1360_v13  ;;  %11322 = vmatprep.mubr.msk.f32.mxu1 %vm152_vm1, %v12313_v58  ;;  %v1364_v58 = vld [vmem:[%s17272_s0 + $0x28a] sm:$0xff] }
  0xb3   :  { %11514 = vmatpush3.msk.msra.mxu1 %vm345_vm0, %v12516_v59  ;;  %v1372_v13 = vld [vmem:[%s17272_s0 + $0x2ea] sm:$0xff] }
  0xb5   :  { %11291 = vmatmul.mubr.msk.f32.gmra.mxu0 %vm152_vm1, %v1361_v54  ;;  %11323 = vmatmul.mubr.msk.f32.gmra.mxu1 %vm152_vm1, %v12330_v60  ;;  %v1365_v60 = vld [vmem:[%s17272_s0 + $0x292] sm:$0xff] }
  0xb6   :  { %11293 = vmatprep.mubr.msk.f32.mxu0 %vm152_vm1, %v1362_v55  ;;  %11325 = vmatprep.mubr.msk.f32.mxu1 %vm152_vm1, %v12338_v62  ;;  %v1366_v62 = vld [vmem:[%s17272_s0 + $0x2a2] sm:$0xff] }
  0xb9   :  { %11294 = vmatmul.mubr.msk.f32.gmra.mxu0 %vm152_vm1, %v1363_v56  ;;  %11326 = vmatmul.mubr.msk.f32.gmra.mxu1 %vm152_vm1, %v12352_v0  ;;  %v1367_v0 = vld [vmem:[%s17272_s0 + $0x2aa] sm:$0xff] }
  0xba   :  { %11296 = vmatprep.mubr.msk.f32.mxu0 %vm152_vm1, %v1364_v58  ;;  %11328 = vmatprep.mubr.msk.f32.mxu1 %vm152_vm1, %v12360_v2  ;;  %v1368_v2 = vld [vmem:[%s17272_s0 + $0x2ba] sm:$0xff]  ;;  %v1374_v58 = vld [vmem:[%s17272_s0 + $0x302] sm:$0xff] }
  0xbd   :  { %11297 = vmatmul.mubr.msk.f32.gmra.mxu0 %vm152_vm1, %v1365_v60  ;;  %11329 = vmatmul.mubr.msk.f32.gmra.mxu1 %vm152_vm1, %v12374_v4  ;;  %v1369_v4 = vld [vmem:[%s17272_s0 + $0x2c2] sm:$0xff] }
  0xbe   :  { %11299 = vmatprep.mubr.msk.f32.mxu0 %vm152_vm1, %v1366_v62  ;;  %11331 = vmatprep.mubr.msk.f32.mxu1 %vm152_vm1, %v12382_v7  ;;  %v1370_v7 = vld [vmem:[%s17272_s0 + $0x2d2] sm:$0xff] }
  0xc1   :  { %11300 = vmatmul.mubr.msk.f32.gmra.mxu0 %vm152_vm1, %v1367_v0  ;;  %11332 = vmatmul.mubr.msk.f32.gmra.mxu1 %vm152_vm1, %v12396_v11  ;;  %v1371_v11 = vld [vmem:[%s17272_s0 + $0x2da] sm:$0xff] }
  0xc2   :  { %11302 = vmatprep.mubr.msk.f32.mxu0 %vm152_vm1, %v1368_v2  ;;  %11334 = vmatprep.mubr.msk.f32.mxu1 %vm152_vm1, %v12404_v15  ;;  %v1376_v2 = vld [vmem:[%s17272_s0 + $0x31a] sm:$0xff] }
  0xc5   :  { %v13057_v59 = vpop.f32.mrf.mxu0  ;;  %v13059_v47 = vpop.f32.mrf.mxu1  ;;  %11303 = vmatmul.mubr.msk.f32.gmra.mxu0 %vm152_vm1, %v1369_v4  ;;  %11335 = vmatmul.mubr.msk.f32.gmra.mxu1 %vm152_vm1, %v12418_v19 }
  0xc6   :  { %11305 = vmatprep.mubr.msk.f32.mxu0 %vm152_vm1, %v1370_v7  ;;  %11337 = vmatprep.mubr.msk.f32.mxu1 %vm152_vm1, %v12426_v22  ;;  %v1373_v22 = vld [vmem:[%s17272_s0 + $0x2f2] sm:$0xff] }
  0xc7   :  { %v13070_v15 = vpop.f32.mrf.mxu0  ;;  %v13072_v61 = vpop.f32.mrf.mxu1 }
  0xc9   :  { %v13077_v54 = vpop.f32.mrf.mxu0  ;;  %v13079_v19 = vpop.f32.mrf.mxu1  ;;  %11306 = vmatmul.mubr.msk.f32.gmra.mxu0 %vm152_vm1, %v1371_v11  ;;  %11338 = vmatmul.mubr.msk.f32.gmra.mxu1 %vm152_vm1, %v12440_v26 }
  0xca   :  { %11308 = vmatprep.mubr.msk.f32.mxu0 %vm152_vm1, %v1372_v13  ;;  %11340 = vmatprep.mubr.msk.f32.mxu1 %vm152_vm1, %v12448_v30  ;;  %v1375_v30 = vld [vmem:[%s17272_s0 + $0x30a] sm:$0xff] }
  0xcb   :  { %v13090_v55 = vpop.f32.mrf.mxu0  ;;  %v13092_v56 = vpop.f32.mrf.mxu1 }
  0xcd   :  { %v13097_v60 = vpop.f32.mrf.mxu0  ;;  %v13099_v26 = vpop.f32.mrf.mxu1  ;;  %11309 = vmatmul.mubr.msk.f32.gmra.mxu0 %vm152_vm1, %v1373_v22  ;;  %11341 = vmatmul.mubr.msk.f32.gmra.mxu1 %vm152_vm1, %v12462_v34 }
  0xce   :  { %11311 = vmatprep.mubr.msk.f32.mxu0 %vm152_vm1, %v1374_v58  ;;  %11343 = vmatprep.mubr.msk.f32.mxu1 %vm152_vm1, %v12470_v37  ;;  %v1377_v37 = vld [vmem:[%s17272_s0 + $0x322] sm:$0xff]  ;;  %v13152_v58 = vld [vmem:[%s17273_s1 + $0x1c] sm:$0xf] }
  0xcf   :  { %v13110_v62 = vpop.f32.mrf.mxu0  ;;  %v13112_v0 = vpop.f32.mrf.mxu1  ;;  %11709 = vmatprep.subr.msk.mxu1 %vm345_vm0, %v13152_v58 }
  0xd1   :  { %v13117_v4 = vpop.f32.mrf.mxu0  ;;  %v13119_v34 = vpop.f32.mrf.mxu1  ;;  %11312 = vmatmul.mubr.msk.f32.gmra.mxu0 %vm152_vm1, %v1375_v30  ;;  %11344 = vmatmul.mubr.msk.f32.gmra.mxu1 %vm152_vm1, %v12484_v42 }
  0xd2   :  { %17358 = vst [vmem:[#allocation34_spill] sm:$0xff] %v13119_v34  ;;  %11314 = vmatprep.mubr.msk.f32.mxu0 %vm152_vm1, %v1376_v2  ;;  %11346 = vmatprep.mubr.msk.f32.mxu1 %vm152_vm1, %v12489_v44  ;;  %v17397_v34 = vld [vmem:[#allocation30_spill] sm:$0xff] }
  0xd3   :  { %v13130_v7 = vpop.f32.mrf.mxu0  ;;  %v13132_v11 = vpop.f32.mrf.mxu1 }
  0xd4   :  { %17359 = vst [vmem:[#allocation35_spill] sm:$0xff] %v13132_v11 }
  0xd5   :  { %v13134_v13 = vpop.f32.mrf.mxu0  ;;  %v13136_v22 = vpop.f32.mrf.mxu1  ;;  %11315 = vmatmul.mubr.msk.f32.gmra.mxu0 %vm152_vm1, %v1377_v37  ;;  %11347 = vmatmul.mubr.msk.f32.gmra.mxu1 %vm152_vm1, %v12503_v48 }
  0xd6   :  { %17360 = vst [vmem:[#allocation36_spill] sm:$0xff] %v13136_v22  ;;  %11349 = vmatprep.mubr.msk.f32.mxu1 %vm152_vm1, %v12511_v52  ;;  %11417 = vmatprep.mubr.msk.f32.mxu0 %vm152_vm1, %v12020_v6  ;;  %v13169_v6 = vld [vmem:[%s17273_s1 + $0x20] sm:$0xf]  ;;  %v17395_v22 = vld [vmem:[#allocation28_spill] sm:$0xff] }
  0xd7   :  { %v13145_v42 = vpop.f32.mrf.mxu0  ;;  %v13147_v44 = vpop.f32.mrf.mxu1 }
  0xd8   :  { %17361 = vst [vmem:[#allocation37_spill] sm:$0xff] %v13147_v44  ;;  %v17394_v44 = vld [vmem:[#allocation27_spill] sm:$0xff] }
  0xd9   :  { %v13154_v30 = vpop.f32.mrf.mxu0  ;;  %v13156_v2 = vpop.f32.mrf.mxu1  ;;  %11350 = vmatmul.mubr.msk.f32.gmra.mxu1 %vm152_vm1, %v12538_v1  ;;  %11418 = vmatmul.mubr.msk.f32.vlgmr.msra.gmra.mxu0 %vm152_vm1, %v12035_v8 }
  0xda   :  { %17362 = vst [vmem:[#allocation38_spill] sm:$0xff] %v13156_v2  ;;  %11612 = vmatpush3.msk.msra.mxu0 %vm345_vm0, %v12529_v63  ;;  %11352 = vmatprep.mubr.msk.f32.mxu1 %vm152_vm1, %v12547_v5 }
  0xdb   :  { %v13171_v48 = vpop.f32.mrf.mxu0  ;;  %v13173_v52 = vpop.f32.mrf.mxu1  ;;  %11420 = vmatprep.mubr.msk.f32.mxu0 %vm152_vm1, %v12045_v10  ;;  %11807 = vmatprep.subr.msk.mxu0 %vm345_vm0, %v13169_v6 }
  0xdc   :  { %17363 = vst [vmem:[#allocation39_spill] sm:$0xff] %v13173_v52  ;;  %v17393_v52 = vld [vmem:[#allocation26_spill] sm:$0xff] }
  0xdd   :  { %v13181_v8 = vpop.f32.mrf.mxu0  ;;  %v13183_v63 = vpop.f32.mrf.mxu1  ;;  %11353 = vmatmul.mubr.msk.f32.gmra.mxu1 %vm152_vm1, %v12563_v9  ;;  %11421 = vmatmul.mubr.msk.f32.gmra.mxu0 %vm152_vm1, %v12059_v12 }
  0xde   :  { %17364 = vst [vmem:[#allocation40_spill] sm:$0xff] %v13183_v63  ;;  %11355 = vmatprep.mubr.msk.f32.mxu1 %vm152_vm1, %v12571_v17  ;;  %11423 = vmatprep.mubr.msk.f32.mxu0 %vm152_vm1, %v12067_v14 }
  0xdf   :  { %v13193_v10 = vpop.f32.mrf.mxu0  ;;  %v13195_v1 = vpop.f32.mrf.mxu1 }
  0xe0   :  { %17365 = vst [vmem:[#allocation41_spill] sm:$0xff] %v13195_v1  ;;  %v17391_v1 = vld [vmem:[#allocation24_spill] sm:$0xff] }
  0xe1   :  { %v13197_v5 = vpop.f32.mrf.mxu0  ;;  %v13199_v37 = vpop.f32.mrf.mxu1  ;;  %11356 = vmatmul.mubr.msk.f32.gmra.mxu1 %vm152_vm1, %v12585_v24  ;;  %11424 = vmatmul.mubr.msk.f32.gmra.mxu0 %vm152_vm1, %v12081_v16  ;;  %v9616_v24 = vld [vmem:[%s17272_s0 + $0x180] sm:$0xff] }
  0xe2   :  { %17366 = vst [vmem:[#allocation42_spill] sm:$0xff] %v13199_v37  ;;  %11358 = vmatprep.mubr.msk.f32.mxu1 %vm152_vm1, %v12593_v32  ;;  %11426 = vmatprep.mubr.msk.f32.mxu0 %vm152_vm1, %v12089_v18 }
  0xe3   :  { %v13209_v12 = vpop.f32.mrf.mxu0  ;;  %v13211_v14 = vpop.f32.mrf.mxu1 }
  0xe4   :  { %17367 = vst [vmem:[#allocation43_spill] sm:$0xff] %v13211_v14  ;;  %v17389_v14 = vld [vmem:[#allocation22_spill] sm:$0xff] }
  0xe5   :  { %v13213_v9 = vpop.f32.mrf.mxu0  ;;  %v13215_v17 = vpop.f32.mrf.mxu1  ;;  %11359 = vmatmul.mubr.msk.f32.gmra.mxu1 %vm152_vm1, %v12607_v40  ;;  %11427 = vmatmul.mubr.msk.f32.gmra.mxu0 %vm152_vm1, %v12107_v21  ;;  %v9617_v21 = vld [vmem:[%s17272_s0 + $0x188] sm:$0xff] }
  0xe6   :  { %17368 = vst [vmem:[#allocation44_spill] sm:$0xff] %v13215_v17  ;;  %11361 = vmatprep.mubr.msk.f32.mxu1 %vm152_vm1, %v12615_v50  ;;  %11429 = vmatprep.mubr.msk.f32.mxu0 %vm152_vm1, %v12115_v23 }
  0xe7   :  { %v13225_v16 = vpop.f32.mrf.mxu0  ;;  %v13227_v18 = vpop.f32.mrf.mxu1 }
  0xe8   :  { %17369 = vst [vmem:[#allocation45_spill] sm:$0xff] %v13227_v18 }
  0xe9   :  { %v13232_v32 = vpop.f32.mrf.mxu0  ;;  %v13234_v40 = vpop.f32.mrf.mxu1  ;;  %11362 = vmatmul.mubr.msk.f32.gmra.mxu1 %vm152_vm1, %v12629_v3  ;;  %11430 = vmatmul.mubr.msk.f32.gmra.mxu0 %vm152_vm1, %v12130_v25 }
  0xea   :  { %17370 = vst [vmem:[#allocation46_spill] sm:$0xff] %v13234_v40  ;;  %11364 = vmatprep.mubr.msk.f32.mxu1 %vm152_vm1, %v9616_v24  ;;  %11432 = vmatprep.mubr.msk.f32.mxu0 %vm152_vm1, %v12138_v27 }
  0xeb   :  { %v13246_v23 = vpop.f32.mrf.mxu0  ;;  %v13248_v50 = vpop.f32.mrf.mxu1 }
  0xec   :  { %17371 = vst [vmem:[#allocation47_spill] sm:$0xff] %v13248_v50  ;;  %v17387_v50 = vld [vmem:[#allocation20_spill] sm:$0xff] }
  0xed   :  { %v13250_v40 = vpop.f32.mrf.mxu0  ;;  %v13252_v18 = vpop.f32.mrf.mxu1  ;;  %11365 = vmatmul.mubr.msk.f32.gmra.mxu1 %vm152_vm1, %v9617_v21  ;;  %11433 = vmatmul.mubr.msk.f32.gmra.mxu0 %vm152_vm1, %v12152_v29 }
  0xee   :  { %17372 = vst [vmem:[#allocation48_spill] sm:$0xff] %v13252_v18  ;;  %11367 = vmatprep.mubr.msk.f32.mxu1 %vm152_vm1, %v12654_v46  ;;  %11435 = vmatprep.mubr.msk.f32.mxu0 %vm152_vm1, %v12160_v31  ;;  %v17382_v18 = vld [vmem:[#allocation17_spill] sm:$0xff] }
  0xef   :  { %v13261_v25 = vpop.f32.mrf.mxu0  ;;  %v13263_v27 = vpop.f32.mrf.mxu1 }
  0xf0   :  { %17373 = vst [vmem:[#allocation49_spill] sm:$0xff] %v13263_v27 }
  0xf1   :  { %v13265_v3 = vpop.f32.mrf.mxu0  ;;  %v11125_v24 = vpop.f32.mrf.mxu1  ;;  %11368 = vmatmul.mubr.msk.f32.gmra.mxu1 %vm152_vm1, %v12667_v38  ;;  %11436 = vmatmul.mubr.msk.f32.gmra.mxu0 %vm152_vm1, %v12174_v33 }
  0xf2   :  { %v13272_v29 = vadd.f32 %v11125_v24, %v13057_v59  ;;  %11370 = vmatprep.mubr.msk.f32.mxu1 %vm152_vm1, %v12675_v20  ;;  %11438 = vmatprep.mubr.msk.f32.mxu0 %vm152_vm1, %v12185_v36  ;;  %v17374_v24 = vld [vmem:[#allocation13_spill] sm:$0xff] }
  0xf3   :  { %v13278_v31 = vpop.f32.mrf.mxu0  ;;  %v995_v46 = vpop.f32.mrf.mxu1 }
  0xf4   :  { %v13281_v21 = vadd.f32 %v995_v46, %v13070_v15 }
  0xf5   :  { %v13283_v27 = vpop.f32.mrf.mxu0  ;;  %v11128_v38 = vpop.f32.mrf.mxu1  ;;  %11371 = vmatmul.mubr.msk.f32.gmra.mxu1 %vm152_vm1, %v12689_v35  ;;  %11439 = vmatmul.mubr.msk.f32.gmra.mxu0 %vm152_vm1, %v12207_v39 }
  0xf6   :  { %v13290_v33 = vadd.f32 %v11128_v38, %v13077_v54  ;;  %11373 = vmatprep.mubr.msk.f32.mxu1 %vm152_vm1, %v12697_v57  ;;  %11441 = vmatprep.mubr.msk.f32.mxu0 %vm152_vm1, %v12215_v41 }
  0xf7   :  { %v13296_v36 = vpop.f32.mrf.mxu0  ;;  %v1005_v20 = vpop.f32.mrf.mxu1 }
  0xf8   :  { %v13299_v59 = vadd.f32 %v1005_v20, %v13090_v55 }
  0xf9   :  { %v13301_v15 = vpop.f32.mrf.mxu0  ;;  %v11131_v35 = vpop.f32.mrf.mxu1  ;;  %11374 = vmatmul.mubr.msk.f32.gmra.mxu1 %vm152_vm1, %v12711_v28  ;;  %11442 = vmatmul.mubr.msk.f32.gmra.mxu0 %vm152_vm1, %v12229_v43  ;;  %v17375_v43 = vld [vmem:[#allocation7_spill] sm:$0xff] }
  0xfa   :  { %v13308_v39 = vadd.f32 %v11131_v35, %v13097_v60  ;;  %11376 = vmatprep.mubr.msk.f32.mxu1 %vm152_vm1, %v12719_v53  ;;  %11444 = vmatprep.mubr.msk.f32.mxu0 %vm152_vm1, %v12237_v45  ;;  %v17376_v60 = vld [vmem:[#allocation14_spill] sm:$0xff]  ;;  %v17377_v45 = vld [vmem:[#allocation8_spill] sm:$0xff] }
  0xfb   :  { %v13314_v41 = vpop.f32.mrf.mxu0  ;;  %v1015_v57 = vpop.f32.mrf.mxu1 }
  0xfc   :  { %v13317_v54 = vadd.f32 %v1015_v57, %v13110_v62  ;;  %v17378_v57 = vld [vmem:[#allocation15_spill] sm:$0xff] }
  0xfd   :  { %v13319_v55 = vpop.f32.mrf.mxu0  ;;  %v11134_v28 = vpop.f32.mrf.mxu1  ;;  %11377 = vmatmul.mubr.msk.f32.gmra.mxu1 %vm152_vm1, %v17374_v24  ;;  %11445 = vmatmul.mubr.msk.f32.gmra.mxu0 %vm152_vm1, %v17375_v43  ;;  %v17380_v24 = vld [vmem:[#allocation16_spill] sm:$0xff]  ;;  %v17381_v43 = vld [vmem:[#allocation10_spill] sm:$0xff] }
  0xfe   :  { %v13326_v53 = vadd.f32 %v11134_v28, %v13117_v4  ;;  %11379 = vmatprep.mubr.msk.f32.mxu1 %vm152_vm1, %v17376_v60  ;;  %11447 = vmatprep.mubr.msk.f32.mxu0 %vm152_vm1, %v17377_v45  ;;  %v17379_v4 = vld [vmem:[#allocation9_spill] sm:$0xff] }
  0xff   :  { %v13332_v62 = vpop.f32.mrf.mxu0  ;;  %v1025_v46 = vpop.f32.mrf.mxu1 }
 0x100   :  { %v13335_v38 = vadd.f32 %v1025_v46, %v13130_v7 }
 0x101   :  { %v13337_v20 = vpop.f32.mrf.mxu0  ;;  %v11137_v35 = vpop.f32.mrf.mxu1  ;;  %11380 = vmatmul.mubr.msk.f32.gmra.mxu1 %vm152_vm1, %v17378_v57  ;;  %11448 = vmatmul.mubr.msk.f32.gmra.mxu0 %vm152_vm1, %v17379_v4  ;;  %v17384_v4 = vld [vmem:[#allocation18_spill] sm:$0xff] }
 0x102   :  { %v13344_v28 = vadd.f32 %v11137_v35, %v13134_v13  ;;  %11382 = vmatprep.mubr.msk.f32.mxu1 %vm152_vm1, %v17380_v24  ;;  %11450 = vmatprep.mubr.msk.f32.mxu0 %vm152_vm1, %v17381_v43  ;;  %v17383_v13 = vld [vmem:[#allocation11_spill] sm:$0xff]  ;;  %v17385_v24 = vld [vmem:[#allocation12_spill] sm:$0xff] }
 0x103   :  { %v13350_v7 = vpop.f32.mrf.mxu0  ;;  %v1035_v60 = vpop.f32.mrf.mxu1 }
 0x104   :  { %v13353_v45 = vadd.f32 %v1035_v60, %v13145_v42  ;;  %v9741_v42 = vld [vmem:[%s17272_s0 + $0x141] sm:$0xff] }
 0x105   :  { %v13355_v46 = vpop.f32.mrf.mxu0  ;;  %v11140_v57 = vpop.f32.mrf.mxu1  ;;  %11383 = vmatmul.mubr.msk.f32.gmra.mxu1 %vm152_vm1, %v17382_v18  ;;  %11451 = vmatmul.mubr.msk.f32.gmra.mxu0 %vm152_vm1, %v17383_v13  ;;  %v9742_v18 = vld [vmem:[%s17272_s0 + $0x151] sm:$0xff] }
 0x106   :  { %v13362_v35 = vadd.f32 %v11140_v57, %v13154_v30  ;;  %11385 = vmatprep.mubr.msk.f32.mxu1 %vm152_vm1, %v17384_v4  ;;  %11453 = vmatprep.mubr.msk.f32.mxu0 %vm152_vm1, %v17385_v24  ;;  %v17386_v4 = vld [vmem:[#allocation19_spill] sm:$0xff] }
 0x107   :  { %v13371_v43 = vpop.f32.mrf.mxu0  ;;  %v1045_v60 = vpop.f32.mrf.mxu1 }
 0x108   :  { %v13377_v30 = vadd.f32 %v1045_v60, %v13171_v48  ;;  %v9743_v48 = vld [vmem:[%s17272_s0 + $0x159] sm:$0xff] }
 0x109   :  { %v13379_v57 = vpop.f32.mrf.mxu0  ;;  %v11143_v13 = vpop.f32.mrf.mxu1  ;;  %11386 = vmatmul.mubr.msk.f32.gmra.mxu1 %vm152_vm1, %v17386_v4  ;;  %11454 = vmatmul.mubr.msk.f32.gmra.mxu0 %vm152_vm1, %v9741_v42  ;;  %v9744_v4 = vld [vmem:[%s17272_s0 + $0x169] sm:$0xff] }
 0x10a   :  { %v13385_v24 = vadd.f32 %v11143_v13, %v13181_v8  ;;  %11388 = vmatprep.mubr.msk.f32.mxu1 %vm152_vm1, %v17387_v50  ;;  %11456 = vmatprep.mubr.msk.f32.mxu0 %vm152_vm1, %v9742_v18  ;;  %v17388_v50 = vld [vmem:[#allocation21_spill] sm:$0xff] }
 0x10b   :  { %v13393_v60 = vpop.f32.mrf.mxu0  ;;  %v1055_v17 = vpop.f32.mrf.mxu1 }
 0x10c   :  { %v13399_v42 = vadd.f32 %v1055_v17, %v13193_v10  ;;  %v9745_v10 = vld [vmem:[%s17272_s0 + $0x171] sm:$0xff] }
 0x10d   :  { %v13401_v8 = vpop.f32.mrf.mxu0  ;;  %v11146_v13 = vpop.f32.mrf.mxu1  ;;  %11389 = vmatmul.mubr.msk.f32.gmra.mxu1 %vm152_vm1, %v17388_v50  ;;  %11457 = vmatmul.mubr.msk.f32.gmra.mxu0 %vm152_vm1, %v9743_v48  ;;  %v9746_v50 = vld [vmem:[%s17272_s0 + $0x181] sm:$0xff] }
 0x10e   :  { %v13407_v18 = vadd.f32 %v11146_v13, %v13197_v5  ;;  %11391 = vmatprep.mubr.msk.f32.mxu1 %vm152_vm1, %v17389_v14  ;;  %11459 = vmatprep.mubr.msk.f32.mxu0 %vm152_vm1, %v9744_v4  ;;  %v17390_v14 = vld [vmem:[#allocation23_spill] sm:$0xff] }
 0x10f   :  { %v13415_v17 = vpop.f32.mrf.mxu0  ;;  %v1065_v37 = vpop.f32.mrf.mxu1 }
 0x110   :  { %v13421_v48 = vadd.f32 %v1065_v37, %v13209_v12  ;;  %v9747_v37 = vld [vmem:[%s17272_s0 + $0x189] sm:$0xff] }
 0x111   :  { %v13423_v5 = vpop.f32.mrf.mxu0  ;;  %v11149_v13 = vpop.f32.mrf.mxu1  ;;  %11392 = vmatmul.mubr.msk.f32.gmra.mxu1 %vm152_vm1, %v17390_v14  ;;  %11460 = vmatmul.mubr.msk.f32.gmra.mxu0 %vm152_vm1, %v9745_v10  ;;  %v9748_v14 = vld [vmem:[%s17272_s0 + $0x1c9] sm:$0xff] }
 0x112   :  { %v13429_v4 = vadd.f32 %v11149_v13, %v13213_v9  ;;  %11394 = vmatprep.mubr.msk.f32.mxu1 %vm152_vm1, %v17391_v1  ;;  %11462 = vmatprep.mubr.msk.f32.mxu0 %vm152_vm1, %v9746_v50  ;;  %v17392_v1 = vld [vmem:[#allocation25_spill] sm:$0xff] }
 0x113   :  { %v13437_v12 = vpop.f32.mrf.mxu0  ;;  %v1075_v63 = vpop.f32.mrf.mxu1 }
 0x114   :  { %v13443_v10 = vadd.f32 %v1075_v63, %v13225_v16  ;;  %v9749_v63 = vld [vmem:[%s17272_s0 + $0x1d1] sm:$0xff] }
 0x115   :  { %v13445_v9 = vpop.f32.mrf.mxu0  ;;  %v11152_v13 = vpop.f32.mrf.mxu1  ;;  %11395 = vmatmul.mubr.msk.f32.gmra.mxu1 %vm152_vm1, %v17392_v1  ;;  %11463 = vmatmul.mubr.msk.f32.gmra.mxu0 %vm152_vm1, %v9747_v37  ;;  %v9750_v1 = vld [vmem:[%s17272_s0 + $0x1e1] sm:$0xff] }
 0x116   :  { %v13451_v50 = vadd.f32 %v11152_v13, %v13232_v32  ;;  %11397 = vmatprep.mubr.msk.f32.mxu1 %vm152_vm1, %v17393_v52  ;;  %11465 = vmatprep.mubr.msk.f32.mxu0 %vm152_vm1, %v9748_v14 }
 0x117   :  { %v13459_v16 = vpop.f32.mrf.mxu0  ;;  %v1085_v2 = vpop.f32.mrf.mxu1 }
 0x118   :  { %v13465_v37 = vadd.f32 %v1085_v2, %v13246_v23  ;;  %v9751_v2 = vld [vmem:[%s17272_s0 + $0x1e9] sm:$0xff] }
 0x119   :  { %v11155_v32 = vpop.f32.mrf.mxu1  ;;  %v11223_v13 = vpop.f32.mrf.mxu0  ;;  %11398 = vmatmul.mubr.msk.f32.gmra.mxu1 %vm152_vm1, %v17394_v44  ;;  %11466 = vmatmul.mubr.msk.f32.gmra.mxu0 %vm152_vm1, %v9749_v63  ;;  %v9752_v44 = vld [vmem:[%s17272_s0 + $0x1f9] sm:$0xff] }
 0x11a   :  { %v13471_v52 = vadd.f32 %v11155_v32, %v13250_v40  ;;  %v13474_v14 = vadd.f32 %v11223_v13, %v13272_v29  ;;  %11400 = vmatprep.mubr.msk.f32.mxu1 %vm152_vm1, %v17395_v22  ;;  %11468 = vmatprep.mubr.msk.f32.mxu0 %vm152_vm1, %v9750_v1  ;;  %v17396_v32 = vld [vmem:[#allocation29_spill] sm:$0xff] }
 0x11b   :  { %v1095_v23 = vpop.f32.mrf.mxu1  ;;  %v1641_v11 = vpop.f32.mrf.mxu0 }
 0x11c   :  { %v13486_v40 = vadd.f32 %v1095_v23, %v13261_v25  ;;  %v13489_v29 = vadd.f32 %v1641_v11, %v13281_v21  ;;  %v9753_v11 = vld [vmem:[%s17272_s0 + $0x201] sm:$0xff] }
 0x11d   :  { %v11158_v63 = vpop.f32.mrf.mxu1  ;;  %v11226_v22 = vpop.f32.mrf.mxu0  ;;  %11401 = vmatmul.mubr.msk.f32.gmra.mxu1 %vm152_vm1, %v17396_v32  ;;  %11469 = vmatmul.mubr.msk.f32.gmra.mxu0 %vm152_vm1, %v9751_v2  ;;  %v9754_v2 = vld [vmem:[%s17272_s0 + $0x211] sm:$0xff] }
 0x11e   :  { %v13495_v1 = vadd.f32 %v11158_v63, %v13265_v3  ;;  %v13498_v13 = vadd.f32 %v11226_v22, %v13290_v33  ;;  %11403 = vmatprep.mubr.msk.f32.mxu1 %vm152_vm1, %v17397_v34  ;;  %11471 = vmatprep.mubr.msk.f32.mxu0 %vm152_vm1, %v9752_v44  ;;  %v17398_v63 = vld [vmem:[#allocation31_spill] sm:$0xff]  ;;  %v17399_v32 = vld [vmem:[#allocation32_spill] sm:$0xff] }
 0x11f   :  { %v1105_v25 = vpop.f32.mrf.mxu1  ;;  %v1651_v21 = vpop.f32.mrf.mxu0 }
 0x120   :  { %v13510_v3 = vadd.f32 %v1105_v25, %v13278_v31  ;;  %v13513_v33 = vadd.f32 %v1651_v21, %v13299_v59  ;;  %v9755_v31 = vld [vmem:[%s17272_s0 + $0x219] sm:$0xff] }
 0x121   :  { %v11161_v23 = vpop.f32.mrf.mxu1  ;;  %v11229_v34 = vpop.f32.mrf.mxu0  ;;  %11404 = vmatmul.mubr.msk.f32.gmra.mxu1 %vm152_vm1, %v17398_v63  ;;  %11472 = vmatmul.mubr.msk.f32.gmra.mxu0 %vm152_vm1, %v9753_v11  ;;  %v9756_v11 = vld [vmem:[%s17272_s0 + $0x229] sm:$0xff] }
 0x122   :  { %v13519_v44 = vadd.f32 %v11161_v23, %v13283_v27  ;;  %v13522_v22 = vadd.f32 %v11229_v34, %v13308_v39  ;;  %11406 = vmatprep.mubr.msk.f32.mxu1 %vm152_vm1, %v17399_v32  ;;  %11474 = vmatprep.mubr.msk.f32.mxu0 %vm152_vm1, %v9754_v2  ;;  %v17400_v34 = vld [vmem:[#allocation33_spill] sm:$0xff] }
 0x123   :  { %v1115_v59 = vpop.f32.mrf.mxu1  ;;  %v1661_v25 = vpop.f32.mrf.mxu0 }
 0x124   :  { %v13534_v27 = vadd.f32 %v1115_v59, %v13296_v36  ;;  %v13537_v39 = vadd.f32 %v1661_v25, %v13317_v54  ;;  %v9757_v36 = vld [vmem:[%s17272_s0 + $0x231] sm:$0xff] }
 0x125   :  { %v11164_v21 = vpop.f32.mrf.mxu1  ;;  %v11232_v23 = vpop.f32.mrf.mxu0  ;;  %11407 = vmatmul.mubr.msk.f32.gmra.mxu1 %vm152_vm1, %v17400_v34  ;;  %11475 = vmatmul.mubr.msk.f32.gmra.mxu0 %vm152_vm1, %v9755_v31  ;;  %v9648_v31 = vld [vmem:[%s17272_s0 + $0x330] sm:$0xff] }
 0x126   :  { %v13543_v2 = vadd.f32 %v11164_v21, %v13301_v15  ;;  %v13546_v63 = vadd.f32 %v11232_v23, %v13326_v53  ;;  %11409 = vmatprep.mubr.msk.f32.mxu1 %vm152_vm1, %v12961_v51  ;;  %11477 = vmatprep.mubr.msk.f32.mxu0 %vm152_vm1, %v9756_v11  ;;  %v9758_v15 = vld [vmem:[%s17272_s0 + $0x241] sm:$0xff] }
 0x127   :  { %v1125_v54 = vpop.f32.mrf.mxu1  ;;  %v1671_v32 = vpop.f32.mrf.mxu0 }
 0x128   :  { %v13561_v53 = vadd.f32 %v1125_v54, %v13314_v41  ;;  %v13564_v51 = vadd.f32 %v1671_v32, %v13335_v38  ;;  %v9649_v41 = vld [vmem:[%s17272_s0 + $0x338] sm:$0xff] }
 0x129   :  { %v11167_v59 = vpop.f32.mrf.mxu1  ;;  %v11235_v25 = vpop.f32.mrf.mxu0  ;;  %11410 = vmatmul.mubr.msk.f32.gmra.mxu1 %vm152_vm1, %v12975_v49  ;;  %11478 = vmatmul.mubr.msk.f32.gmra.mxu0 %vm152_vm1, %v9757_v36  ;;  %v9759_v49 = vld [vmem:[%s17272_s0 + $0x249] sm:$0xff] }
 0x12a   :  { %v13570_v11 = vadd.f32 %v11167_v59, %v13319_v55  ;;  %v13573_v21 = vadd.f32 %v11235_v25, %v13344_v28  ;;  %11412 = vmatprep.mubr.msk.f32.mxu1 %vm152_vm1, %v9648_v31  ;;  %11480 = vmatprep.mubr.msk.f32.mxu0 %vm152_vm1, %v9758_v15  ;;  %v9760_v55 = vld [vmem:[%s17272_s0 + $0x259] sm:$0xff] }
 0x12b   :  { %v1135_v38 = vpop.f32.mrf.mxu1  ;;  %v1681_v23 = vpop.f32.mrf.mxu0  ;;  %v9846_v28 = vld [vmem:[%s17272_s0 + $0x1a] sm:$0xff] }
 0x12c   :  { %v13590_v34 = vadd.f32 %v1135_v38, %v13332_v62  ;;  %v13593_v36 = vadd.f32 %v1681_v23, %v13353_v45  ;;  %v9761_v62 = vld [vmem:[%s17272_s0 + $0x261] sm:$0xff] }
 0x12d   :  { %v11170_v54 = vpop.f32.mrf.mxu1  ;;  %v11238_v32 = vpop.f32.mrf.mxu0  ;;  %11413 = vmatmul.mubr.msk.f32.gmra.mxu1 %vm152_vm1, %v9649_v41  ;;  %11481 = vmatmul.mubr.msk.f32.gmra.mxu0 %vm152_vm1, %v9759_v49  ;;  %v9847_v45 = vld [vmem:[%s17272_s0 + $0x22] sm:$0xff] }
 0x12e   :  { %v13598_v31 = vadd.f32 %v11170_v54, %v13337_v20  ;;  %v13601_v15 = vadd.f32 %v11238_v32, %v13362_v35  ;;  %11483 = vmatprep.mubr.msk.f32.mxu0 %vm152_vm1, %v9760_v55  ;;  %11515 = vmatprep.mubr.msk.f32.mxu1 %vm152_vm1, %v9846_v28  ;;  %v9762_v20 = vld [vmem:[%s17272_s0 + $0x271] sm:$0xff] }
 0x12f   :  { %v1145_v59 = vpop.f32.mrf.mxu1  ;;  %v1691_v25 = vpop.f32.mrf.mxu0  ;;  %v9848_v35 = vld [vmem:[%s17272_s0 + $0x32] sm:$0xff] }
 0x130   :  { %v13618_v41 = vadd.f32 %v1145_v59, %v13350_v7  ;;  %v13621_v49 = vadd.f32 %v1691_v25, %v13377_v30  ;;  %v9763_v7 = vld [vmem:[%s17272_s0 + $0x279] sm:$0xff] }
 0x131   :  { %v11173_v38 = vpop.f32.mrf.mxu1  ;;  %v11241_v23 = vpop.f32.mrf.mxu0  ;;  %11484 = vmatmul.mubr.msk.f32.gmra.mxu0 %vm152_vm1, %v9761_v62  ;;  %11516 = vmatmul.mubr.msk.f32.vlgmr.msra.gmra.mxu1 %vm152_vm1, %v9847_v45  ;;  %v9849_v30 = vld [vmem:[%s17272_s0 + $0x3a] sm:$0xff] }
 0x132   :  { %v13626_v55 = vadd.f32 %v11173_v38, %v13355_v46  ;;  %v13629_v28 = vadd.f32 %v11241_v23, %v13385_v24  ;;  %11486 = vmatprep.mubr.msk.f32.mxu0 %vm152_vm1, %v9762_v20  ;;  %11518 = vmatprep.mubr.msk.f32.mxu1 %vm152_vm1, %v9848_v35  ;;  %v9764_v46 = vld [vmem:[%s17272_s0 + $0x289] sm:$0xff] }
 0x133   :  { %v1155_v54 = vpop.f32.mrf.mxu1  ;;  %v1701_v32 = vpop.f32.mrf.mxu0  ;;  %v9850_v24 = vld [vmem:[%s17272_s0 + $0x4a] sm:$0xff]  ;;  %11710 = vmatpush3.msk.msra.mxu1 %vm345_vm0, %v13152_v58 }
 0x134   :  { %v13648_v62 = vadd.f32 %v1155_v54, %v13371_v43  ;;  %v13651_v45 = vadd.f32 %v1701_v32, %v13399_v42  ;;  %v9765_v58 = vld [vmem:[%s17272_s0 + $0x291] sm:$0xff] }
 0x135   :  { %v11176_v59 = vpop.f32.mrf.mxu1  ;;  %v11244_v25 = vpop.f32.mrf.mxu0  ;;  %11487 = vmatmul.mubr.msk.f32.gmra.mxu0 %vm152_vm1, %v9763_v7  ;;  %11519 = vmatmul.mubr.msk.f32.gmra.mxu1 %vm152_vm1, %v9849_v30  ;;  %v9851_v43 = vld [vmem:[%s17272_s0 + $0x52] sm:$0xff] }
 0x136   :  { %v13656_v20 = vadd.f32 %v11176_v59, %v13379_v57  ;;  %v13659_v35 = vadd.f32 %v11244_v25, %v13407_v18  ;;  %11489 = vmatprep.mubr.msk.f32.mxu0 %vm152_vm1, %v9764_v46  ;;  %11521 = vmatprep.mubr.msk.f32.mxu1 %vm152_vm1, %v9850_v24  ;;  %v9766_v57 = vld [vmem:[%s17272_s0 + $0x2a1] sm:$0xff] }
 0x137   :  { %v1165_v42 = vpop.f32.mrf.mxu1  ;;  %v1711_v38 = vpop.f32.mrf.mxu0  ;;  %v9852_v18 = vld [vmem:[%s17272_s0 + $0x62] sm:$0xff] }
 0x138   :  { %v13676_v23 = vadd.f32 %v1165_v42, %v13393_v60  ;;  %v13679_v7 = vadd.f32 %v1711_v38, %v13421_v48  ;;  %v9767_v60 = vld [vmem:[%s17272_s0 + $0x2a9] sm:$0xff] }
 0x139   :  { %v11179_v30 = vpop.f32.mrf.mxu1  ;;  %v11247_v54 = vpop.f32.mrf.mxu0  ;;  %11490 = vmatmul.mubr.msk.f32.gmra.mxu0 %vm152_vm1, %v9765_v58  ;;  %11522 = vmatmul.mubr.msk.f32.gmra.mxu1 %vm152_vm1, %v9851_v43  ;;  %v9853_v48 = vld [vmem:[%s17272_s0 + $0x6a] sm:$0xff] }
 0x13a   :  { %v13684_v32 = vadd.f32 %v11179_v30, %v13401_v8  ;;  %v13687_v46 = vadd.f32 %v11247_v54, %v13429_v4  ;;  %11492 = vmatprep.mubr.msk.f32.mxu0 %vm152_vm1, %v9766_v57  ;;  %11524 = vmatprep.mubr.msk.f32.mxu1 %vm152_vm1, %v9852_v18  ;;  %v9768_v8 = vld [vmem:[%s17272_s0 + $0x2b9] sm:$0xff] }
 0x13b   :  { %v1175_v24 = vpop.f32.mrf.mxu1  ;;  %v1721_v59 = vpop.f32.mrf.mxu0  ;;  %v9854_v4 = vld [vmem:[%s17272_s0 + $0x7a] sm:$0xff] }
 0x13c   :  { %v13704_v25 = vadd.f32 %v1175_v24, %v13415_v17  ;;  %v13707_v58 = vadd.f32 %v1721_v59, %v13443_v10  ;;  %v9769_v17 = vld [vmem:[%s17272_s0 + $0x2c1] sm:$0xff] }
 0x13d   :  { %v11182_v43 = vpop.f32.mrf.mxu1  ;;  %v11250_v42 = vpop.f32.mrf.mxu0  ;;  %11493 = vmatmul.mubr.msk.f32.gmra.mxu0 %vm152_vm1, %v9767_v60  ;;  %11525 = vmatmul.mubr.msk.f32.gmra.mxu1 %vm152_vm1, %v9853_v48  ;;  %v9855_v10 = vld [vmem:[%s17272_s0 + $0x82] sm:$0xff] }
 0x13e   :  { %v13712_v38 = vadd.f32 %v11182_v43, %v13423_v5  ;;  %v13715_v57 = vadd.f32 %v11250_v42, %v13451_v50  ;;  %11495 = vmatprep.mubr.msk.f32.mxu0 %vm152_vm1, %v9768_v8  ;;  %11527 = vmatprep.mubr.msk.f32.mxu1 %vm152_vm1, %v9854_v4  ;;  %v9770_v5 = vld [vmem:[%s17272_s0 + $0x2d1] sm:$0xff] }
 0x13f   :  { %v1185_v18 = vpop.f32.mrf.mxu1  ;;  %v1731_v30 = vpop.f32.mrf.mxu0  ;;  %v9856_v50 = vld [vmem:[%s17272_s0 + $0x92] sm:$0xff] }
 0x140   :  { %v13732_v54 = vadd.f32 %v1185_v18, %v13437_v12  ;;  %v13735_v60 = vadd.f32 %v1731_v30, %v13465_v37  ;;  %v9771_v12 = vld [vmem:[%s17272_s0 + $0x2d9] sm:$0xff] }
 0x141   :  { %v11185_v48 = vpop.f32.mrf.mxu1  ;;  %v11253_v24 = vpop.f32.mrf.mxu0  ;;  %11496 = vmatmul.mubr.msk.f32.gmra.mxu0 %vm152_vm1, %v9769_v17  ;;  %11528 = vmatmul.mubr.msk.f32.gmra.mxu1 %vm152_vm1, %v9855_v10  ;;  %v9857_v37 = vld [vmem:[%s17272_s0 + $0x9a] sm:$0xff] }
 0x142   :  { %v13740_v59 = vadd.f32 %v11185_v48, %v13445_v9  ;;  %v13743_v8 = vadd.f32 %v11253_v24, %v13471_v52  ;;  %11498 = vmatprep.mubr.msk.f32.mxu0 %vm152_vm1, %v9770_v5  ;;  %11530 = vmatprep.mubr.msk.f32.mxu1 %vm152_vm1, %v9856_v50  ;;  %v9772_v9 = vld [vmem:[%s17272_s0 + $0x2e9] sm:$0xff] }
 0x143   :  { %v1195_v4 = vpop.f32.mrf.mxu1  ;;  %v1741_v43 = vpop.f32.mrf.mxu0  ;;  %v9858_v52 = vld [vmem:[%s17272_s0 + $0xaa] sm:$0xff]  ;;  %v9860_v48 = vld [vmem:[%s17272_s0 + $0xc2] sm:$0xff] }
 0x144   :  { %v13760_v42 = vadd.f32 %v1195_v4, %v13459_v16  ;;  %v13763_v17 = vadd.f32 %v1741_v43, %v13486_v40  ;;  %v9773_v16 = vld [vmem:[%s17272_s0 + $0x2f1] sm:$0xff]  ;;  %v9775_v43 = vld [vmem:[%s17272_s0 + $0x309] sm:$0xff] }
 0x145   :  { %v13765_v10 = vpop.f32.mrf.mxu1  ;;  %v11256_v18 = vpop.f32.mrf.mxu0  ;;  %11499 = vmatmul.mubr.msk.f32.gmra.mxu0 %vm152_vm1, %v9771_v12  ;;  %11531 = vmatmul.mubr.msk.f32.gmra.mxu1 %vm152_vm1, %v9857_v37  ;;  %v9859_v40 = vld [vmem:[%s17272_s0 + $0xb2] sm:$0xff] }
 0x146   :  { %v13770_v30 = vadd.f32 %v11256_v18, %v13495_v1  ;;  %11501 = vmatprep.mubr.msk.f32.mxu0 %vm152_vm1, %v9772_v9  ;;  %11533 = vmatprep.mubr.msk.f32.mxu1 %vm152_vm1, %v9858_v52  ;;  %v9774_v1 = vld [vmem:[%s17272_s0 + $0x301] sm:$0xff] }
 0x147   :  { %v13780_v5 = vpop.f32.mrf.mxu1  ;;  %v1751_v50 = vpop.f32.mrf.mxu0  ;;  %v9862_v18 = vld [vmem:[%s17272_s0 + $0xda] sm:$0xff] }
 0x148   :  { %v13789_v24 = vadd.f32 %v1751_v50, %v13510_v3  ;;  %v9861_v3 = vld [vmem:[%s17272_s0 + $0xca] sm:$0xff] }
 0x149   :  { %v13791_v12 = vpop.f32.mrf.mxu1  ;;  %v11259_v37 = vpop.f32.mrf.mxu0  ;;  %11502 = vmatmul.mubr.msk.f32.gmra.mxu0 %vm152_vm1, %v9773_v16  ;;  %11534 = vmatmul.mubr.msk.f32.gmra.mxu1 %vm152_vm1, %v9859_v40 }
 0x14a   :  { %v13796_v4 = vadd.f32 %v11259_v37, %v13519_v44  ;;  %11504 = vmatprep.mubr.msk.f32.mxu0 %vm152_vm1, %v9774_v1  ;;  %11536 = vmatprep.mubr.msk.f32.mxu1 %vm152_vm1, %v9860_v48  ;;  %v9776_v44 = vld [vmem:[%s17272_s0 + $0x319] sm:$0xff]  ;;  %v9777_v48 = vld [vmem:[%s17272_s0 + $0x321] sm:$0xff] }
 0x14b   :  { %v13806_v9 = vpop.f32.mrf.mxu1  ;;  %v1761_v52 = vpop.f32.mrf.mxu0 }
 0x14c   :  { %v13815_v16 = vadd.f32 %v1761_v52, %v13534_v27  ;;  %v9863_v27 = vld [vmem:[%s17272_s0 + $0xe2] sm:$0xff] }
 0x14d   :  { %v13817_v40 = vpop.f32.mrf.mxu1  ;;  %v11262_v50 = vpop.f32.mrf.mxu0  ;;  %11505 = vmatmul.mubr.msk.f32.gmra.mxu0 %vm152_vm1, %v9775_v43  ;;  %11537 = vmatmul.mubr.msk.f32.gmra.mxu1 %vm152_vm1, %v9861_v3  ;;  %v9864_v3 = vld [vmem:[%s17272_s0 + $0xf2] sm:$0xff] }
 0x14e   :  { %v13822_v1 = vadd.f32 %v11262_v50, %v13543_v2  ;;  %11507 = vmatprep.mubr.msk.f32.mxu0 %vm152_vm1, %v9776_v44  ;;  %11539 = vmatprep.mubr.msk.f32.mxu1 %vm152_vm1, %v9862_v18  ;;  %v9778_v2 = vld [vmem:[%s17272_s0 + $0x331] sm:$0xff] }
 0x14f   :  { %v13832_v37 = vpop.f32.mrf.mxu1  ;;  %v1771_v43 = vpop.f32.mrf.mxu0 }
 0x150   :  { %17401 = vst [vmem:[#allocation13_spill] sm:$0xff] %v13822_v1  ;;  %v13841_v52 = vadd.f32 %v1771_v43, %v13561_v53  ;;  %v9779_v1 = vld [vmem:[%s17272_s0 + $0x339] sm:$0xff] }
 0x151   :  { %v13843_v44 = vpop.f32.mrf.mxu1  ;;  %v11265_v18 = vpop.f32.mrf.mxu0  ;;  %11508 = vmatmul.mubr.msk.f32.gmra.mxu0 %vm152_vm1, %v9777_v48  ;;  %11540 = vmatmul.mubr.msk.f32.gmra.mxu1 %vm152_vm1, %v9863_v27  ;;  %v9865_v53 = vld [vmem:[%s17272_s0 + $0xfa] sm:$0xff]  ;;  %v9976_v27 = vld [vmem:[%s17272_s0 + $0x30] sm:$0xff] }
 0x152   :  { %17402 = vst [vmem:[#allocation7_spill] sm:$0xff] %v13841_v52  ;;  %v13848_v50 = vadd.f32 %v11265_v18, %v13570_v11  ;;  %11510 = vmatprep.mubr.msk.f32.mxu0 %vm152_vm1, %v9778_v2  ;;  %11542 = vmatprep.mubr.msk.f32.mxu1 %vm152_vm1, %v9864_v3  ;;  %v9866_v11 = vld [vmem:[%s17272_s0 + $0x10a] sm:$0xff]  ;;  %v9867_v52 = vld [vmem:[%s17272_s0 + $0x112] sm:$0xff] }
 0x153   :  { %v13858_v43 = vpop.f32.mrf.mxu1  ;;  %v1781_v48 = vpop.f32.mrf.mxu0 }
 0x154   :  { %17403 = vst [vmem:[#allocation14_spill] sm:$0xff] %v13848_v50  ;;  %v13867_v2 = vadd.f32 %v1781_v48, %v13590_v34  ;;  %v9977_v34 = vld [vmem:[%s17272_s0 + $0x38] sm:$0xff] }
 0x155   :  { %v13869_v3 = vpop.f32.mrf.mxu1  ;;  %v11268_v18 = vpop.f32.mrf.mxu0  ;;  %11511 = vmatmul.mubr.msk.f32.gmra.mxu0 %vm152_vm1, %v9779_v1  ;;  %11543 = vmatmul.mubr.msk.f32.gmra.mxu1 %vm152_vm1, %v9865_v53 }
 0x156   :  { %17404 = vst [vmem:[#allocation8_spill] sm:$0xff] %v13867_v2  ;;  %v13874_v50 = vadd.f32 %v11268_v18, %v13598_v31  ;;  %11545 = vmatprep.mubr.msk.f32.mxu1 %vm152_vm1, %v9866_v11  ;;  %11613 = vmatprep.mubr.msk.f32.mxu0 %vm152_vm1, %v9976_v27  ;;  %v9868_v31 = vld [vmem:[%s17272_s0 + $0x122] sm:$0xff] }
 0x157   :  { %v13884_v48 = vpop.f32.mrf.mxu1  ;;  %v1791_v1 = vpop.f32.mrf.mxu0  ;;  %v9978_v11 = vld [vmem:[%s17272_s0 + $0x48] sm:$0xff] }
 0x158   :  { %17405 = vst [vmem:[#allocation15_spill] sm:$0xff] %v13874_v50  ;;  %v13890_v53 = vadd.f32 %v1791_v1, %v13618_v41  ;;  %v9869_v41 = vld [vmem:[%s17272_s0 + $0x12a] sm:$0xff] }
 0x159   :  { %v13895_v27 = vpop.f32.mrf.mxu1  ;;  %v11271_v18 = vpop.f32.mrf.mxu0  ;;  %11546 = vmatmul.mubr.msk.f32.gmra.mxu1 %vm152_vm1, %v9867_v52  ;;  %11614 = vmatmul.mubr.msk.f32.vlgmr.msra.gmra.mxu0 %vm152_vm1, %v9977_v34  ;;  %v9979_v1 = vld [vmem:[%s17272_s0 + $0x50] sm:$0xff] }
 0x15a   :  { %17406 = vst [vmem:[#allocation9_spill] sm:$0xff] %v13890_v53  ;;  %v13900_v50 = vadd.f32 %v11271_v18, %v13626_v55  ;;  %11808 = vmatpush3.msk.msra.mxu0 %vm345_vm0, %v13169_v6  ;;  %11548 = vmatprep.mubr.msk.f32.mxu1 %vm152_vm1, %v9868_v31  ;;  %v9870_v55 = vld [vmem:[%s17272_s0 + $0x13a] sm:$0xff]  ;;  %vm6911_vm0 = vcmask 648768  }
 0x15b   :  { %v13911_v53 = vpop.f32.mrf.mxu1  ;;  %v1801_v52 = vpop.f32.mrf.mxu0  ;;  %11616 = vmatprep.mubr.msk.f32.mxu0 %vm152_vm1, %v9978_v11  ;;  %v9980_v6 = vld [vmem:[%s17272_s0 + $0x60] sm:$0xff] }
 0x15c   :  { %17407 = vst [vmem:[#allocation16_spill] sm:$0xff] %v13900_v50  ;;  %v13921_v34 = vadd.f32 %v1801_v52, %v13648_v62  ;;  %v9871_v50 = vld [vmem:[%s17272_s0 + $0x142] sm:$0xff] }
 0x15d   :  { %v13923_v31 = vpop.f32.mrf.mxu1  ;;  %v11274_v18 = vpop.f32.mrf.mxu0  ;;  %11549 = vmatmul.mubr.msk.f32.gmra.mxu1 %vm152_vm1, %v9869_v41  ;;  %11617 = vmatmul.mubr.msk.f32.gmra.mxu0 %vm152_vm1, %v9979_v1  ;;  %v9981_v62 = vld [vmem:[%s17272_s0 + $0x68] sm:$0xff]  ;;  %v9982_v1 = vld [vmem:[%s17272_s0 + $0x78] sm:$0xff] }
 0x15e   :  { %17408 = vst [vmem:[#allocation10_spill] sm:$0xff] %v13921_v34  ;;  %v13928_v11 = vadd.f32 %v11274_v18, %v13656_v20  ;;  %11551 = vmatprep.mubr.msk.f32.mxu1 %vm152_vm1, %v9870_v55  ;;  %11619 = vmatprep.mubr.msk.f32.mxu0 %vm152_vm1, %v9980_v6  ;;  %v9872_v20 = vld [vmem:[%s17272_s0 + $0x152] sm:$0xff]  ;;  %v9873_v34 = vld [vmem:[%s17272_s0 + $0x15a] sm:$0xff] }
 0x15f   :  { %v13938_v52 = vpop.f32.mrf.mxu1  ;;  %v1811_v41 = vpop.f32.mrf.mxu0 }
 0x160   :  { %17409 = vst [vmem:[#allocation17_spill] sm:$0xff] %v13928_v11  ;;  %v13947_v55 = vadd.f32 %v1811_v41, %v13676_v23  ;;  %v9983_v23 = vld [vmem:[%s17272_s0 + $0x80] sm:$0xff] }
 0x161   :  { %v13949_v6 = vpop.f32.mrf.mxu1  ;;  %v11277_v18 = vpop.f32.mrf.mxu0  ;;  %11552 = vmatmul.mubr.msk.f32.gmra.mxu1 %vm152_vm1, %v9871_v50  ;;  %11620 = vmatmul.mubr.msk.f32.gmra.mxu0 %vm152_vm1, %v9981_v62  ;;  %v9984_v62 = vld [vmem:[%s17272_s0 + $0x90] sm:$0xff] }
 0x162   :  { %17410 = vst [vmem:[#allocation11_spill] sm:$0xff] %v13947_v55  ;;  %v13954_v11 = vadd.f32 %v11277_v18, %v13684_v32  ;;  %11554 = vmatprep.mubr.msk.f32.mxu1 %vm152_vm1, %v9872_v20  ;;  %11622 = vmatprep.mubr.msk.f32.mxu0 %vm152_vm1, %v9982_v1  ;;  %v9874_v32 = vld [vmem:[%s17272_s0 + $0x16a] sm:$0xff]  ;;  %v9875_v55 = vld [vmem:[%s17272_s0 + $0x172] sm:$0xff] }
 0x163   :  { %v13964_v41 = vpop.f32.mrf.mxu1  ;;  %v1821_v50 = vpop.f32.mrf.mxu0 }
 0x164   :  { %17411 = vst [vmem:[#allocation18_spill] sm:$0xff] %v13954_v11  ;;  %v13973_v20 = vadd.f32 %v1821_v50, %v13704_v25  ;;  %v9985_v25 = vld [vmem:[%s17272_s0 + $0x98] sm:$0xff] }
 0x165   :  { %v13975_v1 = vpop.f32.mrf.mxu1  ;;  %v11280_v18 = vpop.f32.mrf.mxu0  ;;  %11555 = vmatmul.mubr.msk.f32.gmra.mxu1 %vm152_vm1, %v9873_v34  ;;  %11623 = vmatmul.mubr.msk.f32.gmra.mxu0 %vm152_vm1, %v9983_v23  ;;  %v9986_v23 = vld [vmem:[%s17272_s0 + $0xa8] sm:$0xff] }
 0x166   :  { %17412 = vst [vmem:[#allocation12_spill] sm:$0xff] %v13973_v20  ;;  %v13980_v11 = vadd.f32 %v11280_v18, %v13712_v38  ;;  %11557 = vmatprep.mubr.msk.f32.mxu1 %vm152_vm1, %v9874_v32  ;;  %11625 = vmatprep.mubr.msk.f32.mxu0 %vm152_vm1, %v9984_v62  ;;  %v9876_v38 = vld [vmem:[%s17272_s0 + $0x182] sm:$0xff]  ;;  %v9877_v20 = vld [vmem:[%s17272_s0 + $0x18a] sm:$0xff] }
 0x167   :  { %v13990_v50 = vpop.f32.mrf.mxu1  ;;  %v1831_v34 = vpop.f32.mrf.mxu0 }
 0x168   :  { %17413 = vst [vmem:[#allocation19_spill] sm:$0xff] %v13980_v11  ;;  %v13999_v32 = vadd.f32 %v1831_v34, %v13732_v54  ;;  %v9987_v54 = vld [vmem:[%s17272_s0 + $0xb0] sm:$0xff] }
 0x169   :  { %v14001_v62 = vpop.f32.mrf.mxu1  ;;  %v11283_v18 = vpop.f32.mrf.mxu0  ;;  %11558 = vmatmul.mubr.msk.f32.gmra.mxu1 %vm152_vm1, %v9875_v55  ;;  %11626 = vmatmul.mubr.msk.f32.gmra.mxu0 %vm152_vm1, %v9985_v25  ;;  %v9988_v25 = vld [vmem:[%s17272_s0 + $0xc0] sm:$0xff] }
 0x16a   :  { %17414 = vst [vmem:[#allocation20_spill] sm:$0xff] %v13999_v32  ;;  %v14006_v11 = vadd.f32 %v11283_v18, %v13740_v59  ;;  %11560 = vmatprep.mubr.msk.f32.mxu1 %vm152_vm1, %v9876_v38  ;;  %11628 = vmatprep.mubr.msk.f32.mxu0 %vm152_vm1, %v9986_v23  ;;  %v9878_v59 = vld [vmem:[%s17272_s0 + $0x1ca] sm:$0xff]  ;;  %v1211_v38 = vadd.f32 %v13765_v10, %v13059_v47  ;;  %v9879_v47 = vld [vmem:[%s17272_s0 + $0x1d2] sm:$0xff] }
 0x16b   :  { %v14016_v34 = vpop.f32.mrf.mxu1  ;;  %v1841_v55 = vpop.f32.mrf.mxu0  ;;  %v1206_v32 = vadd.f32 %v13780_v5, %v13072_v61  ;;  %v9880_v61 = vld [vmem:[%s17272_s0 + $0x1e2] sm:$0xff]  ;;  %v9990_v5 = vld [vmem:[%s17272_s0 + $0xd8] sm:$0xff] }
 0x16c   :  { %17415 = vst [vmem:[#allocation21_spill] sm:$0xff] %v14006_v11  ;;  %v14027_v23 = vadd.f32 %v1841_v55, %v13760_v42  ;;  %v9989_v42 = vld [vmem:[%s17272_s0 + $0xc8] sm:$0xff] }
 0x16d   :  { %v14029_v18 = vpop.f32.mrf.mxu1  ;;  %v11286_v11 = vpop.f32.mrf.mxu0  ;;  %11561 = vmatmul.mubr.msk.f32.gmra.mxu1 %vm152_vm1, %v9877_v20  ;;  %11629 = vmatmul.mubr.msk.f32.gmra.mxu0 %vm152_vm1, %v9987_v54 }
 0x16e   :  { %v14035_v2 = vadd.f32 %v11286_v11, %v1211_v38  ;;  %11563 = vmatprep.mubr.msk.f32.mxu1 %vm152_vm1, %v9878_v59  ;;  %11631 = vmatprep.mubr.msk.f32.mxu0 %vm152_vm1, %v9988_v25  ;;  %v1221_v11 = vadd.f32 %v13791_v12, %v13079_v19  ;;  %v1216_v25 = vadd.f32 %v13806_v9, %v13092_v56  ;;  %v9881_v19 = vld [vmem:[%s17272_s0 + $0x1ea] sm:$0xff]  ;;  %v9991_v12 = vld [vmem:[%s17272_s0 + $0xe0] sm:$0xff] }
 0x16f   :  { %v14045_v10 = vpop.f32.mrf.mxu1  ;;  %v1851_v20 = vpop.f32.mrf.mxu0  ;;  %v9882_v56 = vld [vmem:[%s17272_s0 + $0x1fa] sm:$0xff]  ;;  %v1231_v9 = vadd.f32 %v13817_v40, %v13099_v26  ;;  %v9883_v26 = vld [vmem:[%s17272_s0 + $0x202] sm:$0xff] }
 0x170   :  { %17416 = vst [vmem:[#allocation22_spill] sm:$0xff] %v14035_v2  ;;  %v14055_v54 = vadd.f32 %v1851_v20, %v1206_v32 }
 0x171   :  { %v11289_v55 = vpop.f32.mrf.mxu0  ;;  %v11321_v59 = vpop.f32.mrf.mxu1  ;;  %11564 = vmatmul.mubr.msk.f32.gmra.mxu1 %vm152_vm1, %v9879_v47  ;;  %11632 = vmatmul.mubr.msk.f32.gmra.mxu0 %vm152_vm1, %v9989_v42 }
 0x172   :  { %v14061_v38 = vadd.f32 %v11289_v55, %v1221_v11  ;;  %v14064_v2 = vadd.f32 %v11321_v59, %v13474_v14  ;;  %11566 = vmatprep.mubr.msk.f32.mxu1 %vm152_vm1, %v9880_v61  ;;  %11634 = vmatprep.mubr.msk.f32.mxu0 %vm152_vm1, %v9990_v5  ;;  %v9992_v14 = vld [vmem:[%s17272_s0 + $0xf0] sm:$0xff]  ;;  %v1226_v11 = vadd.f32 %v13832_v37, %v13112_v0  ;;  %v17417_v37 = vld [vmem:[#allocation34_spill] sm:$0xff] }
 0x173   :  { %v1861_v32 = vpop.f32.mrf.mxu0  ;;  %v2352_v47 = vpop.f32.mrf.mxu1  ;;  %v9884_v0 = vld [vmem:[%s17272_s0 + $0x212] sm:$0xff] }
 0x174   :  { %v14082_v42 = vadd.f32 %v1861_v32, %v1216_v25  ;;  %v14085_v20 = vadd.f32 %v2352_v47, %v13489_v29  ;;  %v9993_v29 = vld [vmem:[%s17272_s0 + $0xf8] sm:$0xff] }
 0x175   :  { %v11292_v61 = vpop.f32.mrf.mxu0  ;;  %v11324_v5 = vpop.f32.mrf.mxu1  ;;  %11567 = vmatmul.mubr.msk.f32.gmra.mxu1 %vm152_vm1, %v9881_v19  ;;  %11635 = vmatmul.mubr.msk.f32.gmra.mxu0 %vm152_vm1, %v9991_v12  ;;  %v1241_v19 = vadd.f32 %v13843_v44, %v17417_v37  ;;  %v9995_v44 = vld [vmem:[%s17272_s0 + $0x110] sm:$0xff] }
 0x176   :  { %v14091_v55 = vadd.f32 %v11292_v61, %v1231_v9  ;;  %v14094_v59 = vadd.f32 %v11324_v5, %v13498_v13  ;;  %11569 = vmatprep.mubr.msk.f32.mxu1 %vm152_vm1, %v9882_v56  ;;  %11637 = vmatprep.mubr.msk.f32.mxu0 %vm152_vm1, %v9992_v14  ;;  %v9994_v13 = vld [vmem:[%s17272_s0 + $0x108] sm:$0xff] }
 0x177   :  { %v1871_v40 = vpop.f32.mrf.mxu0  ;;  %v2362_v25 = vpop.f32.mrf.mxu1  ;;  %v17418_v14 = vld [vmem:[#allocation35_spill] sm:$0xff] }
 0x178   :  { %v14112_v12 = vadd.f32 %v1871_v40, %v1226_v11  ;;  %v14115_v32 = vadd.f32 %v2362_v25, %v13513_v33  ;;  %v1236_v9 = vadd.f32 %v13858_v43, %v17418_v14  ;;  %v9885_v33 = vld [vmem:[%s17272_s0 + $0x21a] sm:$0xff]  ;;  %v9886_v43 = vld [vmem:[%s17272_s0 + $0x22a] sm:$0xff] }
 0x179   :  { %v11295_v47 = vpop.f32.mrf.mxu0  ;;  %v11327_v56 = vpop.f32.mrf.mxu1  ;;  %11570 = vmatmul.mubr.msk.f32.gmra.mxu1 %vm152_vm1, %v9883_v26  ;;  %11638 = vmatmul.mubr.msk.f32.gmra.mxu0 %vm152_vm1, %v9993_v29  ;;  %v17419_v29 = vld [vmem:[#allocation36_spill] sm:$0xff] }
 0x17a   :  { %v14121_v61 = vadd.f32 %v11295_v47, %v1241_v19  ;;  %v14124_v5 = vadd.f32 %v11327_v56, %v13522_v22  ;;  %11572 = vmatprep.mubr.msk.f32.mxu1 %vm152_vm1, %v9884_v0  ;;  %11640 = vmatprep.mubr.msk.f32.mxu0 %vm152_vm1, %v9994_v13  ;;  %v9996_v22 = vld [vmem:[%s17272_s0 + $0x120] sm:$0xff]  ;;  %v1251_v40 = vadd.f32 %v13869_v3, %v17419_v29  ;;  %v9997_v3 = vld [vmem:[%s17272_s0 + $0x128] sm:$0xff] }
 0x17b   :  { %v1881_v11 = vpop.f32.mrf.mxu0  ;;  %v2372_v26 = vpop.f32.mrf.mxu1  ;;  %v17420_v19 = vld [vmem:[#allocation37_spill] sm:$0xff] }
 0x17c   :  { %v14142_v25 = vadd.f32 %v1881_v11, %v1236_v9  ;;  %v14145_v0 = vadd.f32 %v2372_v26, %v13537_v39  ;;  %v1246_v47 = vadd.f32 %v13884_v48, %v17420_v19  ;;  %v9887_v39 = vld [vmem:[%s17272_s0 + $0x232] sm:$0xff]  ;;  %v9888_v48 = vld [vmem:[%s17272_s0 + $0x242] sm:$0xff] }
 0x17d   :  { %v11298_v13 = vpop.f32.mrf.mxu0  ;;  %v11330_v37 = vpop.f32.mrf.mxu1  ;;  %11573 = vmatmul.mubr.msk.f32.gmra.mxu1 %vm152_vm1, %v9885_v33  ;;  %11641 = vmatmul.mubr.msk.f32.gmra.mxu0 %vm152_vm1, %v9995_v44  ;;  %v17421_v44 = vld [vmem:[#allocation38_spill] sm:$0xff] }
 0x17e   :  { %v14151_v56 = vadd.f32 %v11298_v13, %v1251_v40  ;;  %v14154_v14 = vadd.f32 %v11330_v37, %v13546_v63  ;;  %11575 = vmatprep.mubr.msk.f32.mxu1 %vm152_vm1, %v9886_v43  ;;  %11643 = vmatprep.mubr.msk.f32.mxu0 %vm152_vm1, %v9996_v22  ;;  %v9998_v63 = vld [vmem:[%s17272_s0 + $0x138] sm:$0xff]  ;;  %v1261_v11 = vadd.f32 %v13895_v27, %v17421_v44  ;;  %v17422_v40 = vld [vmem:[#allocation39_spill] sm:$0xff]  ;;  %v9999_v27 = vld [vmem:[%s17272_s0 + $0x140] sm:$0xff] }
 0x17f   :  { %v1891_v9 = vpop.f32.mrf.mxu0  ;;  %v2382_v33 = vpop.f32.mrf.mxu1  ;;  %v1256_v13 = vadd.f32 %v13911_v53, %v17422_v40  ;;  %v9890_v53 = vld [vmem:[%s17272_s0 + $0x25a] sm:$0xff] }
 0x180   :  { %v14172_v26 = vadd.f32 %v1891_v9, %v1246_v47  ;;  %v14175_v43 = vadd.f32 %v2382_v33, %v13564_v51  ;;  %v9889_v51 = vld [vmem:[%s17272_s0 + $0x24a] sm:$0xff] }
 0x181   :  { %v11301_v22 = vpop.f32.mrf.mxu0  ;;  %v11333_v29 = vpop.f32.mrf.mxu1  ;;  %11576 = vmatmul.mubr.msk.f32.gmra.mxu1 %vm152_vm1, %v9887_v39  ;;  %11644 = vmatmul.mubr.msk.f32.gmra.mxu0 %vm152_vm1, %v9997_v3  ;;  %v17423_v3 = vld [vmem:[#allocation40_spill] sm:$0xff] }
 0x182   :  { %v14181_v37 = vadd.f32 %v11301_v22, %v1261_v11  ;;  %v14184_v19 = vadd.f32 %v11333_v29, %v13573_v21  ;;  %11578 = vmatprep.mubr.msk.f32.mxu1 %vm152_vm1, %v9888_v48  ;;  %11646 = vmatprep.mubr.msk.f32.mxu0 %vm152_vm1, %v9998_v63  ;;  %v10000_v21 = vld [vmem:[%s17272_s0 + $0x150] sm:$0xff]  ;;  %v1271_v9 = vadd.f32 %v13923_v31, %v17423_v3  ;;  %v17424_v11 = vld [vmem:[#allocation41_spill] sm:$0xff] }
 0x183   :  { %v1901_v47 = vpop.f32.mrf.mxu0  ;;  %v2392_v39 = vpop.f32.mrf.mxu1  ;;  %v1266_v22 = vadd.f32 %v13938_v52, %v17424_v11  ;;  %v10001_v31 = vld [vmem:[%s17272_s0 + $0x158] sm:$0xff] }
 0x184   :  { %v14202_v33 = vadd.f32 %v1901_v47, %v1256_v13  ;;  %v14205_v48 = vadd.f32 %v2392_v39, %v13593_v36  ;;  %v9891_v36 = vld [vmem:[%s17272_s0 + $0x262] sm:$0xff]  ;;  %v9892_v52 = vld [vmem:[%s17272_s0 + $0x272] sm:$0xff] }
 0x185   :  { %v11304_v63 = vpop.f32.mrf.mxu0  ;;  %v11336_v44 = vpop.f32.mrf.mxu1  ;;  %11579 = vmatmul.mubr.msk.f32.gmra.mxu1 %vm152_vm1, %v9889_v51  ;;  %11647 = vmatmul.mubr.msk.f32.gmra.mxu0 %vm152_vm1, %v9999_v27  ;;  %v17425_v27 = vld [vmem:[#allocation42_spill] sm:$0xff] }
 0x186   :  { %v14211_v29 = vadd.f32 %v11304_v63, %v1271_v9  ;;  %v14214_v40 = vadd.f32 %v11336_v44, %v13601_v15  ;;  %11581 = vmatprep.mubr.msk.f32.mxu1 %vm152_vm1, %v9890_v53  ;;  %11649 = vmatprep.mubr.msk.f32.mxu0 %vm152_vm1, %v10000_v21  ;;  %v10002_v15 = vld [vmem:[%s17272_s0 + $0x168] sm:$0xff]  ;;  %v1281_v47 = vadd.f32 %v13949_v6, %v17425_v27  ;;  %v10003_v6 = vld [vmem:[%s17272_s0 + $0x170] sm:$0xff] }
 0x187   :  { %v1911_v13 = vpop.f32.mrf.mxu0  ;;  %v2402_v51 = vpop.f32.mrf.mxu1  ;;  %v17426_v9 = vld [vmem:[#allocation43_spill] sm:$0xff] }
 0x188   :  { %v14232_v39 = vadd.f32 %v1911_v13, %v1266_v22  ;;  %v14235_v53 = vadd.f32 %v2402_v51, %v13621_v49  ;;  %v1276_v63 = vadd.f32 %v13964_v41, %v17426_v9  ;;  %v9893_v49 = vld [vmem:[%s17272_s0 + $0x27a] sm:$0xff]  ;;  %v9894_v41 = vld [vmem:[%s17272_s0 + $0x28a] sm:$0xff] }
 0x189   :  { %v11307_v21 = vpop.f32.mrf.mxu0  ;;  %v11339_v3 = vpop.f32.mrf.mxu1  ;;  %11582 = vmatmul.mubr.msk.f32.gmra.mxu1 %vm152_vm1, %v9891_v36  ;;  %11650 = vmatmul.mubr.msk.f32.gmra.mxu0 %vm152_vm1, %v10001_v31  ;;  %v17427_v31 = vld [vmem:[#allocation44_spill] sm:$0xff] }
 0x18a   :  { %v14241_v44 = vadd.f32 %v11307_v21, %v1281_v47  ;;  %v14244_v11 = vadd.f32 %v11339_v3, %v13629_v28  ;;  %11584 = vmatprep.mubr.msk.f32.mxu1 %vm152_vm1, %v9892_v52  ;;  %11652 = vmatprep.mubr.msk.f32.mxu0 %vm152_vm1, %v10002_v15  ;;  %v10004_v28 = vld [vmem:[%s17272_s0 + $0x180] sm:$0xff]  ;;  %v1291_v13 = vadd.f32 %v13975_v1, %v17427_v31  ;;  %v10005_v1 = vld [vmem:[%s17272_s0 + $0x188] sm:$0xff] }
 0x18b   :  { %v1921_v22 = vpop.f32.mrf.mxu0  ;;  %v2412_v36 = vpop.f32.mrf.mxu1  ;;  %v17428_v47 = vld [vmem:[#allocation45_spill] sm:$0xff] }
 0x18c   :  { %v14262_v51 = vadd.f32 %v1921_v22, %v1276_v63  ;;  %v14265_v52 = vadd.f32 %v2412_v36, %v13651_v45  ;;  %v1286_v21 = vadd.f32 %v13990_v50, %v17428_v47  ;;  %v9895_v45 = vld [vmem:[%s17272_s0 + $0x292] sm:$0xff]  ;;  %v9896_v50 = vld [vmem:[%s17272_s0 + $0x2a2] sm:$0xff] }
 0x18d   :  { %v11310_v15 = vpop.f32.mrf.mxu0  ;;  %v11342_v27 = vpop.f32.mrf.mxu1  ;;  %11585 = vmatmul.mubr.msk.f32.gmra.mxu1 %vm152_vm1, %v9893_v49  ;;  %11653 = vmatmul.mubr.msk.f32.gmra.mxu0 %vm152_vm1, %v10003_v6  ;;  %v17429_v6 = vld [vmem:[#allocation46_spill] sm:$0xff] }
 0x18e   :  { %v14271_v3 = vadd.f32 %v11310_v15, %v1291_v13  ;;  %v14274_v9 = vadd.f32 %v11342_v27, %v13659_v35  ;;  %11587 = vmatprep.mubr.msk.f32.mxu1 %vm152_vm1, %v9894_v41  ;;  %11655 = vmatprep.mubr.msk.f32.mxu0 %vm152_vm1, %v10004_v28  ;;  %v10006_v35 = vld [vmem:[%s17272_s0 + $0x198] sm:$0xff]  ;;  %v1301_v22 = vadd.f32 %v14001_v62, %v17429_v6  ;;  %v17430_v13 = vld [vmem:[#allocation47_spill] sm:$0xff]  ;;  %v10007_v62 = vld [vmem:[%s17272_s0 + $0x1a0] sm:$0xff] }
 0x18f   :  { %v1931_v63 = vpop.f32.mrf.mxu0  ;;  %v2422_v49 = vpop.f32.mrf.mxu1  ;;  %v1296_v15 = vadd.f32 %v14016_v34, %v17430_v13  ;;  %v9898_v34 = vld [vmem:[%s17272_s0 + $0x2ba] sm:$0xff] }
 0x190   :  { %v14292_v36 = vadd.f32 %v1931_v63, %v1286_v21  ;;  %v14295_v41 = vadd.f32 %v2422_v49, %v13679_v7  ;;  %v9897_v7 = vld [vmem:[%s17272_s0 + $0x2aa] sm:$0xff] }
 0x191   :  { %v11313_v28 = vpop.f32.mrf.mxu0  ;;  %v11345_v31 = vpop.f32.mrf.mxu1  ;;  %11588 = vmatmul.mubr.msk.f32.gmra.mxu1 %vm152_vm1, %v9895_v45  ;;  %11656 = vmatmul.mubr.msk.f32.gmra.mxu0 %vm152_vm1, %v10005_v1  ;;  %v17431_v1 = vld [vmem:[#allocation48_spill] sm:$0xff] }
 0x192   :  { %v14301_v27 = vadd.f32 %v11313_v28, %v1301_v22  ;;  %v14304_v47 = vadd.f32 %v11345_v31, %v13687_v46  ;;  %11590 = vmatprep.mubr.msk.f32.mxu1 %vm152_vm1, %v9896_v50  ;;  %11658 = vmatprep.mubr.msk.f32.mxu0 %vm152_vm1, %v10006_v35  ;;  %v10008_v46 = vld [vmem:[%s17272_s0 + $0x1e0] sm:$0xff]  ;;  %v1311_v63 = vadd.f32 %v14029_v18, %v17431_v1  ;;  %v10009_v18 = vld [vmem:[%s17272_s0 + $0x1e8] sm:$0xff] }
 0x193   :  { %v1941_v21 = vpop.f32.mrf.mxu0  ;;  %v2432_v45 = vpop.f32.mrf.mxu1  ;;  %v17432_v22 = vld [vmem:[#allocation49_spill] sm:$0xff] }
 0x194   :  { %v14322_v49 = vadd.f32 %v1941_v21, %v1296_v15  ;;  %v14325_v50 = vadd.f32 %v2432_v45, %v13707_v58  ;;  %v1306_v28 = vadd.f32 %v14045_v10, %v17432_v22  ;;  %v9899_v58 = vld [vmem:[%s17272_s0 + $0x2c2] sm:$0xff]  ;;  %v9900_v10 = vld [vmem:[%s17272_s0 + $0x2d2] sm:$0xff] }
 0x195   :  { %v11316_v35 = vpop.f32.mrf.mxu0  ;;  %v11348_v6 = vpop.f32.mrf.mxu1  ;;  %11591 = vmatmul.mubr.msk.f32.gmra.mxu1 %vm152_vm1, %v9897_v7  ;;  %11659 = vmatmul.mubr.msk.f32.gmra.mxu0 %vm152_vm1, %v10007_v62 }
 0x196   :  { %v14331_v31 = vadd.f32 %v11316_v35, %v1311_v63  ;;  %v14334_v13 = vadd.f32 %v11348_v6, %v13715_v57  ;;  %11593 = vmatprep.mubr.msk.f32.mxu1 %vm152_vm1, %v9898_v34  ;;  %11661 = vmatprep.mubr.msk.f32.mxu0 %vm152_vm1, %v10008_v46  ;;  %v10010_v57 = vld [vmem:[%s17272_s0 + $0x1f8] sm:$0xff]  ;;  %v10011_v63 = vld [vmem:[%s17272_s0 + $0x200] sm:$0xff] }
 0x197   :  { %v1951_v15 = vpop.f32.mrf.mxu0  ;;  %v2442_v7 = vpop.f32.mrf.mxu1 }
 0x198   :  { %v14350_v62 = vadd.f32 %v1951_v15, %v1306_v28  ;;  %v14353_v21 = vadd.f32 %v2442_v7, %v13735_v60  ;;  %v9901_v60 = vld [vmem:[%s17272_s0 + $0x2da] sm:$0xff] }
 0x199   :  { %v11351_v45 = vpop.f32.mrf.mxu1  ;;  %v11419_v34 = vpop.f32.mrf.mxu0  ;;  %11594 = vmatmul.mubr.msk.f32.gmra.mxu1 %vm152_vm1, %v9899_v58  ;;  %11662 = vmatmul.mubr.msk.f32.gmra.mxu0 %vm152_vm1, %v10009_v18 }
 0x19a   :  { %v14358_v46 = vadd.f32 %v11351_v45, %v13743_v8  ;;  %v14361_v1 = vadd.f32 %v11419_v34, %v14064_v2  ;;  %11596 = vmatprep.mubr.msk.f32.mxu1 %vm152_vm1, %v9900_v10  ;;  %11664 = vmatprep.mubr.msk.f32.mxu0 %vm152_vm1, %v10010_v57  ;;  %v9902_v8 = vld [vmem:[%s17272_s0 + $0x2ea] sm:$0xff] }
 0x19b   :  { %v2452_v35 = vpop.f32.mrf.mxu1  ;;  %v3062_v6 = vpop.f32.mrf.mxu0  ;;  %v10012_v2 = vld [vmem:[%s17272_s0 + $0x210] sm:$0xff] }
 0x19c   :  { %v14378_v22 = vadd.f32 %v2452_v35, %v13763_v17  ;;  %v14381_v28 = vadd.f32 %v3062_v6, %v14085_v20  ;;  %v9903_v17 = vld [vmem:[%s17272_s0 + $0x2f2] sm:$0xff] }
 0x19d   :  { %v11354_v58 = vpop.f32.mrf.mxu1  ;;  %v11422_v18 = vpop.f32.mrf.mxu0  ;;  %11597 = vmatmul.mubr.msk.f32.gmra.mxu1 %vm152_vm1, %v9901_v60  ;;  %11665 = vmatmul.mubr.msk.f32.gmra.mxu0 %vm152_vm1, %v10011_v63  ;;  %v10013_v20 = vld [vmem:[%s17272_s0 + $0x218] sm:$0xff] }
 0x19e   :  { %v14386_v15 = vadd.f32 %v11354_v58, %v13770_v30  ;;  %v14389_v7 = vadd.f32 %v11422_v18, %v14094_v59  ;;  %11599 = vmatprep.mubr.msk.f32.mxu1 %vm152_vm1, %v9902_v8  ;;  %11667 = vmatprep.mubr.msk.f32.mxu0 %vm152_vm1, %v10012_v2  ;;  %v9904_v30 = vld [vmem:[%s17272_s0 + $0x302] sm:$0xff] }
 0x19f   :  { %v2462_v10 = vpop.f32.mrf.mxu1  ;;  %v3072_v57 = vpop.f32.mrf.mxu0  ;;  %v10014_v59 = vld [vmem:[%s17272_s0 + $0x228] sm:$0xff] }
 0x1a0   :  { %v14406_v45 = vadd.f32 %v2462_v10, %v13789_v24  ;;  %v14409_v34 = vadd.f32 %v3072_v57, %v14115_v32  ;;  %v9905_v24 = vld [vmem:[%s17272_s0 + $0x30a] sm:$0xff]  ;;  %v17433_v10 = vld [vmem:[#allocation13_spill] sm:$0xff] }
 0x1a1   :  { %v11357_v60 = vpop.f32.mrf.mxu1  ;;  %v11425_v63 = vpop.f32.mrf.mxu0  ;;  %11600 = vmatmul.mubr.msk.f32.gmra.mxu1 %vm152_vm1, %v9903_v17  ;;  %11668 = vmatmul.mubr.msk.f32.gmra.mxu0 %vm152_vm1, %v10013_v20  ;;  %v10015_v32 = vld [vmem:[%s17272_s0 + $0x230] sm:$0xff] }
 0x1a2   :  { %v14414_v35 = vadd.f32 %v11357_v60, %v13796_v4  ;;  %v14417_v6 = vadd.f32 %v11425_v63, %v14124_v5  ;;  %11602 = vmatprep.mubr.msk.f32.mxu1 %vm152_vm1, %v9904_v30  ;;  %11670 = vmatprep.mubr.msk.f32.mxu0 %vm152_vm1, %v10014_v59  ;;  %v9906_v4 = vld [vmem:[%s17272_s0 + $0x31a] sm:$0xff]  ;;  %v9908_v63 = vld [vmem:[%s17272_s0 + $0x332] sm:$0xff] }
 0x1a3   :  { %v2472_v8 = vpop.f32.mrf.mxu1  ;;  %v3082_v2 = vpop.f32.mrf.mxu0  ;;  %v10016_v5 = vld [vmem:[%s17272_s0 + $0x240] sm:$0xff] }
 0x1a4   :  { %v14434_v58 = vadd.f32 %v2472_v8, %v13815_v16  ;;  %v14437_v18 = vadd.f32 %v3082_v2, %v14145_v0  ;;  %v9907_v16 = vld [vmem:[%s17272_s0 + $0x322] sm:$0xff] }
 0x1a5   :  { %v11360_v17 = vpop.f32.mrf.mxu1  ;;  %v11428_v20 = vpop.f32.mrf.mxu0  ;;  %11603 = vmatmul.mubr.msk.f32.gmra.mxu1 %vm152_vm1, %v9905_v24  ;;  %11671 = vmatmul.mubr.msk.f32.gmra.mxu0 %vm152_vm1, %v10015_v32  ;;  %v10017_v0 = vld [vmem:[%s17272_s0 + $0x248] sm:$0xff] }
 0x1a6   :  { %v14442_v57 = vadd.f32 %v11360_v17, %v17433_v10  ;;  %v14445_v30 = vadd.f32 %v11428_v20, %v14154_v14  ;;  %11605 = vmatprep.mubr.msk.f32.mxu1 %vm152_vm1, %v9906_v4  ;;  %11673 = vmatprep.mubr.msk.f32.mxu0 %vm152_vm1, %v10016_v5  ;;  %v10018_v14 = vld [vmem:[%s17272_s0 + $0x258] sm:$0xff]  ;;  %v17434_v24 = vld [vmem:[#allocation7_spill] sm:$0xff]  ;;  %v17435_v5 = vld [vmem:[#allocation14_spill] sm:$0xff] }
 0x1a7   :  { %v2482_v59 = vpop.f32.mrf.mxu1  ;;  %v3092_v60 = vpop.f32.mrf.mxu0  ;;  %v10019_v10 = vld [vmem:[%s17272_s0 + $0x260] sm:$0xff] }
 0x1a8   :  { %v14462_v32 = vadd.f32 %v2482_v59, %v17434_v24  ;;  %v14465_v8 = vadd.f32 %v3092_v60, %v14175_v43  ;;  %v9909_v43 = vld [vmem:[%s17272_s0 + $0x33a] sm:$0xff]  ;;  %v10020_v59 = vld [vmem:[%s17272_s0 + $0x270] sm:$0xff] }
 0x1a9   :  { %v11363_v2 = vpop.f32.mrf.mxu1  ;;  %v11431_v4 = vpop.f32.mrf.mxu0  ;;  %11606 = vmatmul.mubr.msk.f32.gmra.mxu1 %vm152_vm1, %v9907_v16  ;;  %11674 = vmatmul.mubr.msk.f32.gmra.mxu0 %vm152_vm1, %v10017_v0  ;;  %v17437_v60 = vld [vmem:[#allocation8_spill] sm:$0xff] }
 0x1aa   :  { %v14470_v17 = vadd.f32 %v11363_v2, %v17435_v5  ;;  %v14473_v20 = vadd.f32 %v11431_v4, %v14184_v19  ;;  %11608 = vmatprep.mubr.msk.f32.mxu1 %vm152_vm1, %v9908_v63  ;;  %11676 = vmatprep.mubr.msk.f32.mxu0 %vm152_vm1, %v10018_v14  ;;  %v10106_v19 = vld [vmem:[%s17272_s0 + $0x31] sm:$0xff] }
 0x1ab   :  { %v2492_v16 = vpop.f32.mrf.mxu1  ;;  %v3102_v0 = vpop.f32.mrf.mxu0  ;;  %v17439_v4 = vld [vmem:[#allocation15_spill] sm:$0xff] }
 0x1ac   :  { %17436 = vst [vmem:[#allocation23_spill] sm:$0xff] %v14473_v20  ;;  %v14490_v63 = vadd.f32 %v2492_v16, %v17437_v60  ;;  %v14493_v14 = vadd.f32 %v3102_v0, %v14205_v48  ;;  %v10021_v48 = vld [vmem:[%s17272_s0 + $0x278] sm:$0xff]  ;;  %v10022_v0 = vld [vmem:[%s17272_s0 + $0x288] sm:$0xff] }
 0x1ad   :  { %v11366_v24 = vpop.f32.mrf.mxu1  ;;  %v11434_v2 = vpop.f32.mrf.mxu0  ;;  %11609 = vmatmul.mubr.msk.f32.gmra.mxu1 %vm152_vm1, %v9909_v43  ;;  %11677 = vmatmul.mubr.msk.f32.gmra.mxu0 %vm152_vm1, %v10019_v10  ;;  %v10107_v43 = vld [vmem:[%s17272_s0 + $0x39] sm:$0xff] }
 0x1ae   :  { %17438 = vst [vmem:[#allocation24_spill] sm:$0xff] %v14493_v14  ;;  %v14498_v5 = vadd.f32 %v11366_v24, %v17439_v4  ;;  %v14501_v20 = vadd.f32 %v11434_v2, %v14214_v40  ;;  %11679 = vmatprep.mubr.msk.f32.mxu0 %vm152_vm1, %v10020_v59  ;;  %11711 = vmatprep.mubr.msk.f32.mxu1 %vm152_vm1, %v10106_v19  ;;  %v10108_v40 = vld [vmem:[%s17272_s0 + $0x49] sm:$0xff]  ;;  %v17441_v59 = vld [vmem:[#allocation9_spill] sm:$0xff]  ;;  %v17443_v4 = vld [vmem:[#allocation16_spill] sm:$0xff] }
 0x1af   :  { %v2502_v16 = vpop.f32.mrf.mxu1  ;;  %v3112_v10 = vpop.f32.mrf.mxu0 }
 0x1b0   :  { %17440 = vst [vmem:[#allocation25_spill] sm:$0xff] %v14501_v20  ;;  %v14518_v19 = vadd.f32 %v2502_v16, %v17441_v59  ;;  %v14521_v60 = vadd.f32 %v3112_v10, %v14235_v53  ;;  %v10023_v53 = vld [vmem:[%s17272_s0 + $0x290] sm:$0xff]  ;;  %v10024_v10 = vld [vmem:[%s17272_s0 + $0x2a0] sm:$0xff] }
 0x1b1   :  { %v11369_v24 = vpop.f32.mrf.mxu1  ;;  %v11437_v2 = vpop.f32.mrf.mxu0  ;;  %11680 = vmatmul.mubr.msk.f32.gmra.mxu0 %vm152_vm1, %v10021_v48  ;;  %11712 = vmatmul.mubr.msk.f32.vlgmr.msra.gmra.mxu1 %vm152_vm1, %v10107_v43  ;;  %v10109_v48 = vld [vmem:[%s17272_s0 + $0x51] sm:$0xff] }
 0x1b2   :  { %17442 = vst [vmem:[#allocation26_spill] sm:$0xff] %v14521_v60  ;;  %v14526_v20 = vadd.f32 %v11369_v24, %v17443_v4  ;;  %v14529_v14 = vadd.f32 %v11437_v2, %v14244_v11  ;;  %11682 = vmatprep.mubr.msk.f32.mxu0 %vm152_vm1, %v10022_v0  ;;  %11714 = vmatprep.mubr.msk.f32.mxu1 %vm152_vm1, %v10108_v40  ;;  %v10110_v11 = vld [vmem:[%s17272_s0 + $0x61] sm:$0xff] }
 0x1b3   :  { %v2512_v16 = vpop.f32.mrf.mxu1  ;;  %v3122_v43 = vpop.f32.mrf.mxu0  ;;  %v17445_v0 = vld [vmem:[#allocation10_spill] sm:$0xff]  ;;  %v17447_v4 = vld [vmem:[#allocation17_spill] sm:$0xff] }
 0x1b4   :  { %17444 = vst [vmem:[#allocation27_spill] sm:$0xff] %v14529_v14  ;;  %v14546_v40 = vadd.f32 %v2512_v16, %v17445_v0  ;;  %v14549_v59 = vadd.f32 %v3122_v43, %v14265_v52  ;;  %v10025_v52 = vld [vmem:[%s17272_s0 + $0x2a8] sm:$0xff]  ;;  %v10026_v43 = vld [vmem:[%s17272_s0 + $0x2b8] sm:$0xff] }
 0x1b5   :  { %v11372_v24 = vpop.f32.mrf.mxu1  ;;  %v11440_v2 = vpop.f32.mrf.mxu0  ;;  %11683 = vmatmul.mubr.msk.f32.gmra.mxu0 %vm152_vm1, %v10023_v53  ;;  %11715 = vmatmul.mubr.msk.f32.gmra.mxu1 %vm152_vm1, %v10109_v48  ;;  %v10111_v53 = vld [vmem:[%s17272_s0 + $0x69] sm:$0xff] }
 0x1b6   :  { %17446 = vst [vmem:[#allocation28_spill] sm:$0xff] %v14549_v59  ;;  %v14554_v14 = vadd.f32 %v11372_v24, %v17447_v4  ;;  %v14557_v60 = vadd.f32 %v11440_v2, %v14274_v9  ;;  %11685 = vmatprep.mubr.msk.f32.mxu0 %vm152_vm1, %v10024_v10  ;;  %11717 = vmatprep.mubr.msk.f32.mxu1 %vm152_vm1, %v10110_v11  ;;  %v10112_v9 = vld [vmem:[%s17272_s0 + $0x79] sm:$0xff]  ;;  %v17449_v10 = vld [vmem:[#allocation11_spill] sm:$0xff]  ;;  %v17451_v4 = vld [vmem:[#allocation18_spill] sm:$0xff] }
 0x1b7   :  { %v2522_v16 = vpop.f32.mrf.mxu1  ;;  %v3132_v48 = vpop.f32.mrf.mxu0 }
 0x1b8   :  { %17448 = vst [vmem:[#allocation29_spill] sm:$0xff] %v14557_v60  ;;  %v14574_v11 = vadd.f32 %v2522_v16, %v17449_v10  ;;  %v14577_v0 = vadd.f32 %v3132_v48, %v14295_v41  ;;  %v10027_v41 = vld [vmem:[%s17272_s0 + $0x2c0] sm:$0xff]  ;;  %v10028_v48 = vld [vmem:[%s17272_s0 + $0x2d0] sm:$0xff] }
 0x1b9   :  { %v11375_v24 = vpop.f32.mrf.mxu1  ;;  %v11443_v2 = vpop.f32.mrf.mxu0  ;;  %11686 = vmatmul.mubr.msk.f32.gmra.mxu0 %vm152_vm1, %v10025_v52  ;;  %11718 = vmatmul.mubr.msk.f32.gmra.mxu1 %vm152_vm1, %v10111_v53  ;;  %v10113_v52 = vld [vmem:[%s17272_s0 + $0x81] sm:$0xff] }
 0x1ba   :  { %17450 = vst [vmem:[#allocation30_spill] sm:$0xff] %v14577_v0  ;;  %v14582_v60 = vadd.f32 %v11375_v24, %v17451_v4  ;;  %v14585_v59 = vadd.f32 %v11443_v2, %v14304_v47  ;;  %11688 = vmatprep.mubr.msk.f32.mxu0 %vm152_vm1, %v10026_v43  ;;  %11720 = vmatprep.mubr.msk.f32.mxu1 %vm152_vm1, %v10112_v9  ;;  %v10114_v47 = vld [vmem:[%s17272_s0 + $0x91] sm:$0xff] }
 0x1bb   :  { %v2532_v16 = vpop.f32.mrf.mxu1  ;;  %v3142_v53 = vpop.f32.mrf.mxu0  ;;  %v17453_v43 = vld [vmem:[#allocation12_spill] sm:$0xff]  ;;  %v17455_v4 = vld [vmem:[#allocation19_spill] sm:$0xff] }
 0x1bc   :  { %17452 = vst [vmem:[#allocation31_spill] sm:$0xff] %v14585_v59  ;;  %v14602_v9 = vadd.f32 %v2532_v16, %v17453_v43  ;;  %v14605_v10 = vadd.f32 %v3142_v53, %v14325_v50  ;;  %v10029_v50 = vld [vmem:[%s17272_s0 + $0x2d8] sm:$0xff]  ;;  %v10030_v53 = vld [vmem:[%s17272_s0 + $0x2e8] sm:$0xff] }
 0x1bd   :  { %v11378_v24 = vpop.f32.mrf.mxu1  ;;  %v11446_v2 = vpop.f32.mrf.mxu0  ;;  %11689 = vmatmul.mubr.msk.f32.gmra.mxu0 %vm152_vm1, %v10027_v41  ;;  %11721 = vmatmul.mubr.msk.f32.gmra.mxu1 %vm152_vm1, %v10113_v52  ;;  %v10115_v41 = vld [vmem:[%s17272_s0 + $0x99] sm:$0xff] }
 0x1be   :  { %17454 = vst [vmem:[#allocation32_spill] sm:$0xff] %v14605_v10  ;;  %v14610_v59 = vadd.f32 %v11378_v24, %v17455_v4  ;;  %v14613_v0 = vadd.f32 %v11446_v2, %v14334_v13  ;;  %11691 = vmatprep.mubr.msk.f32.mxu0 %vm152_vm1, %v10028_v48  ;;  %11723 = vmatprep.mubr.msk.f32.mxu1 %vm152_vm1, %v10114_v47  ;;  %v10116_v13 = vld [vmem:[%s17272_s0 + $0xa9] sm:$0xff]  ;;  %v17457_v48 = vld [vmem:[#allocation20_spill] sm:$0xff]  ;;  %v17459_v4 = vld [vmem:[#allocation21_spill] sm:$0xff] }
 0x1bf   :  { %v2542_v16 = vpop.f32.mrf.mxu1  ;;  %v3152_v52 = vpop.f32.mrf.mxu0 }
 0x1c0   :  { %17456 = vst [vmem:[#allocation33_spill] sm:$0xff] %v14613_v0  ;;  %v14630_v47 = vadd.f32 %v2542_v16, %v17457_v48  ;;  %v14633_v43 = vadd.f32 %v3152_v52, %v14353_v21  ;;  %v10031_v21 = vld [vmem:[%s17272_s0 + $0x2f0] sm:$0xff]  ;;  %v10032_v52 = vld [vmem:[%s17272_s0 + $0x300] sm:$0xff] }
 0x1c1   :  { %v11381_v24 = vpop.f32.mrf.mxu1  ;;  %v11449_v2 = vpop.f32.mrf.mxu0  ;;  %11692 = vmatmul.mubr.msk.f32.gmra.mxu0 %vm152_vm1, %v10029_v50  ;;  %11724 = vmatmul.mubr.msk.f32.gmra.mxu1 %vm152_vm1, %v10115_v41  ;;  %v10117_v50 = vld [vmem:[%s17272_s0 + $0xb1] sm:$0xff] }
 0x1c2   :  { %17458 = vst [vmem:[#allocation34_spill] sm:$0xff] %v14633_v43  ;;  %v14638_v10 = vadd.f32 %v11381_v24, %v17459_v4  ;;  %v14641_v0 = vadd.f32 %v11449_v2, %v14358_v46  ;;  %11694 = vmatprep.mubr.msk.f32.mxu0 %vm152_vm1, %v10030_v53  ;;  %11726 = vmatprep.mubr.msk.f32.mxu1 %vm152_vm1, %v10116_v13  ;;  %v10118_v46 = vld [vmem:[%s17272_s0 + $0xc1] sm:$0xff] }
 0x1c3   :  { %v2552_v16 = vpop.f32.mrf.mxu1  ;;  %v3162_v41 = vpop.f32.mrf.mxu0  ;;  %v17460_v2 = vld [vmem:[#allocation22_spill] sm:$0xff] }
 0x1c4   :  { %v14658_v53 = vadd.f32 %v2552_v16, %v14027_v23  ;;  %v14661_v13 = vadd.f32 %v3162_v41, %v14378_v22  ;;  %v10033_v23 = vld [vmem:[%s17272_s0 + $0x308] sm:$0xff]  ;;  %v10034_v16 = vld [vmem:[%s17272_s0 + $0x318] sm:$0xff] }
 0x1c5   :  { %v11384_v48 = vpop.f32.mrf.mxu1  ;;  %v11452_v24 = vpop.f32.mrf.mxu0  ;;  %11695 = vmatmul.mubr.msk.f32.gmra.mxu0 %vm152_vm1, %v10031_v21  ;;  %11727 = vmatmul.mubr.msk.f32.gmra.mxu1 %vm152_vm1, %v10117_v50  ;;  %v10119_v22 = vld [vmem:[%s17272_s0 + $0xc9] sm:$0xff] }
 0x1c6   :  { %v14666_v4 = vadd.f32 %v11384_v48, %v17460_v2  ;;  %v14669_v43 = vadd.f32 %v11452_v24, %v14386_v15  ;;  %11697 = vmatprep.mubr.msk.f32.mxu0 %vm152_vm1, %v10032_v52  ;;  %11729 = vmatprep.mubr.msk.f32.mxu1 %vm152_vm1, %v10118_v46  ;;  %v10120_v15 = vld [vmem:[%s17272_s0 + $0xd9] sm:$0xff] }
 0x1c7   :  { %v2562_v21 = vpop.f32.mrf.mxu1  ;;  %v3172_v50 = vpop.f32.mrf.mxu0 }
 0x1c8   :  { %v14686_v41 = vadd.f32 %v2562_v21, %v14055_v54  ;;  %v14689_v52 = vadd.f32 %v3172_v50, %v14406_v45  ;;  %v10035_v54 = vld [vmem:[%s17272_s0 + $0x320] sm:$0xff] }
 0x1c9   :  { %v11387_v46 = vpop.f32.mrf.mxu1  ;;  %v11455_v48 = vpop.f32.mrf.mxu0  ;;  %11698 = vmatmul.mubr.msk.f32.gmra.mxu0 %vm152_vm1, %v10033_v23  ;;  %11730 = vmatmul.mubr.msk.f32.gmra.mxu1 %vm152_vm1, %v10119_v22  ;;  %v10121_v45 = vld [vmem:[%s17272_s0 + $0xe1] sm:$0xff] }
 0x1ca   :  { %v14694_v24 = vadd.f32 %v11387_v46, %v14061_v38  ;;  %v14697_v2 = vadd.f32 %v11455_v48, %v14414_v35  ;;  %11700 = vmatprep.mubr.msk.f32.mxu0 %vm152_vm1, %v10034_v16  ;;  %11732 = vmatprep.mubr.msk.f32.mxu1 %vm152_vm1, %v10120_v15  ;;  %v10036_v38 = vld [vmem:[%s17272_s0 + $0x330] sm:$0xff] }
 0x1cb   :  { %v2572_v23 = vpop.f32.mrf.mxu1  ;;  %v3182_v22 = vpop.f32.mrf.mxu0  ;;  %v10122_v35 = vld [vmem:[%s17272_s0 + $0xf1] sm:$0xff] }
 0x1cc   :  { %v14714_v21 = vadd.f32 %v2572_v23, %v14082_v42  ;;  %v14717_v50 = vadd.f32 %v3182_v22, %v14434_v58  ;;  %v10037_v42 = vld [vmem:[%s17272_s0 + $0x338] sm:$0xff] }
 0x1cd   :  { %v11390_v16 = vpop.f32.mrf.mxu1  ;;  %v11458_v15 = vpop.f32.mrf.mxu0  ;;  %11701 = vmatmul.mubr.msk.f32.gmra.mxu0 %vm152_vm1, %v10035_v54  ;;  %11733 = vmatmul.mubr.msk.f32.gmra.mxu1 %vm152_vm1, %v10121_v45  ;;  %v10123_v58 = vld [vmem:[%s17272_s0 + $0xf9] sm:$0xff] }
 0x1ce   :  { %v14722_v46 = vadd.f32 %v11390_v16, %v14091_v55  ;;  %v14725_v48 = vadd.f32 %v11458_v15, %v14442_v57  ;;  %11703 = vmatprep.mubr.msk.f32.mxu0 %vm152_vm1, %v10036_v38  ;;  %11735 = vmatprep.mubr.msk.f32.mxu1 %vm152_vm1, %v10122_v35  ;;  %v10038_v55 = vld [vmem:[%s17272_s0 + $0x348] sm:$0xff] }
 0x1cf   :  { %v2582_v54 = vpop.f32.mrf.mxu1  ;;  %v3192_v45 = vpop.f32.mrf.mxu0  ;;  %v10124_v57 = vld [vmem:[%s17272_s0 + $0x109] sm:$0xff] }
 0x1d0   :  { %v14742_v23 = vadd.f32 %v2582_v54, %v14112_v12  ;;  %v14745_v22 = vadd.f32 %v3192_v45, %v14462_v32  ;;  %v10039_v12 = vld [vmem:[%s17272_s0 + $0x350] sm:$0xff] }
 0x1d1   :  { %v11393_v38 = vpop.f32.mrf.mxu1  ;;  %v11461_v35 = vpop.f32.mrf.mxu0  ;;  %11704 = vmatmul.mubr.msk.f32.gmra.mxu0 %vm152_vm1, %v10037_v42  ;;  %11736 = vmatmul.mubr.msk.f32.gmra.mxu1 %vm152_vm1, %v10123_v58  ;;  %v10125_v32 = vld [vmem:[%s17272_s0 + $0x111] sm:$0xff] }
 0x1d2   :  { %v14750_v16 = vadd.f32 %v11393_v38, %v14121_v61  ;;  %v14753_v15 = vadd.f32 %v11461_v35, %v14470_v17  ;;  %11706 = vmatprep.mubr.msk.f32.mxu0 %vm152_vm1, %v10038_v55  ;;  %11738 = vmatprep.mubr.msk.f32.mxu1 %vm152_vm1, %v10124_v57  ;;  %v10126_v61 = vld [vmem:[%s17272_s0 + $0x121] sm:$0xff]  ;;  %v10236_v17 = vld [vmem:[%s17272_s0 + $0x32] sm:$0xff] }
 0x1d3   :  { %v2592_v42 = vpop.f32.mrf.mxu1  ;;  %v3202_v58 = vpop.f32.mrf.mxu0 }
 0x1d4   :  { %v14770_v54 = vadd.f32 %v2592_v42, %v14142_v25  ;;  %v14773_v45 = vadd.f32 %v3202_v58, %v14490_v63  ;;  %v10127_v25 = vld [vmem:[%s17272_s0 + $0x129] sm:$0xff]  ;;  %v10237_v63 = vld [vmem:[%s17272_s0 + $0x3a] sm:$0xff] }
 0x1d5   :  { %v11396_v55 = vpop.f32.mrf.mxu1  ;;  %v11464_v57 = vpop.f32.mrf.mxu0  ;;  %11707 = vmatmul.mubr.msk.f32.gmra.mxu0 %vm152_vm1, %v10039_v12  ;;  %11739 = vmatmul.mubr.msk.f32.gmra.mxu1 %vm152_vm1, %v10125_v32 }
 0x1d6   :  { %v14778_v38 = vadd.f32 %v11396_v55, %v14151_v56  ;;  %v14781_v35 = vadd.f32 %v11464_v57, %v14498_v5  ;;  %11741 = vmatprep.mubr.msk.f32.mxu1 %vm152_vm1, %v10126_v61  ;;  %11809 = vmatprep.mubr.msk.f32.mxu0 %vm152_vm1, %v10236_v17  ;;  %v10128_v56 = vld [vmem:[%s17272_s0 + $0x139] sm:$0xff]  ;;  %v10238_v5 = vld [vmem:[%s17272_s0 + $0x4a] sm:$0xff] }
 0x1d7   :  { %v2602_v12 = vpop.f32.mrf.mxu1  ;;  %v3212_v32 = vpop.f32.mrf.mxu0 }
 0x1d8   :  { %v14798_v42 = vadd.f32 %v2602_v12, %v14172_v26  ;;  %v14801_v58 = vadd.f32 %v3212_v32, %v14518_v19  ;;  %v10129_v26 = vld [vmem:[%s17272_s0 + $0x141] sm:$0xff]  ;;  %v10239_v19 = vld [vmem:[%s17272_s0 + $0x52] sm:$0xff] }
 0x1d9   :  { %v11399_v61 = vpop.f32.mrf.mxu1  ;;  %v11467_v17 = vpop.f32.mrf.mxu0  ;;  %11742 = vmatmul.mubr.msk.f32.gmra.mxu1 %vm152_vm1, %v10127_v25  ;;  %11810 = vmatmul.mubr.msk.f32.vlgmr.msra.gmra.mxu0 %vm152_vm1, %v10237_v63 }
 0x1da   :  { %v14806_v55 = vadd.f32 %v11399_v61, %v14181_v37  ;;  %v14809_v57 = vadd.f32 %v11467_v17, %v14526_v20  ;;  %11744 = vmatprep.mubr.msk.f32.mxu1 %vm152_vm1, %v10128_v56  ;;  %11812 = vmatprep.mubr.msk.f32.mxu0 %vm152_vm1, %v10238_v5  ;;  %v10130_v37 = vld [vmem:[%s17272_s0 + $0x151] sm:$0xff]  ;;  %v10240_v20 = vld [vmem:[%s17272_s0 + $0x62] sm:$0xff] }
 0x1db   :  { %v2612_v25 = vpop.f32.mrf.mxu1  ;;  %v3222_v63 = vpop.f32.mrf.mxu0 }
 0x1dc   :  { %v14826_v12 = vadd.f32 %v2612_v25, %v14202_v33  ;;  %v14829_v32 = vadd.f32 %v3222_v63, %v14546_v40  ;;  %v10131_v33 = vld [vmem:[%s17272_s0 + $0x159] sm:$0xff]  ;;  %v10241_v40 = vld [vmem:[%s17272_s0 + $0x6a] sm:$0xff] }
 0x1dd   :  { %v11402_v56 = vpop.f32.mrf.mxu1  ;;  %v11470_v5 = vpop.f32.mrf.mxu0  ;;  %11745 = vmatmul.mubr.msk.f32.gmra.mxu1 %vm152_vm1, %v10129_v26  ;;  %11813 = vmatmul.mubr.msk.f32.gmra.mxu0 %vm152_vm1, %v10239_v19 }
 0x1de   :  { %v14834_v61 = vadd.f32 %v11402_v56, %v14211_v29  ;;  %v14837_v17 = vadd.f32 %v11470_v5, %v14554_v14  ;;  %11747 = vmatprep.mubr.msk.f32.mxu1 %vm152_vm1, %v10130_v37  ;;  %11815 = vmatprep.mubr.msk.f32.mxu0 %vm152_vm1, %v10240_v20  ;;  %v10132_v29 = vld [vmem:[%s17272_s0 + $0x169] sm:$0xff]  ;;  %v10242_v14 = vld [vmem:[%s17272_s0 + $0x7a] sm:$0xff] }
 0x1df   :  { %v2622_v26 = vpop.f32.mrf.mxu1  ;;  %v3232_v19 = vpop.f32.mrf.mxu0 }
 0x1e0   :  { %v14854_v25 = vadd.f32 %v2622_v26, %v14232_v39  ;;  %v14857_v63 = vadd.f32 %v3232_v19, %v14574_v11  ;;  %v10133_v39 = vld [vmem:[%s17272_s0 + $0x171] sm:$0xff]  ;;  %v10243_v11 = vld [vmem:[%s17272_s0 + $0x82] sm:$0xff] }
 0x1e1   :  { %v11405_v37 = vpop.f32.mrf.mxu1  ;;  %v11473_v20 = vpop.f32.mrf.mxu0  ;;  %11748 = vmatmul.mubr.msk.f32.gmra.mxu1 %vm152_vm1, %v10131_v33  ;;  %11816 = vmatmul.mubr.msk.f32.gmra.mxu0 %vm152_vm1, %v10241_v40 }
 0x1e2   :  { %v14862_v56 = vadd.f32 %v11405_v37, %v14241_v44  ;;  %v14865_v5 = vadd.f32 %v11473_v20, %v14582_v60  ;;  %11750 = vmatprep.mubr.msk.f32.mxu1 %vm152_vm1, %v10132_v29  ;;  %11818 = vmatprep.mubr.msk.f32.mxu0 %vm152_vm1, %v10242_v14  ;;  %v10134_v44 = vld [vmem:[%s17272_s0 + $0x181] sm:$0xff]  ;;  %v10244_v60 = vld [vmem:[%s17272_s0 + $0x92] sm:$0xff] }
 0x1e3   :  { %v2632_v33 = vpop.f32.mrf.mxu1  ;;  %v3242_v40 = vpop.f32.mrf.mxu0 }
 0x1e4   :  { %v14882_v26 = vadd.f32 %v2632_v33, %v14262_v51  ;;  %v14885_v19 = vadd.f32 %v3242_v40, %v14602_v9  ;;  %v10135_v51 = vld [vmem:[%s17272_s0 + $0x189] sm:$0xff]  ;;  %v10245_v9 = vld [vmem:[%s17272_s0 + $0x9a] sm:$0xff] }
 0x1e5   :  { %v11408_v29 = vpop.f32.mrf.mxu1  ;;  %v11476_v14 = vpop.f32.mrf.mxu0  ;;  %11751 = vmatmul.mubr.msk.f32.gmra.mxu1 %vm152_vm1, %v10133_v39  ;;  %11819 = vmatmul.mubr.msk.f32.gmra.mxu0 %vm152_vm1, %v10243_v11 }
 0x1e6   :  { %v14890_v37 = vadd.f32 %v11408_v29, %v14271_v3  ;;  %v14893_v20 = vadd.f32 %v11476_v14, %v14610_v59  ;;  %11753 = vmatprep.mubr.msk.f32.mxu1 %vm152_vm1, %v10134_v44  ;;  %11821 = vmatprep.mubr.msk.f32.mxu0 %vm152_vm1, %v10244_v60  ;;  %v10136_v3 = vld [vmem:[%s17272_s0 + $0x199] sm:$0xff]  ;;  %v10246_v59 = vld [vmem:[%s17272_s0 + $0xaa] sm:$0xff] }
 0x1e7   :  { %v2642_v39 = vpop.f32.mrf.mxu1  ;;  %v3252_v11 = vpop.f32.mrf.mxu0 }
 0x1e8   :  { %v14910_v33 = vadd.f32 %v2642_v39, %v14292_v36  ;;  %v14913_v40 = vadd.f32 %v3252_v11, %v14630_v47  ;;  %v10137_v36 = vld [vmem:[%s17272_s0 + $0x1a1] sm:$0xff]  ;;  %v10247_v47 = vld [vmem:[%s17272_s0 + $0xb2] sm:$0xff] }
 0x1e9   :  { %v11411_v44 = vpop.f32.mrf.mxu1  ;;  %v11479_v60 = vpop.f32.mrf.mxu0  ;;  %11754 = vmatmul.mubr.msk.f32.gmra.mxu1 %vm152_vm1, %v10135_v51  ;;  %11822 = vmatmul.mubr.msk.f32.gmra.mxu0 %vm152_vm1, %v10245_v9 }
 0x1ea   :  { %v14918_v29 = vadd.f32 %v11411_v44, %v14301_v27  ;;  %v14921_v14 = vadd.f32 %v11479_v60, %v14638_v10  ;;  %11756 = vmatprep.mubr.msk.f32.mxu1 %vm152_vm1, %v10136_v3  ;;  %11824 = vmatprep.mubr.msk.f32.mxu0 %vm152_vm1, %v10246_v59  ;;  %v10138_v27 = vld [vmem:[%s17272_s0 + $0x1e1] sm:$0xff] }
 0x1eb   :  { %v2652_v51 = vpop.f32.mrf.mxu1  ;;  %v3262_v9 = vpop.f32.mrf.mxu0  ;;  %v10248_v10 = vld [vmem:[%s17272_s0 + $0xc2] sm:$0xff] }
 0x1ec   :  { %v14938_v39 = vadd.f32 %v2652_v51, %v14322_v49  ;;  %v14941_v11 = vadd.f32 %v3262_v9, %v14658_v53  ;;  %v10139_v49 = vld [vmem:[%s17272_s0 + $0x1e9] sm:$0xff] }
 0x1ed   :  { %v11414_v3 = vpop.f32.mrf.mxu1  ;;  %v11482_v59 = vpop.f32.mrf.mxu0  ;;  %11757 = vmatmul.mubr.msk.f32.gmra.mxu1 %vm152_vm1, %v10137_v36  ;;  %11825 = vmatmul.mubr.msk.f32.gmra.mxu0 %vm152_vm1, %v10247_v47  ;;  %v10249_v53 = vld [vmem:[%s17272_s0 + $0xca] sm:$0xff] }
 0x1ee   :  { %v14946_v44 = vadd.f32 %v11414_v3, %v14331_v31  ;;  %v14949_v60 = vadd.f32 %v11482_v59, %v14666_v4  ;;  %11759 = vmatprep.mubr.msk.f32.mxu1 %vm152_vm1, %v10138_v27  ;;  %11827 = vmatprep.mubr.msk.f32.mxu0 %vm152_vm1, %v10248_v10  ;;  %v10140_v31 = vld [vmem:[%s17272_s0 + $0x1f9] sm:$0xff] }
 0x1ef   :  { %v2662_v36 = vpop.f32.mrf.mxu1  ;;  %v3272_v47 = vpop.f32.mrf.mxu0  ;;  %v10250_v4 = vld [vmem:[%s17272_s0 + $0xda] sm:$0xff] }
 0x1f0   :  { %v14966_v51 = vadd.f32 %v2662_v36, %v14350_v62  ;;  %v14969_v9 = vadd.f32 %v3272_v47, %v14686_v41  ;;  %v10141_v62 = vld [vmem:[%s17272_s0 + $0x201] sm:$0xff] }
 0x1f1   :  { %v11485_v27 = vpop.f32.mrf.mxu0  ;;  %v11517_v10 = vpop.f32.mrf.mxu1  ;;  %11760 = vmatmul.mubr.msk.f32.gmra.mxu1 %vm152_vm1, %v10139_v49  ;;  %11828 = vmatmul.mubr.msk.f32.gmra.mxu0 %vm152_vm1, %v10249_v53  ;;  %v10251_v41 = vld [vmem:[%s17272_s0 + $0xe2] sm:$0xff] }
 0x1f2   :  { %v14974_v3 = vadd.f32 %v11485_v27, %v14694_v24  ;;  %v14977_v59 = vadd.f32 %v11517_v10, %v14361_v1  ;;  %11762 = vmatprep.mubr.msk.f32.mxu1 %vm152_vm1, %v10140_v31  ;;  %11830 = vmatprep.mubr.msk.f32.mxu0 %vm152_vm1, %v10250_v4  ;;  %v10142_v24 = vld [vmem:[%s17272_s0 + $0x211] sm:$0xff] }
 0x1f3   :  { %v3282_v49 = vpop.f32.mrf.mxu0  ;;  %v3772_v53 = vpop.f32.mrf.mxu1  ;;  %v10252_v1 = vld [vmem:[%s17272_s0 + $0xf2] sm:$0xff] }
 0x1f4   :  { %v14994_v36 = vadd.f32 %v3282_v49, %v14714_v21  ;;  %v14997_v47 = vadd.f32 %v3772_v53, %v14381_v28  ;;  %v10143_v28 = vld [vmem:[%s17272_s0 + $0x219] sm:$0xff] }
 0x1f5   :  { %v11488_v31 = vpop.f32.mrf.mxu0  ;;  %v11520_v4 = vpop.f32.mrf.mxu1  ;;  %11763 = vmatmul.mubr.msk.f32.gmra.mxu1 %vm152_vm1, %v10141_v62  ;;  %11831 = vmatmul.mubr.msk.f32.gmra.mxu0 %vm152_vm1, %v10251_v41  ;;  %v10253_v21 = vld [vmem:[%s17272_s0 + $0xfa] sm:$0xff] }
 0x1f6   :  { %v15002_v27 = vadd.f32 %v11488_v31, %v14722_v46  ;;  %v15005_v10 = vadd.f32 %v11520_v4, %v14389_v7  ;;  %11765 = vmatprep.mubr.msk.f32.mxu1 %vm152_vm1, %v10142_v24  ;;  %11833 = vmatprep.mubr.msk.f32.mxu0 %vm152_vm1, %v10252_v1  ;;  %v10144_v46 = vld [vmem:[%s17272_s0 + $0x229] sm:$0xff] }
 0x1f7   :  { %v3292_v62 = vpop.f32.mrf.mxu0  ;;  %v3782_v41 = vpop.f32.mrf.mxu1  ;;  %v10254_v7 = vld [vmem:[%s17272_s0 + $0x10a] sm:$0xff] }
 0x1f8   :  { %v15022_v49 = vadd.f32 %v3292_v62, %v14742_v23  ;;  %v15025_v53 = vadd.f32 %v3782_v41, %v14409_v34  ;;  %v10145_v34 = vld [vmem:[%s17272_s0 + $0x231] sm:$0xff] }
 0x1f9   :  { %v11491_v24 = vpop.f32.mrf.mxu0  ;;  %v11523_v1 = vpop.f32.mrf.mxu1  ;;  %11766 = vmatmul.mubr.msk.f32.gmra.mxu1 %vm152_vm1, %v10143_v28  ;;  %11834 = vmatmul.mubr.msk.f32.gmra.mxu0 %vm152_vm1, %v10253_v21  ;;  %v10255_v23 = vld [vmem:[%s17272_s0 + $0x112] sm:$0xff] }
 0x1fa   :  { %v15030_v31 = vadd.f32 %v11491_v24, %v14750_v16  ;;  %v15033_v4 = vadd.f32 %v11523_v1, %v14417_v6  ;;  %11768 = vmatprep.mubr.msk.f32.mxu1 %vm152_vm1, %v10144_v46  ;;  %11836 = vmatprep.mubr.msk.f32.mxu0 %vm152_vm1, %v10254_v7  ;;  %v10146_v16 = vld [vmem:[%s17272_s0 + $0x241] sm:$0xff] }
 0x1fb   :  { %v3302_v28 = vpop.f32.mrf.mxu0  ;;  %v3792_v21 = vpop.f32.mrf.mxu1  ;;  %v10256_v6 = vld [vmem:[%s17272_s0 + $0x122] sm:$0xff] }
 0x1fc   :  { %v15050_v62 = vadd.f32 %v3302_v28, %v14770_v54  ;;  %v15053_v41 = vadd.f32 %v3792_v21, %v14437_v18  ;;  %v10147_v18 = vld [vmem:[%s17272_s0 + $0x249] sm:$0xff] }
 0x1fd   :  { %v11494_v46 = vpop.f32.mrf.mxu0  ;;  %v11526_v7 = vpop.f32.mrf.mxu1  ;;  %11769 = vmatmul.mubr.msk.f32.gmra.mxu1 %vm152_vm1, %v10145_v34  ;;  %11837 = vmatmul.mubr.msk.f32.gmra.mxu0 %vm152_vm1, %v10255_v23  ;;  %v10257_v54 = vld [vmem:[%s17272_s0 + $0x12a] sm:$0xff] }
 0x1fe   :  { %v15058_v24 = vadd.f32 %v11494_v46, %v14778_v38  ;;  %v15061_v1 = vadd.f32 %v11526_v7, %v14445_v30  ;;  %11771 = vmatprep.mubr.msk.f32.mxu1 %vm152_vm1, %v10146_v16  ;;  %11839 = vmatprep.mubr.msk.f32.mxu0 %vm152_vm1, %v10256_v6  ;;  %v10148_v38 = vld [vmem:[%s17272_s0 + $0x259] sm:$0xff]  ;;  %v17464_v7 = vld [vmem:[#allocation23_spill] sm:$0xff] }
 0x1ff   :  { %v3312_v34 = vpop.f32.mrf.mxu0  ;;  %v3802_v23 = vpop.f32.mrf.mxu1  ;;  %v10258_v30 = vld [vmem:[%s17272_s0 + $0x13a] sm:$0xff] }
 0x200   :  { %17461 = vst [vmem:[#allocation35_spill] sm:$0xff] %v15058_v24  ;;  %v15078_v28 = vadd.f32 %v3312_v34, %v14798_v42  ;;  %v15081_v21 = vadd.f32 %v3802_v23, %v14465_v8  ;;  %v10149_v8 = vld [vmem:[%s17272_s0 + $0x261] sm:$0xff]  ;;  %v10260_v34 = vld [vmem:[%s17272_s0 + $0x152] sm:$0xff] }
 0x201   :  { %v11497_v16 = vpop.f32.mrf.mxu0  ;;  %v11529_v6 = vpop.f32.mrf.mxu1  ;;  %11772 = vmatmul.mubr.msk.f32.gmra.mxu1 %vm152_vm1, %v10147_v18  ;;  %11840 = vmatmul.mubr.msk.f32.gmra.mxu0 %vm152_vm1, %v10257_v54  ;;  %v10259_v42 = vld [vmem:[%s17272_s0 + $0x142] sm:$0xff] }
 0x202   :  { %17462 = vst [vmem:[#allocation36_spill] sm:$0xff] %v15078_v28  ;;  %v15086_v46 = vadd.f32 %v11497_v16, %v14806_v55  ;;  %v15089_v24 = vadd.f32 %v11529_v6, %v17464_v7  ;;  %11774 = vmatprep.mubr.msk.f32.mxu1 %vm152_vm1, %v10148_v38  ;;  %11842 = vmatprep.mubr.msk.f32.mxu0 %vm152_vm1, %v10258_v30  ;;  %v10150_v55 = vld [vmem:[%s17272_s0 + $0x271] sm:$0xff] }
 0x203   :  { %v3322_v18 = vpop.f32.mrf.mxu0  ;;  %v3812_v54 = vpop.f32.mrf.mxu1  ;;  %v17466_v38 = vld [vmem:[#allocation24_spill] sm:$0xff] }
 0x204   :  { %17463 = vst [vmem:[#allocation37_spill] sm:$0xff] %v15086_v46  ;;  %v15106_v23 = vadd.f32 %v3322_v18, %v14826_v12  ;;  %v15109_v30 = vadd.f32 %v3812_v54, %v17466_v38  ;;  %v17468_v46 = vld [vmem:[#allocation25_spill] sm:$0xff] }
 0x205   :  { %v11500_v16 = vpop.f32.mrf.mxu0  ;;  %v11532_v6 = vpop.f32.mrf.mxu1  ;;  %11775 = vmatmul.mubr.msk.f32.gmra.mxu1 %vm152_vm1, %v10149_v8  ;;  %11843 = vmatmul.mubr.msk.f32.gmra.mxu0 %vm152_vm1, %v10259_v42  ;;  %v10151_v12 = vld [vmem:[%s17272_s0 + $0x279] sm:$0xff] }
 0x206   :  { %17465 = vst [vmem:[#allocation38_spill] sm:$0xff] %v15106_v23  ;;  %v15114_v7 = vadd.f32 %v11500_v16, %v14834_v61  ;;  %v15117_v28 = vadd.f32 %v11532_v6, %v17468_v46  ;;  %11777 = vmatprep.mubr.msk.f32.mxu1 %vm152_vm1, %v10150_v55  ;;  %11845 = vmatprep.mubr.msk.f32.mxu0 %vm152_vm1, %v10260_v34  ;;  %v10261_v8 = vld [vmem:[%s17272_s0 + $0x15a] sm:$0xff]  ;;  %v10152_v61 = vld [vmem:[%s17272_s0 + $0x289] sm:$0xff] }
 0x207   :  { %v3332_v18 = vpop.f32.mrf.mxu0  ;;  %v3822_v42 = vpop.f32.mrf.mxu1  ;;  %v10262_v46 = vld [vmem:[%s17272_s0 + $0x16a] sm:$0xff]  ;;  %v17470_v55 = vld [vmem:[#allocation26_spill] sm:$0xff] }
 0x208   :  { %17467 = vst [vmem:[#allocation39_spill] sm:$0xff] %v15114_v7  ;;  %v15134_v54 = vadd.f32 %v3332_v18, %v14854_v25  ;;  %v15137_v34 = vadd.f32 %v3822_v42, %v17470_v55  ;;  %v17472_v7 = vld [vmem:[#allocation27_spill] sm:$0xff] }
 0x209   :  { %v11503_v38 = vpop.f32.mrf.mxu0  ;;  %v11535_v16 = vpop.f32.mrf.mxu1  ;;  %11778 = vmatmul.mubr.msk.f32.gmra.mxu1 %vm152_vm1, %v10151_v12  ;;  %11846 = vmatmul.mubr.msk.f32.gmra.mxu0 %vm152_vm1, %v10261_v8  ;;  %v10153_v25 = vld [vmem:[%s17272_s0 + $0x291] sm:$0xff] }
 0x20a   :  { %17469 = vst [vmem:[#allocation40_spill] sm:$0xff] %v15134_v54  ;;  %v15142_v6 = vadd.f32 %v11503_v38, %v14862_v56  ;;  %v15145_v23 = vadd.f32 %v11535_v16, %v17472_v7  ;;  %11780 = vmatprep.mubr.msk.f32.mxu1 %vm152_vm1, %v10152_v61  ;;  %11848 = vmatprep.mubr.msk.f32.mxu0 %vm152_vm1, %v10262_v46  ;;  %v10263_v12 = vld [vmem:[%s17272_s0 + $0x172] sm:$0xff]  ;;  %v10154_v56 = vld [vmem:[%s17272_s0 + $0x2a1] sm:$0xff] }
 0x20b   :  { %v3342_v18 = vpop.f32.mrf.mxu0  ;;  %v3832_v8 = vpop.f32.mrf.mxu1  ;;  %v10264_v7 = vld [vmem:[%s17272_s0 + $0x182] sm:$0xff]  ;;  %v17474_v61 = vld [vmem:[#allocation28_spill] sm:$0xff] }
 0x20c   :  { %17471 = vst [vmem:[#allocation41_spill] sm:$0xff] %v15142_v6  ;;  %v15162_v42 = vadd.f32 %v3342_v18, %v14882_v26  ;;  %v15165_v46 = vadd.f32 %v3832_v8, %v17474_v61  ;;  %v17476_v6 = vld [vmem:[#allocation29_spill] sm:$0xff]  ;;  %v10155_v26 = vld [vmem:[%s17272_s0 + $0x2a9] sm:$0xff] }
 0x20d   :  { %v11506_v55 = vpop.f32.mrf.mxu0  ;;  %v11538_v38 = vpop.f32.mrf.mxu1  ;;  %11781 = vmatmul.mubr.msk.f32.gmra.mxu1 %vm152_vm1, %v10153_v25  ;;  %11849 = vmatmul.mubr.msk.f32.gmra.mxu0 %vm152_vm1, %v10263_v12  ;;  %v10265_v25 = vld [vmem:[%s17272_s0 + $0x18a] sm:$0xff] }
 0x20e   :  { %17473 = vst [vmem:[#allocation42_spill] sm:$0xff] %v15162_v42  ;;  %v15170_v16 = vadd.f32 %v11506_v55, %v14890_v37  ;;  %v15173_v54 = vadd.f32 %v11538_v38, %v17476_v6  ;;  %11783 = vmatprep.mubr.msk.f32.mxu1 %vm152_vm1, %v10154_v56  ;;  %11851 = vmatprep.mubr.msk.f32.mxu0 %vm152_vm1, %v10264_v7  ;;  %v10156_v37 = vld [vmem:[%s17272_s0 + $0x2b9] sm:$0xff]  ;;  %v17477_v56 = vld [vmem:[#allocation30_spill] sm:$0xff] }
 0x20f   :  { %v3352_v18 = vpop.f32.mrf.mxu0  ;;  %v3842_v12 = vpop.f32.mrf.mxu1  ;;  %v10266_v6 = vld [vmem:[%s17272_s0 + $0x19a] sm:$0xff] }
 0x210   :  { %17475 = vst [vmem:[#allocation43_spill] sm:$0xff] %v15170_v16  ;;  %v15190_v8 = vadd.f32 %v3352_v18, %v14910_v33  ;;  %v15193_v7 = vadd.f32 %v3842_v12, %v17477_v56  ;;  %v17478_v16 = vld [vmem:[#allocation31_spill] sm:$0xff]  ;;  %v10157_v33 = vld [vmem:[%s17272_s0 + $0x2c1] sm:$0xff] }
 0x211   :  { %v11509_v61 = vpop.f32.mrf.mxu0  ;;  %v11541_v55 = vpop.f32.mrf.mxu1  ;;  %11784 = vmatmul.mubr.msk.f32.gmra.mxu1 %vm152_vm1, %v10155_v26  ;;  %11852 = vmatmul.mubr.msk.f32.gmra.mxu0 %vm152_vm1, %v10265_v25  ;;  %v10267_v26 = vld [vmem:[%s17272_s0 + $0x1a2] sm:$0xff] }
 0x212   :  { %v15198_v38 = vadd.f32 %v11509_v61, %v14918_v29  ;;  %v15201_v42 = vadd.f32 %v11541_v55, %v17478_v16  ;;  %11786 = vmatprep.mubr.msk.f32.mxu1 %vm152_vm1, %v10156_v37  ;;  %11854 = vmatprep.mubr.msk.f32.mxu0 %vm152_vm1, %v10266_v6  ;;  %v10158_v29 = vld [vmem:[%s17272_s0 + $0x2d1] sm:$0xff]  ;;  %v10268_v16 = vld [vmem:[%s17272_s0 + $0x1e2] sm:$0xff]  ;;  %v17480_v61 = vld [vmem:[#allocation33_spill] sm:$0xff] }
 0x213   :  { %v3362_v18 = vpop.f32.mrf.mxu0  ;;  %v15211_v25 = vpop.f32.mrf.mxu1 }
 0x214   :  { %v15220_v12 = vadd.f32 %v3362_v18, %v14938_v39  ;;  %v10159_v39 = vld [vmem:[%s17272_s0 + $0x2d9] sm:$0xff] }
 0x215   :  { %v11512_v37 = vpop.f32.mrf.mxu0  ;;  %v11544_v6 = vpop.f32.mrf.mxu1  ;;  %11787 = vmatmul.mubr.msk.f32.gmra.mxu1 %vm152_vm1, %v10157_v33  ;;  %11855 = vmatmul.mubr.msk.f32.gmra.mxu0 %vm152_vm1, %v10267_v26  ;;  %v10269_v33 = vld [vmem:[%s17272_s0 + $0x1ea] sm:$0xff] }
 0x216   :  { %v15225_v56 = vadd.f32 %v11512_v37, %v14946_v44  ;;  %v15228_v55 = vadd.f32 %v11544_v6, %v17480_v61  ;;  %11789 = vmatprep.mubr.msk.f32.mxu1 %vm152_vm1, %v10158_v29  ;;  %11857 = vmatprep.mubr.msk.f32.mxu0 %vm152_vm1, %v10268_v16  ;;  %v10160_v44 = vld [vmem:[%s17272_s0 + $0x2e9] sm:$0xff]  ;;  %v10270_v29 = vld [vmem:[%s17272_s0 + $0x1fa] sm:$0xff] }
 0x217   :  { %v3372_v18 = vpop.f32.mrf.mxu0  ;;  %v15238_v26 = vpop.f32.mrf.mxu1 }
 0x218   :  { %17479 = vst [vmem:[#allocation44_spill] sm:$0xff] %v15225_v56  ;;  %v15247_v16 = vadd.f32 %v3372_v18, %v14966_v51  ;;  %v10161_v51 = vld [vmem:[%s17272_s0 + $0x2f1] sm:$0xff] }
 0x219   :  { %v11547_v37 = vpop.f32.mrf.mxu1  ;;  %v11615_v6 = vpop.f32.mrf.mxu0  ;;  %11790 = vmatmul.mubr.msk.f32.gmra.mxu1 %vm152_vm1, %v10159_v39  ;;  %11858 = vmatmul.mubr.msk.f32.gmra.mxu0 %vm152_vm1, %v10269_v33  ;;  %v10271_v39 = vld [vmem:[%s17272_s0 + $0x202] sm:$0xff] }
 0x21a   :  { %17481 = vst [vmem:[#allocation45_spill] sm:$0xff] %v15247_v16  ;;  %v15252_v61 = vadd.f32 %v11547_v37, %v14641_v0  ;;  %v15255_v56 = vadd.f32 %v11615_v6, %v14977_v59  ;;  %11792 = vmatprep.mubr.msk.f32.mxu1 %vm152_vm1, %v10160_v44  ;;  %11860 = vmatprep.mubr.msk.f32.mxu0 %vm152_vm1, %v10270_v29  ;;  %v10162_v0 = vld [vmem:[%s17272_s0 + $0x301] sm:$0xff]  ;;  %v10272_v59 = vld [vmem:[%s17272_s0 + $0x212] sm:$0xff] }
 0x21b   :  { %v3872_v18 = vpop.f32.mrf.mxu1  ;;  %v4483_v33 = vpop.f32.mrf.mxu0 }
 0x21c   :  { %17482 = vst [vmem:[#allocation46_spill] sm:$0xff] %v15255_v56  ;;  %v15272_v44 = vadd.f32 %v3872_v18, %v14661_v13  ;;  %v15275_v29 = vadd.f32 %v4483_v33, %v14997_v47  ;;  %v10163_v13 = vld [vmem:[%s17272_s0 + $0x309] sm:$0xff]  ;;  %v10273_v47 = vld [vmem:[%s17272_s0 + $0x21a] sm:$0xff] }
 0x21d   :  { %v11550_v37 = vpop.f32.mrf.mxu1  ;;  %v11618_v6 = vpop.f32.mrf.mxu0  ;;  %11793 = vmatmul.mubr.msk.f32.gmra.mxu1 %vm152_vm1, %v10161_v51  ;;  %11861 = vmatmul.mubr.msk.f32.gmra.mxu0 %vm152_vm1, %v10271_v39 }
 0x21e   :  { %v15280_v56 = vadd.f32 %v11550_v37, %v14669_v43  ;;  %v15283_v16 = vadd.f32 %v11618_v6, %v15005_v10  ;;  %11795 = vmatprep.mubr.msk.f32.mxu1 %vm152_vm1, %v10162_v0  ;;  %11863 = vmatprep.mubr.msk.f32.mxu0 %vm152_vm1, %v10272_v59  ;;  %v10164_v43 = vld [vmem:[%s17272_s0 + $0x319] sm:$0xff]  ;;  %v10274_v10 = vld [vmem:[%s17272_s0 + $0x22a] sm:$0xff] }
 0x21f   :  { %v3882_v51 = vpop.f32.mrf.mxu1  ;;  %v4493_v39 = vpop.f32.mrf.mxu0 }
 0x220   :  { %v15300_v18 = vadd.f32 %v3882_v51, %v14689_v52  ;;  %v15303_v33 = vadd.f32 %v4493_v39, %v15025_v53  ;;  %v10165_v52 = vld [vmem:[%s17272_s0 + $0x321] sm:$0xff]  ;;  %v10275_v53 = vld [vmem:[%s17272_s0 + $0x232] sm:$0xff] }
 0x221   :  { %v11553_v0 = vpop.f32.mrf.mxu1  ;;  %v11621_v59 = vpop.f32.mrf.mxu0  ;;  %11796 = vmatmul.mubr.msk.f32.gmra.mxu1 %vm152_vm1, %v10163_v13  ;;  %11864 = vmatmul.mubr.msk.f32.gmra.mxu0 %vm152_vm1, %v10273_v47 }
 0x222   :  { %v15308_v37 = vadd.f32 %v11553_v0, %v14697_v2  ;;  %v15311_v6 = vadd.f32 %v11621_v59, %v15033_v4  ;;  %11798 = vmatprep.mubr.msk.f32.mxu1 %vm152_vm1, %v10164_v43  ;;  %11866 = vmatprep.mubr.msk.f32.mxu0 %vm152_vm1, %v10274_v10  ;;  %v10166_v2 = vld [vmem:[%s17272_s0 + $0x331] sm:$0xff]  ;;  %v10276_v4 = vld [vmem:[%s17272_s0 + $0x242] sm:$0xff] }
 0x223   :  { %v3892_v13 = vpop.f32.mrf.mxu1  ;;  %v4503_v47 = vpop.f32.mrf.mxu0 }
 0x224   :  { %v15328_v51 = vadd.f32 %v3892_v13, %v14717_v50  ;;  %v15331_v39 = vadd.f32 %v4503_v47, %v15053_v41  ;;  %v10167_v50 = vld [vmem:[%s17272_s0 + $0x339] sm:$0xff]  ;;  %v10277_v41 = vld [vmem:[%s17272_s0 + $0x24a] sm:$0xff] }
 0x225   :  { %v11556_v43 = vpop.f32.mrf.mxu1  ;;  %v11624_v10 = vpop.f32.mrf.mxu0  ;;  %11799 = vmatmul.mubr.msk.f32.gmra.mxu1 %vm152_vm1, %v10165_v52  ;;  %11867 = vmatmul.mubr.msk.f32.gmra.mxu0 %vm152_vm1, %v10275_v53 }
 0x226   :  { %v15336_v0 = vadd.f32 %v11556_v43, %v14725_v48  ;;  %v15339_v59 = vadd.f32 %v11624_v10, %v15061_v1  ;;  %11801 = vmatprep.mubr.msk.f32.mxu1 %vm152_vm1, %v10166_v2  ;;  %11869 = vmatprep.mubr.msk.f32.mxu0 %vm152_vm1, %v10276_v4  ;;  %v10168_v48 = vld [vmem:[%s17272_s0 + $0x349] sm:$0xff]  ;;  %v10278_v1 = vld [vmem:[%s17272_s0 + $0x25a] sm:$0xff] }
 0x227   :  { %v3902_v52 = vpop.f32.mrf.mxu1  ;;  %v4513_v53 = vpop.f32.mrf.mxu0 }
 0x228   :  { %v15356_v13 = vadd.f32 %v3902_v52, %v14745_v22  ;;  %v15359_v47 = vadd.f32 %v4513_v53, %v15081_v21  ;;  %v10169_v22 = vld [vmem:[%s17272_s0 + $0x351] sm:$0xff]  ;;  %v10279_v21 = vld [vmem:[%s17272_s0 + $0x262] sm:$0xff] }
 0x229   :  { %v11559_v2 = vpop.f32.mrf.mxu1  ;;  %v11627_v4 = vpop.f32.mrf.mxu0  ;;  %11802 = vmatmul.mubr.msk.f32.gmra.mxu1 %vm152_vm1, %v10167_v50  ;;  %11870 = vmatmul.mubr.msk.f32.gmra.mxu0 %vm152_vm1, %v10277_v41 }
 0x22a   :  { %v15364_v43 = vadd.f32 %v11559_v2, %v14753_v15  ;;  %v15367_v10 = vadd.f32 %v11627_v4, %v15089_v24  ;;  %11804 = vmatprep.mubr.msk.f32.mxu1 %vm152_vm1, %v10168_v48  ;;  %11872 = vmatprep.mubr.msk.f32.mxu0 %vm152_vm1, %v10278_v1  ;;  %v10280_v15 = vld [vmem:[%s17272_s0 + $0x272] sm:$0xff] }
 0x22b   :  { %v3912_v50 = vpop.f32.mrf.mxu1  ;;  %v4523_v41 = vpop.f32.mrf.mxu0 }
 0x22c   :  { %v15381_v24 = vadd.f32 %v3912_v50, %v14773_v45  ;;  %v15384_v52 = vadd.f32 %v4523_v41, %v15109_v30  ;;  %v10281_v45 = vld [vmem:[%s17272_s0 + $0x27a] sm:$0xff] }
 0x22d   :  { %v11562_v53 = vpop.f32.mrf.mxu1  ;;  %v11630_v48 = vpop.f32.mrf.mxu0  ;;  %11805 = vmatmul.mubr.msk.f32.gmra.mxu1 %vm152_vm1, %v10169_v22  ;;  %11873 = vmatmul.mubr.msk.f32.gmra.mxu0 %vm152_vm1, %v10279_v21  ;;  %v10282_v22 = vld [vmem:[%s17272_s0 + $0x28a] sm:$0xff] }
 0x22e   :  { %v15389_v1 = vadd.f32 %v11562_v53, %v14781_v35  ;;  %v15392_v2 = vadd.f32 %v11630_v48, %v15117_v28  ;;  %11875 = vmatprep.mubr.msk.f32.mxu0 %vm152_vm1, %v10280_v15 }
 0x22f   :  { %v3922_v30 = vpop.f32.mrf.mxu1  ;;  %v4533_v4 = vpop.f32.mrf.mxu0 }
 0x230   :  { %v15402_v21 = vadd.f32 %v3922_v30, %v14801_v58  ;;  %v15405_v35 = vadd.f32 %v4533_v4, %v15137_v34  ;;  %v10283_v58 = vld [vmem:[%s17272_s0 + $0x292] sm:$0xff]  ;;  %v10284_v34 = vld [vmem:[%s17272_s0 + $0x2a2] sm:$0xff] }
 0x231   :  { %v11565_v28 = vpop.f32.mrf.mxu1  ;;  %v11633_v50 = vpop.f32.mrf.mxu0  ;;  %11876 = vmatmul.mubr.msk.f32.gmra.mxu0 %vm152_vm1, %v10281_v45 }
 0x232   :  { %v15409_v41 = vadd.f32 %v11565_v28, %v14809_v57  ;;  %v15412_v15 = vadd.f32 %v11633_v50, %v15145_v23  ;;  %11878 = vmatprep.mubr.msk.f32.mxu0 %vm152_vm1, %v10282_v22 }
 0x233   :  { %v3932_v53 = vpop.f32.mrf.mxu1  ;;  %v4543_v48 = vpop.f32.mrf.mxu0 }
 0x234   :  { %v15422_v45 = vadd.f32 %v3932_v53, %v14829_v32  ;;  %v15425_v57 = vadd.f32 %v4543_v48, %v15165_v46  ;;  %v10285_v32 = vld [vmem:[%s17272_s0 + $0x2aa] sm:$0xff]  ;;  %v10286_v46 = vld [vmem:[%s17272_s0 + $0x2ba] sm:$0xff]  ;;  %v17483_v48 = vld [vmem:[#allocation32_spill] sm:$0xff] }
 0x235   :  { %v11568_v23 = vpop.f32.mrf.mxu1  ;;  %v11636_v30 = vpop.f32.mrf.mxu0  ;;  %11879 = vmatmul.mubr.msk.f32.gmra.mxu0 %vm152_vm1, %v10283_v58 }
 0x236   :  { %v15429_v4 = vadd.f32 %v11568_v23, %v14837_v17  ;;  %v15432_v22 = vadd.f32 %v11636_v30, %v15173_v54  ;;  %11881 = vmatprep.mubr.msk.f32.mxu0 %vm152_vm1, %v10284_v34  ;;  %v4107_v34 = vadd.f32 %v15211_v25, %v17483_v48 }
 0x237   :  { %v3942_v28 = vpop.f32.mrf.mxu1  ;;  %v4553_v50 = vpop.f32.mrf.mxu0 }
 0x238   :  { %v15442_v58 = vadd.f32 %v3942_v28, %v14857_v63  ;;  %v15445_v17 = vadd.f32 %v4553_v50, %v15193_v7  ;;  %v10287_v63 = vld [vmem:[%s17272_s0 + $0x2c2] sm:$0xff] }
 0x239   :  { %v11571_v54 = vpop.f32.mrf.mxu1  ;;  %v11639_v53 = vpop.f32.mrf.mxu0  ;;  %11882 = vmatmul.mubr.msk.f32.gmra.mxu0 %vm152_vm1, %v10285_v32  ;;  %v10288_v32 = vld [vmem:[%s17272_s0 + $0x2d2] sm:$0xff] }
 0x23a   :  { %v15451_v23 = vadd.f32 %v11571_v54, %v14865_v5  ;;  %v15454_v30 = vadd.f32 %v11639_v53, %v15201_v42  ;;  %11884 = vmatprep.mubr.msk.f32.mxu0 %vm152_vm1, %v10286_v46  ;;  %v17484_v46 = vld [vmem:[#allocation34_spill] sm:$0xff] }
 0x23b   :  { %v3952_v7 = vpop.f32.mrf.mxu1  ;;  %v4563_v28 = vpop.f32.mrf.mxu0  ;;  %v4109_v54 = vadd.f32 %v15238_v26, %v17484_v46 }
 0x23c   :  { %v15464_v25 = vadd.f32 %v3952_v7, %v14885_v19  ;;  %v15466_v5 = vadd.f32 %v4563_v28, %v4107_v34  ;;  %v10289_v19 = vld [vmem:[%s17272_s0 + $0x2da] sm:$0xff] }
 0x23d   :  { %v11574_v50 = vpop.f32.mrf.mxu1  ;;  %v11642_v42 = vpop.f32.mrf.mxu0  ;;  %11885 = vmatmul.mubr.msk.f32.gmra.mxu0 %vm152_vm1, %v10287_v63  ;;  %v10290_v63 = vld [vmem:[%s17272_s0 + $0x2ea] sm:$0xff] }
 0x23e   :  { %v15472_v53 = vadd.f32 %v11574_v50, %v14893_v20  ;;  %v15475_v48 = vadd.f32 %v11642_v42, %v15228_v55  ;;  %11887 = vmatprep.mubr.msk.f32.mxu0 %vm152_vm1, %v10288_v32  ;;  %v10291_v42 = vld [vmem:[%s17272_s0 + $0x2f2] sm:$0xff] }
 0x23f   :  { %v3962_v34 = vpop.f32.mrf.mxu1  ;;  %v4573_v7 = vpop.f32.mrf.mxu0 }
 0x240   :  { %v15485_v26 = vadd.f32 %v3962_v34, %v14913_v40  ;;  %v15487_v20 = vadd.f32 %v4573_v7, %v4109_v54  ;;  %v10292_v54 = vld [vmem:[%s17272_s0 + $0x302] sm:$0xff] }
 0x241   :  { %v11577_v28 = vpop.f32.mrf.mxu1  ;;  %v11645_v55 = vpop.f32.mrf.mxu0  ;;  %11888 = vmatmul.mubr.msk.f32.gmra.mxu0 %vm152_vm1, %v10289_v19 }
 0x242   :  { %v15491_v32 = vadd.f32 %v11577_v28, %v14921_v14  ;;  %v15494_v50 = vadd.f32 %v11645_v55, %v15252_v61  ;;  %11890 = vmatprep.mubr.msk.f32.mxu0 %vm152_vm1, %v10290_v63 }
 0x243   :  { %v3972_v40 = vpop.f32.mrf.mxu1  ;;  %v4583_v46 = vpop.f32.mrf.mxu0 }
 0x244   :  { %v15504_v19 = vadd.f32 %v3972_v40, %v14941_v11  ;;  %v15507_v14 = vadd.f32 %v4583_v46, %v15272_v44  ;;  %v10293_v11 = vld [vmem:[%s17272_s0 + $0x30a] sm:$0xff]  ;;  %v10294_v44 = vld [vmem:[%s17272_s0 + $0x31a] sm:$0xff] }
 0x245   :  { %v11580_v61 = vpop.f32.mrf.mxu1  ;;  %v11648_v34 = vpop.f32.mrf.mxu0  ;;  %11891 = vmatmul.mubr.msk.f32.gmra.mxu0 %vm152_vm1, %v10291_v42 }
 0x246   :  { %v15511_v7 = vadd.f32 %v11580_v61, %v14949_v60  ;;  %v15514_v63 = vadd.f32 %v11648_v34, %v15280_v56  ;;  %11893 = vmatprep.mubr.msk.f32.mxu0 %vm152_vm1, %v10292_v54 }
 0x247   :  { %v3982_v28 = vpop.f32.mrf.mxu1  ;;  %v4593_v55 = vpop.f32.mrf.mxu0 }
 0x248   :  { %v15524_v42 = vadd.f32 %v3982_v28, %v14969_v9  ;;  %v15527_v60 = vadd.f32 %v4593_v55, %v15300_v18  ;;  %v10295_v9 = vld [vmem:[%s17272_s0 + $0x322] sm:$0xff]  ;;  %v10296_v18 = vld [vmem:[%s17272_s0 + $0x332] sm:$0xff] }
 0x249   :  { %v11583_v56 = vpop.f32.mrf.mxu1  ;;  %v11651_v40 = vpop.f32.mrf.mxu0  ;;  %11894 = vmatmul.mubr.msk.f32.gmra.mxu0 %vm152_vm1, %v10293_v11 }
 0x24a   :  { %v15531_v46 = vadd.f32 %v11583_v56, %v14974_v3  ;;  %v15534_v54 = vadd.f32 %v11651_v40, %v15308_v37  ;;  %11896 = vmatprep.mubr.msk.f32.mxu0 %vm152_vm1, %v10294_v44 }
 0x24b   :  { %v3992_v61 = vpop.f32.mrf.mxu1  ;;  %v4603_v34 = vpop.f32.mrf.mxu0 }
 0x24c   :  { %v15544_v11 = vadd.f32 %v3992_v61, %v14994_v36  ;;  %v15547_v3 = vadd.f32 %v4603_v34, %v15328_v51  ;;  %v10297_v36 = vld [vmem:[%s17272_s0 + $0x33a] sm:$0xff]  ;;  %v10298_v51 = vld [vmem:[%s17272_s0 + $0x34a] sm:$0xff] }
 0x24d   :  { %v11586_v37 = vpop.f32.mrf.mxu1  ;;  %v11654_v28 = vpop.f32.mrf.mxu0  ;;  %11897 = vmatmul.mubr.msk.f32.gmra.mxu0 %vm152_vm1, %v10295_v9 }
 0x24e   :  { %v15551_v55 = vadd.f32 %v11586_v37, %v15002_v27  ;;  %v15554_v44 = vadd.f32 %v11654_v28, %v15336_v0  ;;  %11899 = vmatprep.mubr.msk.f32.mxu0 %vm152_vm1, %v10296_v18 }
 0x24f   :  { %v4002_v56 = vpop.f32.mrf.mxu1  ;;  %v4613_v40 = vpop.f32.mrf.mxu0 }
 0x250   :  { %v15564_v9 = vadd.f32 %v4002_v56, %v15022_v49  ;;  %v15567_v27 = vadd.f32 %v4613_v40, %v15356_v13  ;;  %v10299_v49 = vld [vmem:[%s17272_s0 + $0x352] sm:$0xff]  ;;  %s11961_s0 = smov 72  }
 0x251   :  { %v11589_v0 = vpop.f32.mrf.mxu1  ;;  %v11657_v61 = vpop.f32.mrf.mxu0  ;;  %11900 = vmatmul.mubr.msk.f32.gmra.mxu0 %vm152_vm1, %v10297_v36 }
 0x252   :  { %17485 = vst [vmem:[#allocation47_spill] sm:$0xff] %v15567_v27  ;;  %v15571_v34 = vadd.f32 %v11589_v0, %v15030_v31  ;;  %v15574_v18 = vadd.f32 %v11657_v61, %v15364_v43  ;;  %11902 = vmatprep.mubr.msk.f32.mxu0 %vm152_vm1, %v10298_v51  ;;  %v17488_v43 = vld [vmem:[#allocation35_spill] sm:$0xff] }
 0x253   :  { %v4012_v37 = vpop.f32.mrf.mxu1  ;;  %v4623_v28 = vpop.f32.mrf.mxu0 }
 0x254   :  { %17486 = vst [vmem:[#allocation48_spill] sm:$0xff] %v15574_v18  ;;  %v15581_v13 = vadd.f32 %v4012_v37, %v15050_v62  ;;  %v15584_v56 = vadd.f32 %v4623_v28, %v15381_v24  ;;  %v17490_v18 = vld [vmem:[#allocation36_spill] sm:$0xff]  ;;  %v17492_v28 = vld [vmem:[#allocation37_spill] sm:$0xff] }
 0x255   :  { %v11592_v36 = vpop.f32.mrf.mxu1  ;;  %v11660_v31 = vpop.f32.mrf.mxu0  ;;  %11903 = vmatmul.mubr.msk.f32.gmra.mxu0 %vm152_vm1, %v10299_v49  ;;  %vm17330_vm1 = vcmask 714368  }
 0x256   :  { %17487 = vst [vmem:[#allocation49_spill] sm:$0xff] %v15584_v56  ;;  %v15588_v40 = vadd.f32 %v11592_v36, %v17488_v43  ;;  %v15591_v51 = vadd.f32 %v11660_v31, %v15389_v1  ;;  %v17494_v1 = vld [vmem:[#allocation38_spill] sm:$0xff] }
 0x257   :  { %v4022_v0 = vpop.f32.mrf.mxu1  ;;  %v4633_v61 = vpop.f32.mrf.mxu0 }
 0x258   :  { %17489 = vst [vmem:[#allocation13_spill] sm:$0xff] %v15591_v51  ;;  %v15594_v27 = vadd.f32 %v4022_v0, %v17490_v18  ;;  %v15597_v62 = vadd.f32 %v4633_v61, %v15402_v21  ;;  %v17496_v21 = vld [vmem:[#allocation39_spill] sm:$0xff] }
 0x259   :  { %v11595_v24 = vpop.f32.mrf.mxu1  ;;  %v11663_v37 = vpop.f32.mrf.mxu0 }
 0x25a   :  { %17491 = vst [vmem:[#allocation7_spill] sm:$0xff] %v15597_v62  ;;  %v15600_v56 = vadd.f32 %v11595_v24, %v17492_v28  ;;  %v15603_v49 = vadd.f32 %v11663_v37, %v15409_v41  ;;  %v17498_v41 = vld [vmem:[#allocation40_spill] sm:$0xff] }
 0x25b   :  { %v4032_v36 = vpop.f32.mrf.mxu1  ;;  %v4643_v43 = vpop.f32.mrf.mxu0 }
 0x25c   :  { %17493 = vst [vmem:[#allocation14_spill] sm:$0xff] %v15603_v49  ;;  %v15606_v31 = vadd.f32 %v4032_v36, %v17494_v1  ;;  %v15609_v51 = vadd.f32 %v4643_v43, %v15422_v45  ;;  %v17500_v45 = vld [vmem:[#allocation41_spill] sm:$0xff] }
 0x25d   :  { %v11598_v18 = vpop.f32.mrf.mxu1  ;;  %v11666_v0 = vpop.f32.mrf.mxu0 }
 0x25e   :  { %17495 = vst [vmem:[#allocation8_spill] sm:$0xff] %v15609_v51  ;;  %v15612_v61 = vadd.f32 %v11598_v18, %v17496_v21  ;;  %v15615_v62 = vadd.f32 %v11666_v0, %v15429_v4  ;;  %v17502_v4 = vld [vmem:[#allocation42_spill] sm:$0xff] }
 0x25f   :  { %v4042_v24 = vpop.f32.mrf.mxu1  ;;  %v4653_v28 = vpop.f32.mrf.mxu0 }
 0x260   :  { %17497 = vst [vmem:[#allocation15_spill] sm:$0xff] %v15615_v62  ;;  %v15618_v37 = vadd.f32 %v4042_v24, %v17498_v41  ;;  %v15621_v49 = vadd.f32 %v4653_v28, %v15442_v58  ;;  %v17504_v58 = vld [vmem:[#allocation43_spill] sm:$0xff] }
 0x261   :  { %v11601_v36 = vpop.f32.mrf.mxu1  ;;  %v11669_v1 = vpop.f32.mrf.mxu0 }
 0x262   :  { %17499 = vst [vmem:[#allocation9_spill] sm:$0xff] %v15621_v49  ;;  %v15624_v43 = vadd.f32 %v11601_v36, %v17500_v45  ;;  %v15627_v51 = vadd.f32 %v11669_v1, %v15451_v23 }
 0x263   :  { %v4052_v18 = vpop.f32.mrf.mxu1  ;;  %v4663_v21 = vpop.f32.mrf.mxu0 }
 0x264   :  { %17501 = vst [vmem:[#allocation16_spill] sm:$0xff] %v15627_v51  ;;  %v15630_v0 = vadd.f32 %v4052_v18, %v17502_v4  ;;  %v15633_v62 = vadd.f32 %v4663_v21, %v15464_v25 }
 0x265   :  { %v11604_v24 = vpop.f32.mrf.mxu1  ;;  %v11672_v41 = vpop.f32.mrf.mxu0 }
 0x266   :  { %17503 = vst [vmem:[#allocation10_spill] sm:$0xff] %v15633_v62  ;;  %v15636_v28 = vadd.f32 %v11604_v24, %v17504_v58  ;;  %v15639_v49 = vadd.f32 %v11672_v41, %v15472_v53 }
 0x267   :  { %v4062_v36 = vpop.f32.mrf.mxu1  ;;  %v4673_v45 = vpop.f32.mrf.mxu0 }
 0x268   :  { %17505 = vst [vmem:[#allocation17_spill] sm:$0xff] %v15639_v49  ;;  %v15642_v23 = vadd.f32 %v4062_v36, %v15190_v8  ;;  %v15645_v1 = vadd.f32 %v4673_v45, %v15485_v26  ;;  %v17509_v26 = vld [vmem:[#allocation44_spill] sm:$0xff]  ;;  %v17511_v49 = vld [vmem:[#allocation45_spill] sm:$0xff] }
 0x269   :  { %v11607_v18 = vpop.f32.mrf.mxu1  ;;  %v11675_v4 = vpop.f32.mrf.mxu0 }
 0x26a   :  { %17506 = vst [vmem:[#allocation11_spill] sm:$0xff] %v15645_v1  ;;  %v15648_v25 = vadd.f32 %v11607_v18, %v15198_v38  ;;  %v15651_v21 = vadd.f32 %v11675_v4, %v15491_v32 }
 0x26b   :  { %v4072_v24 = vpop.f32.mrf.mxu1  ;;  %v4683_v58 = vpop.f32.mrf.mxu0 }
 0x26c   :  { %17507 = vst [vmem:[#allocation18_spill] sm:$0xff] %v15651_v21  ;;  %v15654_v53 = vadd.f32 %v4072_v24, %v15220_v12  ;;  %v15657_v41 = vadd.f32 %v4683_v58, %v15504_v19 }
 0x26d   :  { %v11610_v8 = vpop.f32.mrf.mxu1  ;;  %v11678_v36 = vpop.f32.mrf.mxu0 }
 0x26e   :  { %17508 = vst [vmem:[#allocation12_spill] sm:$0xff] %v15657_v41  ;;  %v4154_v45 = vadd.f32 %v11610_v8, %v17509_v26  ;;  %v15661_v1 = vadd.f32 %v11678_v36, %v15511_v7 }
 0x26f   :  { %v4082_v38 = vpop.f32.mrf.mxu1  ;;  %v4693_v18 = vpop.f32.mrf.mxu0 }
 0x270   :  { %17510 = vst [vmem:[#allocation19_spill] sm:$0xff] %v15661_v1  ;;  %v4153_v32 = vadd.f32 %v4082_v38, %v17511_v49  ;;  %v15665_v4 = vadd.f32 %v4693_v18, %v15524_v42 }
 0x271   :  { %v11681_v21 = vpop.f32.mrf.mxu0  ;;  %v11713_v12 = vpop.f32.mrf.mxu1 }
 0x272   :  { %17512 = vst [vmem:[#allocation20_spill] sm:$0xff] %v15665_v4  ;;  %v15668_v24 = vadd.f32 %v11681_v21, %v15531_v46 }
 0x273   :  { %v4703_v19 = vpop.f32.mrf.mxu0  ;;  %v15670_v58 = vpop.f32.mrf.mxu1 }
 0x274   :  { %17513 = vst [vmem:[#allocation21_spill] sm:$0xff] %v15668_v24  ;;  %v15673_v8 = vadd.f32 %v4703_v19, %v15544_v11 }
 0x275   :  { %v11684_v7 = vpop.f32.mrf.mxu0  ;;  %v15675_v36 = vpop.f32.mrf.mxu1 }
 0x276   :  { %17514 = vst [vmem:[#allocation22_spill] sm:$0xff] %v15673_v8  ;;  %v15678_v26 = vadd.f32 %v11684_v7, %v15551_v55 }
 0x277   :  { %v4713_v49 = vpop.f32.mrf.mxu0  ;;  %v15680_v42 = vpop.f32.mrf.mxu1 }
 0x278   :  { %17515 = vst [vmem:[#allocation23_spill] sm:$0xff] %v15678_v26  ;;  %v15683_v38 = vadd.f32 %v4713_v49, %v15564_v9 }
 0x279   :  { %v11687_v46 = vpop.f32.mrf.mxu0  ;;  %v15685_v21 = vpop.f32.mrf.mxu1 }
 0x27a   :  { %17516 = vst [vmem:[#allocation24_spill] sm:$0xff] %v15683_v38  ;;  %v15688_v18 = vadd.f32 %v11687_v46, %v15571_v34 }
 0x27b   :  { %v4723_v11 = vpop.f32.mrf.mxu0  ;;  %v15690_v19 = vpop.f32.mrf.mxu1 }
 0x27c   :  { %17517 = vst [vmem:[#allocation25_spill] sm:$0xff] %v15688_v18  ;;  %v15693_v8 = vadd.f32 %v4723_v11, %v15581_v13 }
 0x27d   :  { %v11690_v55 = vpop.f32.mrf.mxu0  ;;  %v15695_v7 = vpop.f32.mrf.mxu1 }
 0x27e   :  { %17518 = vst [vmem:[#allocation26_spill] sm:$0xff] %v15693_v8  ;;  %v15698_v26 = vadd.f32 %v11690_v55, %v15588_v40 }
 0x27f   :  { %v4733_v9 = vpop.f32.mrf.mxu0  ;;  %v15700_v49 = vpop.f32.mrf.mxu1 }
 0x280   :  { %17519 = vst [vmem:[#allocation27_spill] sm:$0xff] %v15698_v26  ;;  %v15703_v38 = vadd.f32 %v4733_v9, %v15594_v27 }
 0x281   :  { %v11693_v34 = vpop.f32.mrf.mxu0  ;;  %v15705_v46 = vpop.f32.mrf.mxu1 }
 0x282   :  { %17520 = vst [vmem:[#allocation28_spill] sm:$0xff] %v15703_v38  ;;  %v15708_v18 = vadd.f32 %v11693_v34, %v15600_v56 }
 0x283   :  { %v4743_v13 = vpop.f32.mrf.mxu0  ;;  %v15710_v11 = vpop.f32.mrf.mxu1 }
 0x284   :  { %17521 = vst [vmem:[#allocation29_spill] sm:$0xff] %v15708_v18  ;;  %v15713_v8 = vadd.f32 %v4743_v13, %v15606_v31 }
 0x285   :  { %v11696_v40 = vpop.f32.mrf.mxu0  ;;  %v15715_v55 = vpop.f32.mrf.mxu1 }
 0x286   :  { %17522 = vst [vmem:[#allocation30_spill] sm:$0xff] %v15713_v8  ;;  %v15718_v26 = vadd.f32 %v11696_v40, %v15612_v61 }
 0x287   :  { %v4753_v27 = vpop.f32.mrf.mxu0  ;;  %v15720_v9 = vpop.f32.mrf.mxu1 }
 0x288   :  { %17523 = vst [vmem:[#allocation31_spill] sm:$0xff] %v15718_v26  ;;  %v15723_v38 = vadd.f32 %v4753_v27, %v15618_v37 }
 0x289   :  { %v11699_v56 = vpop.f32.mrf.mxu0  ;;  %v15725_v34 = vpop.f32.mrf.mxu1 }
 0x28a   :  { %17524 = vst [vmem:[#allocation33_spill] sm:$0xff] %v15723_v38  ;;  %v15728_v18 = vadd.f32 %v11699_v56, %v15624_v43 }
 0x28b   :  { %v4763_v31 = vpop.f32.mrf.mxu0  ;;  %v15730_v13 = vpop.f32.mrf.mxu1 }
 0x28c   :  { %17525 = vst [vmem:[#allocation32_spill] sm:$0xff] %v15728_v18  ;;  %v15733_v8 = vadd.f32 %v4763_v31, %v15630_v0 }
 0x28d   :  { %v11702_v61 = vpop.f32.mrf.mxu0  ;;  %v15735_v40 = vpop.f32.mrf.mxu1 }
 0x28e   :  { %17526 = vst [vmem:[#allocation34_spill] sm:$0xff] %v15733_v8  ;;  %v15738_v26 = vadd.f32 %v11702_v61, %v15636_v28 }
 0x28f   :  { %v4773_v37 = vpop.f32.mrf.mxu0  ;;  %v15740_v27 = vpop.f32.mrf.mxu1 }
 0x290   :  { %17527 = vst [vmem:[#allocation35_spill] sm:$0xff] %v15738_v26  ;;  %v15743_v38 = vadd.f32 %v4773_v37, %v15642_v23  ;;  %v17532_v37 = vld [vmem:[#allocation46_spill] sm:$0xff] }
 0x291   :  { %v11705_v43 = vpop.f32.mrf.mxu0  ;;  %v15745_v56 = vpop.f32.mrf.mxu1 }
 0x292   :  { %17528 = vst [vmem:[#allocation36_spill] sm:$0xff] %v15743_v38  ;;  %v15748_v18 = vadd.f32 %v11705_v43, %v15648_v25  ;;  %v5513_v38 = vadd.f32 %v11713_v12, %v17532_v37 }
 0x293   :  { %v4783_v0 = vpop.f32.mrf.mxu0  ;;  %v15750_v31 = vpop.f32.mrf.mxu1 }
 0x294   :  { %17529 = vst [vmem:[#allocation37_spill] sm:$0xff] %v15748_v18  ;;  %v15753_v8 = vadd.f32 %v4783_v0, %v15654_v53  ;;  %v15769_v53 = vld [vmem:[%s17274_s2] ss:$0 sm:$0xff]  ;;  %v11948_v0 = vmov 1983009808   ;;  %v6506_v18 = vlaneseq }
 0x295   :  { %v11708_v28 = vpop.f32.mrf.mxu0  ;;  %v15755_v61 = vpop.f32.mrf.mxu1 }
 0x296   :  { %17530 = vst [vmem:[#allocation38_spill] sm:$0xff] %v15753_v8  ;;  %v15757_v26 = vadd.f32 %v11708_v28, %v4154_v45  ;;  %v6504_v8 = vunpack.c.l.s4 %v11948_v0  ;;  %v5512_v45 = vadd.f32 %v15670_v58, %v15275_v29  ;;  %v6507_v62 = vshrl.u32 %v6506_v18, 7 }
 0x297   :  { %v4793_v24 = vpop.f32.mrf.mxu0  ;;  %v15759_v23 = vpop.f32.mrf.mxu1  ;;  %v5514_v0 = vadd.f32 %v15680_v42, %v15303_v33  ;;  %v5519_v33 = vadd.f32 %v15695_v7, %v15339_v59  ;;  %v15801_v59 = vadd.f32 %v15715_v55, %v15392_v2  ;;  %v15815_v2 = vadd.f32 %v15730_v13, %v15425_v57 }
 0x298   :  { %17531 = vst [vmem:[#allocation39_spill] sm:$0xff] %v15757_v26  ;;  %v15762_v4 = vadd.f32 %v4793_v24, %v4153_v32  ;;  %v5515_v32 = vadd.f32 %v15675_v36, %v15283_v16  ;;  %v6505_v41 = vunpack.c.0.s8 %v6504_v8  ;;  %v5517_v16 = vadd.f32 %v15685_v21, %v15311_v6 }
 0x299   :  { %v15764_v25 = vpop.f32.mrf.mxu1  ;;  %v11811_v43 = vpop.f32.mrf.mxu0  ;;  %v5516_v8 = vadd.f32 %v15690_v19, %v15331_v39  ;;  %v15797_v39 = vadd.f32 %v15710_v11, %v15384_v52  ;;  %v15809_v19 = vadd.f32 %v15725_v34, %v15412_v15  ;;  %v15827_v15 = vadd.f32 %v15745_v56, %v15454_v30 }
 0x29a   :  { %17533 = vst [vmem:[#allocation40_spill] sm:$0xff] %v15762_v4  ;;  %v6223_v28 = vadd.f32 %v11811_v43, %v5513_v38  ;;  %v15831_v55 = vadd.f32 %v15750_v31, %v15466_v5  ;;  %v15841_v30 = vadd.f32 %v15759_v23, %v15487_v20  ;;  %v15845_v34 = vadd.f32 %v15764_v25, %v15494_v50 }
 0x29b   :  { %v5293_v26 = vpop.f32.mrf.mxu1  ;;  %v5903_v1 = vpop.f32.mrf.mxu0 }
 0x29c   :  { %v6294_v12 = vadd.f32 %v15769_v53, %v6223_v28  ;;  %v6222_v24 = vadd.f32 %v5903_v1, %v5512_v45  ;;  %v5518_v28 = vadd.f32 %v15700_v49, %v15359_v47  ;;  %v15805_v47 = vadd.f32 %v15720_v9, %v15405_v35 }
 0x29d   :  { %v11746_v37 = vpop.f32.mrf.mxu1  ;;  %v11814_v4 = vpop.f32.mrf.mxu0  ;;  %v15819_v35 = vadd.f32 %v15735_v40, %v15432_v22  ;;  %v15823_v49 = vadd.f32 %v15740_v27, %v15445_v17  ;;  %v15837_v17 = vadd.f32 %v15755_v61, %v15475_v48  ;;  %v15848_v5 = vadd.f32 %v5293_v26, %v15507_v14 }
 0x29e   :  { %v6358_v51 = vmax.f32 %v6294_v12, 0.0  ;;  %v6293_v29 = vadd.f32 %v15769_v53, %v6222_v24  ;;  %v6225_v58 = vadd.f32 %v11814_v4, %v5515_v32  ;;  %v15787_v4 = vsub.s32 %v6505_v41, %v6507_v62 }
 0x29f   :  { %v5303_v38 = vpop.f32.mrf.mxu1  ;;  %v5913_v43 = vpop.f32.mrf.mxu0  ;;  %v5521_v32 = vadd.f32 %v15705_v46, %v15367_v10  ;;  %v15851_v12 = vadd.f32 %v11746_v37, %v15514_v63 }
 0x2a0   :  { %6423 = vst.msk [vmem:[#allocation2 + $0x8] sm:$0xff] %vm6421_vm2, %v6358_v51  ;;  %v6357_v1 = vmax.f32 %v6293_v29, 0.0  ;;  %v6296_v36 = vadd.f32 %v15769_v53, %v6225_v58  ;;  %v6224_v45 = vadd.f32 %v5913_v43, %v5514_v0  ;;  %v15858_v14 = vadd.f32 %v5303_v38, %v15527_v60 }
 0x2a1   :  { %v11749_v42 = vpop.f32.mrf.mxu1  ;;  %v11817_v18 = vpop.f32.mrf.mxu0 }
 0x2a2   :  { %6422 = vst.msk [vmem:[#allocation2] sm:$0xff] %vm6421_vm2, %v6357_v1  ;;  %v6360_v6 = vmax.f32 %v6296_v36, 0.0  ;;  %v6295_v51 = vadd.f32 %v15769_v53, %v6224_v45  ;;  %v6227_v21 = vadd.f32 %v11817_v18, %v5517_v16  ;;  %v15861_v26 = vadd.f32 %v11749_v42, %v15534_v54  ;;  %v17534_v16 = vld [vmem:[#allocation47_spill] sm:$0xff] }
 0x2a3   :  { %v5313_v62 = vpop.f32.mrf.mxu1  ;;  %v5923_v41 = vpop.f32.mrf.mxu0 }
 0x2a4   :  { %6425 = vst.msk [vmem:[#allocation2 + $0x18] sm:$0xff] %vm6421_vm2, %v6360_v6  ;;  %v6359_v10 = vmax.f32 %v6295_v51, 0.0  ;;  %v6298_v52 = vadd.f32 %v15769_v53, %v6227_v21  ;;  %v6226_v7 = vadd.f32 %v5923_v41, %v5516_v8  ;;  %v15864_v25 = vadd.f32 %v5313_v62, %v15547_v3 }
 0x2a5   :  { %v11752_v46 = vpop.f32.mrf.mxu1  ;;  %v11820_v11 = vpop.f32.mrf.mxu0 }
 0x2a6   :  { %6424 = vst.msk [vmem:[#allocation2 + $0x10] sm:$0xff] %vm6421_vm2, %v6359_v10  ;;  %v6362_v57 = vmax.f32 %v6298_v52, 0.0  ;;  %v6297_v22 = vadd.f32 %v15769_v53, %v6226_v7  ;;  %v6229_v9 = vadd.f32 %v11820_v11, %v5519_v33  ;;  %v15867_v63 = vadd.f32 %v11752_v46, %v15554_v44  ;;  %v17535_v44 = vld [vmem:[#allocation48_spill] sm:$0xff]  ;;  %v17536_v7 = vld [vmem:[#allocation49_spill] sm:$0xff] }
 0x2a7   :  { %v5323_v13 = vpop.f32.mrf.mxu1  ;;  %v5933_v40 = vpop.f32.mrf.mxu0  ;;  %v6659_v27 = vld [vmem:[#allocation2 + $0x8] sm:$0x1]  ;;  %v6661_v56 = vld [vmem:[#allocation2 + $0x9] sm:$0x1]  ;;  %v6701_v31 = vld [vmem:[#allocation2 + $0xa] sm:$0x1] }
 0x2a8   :  { %6427 = vst.msk [vmem:[#allocation2 + $0x28] sm:$0xff] %vm6421_vm2, %v6362_v57  ;;  %v6361_v48 = vmax.f32 %v6297_v22, 0.0  ;;  %v6300_v20 = vadd.f32 %v15769_v53, %v6229_v9  ;;  %v6228_v61 = vadd.f32 %v5933_v40, %v5518_v28  ;;  %v6703_v23 = vld [vmem:[#allocation2 + $0xb] sm:$0x1]  ;;  %v15855_v50 = vld [vmem:[#allocation2 + $0xc] sm:$0x1]  ;;  %v15871_v60 = vadd.f32 %v5323_v13, %v17534_v16 }
 0x2a9   :  { %v11755_v24 = vpop.f32.mrf.mxu1  ;;  %v11823_v37 = vpop.f32.mrf.mxu0  ;;  %v6745_v0 = vld [vmem:[#allocation2 + $0xd] sm:$0x1]  ;;  %v6785_v29 = vld [vmem:[#allocation2 + $0xe] sm:$0x1]  ;;  %v6787_v58 = vld [vmem:[#allocation2 + $0xf] sm:$0x1]  ;;  %v6667_v18 = vmax.f32 %v6659_v27, %v6661_v56  ;;  %v6709_v6 = vmax.f32 %v6701_v31, %v6703_v23 }
 0x2aa   :  { %6426 = vst.msk [vmem:[#allocation2 + $0x20] sm:$0xff] %vm6421_vm2, %v6361_v48  ;;  %v6364_v43 = vmax.f32 %v6300_v20, 0.0  ;;  %v6299_v54 = vadd.f32 %v15769_v53, %v6228_v61  ;;  %v6231_v38 = vadd.f32 %v11823_v37, %v5521_v32  ;;  %v15874_v1 = vld [vmem:[#allocation2 + $0x2] sm:$0x1]  ;;  %v15876_v3 = vld [vmem:[#allocation2 + $0x3] sm:$0x1]  ;;  %v15879_v36 = vadd.f32 %v11755_v24, %v17535_v44 }
 0x2ab   :  { %v5333_v45 = vpop.f32.mrf.mxu1  ;;  %v5943_v8 = vpop.f32.mrf.mxu0  ;;  %v6663_v33 = vld [vmem:[#allocation2 + $0x18] sm:$0x1]  ;;  %v6665_v42 = vld [vmem:[#allocation2 + $0x19] sm:$0x1]  ;;  %v6705_v28 = vld [vmem:[#allocation2 + $0x1a] sm:$0x1]  ;;  %v6751_v51 = vmax.f32 %v15855_v50, %v6745_v0  ;;  %v6793_v52 = vmax.f32 %v6785_v29, %v6787_v58  ;;  %v6541_v56 = vmax.f32 %v15874_v1, %v15876_v3 }
 0x2ac   :  { %6429 = vst.msk [vmem:[#allocation2 + $0x38] sm:$0xff] %vm6421_vm2, %v6364_v43  ;;  %v6363_v21 = vmax.f32 %v6299_v54, 0.0  ;;  %v6302_v32 = vadd.f32 %v15769_v53, %v6231_v38  ;;  %v6230_v62 = vadd.f32 %v5943_v8, %v15797_v39  ;;  %v6707_v41 = vld [vmem:[#allocation2 + $0x1b] sm:$0x1]  ;;  %v6747_v10 = vld [vmem:[#allocation2 + $0x1c] sm:$0x1]  ;;  %v15886_v46 = vadd.f32 %v5333_v45, %v17536_v7 }
 0x2ad   :  { %v11758_v11 = vpop.f32.mrf.mxu1  ;;  %v11826_v57 = vpop.f32.mrf.mxu0  ;;  %v6669_v22 = vmax.f32 %v6663_v33, %v6665_v42  ;;  %v6711_v9 = vmax.f32 %v6705_v28, %v6707_v41  ;;  %v6749_v13 = vld [vmem:[#allocation2 + $0x1d] sm:$0x1]  ;;  %v6789_v40 = vld [vmem:[#allocation2 + $0x1e] sm:$0x1]  ;;  %v6791_v27 = vld [vmem:[#allocation2 + $0x1f] sm:$0x1] }
 0x2ae   :  { %6428 = vst.msk [vmem:[#allocation2 + $0x30] sm:$0xff] %vm6421_vm2, %v6363_v21  ;;  %v6366_v31 = vmax.f32 %v6302_v32, 0.0  ;;  %v6301_v39 = vadd.f32 %v15769_v53, %v6230_v62  ;;  %v17537_v48 = vld [vmem:[#allocation13_spill] sm:$0xff]  ;;  %v6233_v61 = vadd.f32 %v11826_v57, %v15801_v59  ;;  %v6753_v0 = vmax.f32 %v6747_v10, %v6749_v13  ;;  %v6537_v58 = vld [vmem:[#allocation2 + $0x12] sm:$0x1]  ;;  %v17538_v1 = vld [vmem:[#allocation7_spill] sm:$0xff] }
 0x2af   :  { %v15893_v20 = vadd.f32 %v11758_v11, %v17537_v48  ;;  %v5343_v23 = vpop.f32.mrf.mxu1  ;;  %v5953_v50 = vpop.f32.mrf.mxu0  ;;  %v15896_v24 = vmax.f32 %v6667_v18, %v6669_v22  ;;  %v15898_v37 = vmax.f32 %v6709_v6, %v6711_v9  ;;  %v6795_v29 = vmax.f32 %v6789_v40, %v6791_v27  ;;  %v6539_v43 = vld [vmem:[#allocation2 + $0x13] sm:$0x1]  ;;  %v6575_v16 = vld [vmem:[#allocation2 + $0x4] sm:$0x1]  ;;  %v6577_v44 = vld [vmem:[#allocation2 + $0x5] sm:$0x1] }
 0x2b0   :  { %6431 = vst.msk [vmem:[#allocation2 + $0x48] sm:$0xff] %vm6421_vm2, %v6366_v31  ;;  %v6365_v54 = vmax.f32 %v6301_v39, 0.0  ;;  %v6304_v38 = vadd.f32 %v15769_v53, %v6233_v61  ;;  %v15903_v3 = vadd.f32 %v5343_v23, %v17538_v1  ;;  %v6232_v59 = vadd.f32 %v5953_v50, %v15805_v47  ;;  %v6579_v45 = vld [vmem:[#allocation2 + $0x14] sm:$0x1]  ;;  %v6581_v21 = vld [vmem:[#allocation2 + $0x15] sm:$0x1] }
 0x2b1   :  { %v11761_v8 = vpop.f32.mrf.mxu1  ;;  %v11829_v33 = vpop.f32.mrf.mxu0  ;;  %v15910_v28 = vmax.f32 %v6751_v51, %v6753_v0  ;;  %v15912_v6 = vmax.f32 %v6793_v52, %v6795_v29  ;;  %v6617_v32 = vld [vmem:[#allocation2 + $0x6] sm:$0x1]  ;;  %v6619_v62 = vld [vmem:[#allocation2 + $0x7] sm:$0x1]  ;;  %v6621_v57 = vld [vmem:[#allocation2 + $0x16] sm:$0x1]  ;;  %v6543_v40 = vmax.f32 %v6537_v58, %v6539_v43  ;;  %v6583_v27 = vmax.f32 %v6575_v16, %v6577_v44 }
 0x2b2   :  { %6430 = vst.msk [vmem:[#allocation2 + $0x40] sm:$0xff] %vm6421_vm2, %v6365_v54  ;;  %v6368_v47 = vmax.f32 %v6304_v38, 0.0  ;;  %v6303_v41 = vadd.f32 %v15769_v53, %v6232_v59  ;;  %v17539_v10 = vld [vmem:[#allocation14_spill] sm:$0xff]  ;;  %v6235_v11 = vadd.f32 %v11829_v33, %v15809_v19  ;;  %v6623_v22 = vld [vmem:[#allocation2 + $0x17] sm:$0x1]  ;;  %v6585_v58 = vmax.f32 %v6579_v45, %v6581_v21  ;;  %v17541_v59 = vld [vmem:[#allocation15_spill] sm:$0xff] }
 0x2b3   :  { %v15917_v7 = vadd.f32 %v11761_v8, %v17539_v10  ;;  %v5353_v9 = vpop.f32.mrf.mxu1  ;;  %v5963_v51 = vpop.f32.mrf.mxu0  ;;  %v17540_v48 = vld [vmem:[#allocation8_spill] sm:$0xff]  ;;  %v15930_v23 = vld [vmem:[#allocation2 + $0x28] sm:$0x1]  ;;  %v15932_v50 = vld [vmem:[#allocation2 + $0x29] sm:$0x1]  ;;  %v15934_v54 = vmax.f32 %v6541_v56, %v6543_v40  ;;  %v6625_v43 = vmax.f32 %v6617_v32, %v6619_v62  ;;  %v6627_v16 = vmax.f32 %v6621_v57, %v6623_v22 }
 0x2b4   :  { %6433 = vst.msk [vmem:[#allocation2 + $0x58] sm:$0xff] %vm6421_vm2, %v6368_v47  ;;  %v6367_v31 = vmax.f32 %v6303_v41, 0.0  ;;  %v6306_v39 = vadd.f32 %v15769_v53, %v6235_v11  ;;  %v15927_v61 = vadd.f32 %v5353_v9, %v17540_v48  ;;  %v6234_v19 = vadd.f32 %v5963_v51, %v15815_v2  ;;  %v7001_v8 = vld [vmem:[#allocation2 + $0x38] sm:$0x1]  ;;  %v7003_v33 = vld [vmem:[#allocation2 + $0x39] sm:$0x1] }
 0x2b5   :  { %v11764_v0 = vpop.f32.mrf.mxu1  ;;  %v11832_v29 = vpop.f32.mrf.mxu0  ;;  %v15950_v32 = vmax.f32 %v6583_v27, %v6585_v58  ;;  %v15952_v62 = vmax.f32 %v6625_v43, %v6627_v16  ;;  %v17542_v22 = vld [vmem:[#allocation9_spill] sm:$0xff]  ;;  %v15964_v27 = vld [vmem:[#allocation2 + $0x2a] sm:$0x1] }
 0x2b6   :  { %6432 = vst.msk [vmem:[#allocation2 + $0x50] sm:$0xff] %vm6421_vm2, %v6367_v31  ;;  %v6370_v38 = vmax.f32 %v6306_v39, 0.0  ;;  %v6305_v1 = vadd.f32 %v15769_v53, %v6234_v19  ;;  %v15939_v44 = vadd.f32 %v11764_v0, %v17541_v59  ;;  %v6237_v2 = vadd.f32 %v11832_v29, %v15819_v35  ;;  %v15966_v39 = vld [vmem:[#allocation2 + $0x2b] sm:$0x1] }
 0x2b7   :  { %v5363_v47 = vpop.f32.mrf.mxu1  ;;  %v5973_v41 = vpop.f32.mrf.mxu0  ;;  %v15942_v10 = vld [vmem:[#allocation2 + $0x48] sm:$0x1]  ;;  %v15944_v56 = vld [vmem:[#allocation2 + $0x49] sm:$0x1]  ;;  %v15948_v21 = vld [vmem:[#allocation2 + $0x4a] sm:$0x1]  ;;  %v7005_v35 = vmax.f32 %v15930_v23, %v15932_v50 }
 0x2b8   :  { %6435 = vst.msk [vmem:[#allocation2 + $0x68] sm:$0xff] %vm6421_vm2, %v6370_v38  ;;  %v6369_v11 = vmax.f32 %v6305_v1, 0.0  ;;  %v6308_v57 = vadd.f32 %v15769_v53, %v6237_v2  ;;  %v15959_v9 = vadd.f32 %v5363_v47, %v17542_v22  ;;  %v6236_v51 = vadd.f32 %v5973_v41, %v15823_v49  ;;  %v7372_v40 = vld [vmem:[#allocation2 + $0x4b] sm:$0x1]  ;;  %v15962_v31 = vld [vmem:[#allocation2 + $0x4c] sm:$0x1] }
 0x2b9   :  { %v11767_v48 = vpop.f32.mrf.mxu1  ;;  %v11835_v19 = vpop.f32.mrf.mxu0  ;;  %v7337_v23 = vmax.f32 %v15942_v10, %v15944_v56  ;;  %v7378_v50 = vmax.f32 %v15948_v21, %v7372_v40  ;;  %v7413_v29 = vld [vmem:[#allocation2 + $0x4d] sm:$0x1]  ;;  %v7452_v58 = vld [vmem:[#allocation2 + $0x4e] sm:$0x1]  ;;  %v7454_v43 = vld [vmem:[#allocation2 + $0x4f] sm:$0x1] }
 0x2ba   :  { %6434 = vst.msk [vmem:[#allocation2 + $0x60] sm:$0xff] %vm6421_vm2, %v6369_v11  ;;  %v6372_v16 = vmax.f32 %v6308_v57, 0.0  ;;  %v6307_v38 = vadd.f32 %v15769_v53, %v6236_v51  ;;  %v17543_v1 = vld [vmem:[#allocation16_spill] sm:$0xff]  ;;  %v6239_v2 = vadd.f32 %v11835_v19, %v15827_v15  ;;  %v15981_v47 = vld [vmem:[#allocation2 + $0x44] sm:$0x1]  ;;  %v7419_v49 = vmax.f32 %v15962_v31, %v7413_v29 }
 0x2bb   :  { %v15978_v59 = vadd.f32 %v11767_v48, %v17543_v1  ;;  %v15983_v41 = vld [vmem:[#allocation2 + $0x45] sm:$0x1]  ;;  %v5373_v10 = vpop.f32.mrf.mxu1  ;;  %v5983_v56 = vpop.f32.mrf.mxu0  ;;  %v7333_v21 = vld [vmem:[#allocation2 + $0x58] sm:$0x1]  ;;  %v7335_v22 = vld [vmem:[#allocation2 + $0x59] sm:$0x1]  ;;  %v7460_v11 = vmax.f32 %v7452_v58, %v7454_v43  ;;  %v7007_v57 = vmax.f32 %v7001_v8, %v7003_v33 }
 0x2bc   :  { %v7374_v40 = vld [vmem:[#allocation2 + $0x5a] sm:$0x1]  ;;  %v7255_v51 = vmax.f32 %v15981_v47, %v15983_v41  ;;  %6437 = vst.msk [vmem:[#allocation2 + $0x78] sm:$0xff] %vm6421_vm2, %v6372_v16  ;;  %v6371_v48 = vmax.f32 %v6307_v38, 0.0  ;;  %v6310_v15 = vadd.f32 %v15769_v53, %v6239_v2  ;;  %v17544_v19 = vld [vmem:[#allocation10_spill] sm:$0xff]  ;;  %v6238_v0 = vadd.f32 %v5983_v56, %v15831_v55 }
 0x2bd   :  { %v15991_v1 = vadd.f32 %v5373_v10, %v17544_v19  ;;  %v7376_v45 = vld [vmem:[#allocation2 + $0x5b] sm:$0x1]  ;;  %v7415_v13 = vld [vmem:[#allocation2 + $0x5c] sm:$0x1]  ;;  %v11770_v52 = vpop.f32.mrf.mxu1  ;;  %v11838_v18 = vpop.f32.mrf.mxu0  ;;  %v7339_v31 = vmax.f32 %v7333_v21, %v7335_v22  ;;  %v7417_v8 = vld [vmem:[#allocation2 + $0x5d] sm:$0x1]  ;;  %v15994_v43 = vmax.f32 %v7005_v35, %v7007_v57 }
 0x2be   :  { %v7380_v29 = vmax.f32 %v7374_v40, %v7376_v45  ;;  %v7456_v33 = vld [vmem:[#allocation2 + $0x5e] sm:$0x1]  ;;  %v7458_v58 = vld [vmem:[#allocation2 + $0x5f] sm:$0x1]  ;;  %6436 = vst.msk [vmem:[#allocation2 + $0x70] sm:$0xff] %vm6421_vm2, %v6371_v48  ;;  %v6374_v38 = vmax.f32 %v6310_v15, 0.0  ;;  %v6309_v2 = vadd.f32 %v15769_v53, %v6238_v0  ;;  %v6241_v56 = vadd.f32 %v11838_v18, %v15837_v17 }
 0x2bf   :  { %17545 = vst [vmem:[#allocation41_spill] sm:$0xff] %v15994_v43  ;;  %v17546_v55 = vld [vmem:[#allocation17_spill] sm:$0xff]  ;;  %v5383_v21 = vpop.f32.mrf.mxu1  ;;  %v5993_v45 = vpop.f32.mrf.mxu0  ;;  %v16004_v22 = vmax.f32 %v7337_v23, %v7339_v31  ;;  %v7421_v35 = vmax.f32 %v7415_v13, %v7417_v8  ;;  %v7462_v57 = vmax.f32 %v7456_v33, %v7458_v58  ;;  %v17547_v15 = vld [vmem:[#allocation11_spill] sm:$0xff]  ;;  %v7253_v17 = vld [vmem:[#allocation2 + $0x55] sm:$0x1] }
 0x2c0   :  { %v16001_v10 = vadd.f32 %v11770_v52, %v17546_v55  ;;  %v16006_v40 = vmax.f32 %v7378_v50, %v7380_v29  ;;  %6439 = vst.msk [vmem:[#allocation2 + $0x88] sm:$0xff] %vm6421_vm2, %v6374_v38  ;;  %v6373_v19 = vmax.f32 %v6309_v2, 0.0  ;;  %v6312_v48 = vadd.f32 %v15769_v53, %v6241_v56  ;;  %v7251_v55 = vld [vmem:[#allocation2 + $0x54] sm:$0x1]  ;;  %v7043_v18 = vld [vmem:[#allocation2 + $0x3a] sm:$0x1] }
 0x2c1   :  { %v16011_v0 = vadd.f32 %v5383_v21, %v17547_v15  ;;  %v6240_v52 = vadd.f32 %v5993_v45, %v15841_v30  ;;  %v11773_v42 = vpop.f32.mrf.mxu1  ;;  %v11841_v23 = vpop.f32.mrf.mxu0  ;;  %v16018_v31 = vmax.f32 %v7419_v49, %v7421_v35  ;;  %v16020_v29 = vmax.f32 %v7460_v11, %v7462_v57  ;;  %v7045_v8 = vld [vmem:[#allocation2 + $0x3b] sm:$0x1]  ;;  %v7288_v33 = vld [vmem:[#allocation2 + $0x46] sm:$0x1]  ;;  %v7290_v58 = vld [vmem:[#allocation2 + $0x47] sm:$0x1] }
 0x2c2   :  { %6438 = vst.msk [vmem:[#allocation2 + $0x80] sm:$0xff] %vm6421_vm2, %v6373_v19  ;;  %v6376_v30 = vmax.f32 %v6312_v48, 0.0  ;;  %v17549_v2 = vld [vmem:[#allocation18_spill] sm:$0xff]  ;;  %v6243_v21 = vadd.f32 %v11841_v23, %v15845_v34  ;;  %v7292_v45 = vld [vmem:[#allocation2 + $0x56] sm:$0x1]  ;;  %v7257_v19 = vmax.f32 %v7251_v55, %v7253_v17  ;;  %v7049_v55 = vmax.f32 %v7043_v18, %v7045_v8 }
 0x2c3   :  { %17548 = vst [vmem:[#allocation42_spill] sm:$0xff] %v16020_v29  ;;  %v6311_v38 = vadd.f32 %v15769_v53, %v6240_v52  ;;  %v16025_v56 = vadd.f32 %v11773_v42, %v17549_v2  ;;  %v7294_v15 = vld [vmem:[#allocation2 + $0x57] sm:$0x1]  ;;  %v5393_v13 = vpop.f32.mrf.mxu1  ;;  %v6003_v49 = vpop.f32.mrf.mxu0  ;;  %v7081_v2 = vld [vmem:[#allocation2 + $0x2c] sm:$0x1]  ;;  %v7296_v17 = vmax.f32 %v7288_v33, %v7290_v58  ;;  %v17553_v8 = vmax.f32 %v15964_v27, %v15966_v39 }
 0x2c4   :  { %6441 = vst.msk [vmem:[#allocation2 + $0x98] sm:$0xff] %vm6421_vm2, %v6376_v30  ;;  %v6314_v48 = vadd.f32 %v15769_v53, %v6243_v21  ;;  %v17550_v34 = vld [vmem:[#allocation12_spill] sm:$0xff]  ;;  %v6242_v23 = vadd.f32 %v6003_v49, %v15848_v5  ;;  %v7083_v50 = vld [vmem:[#allocation2 + $0x2d] sm:$0x1]  ;;  %v16043_v35 = vmax.f32 %v7255_v51, %v7257_v19  ;;  %v7298_v30 = vmax.f32 %v7292_v45, %v7294_v15  ;;  %v7087_v57 = vld [vmem:[#allocation2 + $0x3d] sm:$0x1] }
 0x2c5   :  { %v6375_v42 = vmax.f32 %v6311_v38, 0.0  ;;  %v16037_v52 = vadd.f32 %v5393_v13, %v17550_v34  ;;  %v11776_v11 = vpop.f32.mrf.mxu1  ;;  %v11844_v16 = vpop.f32.mrf.mxu0  ;;  %v7085_v38 = vld [vmem:[#allocation2 + $0x3c] sm:$0x1]  ;;  %v7659_v21 = vld [vmem:[#allocation2 + $0x68] sm:$0x1]  ;;  %v17552_v49 = vld [vmem:[#allocation19_spill] sm:$0xff]  ;;  %v16056_v33 = vmax.f32 %v17553_v8, %v7049_v55  ;;  %v7089_v45 = vmax.f32 %v7081_v2, %v7083_v50 }
 0x2c6   :  { %17551 = vst [vmem:[#allocation43_spill] sm:$0xff] %v16043_v35  ;;  %v6378_v13 = vmax.f32 %v6314_v48, 0.0  ;;  %v6313_v5 = vadd.f32 %v15769_v53, %v6242_v23  ;;  %v16048_v34 = vadd.f32 %v11776_v11, %v17552_v49  ;;  %v6245_v43 = vadd.f32 %v11844_v16, %v15851_v12  ;;  %v7661_v29 = vld [vmem:[#allocation2 + $0x69] sm:$0x1]  ;;  %v7123_v47 = vld [vmem:[#allocation2 + $0x2e] sm:$0x1] }
 0x2c7   :  { %6440 = vst.msk [vmem:[#allocation2 + $0x90] sm:$0xff] %vm6421_vm2, %v6375_v42  ;;  %v5403_v41 = vpop.f32.mrf.mxu1  ;;  %v6013_v51 = vpop.f32.mrf.mxu0  ;;  %17554 = vst [vmem:[#allocation44_spill] sm:$0xff] %v16056_v33  ;;  %v16058_v58 = vmax.f32 %v7296_v17, %v7298_v30  ;;  %v7125_v15 = vld [vmem:[#allocation2 + $0x2f] sm:$0x1]  ;;  %v7127_v11 = vld [vmem:[#allocation2 + $0x3e] sm:$0x1]  ;;  %v7091_v17 = vmax.f32 %v7085_v38, %v7087_v57  ;;  %v7667_v30 = vmax.f32 %v7659_v21, %v7661_v29 }
 0x2c8   :  { %v7129_v19 = vld [vmem:[#allocation2 + $0x3f] sm:$0x1]  ;;  %6443 = vst.msk [vmem:[#allocation2 + $0xa8] sm:$0xff] %vm6421_vm2, %v6378_v13  ;;  %v6377_v12 = vmax.f32 %v6313_v5, 0.0  ;;  %v6316_v16 = vadd.f32 %v15769_v53, %v6245_v43  ;;  %v17556_v42 = vld [vmem:[#allocation20_spill] sm:$0xff]  ;;  %v6244_v23 = vadd.f32 %v6013_v51, %v15858_v14  ;;  %v7131_v2 = vmax.f32 %v7123_v47, %v7125_v15 }
 0x2c9   :  { %17555 = vst [vmem:[#allocation45_spill] sm:$0xff] %v16058_v58  ;;  %v16063_v48 = vadd.f32 %v5403_v41, %v17556_v42  ;;  %v7663_v49 = vld [vmem:[#allocation2 + $0x78] sm:$0x1]  ;;  %v7665_v27 = vld [vmem:[#allocation2 + $0x79] sm:$0x1]  ;;  %v11779_v39 = vpop.f32.mrf.mxu1  ;;  %v11847_v55 = vpop.f32.mrf.mxu0  ;;  %v17557_v5 = vld [vmem:[#allocation21_spill] sm:$0xff]  ;;  %v16076_v50 = vmax.f32 %v7089_v45, %v7091_v17  ;;  %v7133_v57 = vmax.f32 %v7127_v11, %v7129_v19 }
 0x2ca   :  { %6442 = vst.msk [vmem:[#allocation2 + $0xa0] sm:$0xff] %vm6421_vm2, %v6377_v12  ;;  %v6380_v43 = vmax.f32 %v6316_v16, 0.0  ;;  %v6315_v13 = vadd.f32 %v15769_v53, %v6244_v23  ;;  %v16073_v41 = vadd.f32 %v11779_v39, %v17557_v5  ;;  %v6247_v14 = vadd.f32 %v11847_v55, %v15861_v26  ;;  %v7700_v51 = vld [vmem:[#allocation2 + $0x6a] sm:$0x1]  ;;  %v7702_v8 = vld [vmem:[#allocation2 + $0x6b] sm:$0x1] }
 0x2cb   :  { %v5413_v42 = vpop.f32.mrf.mxu1  ;;  %v6023_v18 = vpop.f32.mrf.mxu0  ;;  %17558 = vst [vmem:[#allocation46_spill] sm:$0xff] %v16076_v50  ;;  %v7669_v33 = vmax.f32 %v7663_v49, %v7665_v27  ;;  %v7704_v29 = vld [vmem:[#allocation2 + $0x7a] sm:$0x1]  ;;  %v7706_v38 = vld [vmem:[#allocation2 + $0x7b] sm:$0x1]  ;;  %v17559_v23 = vld [vmem:[#allocation22_spill] sm:$0xff]  ;;  %v16088_v11 = vmax.f32 %v7131_v2, %v7133_v57  ;;  %v7708_v19 = vmax.f32 %v7700_v51, %v7702_v8 }
 0x2cc   :  { %v6828_v21 = vld [vmem:[#allocation2 + $0x20] sm:$0x1]  ;;  %6445 = vst.msk [vmem:[#allocation2 + $0xb8] sm:$0xff] %vm6421_vm2, %v6380_v43  ;;  %v6379_v12 = vmax.f32 %v6315_v13, 0.0  ;;  %v6318_v16 = vadd.f32 %v15769_v53, %v6247_v14  ;;  %v16081_v39 = vadd.f32 %v5413_v42, %v17559_v23  ;;  %v6246_v26 = vadd.f32 %v6023_v18, %v15864_v25  ;;  %v6830_v55 = vld [vmem:[#allocation2 + $0x21] sm:$0x1] }
 0x2cd   :  { %v6833_v5 = vld [vmem:[#allocation2 + $0x30] sm:$0x1]  ;;  %v11782_v45 = vpop.f32.mrf.mxu1  ;;  %v11850_v17 = vpop.f32.mrf.mxu0  ;;  %v16086_v15 = vmax.f32 %v7667_v30, %v7669_v33  ;;  %17561 = vst [vmem:[#allocation48_spill] sm:$0xff] %v16088_v11  ;;  %v6835_v49 = vld [vmem:[#allocation2 + $0x31] sm:$0x1]  ;;  %v7710_v8 = vmax.f32 %v7704_v29, %v7706_v38  ;;  %v6837_v57 = vmax.f32 %v6828_v21, %v6830_v55 }
 0x2ce   :  { %v7741_v27 = vld [vmem:[#allocation2 + $0x6c] sm:$0x1]  ;;  %v7743_v43 = vld [vmem:[#allocation2 + $0x6d] sm:$0x1]  ;;  %6444 = vst.msk [vmem:[#allocation2 + $0xb0] sm:$0xff] %vm6421_vm2, %v6379_v12  ;;  %v6382_v13 = vmax.f32 %v6318_v16, 0.0  ;;  %v6317_v25 = vadd.f32 %v15769_v53, %v6246_v26  ;;  %v6249_v42 = vadd.f32 %v11850_v17, %v15867_v63 }
 0x2cf   :  { %17560 = vst [vmem:[#allocation47_spill] sm:$0xff] %v16086_v15  ;;  %v17562_v18 = vld [vmem:[#allocation23_spill] sm:$0xff]  ;;  %v7745_v23 = vld [vmem:[#allocation2 + $0x7c] sm:$0x1]  ;;  %v7747_v47 = vld [vmem:[#allocation2 + $0x7d] sm:$0x1]  ;;  %v5423_v33 = vpop.f32.mrf.mxu1  ;;  %v6033_v30 = vpop.f32.mrf.mxu0  ;;  %v16106_v2 = vmax.f32 %v7708_v19, %v7710_v8  ;;  %v6839_v15 = vmax.f32 %v6833_v5, %v6835_v49  ;;  %v7749_v51 = vmax.f32 %v7741_v27, %v7743_v43 }
 0x2d0   :  { %v16093_v14 = vadd.f32 %v11782_v45, %v17562_v18  ;;  %6447 = vst.msk [vmem:[#allocation2 + $0xc8] sm:$0xff] %vm6421_vm2, %v6382_v13  ;;  %v6381_v12 = vmax.f32 %v6317_v25, 0.0  ;;  %v6320_v16 = vadd.f32 %v15769_v53, %v6249_v42  ;;  %v17563_v26 = vld [vmem:[#allocation24_spill] sm:$0xff]  ;;  %v6248_v63 = vadd.f32 %v6033_v30, %v15871_v60  ;;  %v6871_v17 = vld [vmem:[#allocation2 + $0x22] sm:$0x1]  ;;  %v17565_v42 = vld [vmem:[#allocation25_spill] sm:$0xff] }
 0x2d1   :  { %v16103_v45 = vadd.f32 %v5423_v33, %v17563_v26  ;;  %v6873_v18 = vld [vmem:[#allocation2 + $0x23] sm:$0x1]  ;;  %v11785_v50 = vpop.f32.mrf.mxu1  ;;  %v11853_v58 = vpop.f32.mrf.mxu0  ;;  %17564 = vst [vmem:[#allocation49_spill] sm:$0xff] %v16106_v2  ;;  %v7751_v29 = vmax.f32 %v7745_v23, %v7747_v47  ;;  %v6875_v38 = vld [vmem:[#allocation2 + $0x32] sm:$0x1]  ;;  %v16116_v47 = vmax.f32 %v6837_v57, %v6839_v15 }
 0x2d2   :  { %v6877_v21 = vld [vmem:[#allocation2 + $0x33] sm:$0x1]  ;;  %v7782_v55 = vld [vmem:[#allocation2 + $0x6e] sm:$0x1]  ;;  %6446 = vst.msk [vmem:[#allocation2 + $0xc0] sm:$0xff] %vm6421_vm2, %v6381_v12  ;;  %v6384_v13 = vmax.f32 %v6320_v16, 0.0  ;;  %v6319_v25 = vadd.f32 %v15769_v53, %v6248_v63  ;;  %v16111_v33 = vadd.f32 %v11785_v50, %v17565_v42  ;;  %v6251_v60 = vadd.f32 %v11853_v58, %v15879_v36 }
 0x2d3   :  { %v7784_v30 = vld [vmem:[#allocation2 + $0x6f] sm:$0x1]  ;;  %v7786_v26 = vld [vmem:[#allocation2 + $0x7e] sm:$0x1]  ;;  %v5433_v19 = vpop.f32.mrf.mxu1  ;;  %v6043_v8 = vpop.f32.mrf.mxu0  ;;  %17566 = vst [vmem:[#allocation13_spill] sm:$0xff] %v16116_v47  ;;  %v16118_v49 = vmax.f32 %v7749_v51, %v7751_v29  ;;  %v6879_v27 = vmax.f32 %v6871_v17, %v6873_v18  ;;  %v17568_v58 = vld [vmem:[#allocation26_spill] sm:$0xff]  ;;  %v6881_v18 = vmax.f32 %v6875_v38, %v6877_v21 }
 0x2d4   :  { %v7788_v43 = vld [vmem:[#allocation2 + $0x7f] sm:$0x1]  ;;  %v6913_v23 = vld [vmem:[#allocation2 + $0x24] sm:$0x1]  ;;  %v6915_v12 = vld [vmem:[#allocation2 + $0x25] sm:$0x1]  ;;  %v6322_v36 = vadd.f32 %v15769_v53, %v6251_v60  ;;  %v16123_v16 = vadd.f32 %v5433_v19, %v17568_v58  ;;  %v6250_v63 = vadd.f32 %v6043_v8, %v15886_v46  ;;  %v7790_v29 = vmax.f32 %v7782_v55, %v7784_v30 }
 0x2d5   :  { %17567 = vst [vmem:[#allocation7_spill] sm:$0xff] %v16118_v49  ;;  %6449 = vst.msk [vmem:[#allocation2 + $0xd8] sm:$0xff] %vm6421_vm2, %v6384_v13  ;;  %v6383_v50 = vmax.f32 %v6319_v25, 0.0  ;;  %v6917_v42 = vld [vmem:[#allocation2 + $0x34] sm:$0x1]  ;;  %v11788_v15 = vpop.f32.mrf.mxu1  ;;  %v11856_v57 = vpop.f32.mrf.mxu0  ;;  %v17569_v60 = vld [vmem:[#allocation27_spill] sm:$0xff]  ;;  %v16136_v51 = vmax.f32 %v6879_v27, %v6881_v18  ;;  %v7792_v47 = vmax.f32 %v7786_v26, %v7788_v43  ;;  %v6921_v17 = vmax.f32 %v6913_v23, %v6915_v12 }
 0x2d6   :  { %v6919_v5 = vld [vmem:[#allocation2 + $0x35] sm:$0x1]  ;;  %v6386_v13 = vmax.f32 %v6322_v36, 0.0  ;;  %v6321_v25 = vadd.f32 %v15769_v53, %v6250_v63  ;;  %v16133_v19 = vadd.f32 %v11788_v15, %v17569_v60  ;;  %v6253_v46 = vadd.f32 %v11856_v57, %v15893_v20  ;;  %v7494_v8 = vld [vmem:[#allocation2 + $0x60] sm:$0x1] }
 0x2d7   :  { %6448 = vst.msk [vmem:[#allocation2 + $0xd0] sm:$0xff] %vm6421_vm2, %v6383_v50  ;;  %v7496_v58 = vld [vmem:[#allocation2 + $0x61] sm:$0x1]  ;;  %v5443_v2 = vpop.f32.mrf.mxu1  ;;  %v6053_v11 = vpop.f32.mrf.mxu0  ;;  %17570 = vst [vmem:[#allocation14_spill] sm:$0xff] %v16136_v51  ;;  %v6923_v38 = vmax.f32 %v6917_v42, %v6919_v5  ;;  %v7499_v21 = vld [vmem:[#allocation2 + $0x70] sm:$0x1]  ;;  %v16146_v5 = vmax.f32 %v7790_v29, %v7792_v47 }
 0x2d8   :  { %v7501_v55 = vld [vmem:[#allocation2 + $0x71] sm:$0x1]  ;;  %v6955_v30 = vld [vmem:[#allocation2 + $0x26] sm:$0x1]  ;;  %6451 = vst.msk [vmem:[#allocation2 + $0xe8] sm:$0xff] %vm6421_vm2, %v6386_v13  ;;  %v6385_v50 = vmax.f32 %v6321_v25, 0.0  ;;  %v6324_v36 = vadd.f32 %v15769_v53, %v6253_v46  ;;  %v6252_v20 = vadd.f32 %v6053_v11, %v15903_v3  ;;  %v7503_v23 = vmax.f32 %v7494_v8, %v7496_v58 }
 0x2d9   :  { %v17571_v63 = vld [vmem:[#allocation28_spill] sm:$0xff]  ;;  %v6957_v57 = vld [vmem:[#allocation2 + $0x27] sm:$0x1]  ;;  %v11791_v27 = vpop.f32.mrf.mxu1  ;;  %v11859_v18 = vpop.f32.mrf.mxu0  ;;  %17572 = vst [vmem:[#allocation8_spill] sm:$0xff] %v16146_v5  ;;  %v16148_v43 = vmax.f32 %v6921_v17, %v6923_v38  ;;  %v7536_v42 = vld [vmem:[#allocation2 + $0x62] sm:$0x1]  ;;  %v7505_v58 = vmax.f32 %v7499_v21, %v7501_v55 }
 0x2da   :  { %v16141_v15 = vadd.f32 %v5443_v2, %v17571_v63  ;;  %v6959_v60 = vld [vmem:[#allocation2 + $0x36] sm:$0x1]  ;;  %v6961_v12 = vld [vmem:[#allocation2 + $0x37] sm:$0x1]  ;;  %v7538_v13 = vld [vmem:[#allocation2 + $0x63] sm:$0x1]  ;;  %v6323_v3 = vadd.f32 %v15769_v53, %v6252_v20  ;;  %v6255_v46 = vadd.f32 %v11859_v18, %v15917_v7  ;;  %v6963_v38 = vmax.f32 %v6955_v30, %v6957_v57 }
 0x2db   :  { %17573 = vst [vmem:[#allocation15_spill] sm:$0xff] %v16148_v43  ;;  %6450 = vst.msk [vmem:[#allocation2 + $0xe0] sm:$0xff] %vm6421_vm2, %v6385_v50  ;;  %v6388_v2 = vmax.f32 %v6324_v36, 0.0  ;;  %v17574_v11 = vld [vmem:[#allocation29_spill] sm:$0xff]  ;;  %v7540_v63 = vld [vmem:[#allocation2 + $0x72] sm:$0x1]  ;;  %v5453_v47 = vpop.f32.mrf.mxu1  ;;  %v6063_v29 = vpop.f32.mrf.mxu0  ;;  %v16166_v17 = vmax.f32 %v7503_v23, %v7505_v58  ;;  %v6965_v5 = vmax.f32 %v6959_v60, %v6961_v12  ;;  %v7544_v8 = vmax.f32 %v7536_v42, %v7538_v13 }
 0x2dc   :  { %v16153_v25 = vadd.f32 %v11791_v27, %v17574_v11  ;;  %v7542_v26 = vld [vmem:[#allocation2 + $0x73] sm:$0x1]  ;;  %v6387_v50 = vmax.f32 %v6323_v3, 0.0  ;;  %v6326_v36 = vadd.f32 %v15769_v53, %v6255_v46  ;;  %v17575_v20 = vld [vmem:[#allocation30_spill] sm:$0xff]  ;;  %v6254_v7 = vadd.f32 %v6063_v29, %v15927_v61  ;;  %v7210_v55 = vld [vmem:[#allocation2 + $0x52] sm:$0x1] }
 0x2dd   :  { %6453 = vst.msk [vmem:[#allocation2 + $0xf8] sm:$0xff] %vm6421_vm2, %v6388_v2  ;;  %v16163_v27 = vadd.f32 %v5453_v47, %v17575_v20  ;;  %v7206_v18 = vld [vmem:[#allocation2 + $0x42] sm:$0x1]  ;;  %v7208_v11 = vld [vmem:[#allocation2 + $0x43] sm:$0x1]  ;;  %v11794_v51 = vpop.f32.mrf.mxu1  ;;  %v11862_v49 = vpop.f32.mrf.mxu0  ;;  %17576 = vst [vmem:[#allocation9_spill] sm:$0xff] %v16166_v17  ;;  %v7546_v21 = vmax.f32 %v7540_v63, %v7542_v26  ;;  %v16176_v26 = vmax.f32 %v6963_v38, %v6965_v5 }
 0x2de   :  { %v7212_v30 = vld [vmem:[#allocation2 + $0x53] sm:$0x1]  ;;  %v7577_v57 = vld [vmem:[#allocation2 + $0x64] sm:$0x1]  ;;  %6452 = vst.msk [vmem:[#allocation2 + $0xf0] sm:$0xff] %vm6421_vm2, %v6387_v50  ;;  %v6390_v2 = vmax.f32 %v6326_v36, 0.0  ;;  %v6325_v3 = vadd.f32 %v15769_v53, %v6254_v7  ;;  %v6257_v61 = vadd.f32 %v11862_v49, %v15939_v44  ;;  %v7214_v42 = vmax.f32 %v7206_v18, %v7208_v11 }
 0x2df   :  { %v17577_v46 = vld [vmem:[#allocation31_spill] sm:$0xff]  ;;  %v7579_v29 = vld [vmem:[#allocation2 + $0x65] sm:$0x1]  ;;  %v7581_v20 = vld [vmem:[#allocation2 + $0x74] sm:$0x1]  ;;  %v5463_v23 = vpop.f32.mrf.mxu1  ;;  %v6073_v58 = vpop.f32.mrf.mxu0  ;;  %17578 = vst [vmem:[#allocation16_spill] sm:$0xff] %v16176_v26  ;;  %v16178_v12 = vmax.f32 %v7544_v8, %v7546_v21  ;;  %v7216_v11 = vmax.f32 %v7210_v55, %v7212_v30 }
 0x2e0   :  { %v16171_v47 = vadd.f32 %v11794_v51, %v17577_v46  ;;  %v7583_v13 = vld [vmem:[#allocation2 + $0x75] sm:$0x1]  ;;  %v7987_v63 = vld [vmem:[#allocation2 + $0x88] sm:$0x1]  ;;  %v7989_v50 = vld [vmem:[#allocation2 + $0x89] sm:$0x1]  ;;  %v6328_v44 = vadd.f32 %v15769_v53, %v6257_v61  ;;  %v6256_v7 = vadd.f32 %v6073_v58, %v15959_v9  ;;  %v7585_v21 = vmax.f32 %v7577_v57, %v7579_v29 }
 0x2e1   :  { %17579 = vst [vmem:[#allocation10_spill] sm:$0xff] %v16178_v12  ;;  %6455 = vst.msk [vmem:[#allocation2 + $0x108] sm:$0xff] %vm6421_vm2, %v6390_v2  ;;  %v6389_v51 = vmax.f32 %v6325_v3, 0.0  ;;  %v17580_v49 = vld [vmem:[#allocation33_spill] sm:$0xff]  ;;  %v7991_v46 = vld [vmem:[#allocation2 + $0x98] sm:$0x1]  ;;  %v11797_v5 = vpop.f32.mrf.mxu1  ;;  %v11865_v38 = vpop.f32.mrf.mxu0  ;;  %v16196_v8 = vmax.f32 %v7214_v42, %v7216_v11  ;;  %v7587_v26 = vmax.f32 %v7581_v20, %v7583_v13  ;;  %v7995_v18 = vmax.f32 %v7987_v63, %v7989_v50 }
 0x2e2   :  { %v16183_v36 = vadd.f32 %v5463_v23, %v17580_v49  ;;  %v7993_v60 = vld [vmem:[#allocation2 + $0x99] sm:$0x1]  ;;  %v6392_v2 = vmax.f32 %v6328_v44, 0.0  ;;  %v6327_v3 = vadd.f32 %v15769_v53, %v6256_v7  ;;  %v6259_v9 = vadd.f32 %v11865_v38, %v15978_v59  ;;  %v7618_v58 = vld [vmem:[#allocation2 + $0x66] sm:$0x1]  ;;  %v17589_v50 = vld [vmem:[#allocation37_spill] sm:$0xff] }
 0x2e3   :  { %6454 = vst.msk [vmem:[#allocation2 + $0x100] sm:$0xff] %vm6421_vm2, %v6389_v51  ;;  %v17581_v61 = vld [vmem:[#allocation32_spill] sm:$0xff]  ;;  %v7620_v49 = vld [vmem:[#allocation2 + $0x67] sm:$0x1]  ;;  %v5473_v17 = vpop.f32.mrf.mxu1  ;;  %v6083_v43 = vpop.f32.mrf.mxu0  ;;  %17582 = vst [vmem:[#allocation17_spill] sm:$0xff] %v16196_v8  ;;  %v7997_v55 = vmax.f32 %v7991_v46, %v7993_v60  ;;  %v16215_v7 = vmax.f32 %v7585_v21, %v7587_v26 }
 0x2e4   :  { %v16193_v23 = vadd.f32 %v11797_v5, %v17581_v61  ;;  %v7622_v30 = vld [vmem:[#allocation2 + $0x76] sm:$0x1]  ;;  %v7624_v57 = vld [vmem:[#allocation2 + $0x77] sm:$0x1]  ;;  %6457 = vst.msk [vmem:[#allocation2 + $0x118] sm:$0xff] %vm6421_vm2, %v6392_v2  ;;  %v6391_v29 = vmax.f32 %v6327_v3, 0.0  ;;  %v6258_v42 = vadd.f32 %v6083_v43, %v15991_v1  ;;  %v7626_v5 = vmax.f32 %v7618_v58, %v7620_v49 }
 0x2e5   :  { %v16202_v53 = vld [vmem:[%s17274_s2] ss:$0 sm:$0xff]  ;;  %v17583_v51 = vld [vmem:[#allocation34_spill] sm:$0xff]  ;;  %v16209_v20 = vld [vmem:[#allocation2 + $0x8a] sm:$0x1]  ;;  %v11800_v13 = vpop.f32.mrf.mxu1  ;;  %v11868_v63 = vpop.f32.mrf.mxu0  ;;  %17584 = vst [vmem:[#allocation11_spill] sm:$0xff] %v16215_v7  ;;  %v16217_v46 = vmax.f32 %v7995_v18, %v7997_v55  ;;  %v7628_v55 = vmax.f32 %v7622_v30, %v7624_v57 }
 0x2e6   :  { %v6330_v59 = vadd.f32 %v16202_v53, %v6259_v9  ;;  %v16206_v44 = vadd.f32 %v5473_v17, %v17583_v51  ;;  %v16211_v60 = vld [vmem:[#allocation2 + $0x8b] sm:$0x1]  ;;  %6456 = vst.msk [vmem:[#allocation2 + $0x110] sm:$0xff] %vm6421_vm2, %v6391_v29  ;;  %v6329_v38 = vadd.f32 %v16202_v53, %v6258_v42  ;;  %v6261_v11 = vadd.f32 %v11868_v63, %v16001_v10  ;;  %v16225_v2 = vld [vmem:[#allocation2 + $0x9a] sm:$0x1]  ;;  %v17587_v51 = vld [vmem:[#allocation36_spill] sm:$0xff] }
 0x2e7   :  { %17585 = vst [vmem:[#allocation18_spill] sm:$0xff] %v16217_v46  ;;  %v17586_v1 = vld [vmem:[#allocation35_spill] sm:$0xff]  ;;  %v16227_v3 = vld [vmem:[#allocation2 + $0x9b] sm:$0x1]  ;;  %v5483_v61 = vpop.f32.mrf.mxu1  ;;  %v6093_v26 = vpop.f32.mrf.mxu0  ;;  %v8036_v10 = vmax.f32 %v16209_v20, %v16211_v60  ;;  %v16249_v58 = vld [vmem:[#allocation2 + $0x82] sm:$0x1] }
 0x2e8   :  { %v6394_v17 = vmax.f32 %v6330_v59, 0.0  ;;  %v16222_v43 = vadd.f32 %v11800_v13, %v17586_v1  ;;  %v16229_v21 = vld [vmem:[#allocation2 + $0x108] sm:$0x1]  ;;  %v16231_v18 = vld [vmem:[#allocation2 + $0x109] sm:$0x1]  ;;  %v6393_v29 = vmax.f32 %v6329_v38, 0.0  ;;  %v6332_v59 = vadd.f32 %v16202_v53, %v6261_v11 }
 0x2e9   :  { %v16233_v9 = vld [vmem:[#allocation2 + $0x10a] sm:$0x1]  ;;  %v16244_v42 = vadd.f32 %v5483_v61, %v17587_v51  ;;  %v6260_v13 = vadd.f32 %v6093_v26, %v16011_v0  ;;  %v6704_v63 = vld [vmem:[#allocation2 + $0x10b] sm:$0x1]  ;;  %v16247_v1 = vld [vmem:[#allocation2 + $0x10c] sm:$0x1]  ;;  %v11803_v30 = vpop.f32.mrf.mxu1  ;;  %v11871_v57 = vpop.f32.mrf.mxu0  ;;  %v6668_v20 = vmax.f32 %v16229_v21, %v16231_v18  ;;  %v16260_v0 = vmax.f32 %v7626_v5, %v7628_v55 }
 0x2ea   :  { %6459 = vst.msk [vmem:[#allocation2 + $0x128] sm:$0xff] %vm6421_vm2, %v6394_v17  ;;  %v16251_v49 = vld [vmem:[#allocation2 + $0x83] sm:$0x1]  ;;  %v6710_v60 = vmax.f32 %v16233_v9, %v6704_v63  ;;  %v16256_v17 = vld [vmem:[#allocation2 + $0x10d] sm:$0x1]  ;;  %v8038_v61 = vmax.f32 %v16225_v2, %v16227_v3  ;;  %6458 = vst.msk [vmem:[#allocation2 + $0x120] sm:$0xff] %vm6421_vm2, %v6393_v29  ;;  %v16267_v46 = vadd.f32 %v11803_v30, %v17589_v50 }
 0x2eb   :  { %v16258_v38 = vld [vmem:[#allocation2 + $0x10e] sm:$0x1]  ;;  %v6788_v11 = vld [vmem:[#allocation2 + $0x10f] sm:$0x1]  ;;  %17588 = vst [vmem:[#allocation12_spill] sm:$0xff] %v16260_v0  ;;  %v6396_v26 = vmax.f32 %v6332_v59, 0.0  ;;  %v6331_v51 = vadd.f32 %v16202_v53, %v6260_v13  ;;  %v6263_v21 = vadd.f32 %v11871_v57, %v16025_v56  ;;  %v5493_v5 = vpop.f32.mrf.mxu1  ;;  %v6103_v55 = vpop.f32.mrf.mxu0  ;;  %v6752_v29 = vmax.f32 %v16247_v1, %v16256_v17 }
 0x2ec   :  { %v16270_v18 = vld [vmem:[#allocation2 + $0x102] sm:$0x1]  ;;  %v16272_v9 = vld [vmem:[#allocation2 + $0x103] sm:$0x1]  ;;  %v6664_v63 = vld [vmem:[#allocation2 + $0x118] sm:$0x1]  ;;  %v6794_v59 = vmax.f32 %v16258_v38, %v6788_v11  ;;  %v6262_v8 = vadd.f32 %v6103_v55, %v16037_v52 }
 0x2ed   :  { %v6666_v2 = vld [vmem:[#allocation2 + $0x119] sm:$0x1]  ;;  %v6706_v3 = vld [vmem:[#allocation2 + $0x11a] sm:$0x1]  ;;  %v6542_v50 = vmax.f32 %v16270_v18, %v16272_v9  ;;  %6461 = vst.msk [vmem:[#allocation2 + $0x138] sm:$0xff] %vm6421_vm2, %v6396_v26  ;;  %v6395_v13 = vmax.f32 %v6331_v51, 0.0  ;;  %v6334_v30 = vadd.f32 %v16202_v53, %v6263_v21  ;;  %v11806_v38 = vpop.f32.mrf.mxu1  ;;  %v11874_v11 = vpop.f32.mrf.mxu0  ;;  %v16287_v26 = vmax.f32 %v8036_v10, %v8038_v61 }
 0x2ee   :  { %v17590_v57 = vld [vmem:[#allocation38_spill] sm:$0xff]  ;;  %v6708_v1 = vld [vmem:[#allocation2 + $0x11b] sm:$0x1]  ;;  %v6748_v17 = vld [vmem:[#allocation2 + $0x11c] sm:$0x1]  ;;  %v6670_v18 = vmax.f32 %v6664_v63, %v6666_v2  ;;  %v6333_v52 = vadd.f32 %v16202_v53, %v6262_v8  ;;  %s11949_s2 = smov 32  }
 0x2ef   :  { %v16284_v7 = vadd.f32 %v5493_v5, %v17590_v57  ;;  %v6712_v9 = vmax.f32 %v6706_v3, %v6708_v1  ;;  %v6750_v12 = vld [vmem:[#allocation2 + $0x11d] sm:$0x1]  ;;  %v6790_v56 = vld [vmem:[#allocation2 + $0x11e] sm:$0x1]  ;;  %v6792_v0 = vld [vmem:[#allocation2 + $0x11f] sm:$0x1]  ;;  %v6265_v57 = vadd.f32 %v11874_v11, %v16048_v34  ;;  %v5503_v63 = vpop.f32.mrf.mxu1  ;;  %v6113_v2 = vpop.f32.mrf.mxu0 }
 0x2f0   :  { %17591 = vst [vmem:[#allocation19_spill] sm:$0xff] %v16287_v26  ;;  %6460 = vst.msk [vmem:[#allocation2 + $0x130] sm:$0xff] %vm6421_vm2, %v6395_v13  ;;  %v6398_v21 = vmax.f32 %v6334_v30, 0.0  ;;  %v17592_v5 = vld [vmem:[#allocation39_spill] sm:$0xff]  ;;  %v6672_v3 = vmax.f32 %v6668_v20, %v6670_v18  ;;  %v6754_v35 = vmax.f32 %v6748_v17, %v6750_v12  ;;  %v6796_v10 = vmax.f32 %v6790_v56, %v6792_v0  ;;  %v6538_v61 = vld [vmem:[#allocation2 + $0x112] sm:$0x1] }
 0x2f1   :  { %v16294_v55 = vadd.f32 %v11806_v38, %v17592_v5  ;;  %v6714_v1 = vmax.f32 %v6710_v60, %v6712_v9  ;;  %v6540_v26 = vld [vmem:[#allocation2 + $0x113] sm:$0x1]  ;;  %v6397_v51 = vmax.f32 %v6333_v52, 0.0  ;;  %v6336_v13 = vadd.f32 %v16202_v53, %v6265_v57  ;;  %v11877_v5 = vpop.f32.mrf.mxu0 }
 0x2f2   :  { %6463 = vst.msk [vmem:[#allocation2 + $0x148] sm:$0xff] %vm6421_vm2, %v6398_v21  ;;  %v17593_v30 = vld [vmem:[#allocation40_spill] sm:$0xff]  ;;  %v6264_v38 = vadd.f32 %v6113_v2, %v16063_v48  ;;  %v6688_v34 = vrot.slane %v6672_v3, %v15787_v4  ;;  %v6756_v60 = vmax.f32 %v6752_v29, %v6754_v35  ;;  %v6798_v12 = vmax.f32 %v6794_v59, %v6796_v10 }
 0x2f3   :  { %v16300_v8 = vadd.f32 %v5503_v63, %v17593_v30  ;;  %v6730_v20 = vrot.slane %v6714_v1, %v15787_v4  ;;  %6462 = vst.msk [vmem:[#allocation2 + $0x140] sm:$0xff] %vm6421_vm2, %v6397_v51  ;;  %v6400_v0 = vmax.f32 %v6336_v13, 0.0  ;;  %v6267_v17 = vadd.f32 %v11877_v5, %v16073_v41  ;;  %v6123_v18 = vpop.f32.mrf.mxu0 }
 0x2f4   :  { %v6335_v56 = vadd.f32 %v16202_v53, %v6264_v38  ;;  %v6544_v11 = vmax.f32 %v6538_v61, %v6540_v26  ;;  %v6691_v9 = vrot.slane %v6688_v34, 7  ;;  %v6772_v48 = vrot.slane %v6756_v60, %v15787_v4 }
 0x2f5   :  { %v6733_v21 = vrot.slane %v6730_v20, 7  ;;  %v6814_v52 = vrot.slane %v6798_v12, %v15787_v4  ;;  %6465 = vst.msk [vmem:[#allocation2 + $0x158] sm:$0xff] %vm6421_vm2, %v6400_v0  ;;  %v6338_v35 = vadd.f32 %v16202_v53, %v6267_v17  ;;  %v6266_v29 = vadd.f32 %v6123_v18, %v16081_v39  ;;  %v11880_v51 = vpop.f32.mrf.mxu0 }
 0x2f6   :  { %v6399_v57 = vmax.f32 %v6335_v56, 0.0  ;;  %v6546_v59 = vmax.f32 %v6542_v50, %v6544_v11  ;;  %v17594_v41 = vrot.slane %v15896_v24, %v15787_v4  ;;  %v17595_v63 = vrot.slane %v15898_v37, %v15787_v4 }
 0x2f7   :  { %v6775_v3 = vrot.slane %v6772_v48, 7  ;;  %v6817_v1 = vrot.slane %v6814_v52, 7  ;;  %v6402_v10 = vmax.f32 %v6338_v35, 0.0  ;;  %v6337_v61 = vadd.f32 %v16202_v53, %v6266_v29  ;;  %v6133_v13 = vpop.f32.mrf.mxu0 }
 0x2f8   :  { %v6692_v26 = vsel %vm6522_vm3, %v6691_v9, %v17594_v41  ;;  %v6734_v2 = vsel %vm6522_vm3, %v6733_v21, %v17595_v63  ;;  %6464 = vst.msk [vmem:[#allocation2 + $0x150] sm:$0xff] %vm6421_vm2, %v6399_v57  ;;  %v6269_v39 = vadd.f32 %v11880_v51, %v16093_v14  ;;  %v17596_v37 = vrot.slane %v15910_v28, %v15787_v4  ;;  %v6576_v57 = vld [vmem:[#allocation2 + $0x104] sm:$0x1]  ;;  %v6578_v51 = vld [vmem:[#allocation2 + $0x105] sm:$0x1] }
 0x2f9   :  { %v6693_v50 = vsel %vm6524_vm4, %v6691_v9, %v6692_v26  ;;  %v6735_v30 = vsel %vm6524_vm4, %v6733_v21, %v6734_v2  ;;  %v17597_v5 = vrot.slane %v15912_v6, %v15787_v4  ;;  %v7330_v20 = vld [vmem:[#allocation2 + $0x148] sm:$0x1]  ;;  %v7332_v60 = vld [vmem:[#allocation2 + $0x149] sm:$0x1]  ;;  %6467 = vst.msk [vmem:[#allocation2 + $0x168] sm:$0xff] %vm6421_vm2, %v6402_v10  ;;  %v6401_v14 = vmax.f32 %v6337_v61, 0.0  ;;  %v11883_v11 = vpop.f32.mrf.mxu0 }
 0x2fa   :  { %v6694_v24 = vsel %vm6526_vm5, %v6691_v9, %v6693_v50  ;;  %v6776_v38 = vsel %vm6522_vm3, %v6775_v3, %v17596_v37  ;;  %v6340_v12 = vadd.f32 %v16202_v53, %v6269_v39  ;;  %v6268_v0 = vadd.f32 %v6133_v13, %v16103_v45  ;;  %v7371_v17 = vld [vmem:[#allocation2 + $0x14a] sm:$0x1]  ;;  %v7373_v28 = vld [vmem:[#allocation2 + $0x14b] sm:$0x1]  ;;  %v6580_v41 = vld [vmem:[#allocation2 + $0x114] sm:$0x1] }
 0x2fb   :  { %v6818_v34 = vsel %vm6522_vm3, %v6817_v1, %v17597_v5  ;;  %v6695_v56 = vsel %vm6528_vm6, %v6691_v9, %v6694_v24  ;;  %v6736_v6 = vsel %vm6526_vm5, %v6733_v21, %v6735_v30  ;;  %v6777_v18 = vsel %vm6524_vm4, %v6775_v3, %v6776_v38  ;;  %6466 = vst.msk [vmem:[#allocation2 + $0x160] sm:$0xff] %vm6421_vm2, %v6401_v14  ;;  %v6143_v26 = vpop.f32.mrf.mxu0  ;;  %v6582_v38 = vld [vmem:[#allocation2 + $0x115] sm:$0x1] }
 0x2fc   :  { %6696 = vrot.lane.b32.xlu0 %v6695_v56, %s11949_s2  ;;  %v6819_v48 = vsel %vm6524_vm4, %v6817_v1, %v6818_v34  ;;  %v7338_v52 = vmax.f32 %v7330_v20, %v7332_v60  ;;  %v6404_v35 = vmax.f32 %v6340_v12, 0.0  ;;  %v6339_v45 = vadd.f32 %v16202_v53, %v6268_v0  ;;  %v7334_v10 = vld [vmem:[#allocation2 + $0x158] sm:$0x1]  ;;  %v7336_v61 = vld [vmem:[#allocation2 + $0x159] sm:$0x1] }
 0x2fd   :  { %v6271_v9 = vadd.f32 %v11883_v11, %v16111_v33  ;;  %v6737_v29 = vsel %vm6528_vm6, %v6733_v21, %v6736_v6  ;;  %v6778_v63 = vsel %vm6526_vm5, %v6775_v3, %v6777_v18  ;;  %v6820_v2 = vsel %vm6526_vm5, %v6817_v1, %v6819_v48  ;;  %v7375_v50 = vld [vmem:[#allocation2 + $0x15a] sm:$0x1]  ;;  %v7377_v37 = vld [vmem:[#allocation2 + $0x15b] sm:$0x1]  ;;  %v11886_v5 = vpop.f32.mrf.mxu0 }
 0x2fe   :  { %v6562_v39 = vrot.slane %v6546_v59, %v15787_v4  ;;  %v7379_v13 = vmax.f32 %v7371_v17, %v7373_v28  ;;  %6469 = vst.msk [vmem:[#allocation2 + $0x178] sm:$0xff] %vm6421_vm2, %v6404_v35  ;;  %v6403_v24 = vmax.f32 %v6339_v45, 0.0  ;;  %v6270_v21 = vadd.f32 %v6143_v26, %v16123_v16 }
 0x2ff   :  { %v6342_v33 = vadd.f32 %v16202_v53, %v6271_v9  ;;  %v6779_v30 = vsel %vm6528_vm6, %v6775_v3, %v6778_v63  ;;  %v6821_v34 = vsel %vm6528_vm6, %v6817_v1, %v6820_v2  ;;  %v7340_v59 = vmax.f32 %v7334_v10, %v7336_v61  ;;  %v6153_v3 = vpop.f32.mrf.mxu0  ;;  %v16375_v10 = vld [vmem:[#allocation2 + $0x106] sm:$0x1]  ;;  %v16377_v61 = vld [vmem:[#allocation2 + $0x107] sm:$0x1] }
 0x300   :  { %6738 = vrot.lane.b32.xlu0 %v6737_v29, %s11950_s22  ;;  %v6565_v20 = vrot.slane %v6562_v39, 7  ;;  %v7381_v60 = vmax.f32 %v7375_v50, %v7377_v37  ;;  %6468 = vst.msk [vmem:[#allocation2 + $0x170] sm:$0xff] %vm6421_vm2, %v6403_v24  ;;  %v6341_v12 = vadd.f32 %v16202_v53, %v6270_v21  ;;  %v6273_v16 = vadd.f32 %v11886_v5, %v16133_v19  ;;  %v7412_v19 = vld [vmem:[#allocation2 + $0x14c] sm:$0x1] }
 0x301   :  { %v6406_v14 = vmax.f32 %v6342_v33, 0.0  ;;  %v6584_v0 = vmax.f32 %v6576_v57, %v6578_v51  ;;  %v7342_v56 = vmax.f32 %v7338_v52, %v7340_v59  ;;  %v17598_v17 = vrot.slane %v15934_v54, %v15787_v4  ;;  %v7414_v57 = vld [vmem:[#allocation2 + $0x14d] sm:$0x1]  ;;  %v11889_v52 = vpop.f32.mrf.mxu0  ;;  %v7416_v51 = vld [vmem:[#allocation2 + $0x15c] sm:$0x1] }
 0x302   :  { %v7383_v11 = vmax.f32 %v7379_v13, %v7381_v60  ;;  %v6586_v1 = vmax.f32 %v6580_v41, %v6582_v38  ;;  %v6405_v6 = vmax.f32 %v6341_v12, 0.0  ;;  %v6344_v18 = vadd.f32 %v16202_v53, %v6273_v16  ;;  %v7418_v41 = vld [vmem:[#allocation2 + $0x15d] sm:$0x1] }
 0x303   :  { %v6566_v28 = vsel %vm6522_vm3, %v6565_v20, %v17598_v17  ;;  %6471 = vst.msk [vmem:[#allocation2 + $0x188] sm:$0xff] %vm6421_vm2, %v6406_v14  ;;  %v6272_v48 = vadd.f32 %v6153_v3, %v16141_v15  ;;  %v7358_v54 = vrot.slane %v7342_v56, %v15787_v4  ;;  %v6275_v63 = vadd.f32 %v11889_v52, %v16153_v25  ;;  %v6163_v39 = vpop.f32.mrf.mxu0 }
 0x304   :  { %v6567_v35 = vsel %vm6524_vm4, %v6565_v20, %v6566_v28  ;;  %6780 = vrot.lane.b32.xlu0 %v6779_v30, %s11951_s23  ;;  %v7399_v9 = vrot.slane %v7383_v11, %v15787_v4  ;;  %v6588_v29 = vmax.f32 %v6584_v0, %v6586_v1  ;;  %6470 = vst.msk [vmem:[#allocation2 + $0x180] sm:$0xff] %vm6421_vm2, %v6405_v6  ;;  %v6408_v15 = vmax.f32 %v6344_v18, 0.0  ;;  %v6622_v11 = vld [vmem:[#allocation2 + $0x116] sm:$0x1]  ;;  %v6624_v1 = vld [vmem:[#allocation2 + $0x117] sm:$0x1] }
 0x305   :  { %v6568_v45 = vsel %vm6526_vm5, %v6565_v20, %v6567_v35  ;;  %v6343_v26 = vadd.f32 %v16202_v53, %v6272_v48  ;;  %v7361_v50 = vrot.slane %v7358_v54, 7  ;;  %v7420_v33 = vmax.f32 %v7412_v19, %v7414_v57  ;;  %v11892_v38 = vpop.f32.mrf.mxu0  ;;  %v7453_v35 = vld [vmem:[#allocation2 + $0x14e] sm:$0x1]  ;;  %v7455_v19 = vld [vmem:[#allocation2 + $0x14f] sm:$0x1] }
 0x306   :  { %v6569_v2 = vsel %vm6528_vm6, %v6565_v20, %v6568_v45  ;;  %v7402_v13 = vrot.slane %v7399_v9, 7  ;;  %v6604_v24 = vrot.slane %v6588_v29, %v15787_v4  ;;  %6473 = vst.msk [vmem:[#allocation2 + $0x198] sm:$0xff] %vm6421_vm2, %v6408_v15  ;;  %v6346_v30 = vadd.f32 %v16202_v53, %v6275_v63 }
 0x307   :  { %v6407_v21 = vmax.f32 %v6343_v26, 0.0  ;;  %v6274_v37 = vadd.f32 %v6163_v39, %v16163_v27  ;;  %v7422_v25 = vmax.f32 %v7416_v51, %v7418_v41  ;;  %v17599_v5 = vrot.slane %v16004_v22, %v15787_v4  ;;  %v6173_v0 = vpop.f32.mrf.mxu0  ;;  %v7457_v51 = vld [vmem:[#allocation2 + $0x15e] sm:$0x1]  ;;  %v7459_v41 = vld [vmem:[#allocation2 + $0x15f] sm:$0x1] }
 0x308   :  { %6822 = vrot.lane.b32.xlu0 %v6821_v34, %s11952_s24  ;;  %v17600_v20 = vrot.slane %v16006_v40, %v15787_v4  ;;  %v6607_v14 = vrot.slane %v6604_v24, 7  ;;  %v6626_v12 = vmax.f32 %v16375_v10, %v16377_v61  ;;  %v6410_v27 = vmax.f32 %v6346_v30, 0.0 }
 0x309   :  { %v7362_v59 = vsel %vm6522_vm3, %v7361_v50, %v17599_v5  ;;  %6472 = vst.msk [vmem:[#allocation2 + $0x190] sm:$0xff] %vm6421_vm2, %v6407_v21  ;;  %v6345_v34 = vadd.f32 %v16202_v53, %v6274_v37  ;;  %v6277_v16 = vadd.f32 %v11892_v38, %v16171_v47  ;;  %v17601_v56 = vrot.slane %v15950_v32, %v15787_v4  ;;  %v11895_v32 = vpop.f32.mrf.mxu0  ;;  %v7002_v38 = vld [vmem:[#allocation2 + $0x138] sm:$0x1]  ;;  %v7004_v5 = vld [vmem:[#allocation2 + $0x139] sm:$0x1] }
 0x30a   :  { %v7403_v60 = vsel %vm6522_vm3, %v7402_v13, %v17600_v20  ;;  %v7363_v22 = vsel %vm6524_vm4, %v7361_v50, %v7362_v59  ;;  %v7424_v28 = vmax.f32 %v7420_v33, %v7422_v25  ;;  %6475 = vst.msk [vmem:[#allocation2 + $0x1a8] sm:$0xff] %vm6421_vm2, %v6410_v27  ;;  %v6276_v18 = vadd.f32 %v6173_v0, %v16183_v36  ;;  %v7000_v33 = vld [vmem:[#allocation2 + $0x129] sm:$0x1]  ;;  %v7250_v27 = vld [vmem:[#allocation2 + $0x145] sm:$0x1] }
 0x30b   :  { %v7364_v3 = vsel %vm6526_vm5, %v7361_v50, %v7363_v22  ;;  %v7404_v40 = vsel %vm6524_vm4, %v7402_v13, %v7403_v60  ;;  %v6608_v17 = vsel %vm6522_vm3, %v6607_v14, %v17601_v56  ;;  %v6409_v6 = vmax.f32 %v6345_v34, 0.0  ;;  %v6183_v15 = vpop.f32.mrf.mxu0  ;;  %v7252_v0 = vld [vmem:[#allocation2 + $0x154] sm:$0x1] }
 0x30c   :  { %v6348_v47 = vadd.f32 %v16202_v53, %v6277_v16  ;;  %v7365_v48 = vsel %vm6528_vm6, %v7361_v50, %v7364_v3  ;;  %6570 = vrot.lane.b32.xlu0 %v6569_v2, %s11953_s25  ;;  %v7405_v57 = vsel %vm6526_vm5, %v7402_v13, %v7404_v40  ;;  %v6609_v52 = vsel %vm6524_vm4, %v6607_v14, %v6608_v17  ;;  %v7254_v3 = vld [vmem:[#allocation2 + $0x155] sm:$0x1] }
 0x30d   :  { %7366 = vrot.lane.b32.xlu1 %v7365_v48, %s11949_s2  ;;  %v7440_v54 = vrot.slane %v7424_v28, %v15787_v4  ;;  %6474 = vst.msk [vmem:[#allocation2 + $0x1a0] sm:$0xff] %vm6421_vm2, %v6409_v6  ;;  %v6347_v36 = vadd.f32 %v16202_v53, %v6276_v18  ;;  %v6279_v9 = vadd.f32 %v11895_v32, %v16193_v23  ;;  %v6998_v23 = vld [vmem:[#allocation2 + $0x128] sm:$0x1]  ;;  %v16438_v28 = vld [vmem:[#allocation2 + $0x12a] sm:$0x1] }
 0x30e   :  { %v6412_v45 = vmax.f32 %v6348_v47, 0.0  ;;  %v7406_v29 = vsel %vm6528_vm6, %v7402_v13, %v7405_v57  ;;  %v6610_v26 = vsel %vm6526_vm5, %v6607_v14, %v6609_v52  ;;  %v6628_v2 = vmax.f32 %v6622_v11, %v6624_v1  ;;  %v11898_v13 = vpop.f32.mrf.mxu0  ;;  %v16440_v11 = vld [vmem:[#allocation2 + $0x12b] sm:$0x1] }
 0x30f   :  { %v7443_v63 = vrot.slane %v7440_v54, 7  ;;  %v7461_v10 = vmax.f32 %v7453_v35, %v7455_v19  ;;  %v6411_v61 = vmax.f32 %v6347_v36, 0.0  ;;  %v6350_v39 = vadd.f32 %v16202_v53, %v6279_v9 }
 0x310   :  { %6477 = vst.msk [vmem:[#allocation2 + $0x1b8] sm:$0xff] %vm6421_vm2, %v6412_v45  ;;  %v6278_v50 = vadd.f32 %v6183_v15, %v16206_v44  ;;  %v6611_v24 = vsel %vm6528_vm6, %v6607_v14, %v6610_v26  ;;  %v17602_v21 = vrot.slane %v16018_v31, %v15787_v4  ;;  %v6630_v37 = vmax.f32 %v6626_v12, %v6628_v2  ;;  %v7248_v14 = vld [vmem:[#allocation2 + $0x144] sm:$0x1]  ;;  %v6193_v34 = vpop.f32.mrf.mxu0 }
 0x311   :  { %7407 = vrot.lane.b32.xlu1 %v7406_v29, %s11950_s22  ;;  %6612 = vrot.lane.b32.xlu0 %v6611_v24, %s11954_s26  ;;  %v7463_v25 = vmax.f32 %v7457_v51, %v7459_v41  ;;  %6476 = vst.msk [vmem:[#allocation2 + $0x1b0] sm:$0xff] %vm6421_vm2, %v6411_v61  ;;  %v6414_v44 = vmax.f32 %v6350_v39, 0.0  ;;  %v6281_v20 = vadd.f32 %v11898_v13, %v16222_v43  ;;  %v7044_v39 = vld [vmem:[#allocation2 + $0x13a] sm:$0x1]  ;;  %v7289_v13 = vld [vmem:[#allocation2 + $0x146] sm:$0x1] }
 0x312   :  { %v7444_v30 = vsel %vm6522_vm3, %v7443_v63, %v17602_v21  ;;  %v6349_v59 = vadd.f32 %v16202_v53, %v6278_v50  ;;  %v6646_v16 = vrot.slane %v6630_v37, %v15787_v4  ;;  %v7006_v22 = vmax.f32 %v6998_v23, %v7000_v33  ;;  %v11901_v6 = vpop.f32.mrf.mxu0  ;;  %v7046_v50 = vld [vmem:[#allocation2 + $0x13b] sm:$0x1]  ;;  %v7291_v21 = vld [vmem:[#allocation2 + $0x147] sm:$0x1]  ;;  %v16469_v37 = vld [vmem:[#allocation2 + $0x12d] sm:$0x1] }
 0x313   :  { %v7445_v60 = vsel %vm6524_vm4, %v7443_v63, %v7444_v30  ;;  %v7465_v12 = vmax.f32 %v7461_v10, %v7463_v25  ;;  %6479 = vst.msk [vmem:[#allocation2 + $0x1c8] sm:$0xff] %vm6421_vm2, %v6414_v44  ;;  %v6352_v56 = vadd.f32 %v16202_v53, %v6281_v20  ;;  %v6280_v43 = vadd.f32 %v6193_v34, %v16244_v42  ;;  %v16467_v30 = vld [vmem:[#allocation2 + $0x12c] sm:$0x1]  ;;  %v7293_v20 = vld [vmem:[#allocation2 + $0x156] sm:$0x1] }
 0x314   :  { %v7446_v31 = vsel %vm6526_vm5, %v7443_v63, %v7445_v60  ;;  %v6413_v40 = vmax.f32 %v6349_v59, 0.0  ;;  %v6649_v1 = vrot.slane %v6646_v16, 7  ;;  %v7008_v18 = vmax.f32 %v7002_v38, %v7004_v5  ;;  %v6203_v54 = vpop.f32.mrf.mxu0  ;;  %v7295_v60 = vld [vmem:[#allocation2 + $0x157] sm:$0x1]  ;;  %v7086_v16 = vld [vmem:[#allocation2 + $0x13c] sm:$0x1] }
 0x315   :  { %v7447_v17 = vsel %vm6528_vm6, %v7443_v63, %v7446_v31  ;;  %v7481_v47 = vrot.slane %v7465_v12, %v15787_v4  ;;  %v7256_v48 = vmax.f32 %v7248_v14, %v7250_v27  ;;  %v6416_v35 = vmax.f32 %v6352_v56, 0.0  ;;  %v7088_v12 = vld [vmem:[#allocation2 + $0x13d] sm:$0x1] }
 0x316   :  { %7448 = vrot.lane.b32.xlu1 %v7447_v17, %s11951_s23  ;;  %6478 = vst.msk [vmem:[#allocation2 + $0x1c0] sm:$0xff] %vm6421_vm2, %v6413_v40  ;;  %v6351_v19 = vadd.f32 %v16202_v53, %v6280_v43  ;;  %v6283_v42 = vadd.f32 %v11901_v6, %v16267_v46  ;;  %v7258_v32 = vmax.f32 %v7252_v0, %v7254_v3  ;;  %v11904_v10 = vpop.f32.mrf.mxu0  ;;  %v7662_v0 = vld [vmem:[#allocation2 + $0x169] sm:$0x1] }
 0x317   :  { %v17603_v57 = vrot.slane %v15952_v62, %v15787_v4  ;;  %v7484_v45 = vrot.slane %v7481_v47, 7  ;;  %v7010_v36 = vmax.f32 %v7006_v22, %v7008_v18  ;;  %v7048_v9 = vmax.f32 %v16438_v28, %v16440_v11  ;;  %6481 = vst.msk [vmem:[#allocation2 + $0x1d8] sm:$0xff] %vm6421_vm2, %v6416_v35  ;;  %v17604_v62 = vld [vmem:[#allocation42_spill] sm:$0xff]  ;;  %v7664_v28 = vld [vmem:[#allocation2 + $0x178] sm:$0x1] }
 0x318   :  { %v6415_v29 = vmax.f32 %v6351_v19, 0.0  ;;  %v6354_v41 = vadd.f32 %v16202_v53, %v6283_v42  ;;  %v6282_v46 = vadd.f32 %v6203_v54, %v16284_v7  ;;  %v17605_v26 = vrot.slane %v17604_v62, %v15787_v4  ;;  %v6213_v44 = vpop.f32.mrf.mxu0  ;;  %v7660_v22 = vld [vmem:[#allocation2 + $0x168] sm:$0x1]  ;;  %v7124_v11 = vld [vmem:[#allocation2 + $0x12e] sm:$0x1] }
 0x319   :  { %v6650_v52 = vsel %vm6522_vm3, %v6649_v1, %v17603_v57  ;;  %v7026_v2 = vrot.slane %v7010_v36, %v15787_v4  ;;  %v7260_v61 = vmax.f32 %v7256_v48, %v7258_v32  ;;  %v6285_v5 = vadd.f32 %v11904_v10, %v16294_v55  ;;  %v17606_v55 = vld [vmem:[#allocation41_spill] sm:$0xff]  ;;  %v7666_v18 = vld [vmem:[#allocation2 + $0x179] sm:$0x1]  ;;  %v7126_v48 = vld [vmem:[#allocation2 + $0x12f] sm:$0x1] }
 0x31a   :  { %v6651_v51 = vsel %vm6524_vm4, %v6649_v1, %v6650_v52  ;;  %v7485_v63 = vsel %vm6522_vm3, %v7484_v45, %v17605_v26  ;;  %6480 = vst.msk [vmem:[#allocation2 + $0x1d0] sm:$0xff] %vm6421_vm2, %v6415_v29  ;;  %v6418_v23 = vmax.f32 %v6354_v41, 0.0  ;;  %v6353_v7 = vadd.f32 %v16202_v53, %v6282_v46  ;;  %v7128_v35 = vld [vmem:[#allocation2 + $0x13e] sm:$0x1]  ;;  %v17608_v32 = vld [vmem:[#allocation43_spill] sm:$0xff] }
 0x31b   :  { %v6652_v15 = vsel %vm6526_vm5, %v6649_v1, %v6651_v51  ;;  %v7486_v33 = vsel %vm6524_vm4, %v7484_v45, %v7485_v63  ;;  %v7029_v38 = vrot.slane %v7026_v2, 7  ;;  %v7276_v59 = vrot.slane %v7260_v61, %v15787_v4  ;;  %v7701_v36 = vld [vmem:[#allocation2 + $0x16a] sm:$0x1]  ;;  %v7703_v41 = vld [vmem:[#allocation2 + $0x16b] sm:$0x1] }
 0x31c   :  { %v6653_v24 = vsel %vm6528_vm6, %v6649_v1, %v6652_v15  ;;  %v7487_v25 = vsel %vm6526_vm5, %v7484_v45, %v7486_v33  ;;  %6483 = vst.msk [vmem:[#allocation2 + $0x1e8] sm:$0xff] %vm6421_vm2, %v6418_v23  ;;  %v6417_v14 = vmax.f32 %v6353_v7, 0.0  ;;  %v6284_v34 = vadd.f32 %v6213_v44, %v16300_v8  ;;  %v7705_v46 = vld [vmem:[#allocation2 + $0x17a] sm:$0x1]  ;;  %v7707_v2 = vld [vmem:[#allocation2 + $0x17b] sm:$0x1] }
 0x31d   :  { %6654 = vrot.lane.b32.xlu0 %v6653_v24, %s11955_s27  ;;  %v7488_v27 = vsel %vm6528_vm6, %v7484_v45, %v7487_v25  ;;  %v7050_v31 = vmax.f32 %v7044_v39, %v7046_v50  ;;  %v17607_v3 = vrot.slane %v17606_v55, %v15787_v4  ;;  %v6356_v56 = vadd.f32 %v16202_v53, %v6285_v5  ;;  %v7130_v45 = vld [vmem:[#allocation2 + $0x13f] sm:$0x1]  ;;  %v6829_v10 = vld [vmem:[#allocation2 + $0x120] sm:$0x1]  ;;  %v6831_v61 = vld [vmem:[#allocation2 + $0x121] sm:$0x1] }
 0x31e   :  { %7489 = vrot.lane.b32.xlu1 %v7488_v27, %s11952_s24  ;;  %v7279_v43 = vrot.slane %v7276_v59, 7  ;;  %v7297_v17 = vmax.f32 %v7289_v13, %v7291_v21  ;;  %6482 = vst.msk [vmem:[#allocation2 + $0x1e0] sm:$0xff] %vm6421_vm2, %v6417_v14  ;;  %v6355_v1 = vadd.f32 %v16202_v53, %v6284_v34  ;;  %v7299_v47 = vmax.f32 %v7293_v20, %v7295_v60  ;;  %v17610_v25 = vld [vmem:[#allocation44_spill] sm:$0xff]  ;;  %v16514_v55 = vld [vmem:[#allocation2 + $0x16d] sm:$0x1] }
 0x31f   :  { %v7030_v40 = vsel %vm6522_vm3, %v7029_v38, %v17607_v3  ;;  %v7052_v6 = vmax.f32 %v7048_v9, %v7050_v31  ;;  %v6420_v42 = vmax.f32 %v6356_v56, 0.0  ;;  %v17609_v57 = vrot.slane %v17608_v32, %v15787_v4  ;;  %v7748_v32 = vld [vmem:[#allocation2 + $0x17d] sm:$0x1] }
 0x320   :  { %v7031_v8 = vsel %vm6524_vm4, %v7029_v38, %v7030_v40  ;;  %v7090_v54 = vmax.f32 %v16467_v30, %v16469_v37  ;;  %v6419_v9 = vmax.f32 %v6355_v1, 0.0  ;;  %v7301_v62 = vmax.f32 %v7297_v17, %v7299_v47  ;;  %v6834_v30 = vld [vmem:[#allocation2 + $0x130] sm:$0x1]  ;;  %v6836_v37 = vld [vmem:[#allocation2 + $0x131] sm:$0x1]  ;;  %v17612_v40 = vld [vmem:[#allocation45_spill] sm:$0xff] }
 0x321   :  { %v7032_v19 = vsel %vm6526_vm5, %v7029_v38, %v7031_v8  ;;  %v7280_v52 = vsel %vm6522_vm3, %v7279_v43, %v17609_v57  ;;  %v7068_v51 = vrot.slane %v7052_v6, %v15787_v4  ;;  %6485 = vst.msk [vmem:[#allocation2 + $0x1f8] sm:$0xff] %vm6421_vm2, %v6420_v42  ;;  %v7092_v26 = vmax.f32 %v7086_v16, %v7088_v12  ;;  %v7746_v42 = vld [vmem:[#allocation2 + $0x17c] sm:$0x1] }
 0x322   :  { %v7033_v53 = vsel %vm6528_vm6, %v7029_v38, %v7032_v19  ;;  %v7281_v29 = vsel %vm6524_vm4, %v7279_v43, %v7280_v52  ;;  %v7668_v63 = vmax.f32 %v7660_v22, %v7662_v0  ;;  %6484 = vst.msk [vmem:[#allocation2 + $0x1f0] sm:$0xff] %vm6421_vm2, %v6419_v9  ;;  %v7670_v24 = vmax.f32 %v7664_v28, %v7666_v18  ;;  %v16512_v0 = vld [vmem:[#allocation2 + $0x16c] sm:$0x1]  ;;  %v17614_v18 = vld [vmem:[#allocation46_spill] sm:$0xff] }
 0x323   :  { %7034 = vrot.lane.b32.xlu0 %v7033_v53, %s11956_s28  ;;  %v7282_v15 = vsel %vm6526_vm5, %v7279_v43, %v7281_v29  ;;  %v7071_v50 = vrot.slane %v7068_v51, 7  ;;  %v7132_v23 = vmax.f32 %v7124_v11, %v7126_v48  ;;  %v7317_v7 = vrot.slane %v7301_v62, %v15787_v4  ;;  %v6872_v52 = vld [vmem:[#allocation2 + $0x122] sm:$0x1]  ;;  %v6874_v51 = vld [vmem:[#allocation2 + $0x123] sm:$0x1]  ;;  %v17618_v62 = vld [vmem:[#allocation48_spill] sm:$0xff] }
 0x324   :  { %v7283_v39 = vsel %vm6528_vm6, %v7279_v43, %v7282_v15  ;;  %v7094_v33 = vmax.f32 %v7090_v54, %v7092_v26  ;;  %v7134_v13 = vmax.f32 %v7128_v35, %v7130_v45  ;;  %v7709_v21 = vmax.f32 %v7701_v36, %v7703_v41  ;;  %v17616_v36 = vld [vmem:[#allocation47_spill] sm:$0xff]  ;;  %v6876_v41 = vld [vmem:[#allocation2 + $0x132] sm:$0x1] }
 0x325   :  { %7284 = vrot.lane.b32.xlu1 %v7283_v39, %s11954_s26  ;;  %v17611_v38 = vrot.slane %v17610_v25, %v15787_v4  ;;  %v7672_v44 = vmax.f32 %v7668_v63, %v7670_v24  ;;  %v7711_v59 = vmax.f32 %v7705_v46, %v7707_v2  ;;  %v6838_v20 = vmax.f32 %v6829_v10, %v6831_v61  ;;  %v6878_v10 = vld [vmem:[#allocation2 + $0x133] sm:$0x1]  ;;  %v7783_v61 = vld [vmem:[#allocation2 + $0x16e] sm:$0x1]  ;;  %v7785_v39 = vld [vmem:[#allocation2 + $0x16f] sm:$0x1] }
 0x326   :  { %v7320_v14 = vrot.slane %v7317_v7, 7  ;;  %v7110_v27 = vrot.slane %v7094_v33, %v15787_v4  ;;  %v7136_v34 = vmax.f32 %v7132_v23, %v7134_v13  ;;  %v6840_v22 = vmax.f32 %v6834_v30, %v6836_v37  ;;  %v17620_v7 = vld [vmem:[#allocation49_spill] sm:$0xff]  ;;  %v6914_v37 = vld [vmem:[#allocation2 + $0x124] sm:$0x1] }
 0x327   :  { %v7072_v5 = vsel %vm6522_vm3, %v7071_v50, %v17611_v38  ;;  %v7688_v16 = vrot.slane %v7672_v44, %v15787_v4  ;;  %v7713_v12 = vmax.f32 %v7709_v21, %v7711_v59  ;;  %v17613_v56 = vrot.slane %v17612_v40, %v15787_v4  ;;  %v7787_v21 = vld [vmem:[#allocation2 + $0x17e] sm:$0x1]  ;;  %v7789_v30 = vld [vmem:[#allocation2 + $0x17f] sm:$0x1]  ;;  %v6916_v59 = vld [vmem:[#allocation2 + $0x125] sm:$0x1] }
 0x328   :  { %v7073_v60 = vsel %vm6524_vm4, %v7071_v50, %v7072_v5  ;;  %v7113_v17 = vrot.slane %v7110_v27, 7  ;;  %v7152_v28 = vrot.slane %v7136_v34, %v15787_v4  ;;  %v6842_v6 = vmax.f32 %v6838_v20, %v6840_v22  ;;  %v6918_v20 = vld [vmem:[#allocation2 + $0x134] sm:$0x1]  ;;  %v7497_v22 = vld [vmem:[#allocation2 + $0x161] sm:$0x1] }
 0x329   :  { %v7074_v31 = vsel %vm6526_vm5, %v7071_v50, %v7073_v60  ;;  %v7321_v43 = vsel %vm6522_vm3, %v7320_v14, %v17613_v56  ;;  %v7691_v8 = vrot.slane %v7688_v16, 7  ;;  %v7729_v1 = vrot.slane %v7713_v12, %v15787_v4  ;;  %v9171_v60 = vld [vmem:[%s17275_s3 + $0xf8] sm:$0xff]  ;;  %v6920_v16 = vld [vmem:[#allocation2 + $0x135] sm:$0x1]  ;;  %v7495_v12 = vld [vmem:[#allocation2 + $0x160] sm:$0x1] }
 0x32a   :  { %v7075_v3 = vsel %vm6528_vm6, %v7071_v50, %v7074_v31  ;;  %v7322_v11 = vsel %vm6524_vm4, %v7320_v14, %v7321_v43  ;;  %v17615_v48 = vrot.slane %v17614_v18, %v15787_v4  ;;  %v7155_v19 = vrot.slane %v7152_v28, 7  ;;  %10953 = vmatprep.subr.mxu1 %v9171_v60  ;;  %v7502_v28 = vld [vmem:[#allocation2 + $0x171] sm:$0x1]  ;;  %v6958_v18 = vld [vmem:[#allocation2 + $0x127] sm:$0x1] }
 0x32b   :  { %7076 = vrot.lane.b32.xlu0 %v7075_v3, %s11957_s29  ;;  %v7323_v47 = vsel %vm6526_vm5, %v7320_v14, %v7322_v11  ;;  %v7750_v57 = vmax.f32 %v16512_v0, %v16514_v55  ;;  %v17617_v53 = vrot.slane %v17616_v36, %v15787_v4  ;;  %v7732_v29 = vrot.slane %v7729_v1, 7  ;;  %v17622_v55 = vld [vmem:[#allocation13_spill] sm:$0xff]  ;;  %v6956_v11 = vld [vmem:[#allocation2 + $0x126] sm:$0x1] }
 0x32c   :  { %v7114_v35 = vsel %vm6522_vm3, %v7113_v17, %v17615_v48  ;;  %v7324_v54 = vsel %vm6528_vm6, %v7320_v14, %v7323_v47  ;;  %v17619_v26 = vrot.slane %v17618_v62, %v15787_v4  ;;  %v6858_v2 = vrot.slane %v6842_v6, %v15787_v4  ;;  %v6960_v48 = vld [vmem:[#allocation2 + $0x136] sm:$0x1] }
 0x32d   :  { %v7115_v45 = vsel %vm6524_vm4, %v7113_v17, %v7114_v35  ;;  %v7692_v9 = vsel %vm6522_vm3, %v7691_v8, %v17617_v53  ;;  %7325 = vrot.lane.b32.xlu1 %v7324_v54, %s11955_s27  ;;  %v17621_v33 = vrot.slane %v17620_v7, %v15787_v4  ;;  %v7752_v34 = vmax.f32 %v7746_v42, %v7748_v32  ;;  %v6962_v35 = vld [vmem:[#allocation2 + $0x137] sm:$0x1]  ;;  %v16571_v54 = vld [vmem:[#allocation2 + $0x162] sm:$0x1] }
 0x32e   :  { %v7116_v46 = vsel %vm6526_vm5, %v7113_v17, %v7115_v45  ;;  %v7693_v15 = vsel %vm6524_vm4, %v7691_v8, %v7692_v9  ;;  %v7156_v63 = vsel %vm6522_vm3, %v7155_v19, %v17619_v26  ;;  %v6861_v44 = vrot.slane %v6858_v2, 7  ;;  %v16573_v45 = vld [vmem:[#allocation2 + $0x163] sm:$0x1]  ;;  %v16583_v26 = vld [vmem:[#allocation2 + $0x142] sm:$0x1] }
 0x32f   :  { %v7117_v50 = vsel %vm6528_vm6, %v7113_v17, %v7116_v46  ;;  %v7694_v24 = vsel %vm6526_vm5, %v7691_v8, %v7693_v15  ;;  %v7157_v23 = vsel %vm6524_vm4, %v7155_v19, %v7156_v63  ;;  %v7733_v13 = vsel %vm6522_vm3, %v7732_v29, %v17621_v33  ;;  %v7500_v17 = vld [vmem:[#allocation2 + $0x170] sm:$0x1]  ;;  %v16585_v63 = vld [vmem:[#allocation2 + $0x143] sm:$0x1] }
 0x330   :  { %7118 = vrot.lane.b32.xlu0 %v7117_v50, %s11958_s30  ;;  %v7695_v25 = vsel %vm6528_vm6, %v7691_v8, %v7694_v24  ;;  %v7158_v38 = vsel %vm6526_vm5, %v7155_v19, %v7157_v23  ;;  %v7734_v5 = vsel %vm6524_vm4, %v7732_v29, %v7733_v13  ;;  %v6880_v31 = vmax.f32 %v6872_v52, %v6874_v51  ;;  %v16579_v51 = vld [vmem:[#allocation2 + $0x173] sm:$0x1]  ;;  %v9155_v50 = vld [vmem:[%s17275_s3 + $0x78] sm:$0xff] }
 0x331   :  { %v7159_v14 = vsel %vm6528_vm6, %v7155_v19, %v7158_v38  ;;  %v7735_v27 = vsel %vm6526_vm5, %v7732_v29, %v7734_v5  ;;  %7696 = vrot.lane.b32.xlu1 %v7695_v25, %s11956_s28  ;;  %v17623_v3 = vrot.slane %v17622_v55, %v15787_v4  ;;  %v6882_v56 = vmax.f32 %v6876_v41, %v6878_v10  ;;  %v9170_v13 = vld [vmem:[%s17275_s3 + $0xf0] sm:$0xff] }
 0x332   :  { %v7736_v0 = vsel %vm6528_vm6, %v7732_v29, %v7735_v27  ;;  %v7791_v43 = vmax.f32 %v7783_v61, %v7785_v39  ;;  %v7754_v1 = vmax.f32 %v7750_v57, %v7752_v34  ;;  %v7793_v6 = vmax.f32 %v7787_v21, %v7789_v30  ;;  %v16577_v29 = vld [vmem:[#allocation2 + $0x172] sm:$0x1]  ;;  %10954 = vmatpush3.msra.mxu1 %v9155_v50  ;;  %v17624_v21 = vld [vmem:[#allocation7_spill] sm:$0xff] }
 0x333   :  { %v6862_v40 = vsel %vm6522_vm3, %v6861_v44, %v17623_v3  ;;  %v6922_v47 = vmax.f32 %v6914_v37, %v6916_v59  ;;  %v6884_v42 = vmax.f32 %v6880_v31, %v6882_v56  ;;  %v6924_v32 = vmax.f32 %v6918_v20, %v6920_v16  ;;  %10955 = vmatprep.subr.mxu1 %v9170_v13  ;;  %v17626_v20 = vld [vmem:[#allocation14_spill] sm:$0xff] }
 0x334   :  { %v6863_v8 = vsel %vm6524_vm4, %v6861_v44, %v6862_v40  ;;  %7160 = vrot.lane.b32.xlu0 %v7159_v14, %s11959_s8  ;;  %v7504_v52 = vmax.f32 %v7495_v12, %v7497_v22  ;;  %v7770_v57 = vrot.slane %v7754_v1, %v15787_v4  ;;  %v7795_v53 = vmax.f32 %v7791_v43, %v7793_v6  ;;  %v9169_v31 = vld [vmem:[%s17275_s3 + $0xe8] sm:$0xff]  ;;  %v17628_v22 = vld [vmem:[#allocation8_spill] sm:$0xff] }
 0x335   :  { %v6864_v19 = vsel %vm6526_vm5, %v6861_v44, %v6863_v8  ;;  %v7506_v9 = vmax.f32 %v7500_v17, %v7502_v28  ;;  %7737 = vrot.lane.b32.xlu1 %v7736_v0, %s11957_s29  ;;  %v6900_v41 = vrot.slane %v6884_v42, %v15787_v4  ;;  %v6926_v46 = vmax.f32 %v6922_v47, %v6924_v32  ;;  %v7211_v40 = vld [vmem:[#allocation2 + $0x152] sm:$0x1]  ;;  %v9153_v56 = vld [vmem:[%s17275_s3 + $0x68] sm:$0xff]  ;;  %v7213_v6 = vld [vmem:[#allocation2 + $0x153] sm:$0x1] }
 0x336   :  { %v6865_v36 = vsel %vm6528_vm6, %v6861_v44, %v6864_v19  ;;  %v6964_v15 = vmax.f32 %v6956_v11, %v6958_v18  ;;  %v6966_v62 = vmax.f32 %v6960_v48, %v6962_v35  ;;  %v7773_v2 = vrot.slane %v7770_v57, 7  ;;  %v9154_v44 = vld [vmem:[%s17275_s3 + $0x70] sm:$0xff]  ;;  %v7578_v47 = vld [vmem:[#allocation2 + $0x164] sm:$0x1]  ;;  %v7580_v18 = vld [vmem:[#allocation2 + $0x165] sm:$0x1] }
 0x337   :  { %v7811_v10 = vrot.slane %v7795_v53, %v15787_v4  ;;  %v7508_v61 = vmax.f32 %v7504_v52, %v7506_v9  ;;  %v7545_v39 = vmax.f32 %v16571_v54, %v16573_v45  ;;  %v6903_v24 = vrot.slane %v6900_v41, 7  ;;  %10956 = vmatpush3.msra.mxu1 %v9154_v44  ;;  %v17630_v11 = vld [vmem:[#allocation15_spill] sm:$0xff]  ;;  %v17632_v42 = vld [vmem:[#allocation9_spill] sm:$0xff]  ;;  %v7582_v54 = vld [vmem:[#allocation2 + $0x174] sm:$0x1] }
 0x338   :  { %6866 = vrot.lane.b32.xlu0 %v6865_v36, %s11960_s11  ;;  %v6942_v23 = vrot.slane %v6926_v46, %v15787_v4  ;;  %v6968_v7 = vmax.f32 %v6964_v15, %v6966_v62  ;;  %v7547_v33 = vmax.f32 %v16577_v29, %v16579_v51  ;;  %v17625_v30 = vrot.slane %v17624_v21, %v15787_v4  ;;  %v7584_v45 = vld [vmem:[#allocation2 + $0x175] sm:$0x1]  ;;  %v7988_v36 = vld [vmem:[#allocation2 + $0x188] sm:$0x1]  ;;  %v7990_v51 = vld [vmem:[#allocation2 + $0x189] sm:$0x1] }
 0x339   :  { %v7814_v25 = vrot.slane %v7811_v10, 7  ;;  %v7524_v38 = vrot.slane %v7508_v61, %v15787_v4  ;;  %v7215_v5 = vmax.f32 %v16583_v26, %v16585_v63  ;;  %v17627_v60 = vrot.slane %v17626_v20, %v15787_v4  ;;  %10957 = vmatprep.subr.mxu1 %v9169_v31  ;;  %v7992_v41 = vld [vmem:[#allocation2 + $0x198] sm:$0x1]  ;;  %v9168_v46 = vld [vmem:[%s17275_s3 + $0xe0] sm:$0xff]  ;;  %v8033_v20 = vld [vmem:[#allocation2 + $0x19a] sm:$0x1] }
 0x33a   :  { %v7774_v37 = vsel %vm6522_vm3, %v7773_v2, %v17625_v30  ;;  %v6945_v27 = vrot.slane %v6942_v23, 7  ;;  %v6984_v34 = vrot.slane %v6968_v7, %v15787_v4  ;;  %v17629_v0 = vrot.slane %v17628_v22, %v15787_v4  ;;  %10958 = vmatpush3.msra.mxu1 %v9153_v56  ;;  %v7619_v10 = vld [vmem:[#allocation2 + $0x166] sm:$0x1]  ;;  %v7621_v61 = vld [vmem:[#allocation2 + $0x167] sm:$0x1] }
 0x33b   :  { %v7775_v59 = vsel %vm6524_vm4, %v7773_v2, %v7774_v37  ;;  %v6904_v14 = vsel %vm6522_vm3, %v6903_v24, %v17627_v60  ;;  %v7527_v3 = vrot.slane %v7524_v38, 7  ;;  %v17631_v8 = vrot.slane %v17630_v11, %v15787_v4  ;;  %10959 = vmatprep.subr.mxu1 %v9168_v46  ;;  %v7623_v30 = vld [vmem:[#allocation2 + $0x176] sm:$0x1]  ;;  %v7625_v37 = vld [vmem:[#allocation2 + $0x177] sm:$0x1] }
 0x33c   :  { %v7776_v16 = vsel %vm6526_vm5, %v7773_v2, %v7775_v59  ;;  %v6905_v12 = vsel %vm6524_vm4, %v6903_v24, %v6904_v14  ;;  %v7815_v55 = vsel %vm6522_vm3, %v7814_v25, %v17629_v0  ;;  %v17633_v32 = vrot.slane %v17632_v42, %v15787_v4  ;;  %v8031_v59 = vld [vmem:[#allocation2 + $0x18b] sm:$0x1]  ;;  %v8035_v60 = vld [vmem:[#allocation2 + $0x19b] sm:$0x1] }
 0x33d   :  { %v7777_v43 = vsel %vm6528_vm6, %v7773_v2, %v7776_v16  ;;  %v6906_v17 = vsel %vm6526_vm5, %v6903_v24, %v6905_v12  ;;  %v7816_v28 = vsel %vm6524_vm4, %v7814_v25, %v7815_v55  ;;  %v6946_v1 = vsel %vm6522_vm3, %v6945_v27, %v17631_v8  ;;  %v7994_v2 = vld [vmem:[#allocation2 + $0x199] sm:$0x1] }
 0x33e   :  { %7778 = vrot.lane.b32.xlu1 %v7777_v43, %s11958_s30  ;;  %v6907_v48 = vsel %vm6528_vm6, %v6903_v24, %v6906_v17  ;;  %v7817_v35 = vsel %vm6526_vm5, %v7814_v25, %v7816_v28  ;;  %v6947_v19 = vsel %vm6524_vm4, %v6945_v27, %v6946_v1  ;;  %v7528_v52 = vsel %vm6522_vm3, %v7527_v3, %v17633_v32  ;;  %v17634_v24 = vld [vmem:[#allocation16_spill] sm:$0xff]  ;;  %v16668_v43 = vld [vmem:[#allocation2 + $0x182] sm:$0x1]  ;;  %v16670_v17 = vld [vmem:[#allocation2 + $0x183] sm:$0x1] }
 0x33f   :  { %6908 = vrot.lane.b32.xlu0 %v6907_v48, %s11961_s0  ;;  %v7818_v57 = vsel %vm6528_vm6, %v7814_v25, %v7817_v35  ;;  %v6948_v53 = vsel %vm6526_vm5, %v6945_v27, %v6947_v19  ;;  %v7529_v9 = vsel %vm6524_vm4, %v7527_v3, %v7528_v52  ;;  %v6987_v29 = vrot.slane %v6984_v34, 7  ;;  %v8029_v25 = vld [vmem:[#allocation2 + $0x18a] sm:$0x1]  ;;  %v17636_v28 = vld [vmem:[#allocation10_spill] sm:$0xff]  ;;  %v9167_v48 = vld [vmem:[%s17275_s3 + $0xd8] sm:$0xff] }
 0x340   :  { %v6949_v15 = vsel %vm6528_vm6, %v6945_v27, %v6948_v53  ;;  %v7530_v62 = vsel %vm6526_vm5, %v7527_v3, %v7529_v9  ;;  %v7549_v26 = vmax.f32 %v7545_v39, %v7547_v33  ;;  %v7217_v63 = vmax.f32 %v7211_v40, %v7213_v6  ;;  %v9151_v52 = vld [vmem:[%s17275_s3 + $0x58] sm:$0xff]  ;;  %v7868_v9 = vld [vmem:[#allocation2 + $0x92] sm:$0x1] }
 0x341   :  { %v7531_v50 = vsel %vm6528_vm6, %v7527_v3, %v7530_v62  ;;  %v17635_v23 = vrot.slane %v17634_v24, %v15787_v4  ;;  %v7586_v13 = vmax.f32 %v7578_v47, %v7580_v18  ;;  %v7588_v21 = vmax.f32 %v7582_v54, %v7584_v45  ;;  %v17638_v47 = vld [vmem:[#allocation19_spill] sm:$0xff]  ;;  %v17639_v45 = vld [vmem:[#allocation17_spill] sm:$0xff] }
 0x342   :  { %7819 = vrot.lane.b32.xlu1 %v7818_v57, %s11959_s8  ;;  %v7565_v33 = vrot.slane %v7549_v26, %v15787_v4  ;;  %v7219_v38 = vmax.f32 %v7215_v5, %v7217_v63  ;;  %v7996_v44 = vmax.f32 %v7988_v36, %v7990_v51  ;;  %v7998_v34 = vmax.f32 %v7992_v41, %v7994_v2  ;;  %v9152_v5 = vld [vmem:[%s17275_s3 + $0x60] sm:$0xff]  ;;  %v16702_v2 = vld [vmem:[#allocation2 + $0x8c] sm:$0x1] }
 0x343   :  { %v6988_v7 = vsel %vm6522_vm3, %v6987_v29, %v17635_v23  ;;  %6950 = vrot.lane.b32.xlu0 %v6949_v15, %s11962_s21  ;;  %v7590_v27 = vmax.f32 %v7586_v13, %v7588_v21  ;;  %v7627_v31 = vmax.f32 %v7619_v10, %v7621_v61  ;;  %v7629_v0 = vmax.f32 %v7623_v30, %v7625_v37  ;;  %v17641_v15 = vld [vmem:[#allocation11_spill] sm:$0xff]  ;;  %v7871_v13 = vld [vmem:[#allocation2 + $0x193] sm:$0x1] }
 0x344   :  { %v6989_v39 = vsel %vm6524_vm4, %v6987_v29, %v6988_v7  ;;  %v7568_v12 = vrot.slane %v7565_v33, 7  ;;  %v7235_v22 = vrot.slane %v7219_v38, %v15787_v4  ;;  %v8000_v3 = vmax.f32 %v7996_v44, %v7998_v34  ;;  %10960 = vmatpush3.msra.mxu1 %v9152_v5  ;;  %v9166_v10 = vld [vmem:[%s17275_s3 + $0xd0] sm:$0xff]  ;;  %v8071_v44 = vld [vmem:[#allocation2 + $0x8d] sm:$0x1] }
 0x345   :  { %v6990_v14 = vsel %vm6526_vm5, %v6987_v29, %v6989_v39  ;;  %v7606_v55 = vrot.slane %v7590_v27, %v15787_v4  ;;  %v8037_v40 = vmax.f32 %v8029_v25, %v8031_v59  ;;  %v8039_v56 = vmax.f32 %v8033_v20, %v8035_v60  ;;  %10961 = vmatprep.subr.mxu1 %v9167_v48  ;;  %v7869_v7 = vld [vmem:[#allocation2 + $0x192] sm:$0x1]  ;;  %v17643_v25 = vld [vmem:[#allocation18_spill] sm:$0xff]  ;;  %v8073_v59 = vld [vmem:[#allocation2 + $0x9c] sm:$0x1] }
 0x346   :  { %v6991_v16 = vsel %vm6528_vm6, %v6987_v29, %v6990_v14  ;;  %7532 = vrot.lane.b32.xlu1 %v7531_v50, %s11960_s11  ;;  %v17637_v11 = vrot.slane %v17636_v28, %v15787_v4  ;;  %v7238_v1 = vrot.slane %v7235_v22, 7  ;;  %v7631_v6 = vmax.f32 %v7627_v31, %v7629_v0  ;;  %v7870_v29 = vld [vmem:[#allocation2 + $0x93] sm:$0x1]  ;;  %10962 = vmatpush3.msra.mxu1 %v9151_v52  ;;  %v8075_v20 = vld [vmem:[#allocation2 + $0x9d] sm:$0x1]  ;;  %v9165_v5 = vld [vmem:[%s17275_s3 + $0xc8] sm:$0xff] }
 0x347   :  { %v8050_v18 = vrot.slane %v17638_v47, %v15787_v4  ;;  %6992 = vrot.lane.b32.xlu0 %v6991_v16, %s11963_s12  ;;  %v7609_v19 = vrot.slane %v7606_v55, 7  ;;  %v8016_v42 = vrot.slane %v8000_v3, %v15787_v4  ;;  %v8041_v32 = vmax.f32 %v8037_v40, %v8039_v56  ;;  %10963 = vmatprep.subr.mxu1 %v9166_v10  ;;  %v9150_v21 = vld [vmem:[%s17275_s3 + $0x50] sm:$0xff]  ;;  %v8645_v22 = vld [vmem:[#allocation2 + $0xc8] sm:$0x1]  ;;  %v8647_v0 = vld [vmem:[#allocation2 + $0xc9] sm:$0x1] }
 0x348   :  { %v7569_v8 = vsel %vm6522_vm3, %v7568_v12, %v17637_v11  ;;  %v17640_v36 = vrot.slane %v17639_v45, %v15787_v4  ;;  %v7647_v53 = vrot.slane %v7631_v6, %v15787_v4  ;;  %v7873_v51 = vmax.f32 %v16668_v43, %v16670_v17  ;;  %10964 = vmatpush3.msra.mxu1 %v9150_v21  ;;  %v17645_v27 = vld [vmem:[#allocation12_spill] sm:$0xff]  ;;  %v8072_v17 = vld [vmem:[#allocation2 + $0x18d] sm:$0x1]  ;;  %v8074_v28 = vld [vmem:[#allocation2 + $0x19c] sm:$0x1] }
 0x349   :  { %v7570_v35 = vsel %vm6524_vm4, %v7568_v12, %v7569_v8  ;;  %v17642_v62 = vrot.slane %v17641_v15, %v15787_v4  ;;  %v8019_v63 = vrot.slane %v8016_v42, 7  ;;  %v8057_v23 = vrot.slane %v8041_v32, %v15787_v4  ;;  %v8076_v11 = vld [vmem:[#allocation2 + $0x19d] sm:$0x1]  ;;  %v8649_v8 = vld [vmem:[#allocation2 + $0xd8] sm:$0x1]  ;;  %10965 = vmatprep.subr.mxu1 %v9165_v5 }
 0x34a   :  { %v7571_v54 = vsel %vm6526_vm5, %v7568_v12, %v7570_v35  ;;  %v7239_v57 = vsel %vm6522_vm3, %v7238_v1, %v17640_v36  ;;  %v7650_v24 = vrot.slane %v7647_v53, 7  ;;  %v17644_v39 = vrot.slane %v17643_v25, %v15787_v4  ;;  %v8110_v42 = vld [vmem:[#allocation2 + $0x8e] sm:$0x1]  ;;  %v8112_v32 = vld [vmem:[#allocation2 + $0x8f] sm:$0x1] }
 0x34b   :  { %v7572_v41 = vsel %vm6528_vm6, %v7568_v12, %v7571_v54  ;;  %v7240_v46 = vsel %vm6524_vm4, %v7238_v1, %v7239_v57  ;;  %v7610_v26 = vsel %vm6522_vm3, %v7609_v19, %v17642_v62  ;;  %v7874_v38 = vmax.f32 %v7868_v9, %v7870_v29  ;;  %v8070_v12 = vld [vmem:[#allocation2 + $0x18c] sm:$0x1]  ;;  %v8650_v57 = vld [vmem:[#allocation2 + $0x1d8] sm:$0x1]  ;;  %v8652_v53 = vld [vmem:[#allocation2 + $0x1d9] sm:$0x1] }
 0x34c   :  { %7573 = vrot.lane.b32.xlu1 %v7572_v41, %s11961_s0  ;;  %v7241_v61 = vsel %vm6526_vm5, %v7238_v1, %v7240_v46  ;;  %v7611_v50 = vsel %vm6524_vm4, %v7609_v19, %v7610_v26  ;;  %v8020_v33 = vsel %vm6522_vm3, %v8019_v63, %v17644_v39  ;;  %v17646_v34 = vrot.slane %v17645_v27, %v15787_v4  ;;  %v8114_v9 = vld [vmem:[#allocation2 + $0x9e] sm:$0x1]  ;;  %v8111_v46 = vld [vmem:[#allocation2 + $0x18e] sm:$0x1]  ;;  %v8113_v15 = vld [vmem:[#allocation2 + $0x18f] sm:$0x1] }
 0x34d   :  { %v7242_v30 = vsel %vm6528_vm6, %v7238_v1, %v7241_v61  ;;  %v7612_v37 = vsel %vm6526_vm5, %v7609_v19, %v7611_v50  ;;  %v8021_v14 = vsel %vm6524_vm4, %v8019_v63, %v8020_v33  ;;  %v8060_v16 = vrot.slane %v8057_v23, 7  ;;  %v8651_v1 = vld [vmem:[#allocation2 + $0xd9] sm:$0x1]  ;;  %v8116_v62 = vld [vmem:[#allocation2 + $0x9f] sm:$0x1]  ;;  %v9149_v33 = vld [vmem:[%s17275_s3 + $0x48] sm:$0xff] }
 0x34e   :  { %7243 = vrot.lane.b32.xlu0 %v7242_v30, %s11953_s25  ;;  %v7613_v60 = vsel %vm6528_vm6, %v7609_v19, %v7612_v37  ;;  %v7651_v31 = vsel %vm6522_vm3, %v7650_v24, %v17646_v34  ;;  %v8022_v55 = vsel %vm6526_vm5, %v8019_v63, %v8021_v14  ;;  %v7875_v40 = vmax.f32 %v7869_v7, %v7871_v13  ;;  %v8648_v19 = vld [vmem:[#allocation2 + $0x1c9] sm:$0x1]  ;;  %v8686_v10 = vld [vmem:[#allocation2 + $0xca] sm:$0x1]  ;;  %v8115_v7 = vld [vmem:[#allocation2 + $0x19e] sm:$0x1] }
 0x34f   :  { %v7652_v3 = vsel %vm6524_vm4, %v7650_v24, %v7651_v31  ;;  %v17647_v56 = vmax.f32 %v16249_v58, %v16251_v49  ;;  %v8023_v6 = vsel %vm6528_vm6, %v8019_v63, %v8022_v55  ;;  %v8061_v35 = vsel %vm6522_vm3, %v8060_v16, %v8050_v18  ;;  %v8646_v49 = vld [vmem:[#allocation2 + $0x1c8] sm:$0x1]  ;;  %v8117_v13 = vld [vmem:[#allocation2 + $0x19f] sm:$0x1]  ;;  %v8688_v21 = vld [vmem:[#allocation2 + $0xcb] sm:$0x1]  ;;  %10966 = vmatpush3.msra.mxu1 %v9149_v33 }
 0x350   :  { %7614 = vrot.lane.b32.xlu1 %v7613_v60, %s11962_s21  ;;  %v7653_v48 = vsel %vm6526_vm5, %v7650_v24, %v7652_v3  ;;  %v8077_v58 = vmax.f32 %v16702_v2, %v8071_v44  ;;  %v8062_v54 = vsel %vm6524_vm4, %v8060_v16, %v8061_v35  ;;  %v7877_v45 = vmax.f32 %v7873_v51, %v7875_v40  ;;  %v8687_v60 = vld [vmem:[#allocation2 + $0x1ca] sm:$0x1]  ;;  %v8689_v14 = vld [vmem:[#allocation2 + $0x1cb] sm:$0x1]  ;;  %v8690_v27 = vld [vmem:[#allocation2 + $0xda] sm:$0x1] }
 0x351   :  { %v7876_v43 = vmax.f32 %v17647_v56, %v7874_v38  ;;  %v7654_v52 = vsel %vm6528_vm6, %v7650_v24, %v7653_v48  ;;  %v8063_v47 = vsel %vm6526_vm5, %v8060_v16, %v8062_v54  ;;  %v8078_v18 = vmax.f32 %v8070_v12, %v8072_v17  ;;  %v8692_v12 = vld [vmem:[#allocation2 + $0xdb] sm:$0x1]  ;;  %v16760_v5 = vld [vmem:[#allocation2 + $0x85] sm:$0x1]  ;;  %v7906_v48 = vld [vmem:[#allocation2 + $0x184] sm:$0x1] }
 0x352   :  { %8024 = vrot.lane.b32.xlu0 %v8023_v6, %s11949_s2  ;;  %v8079_v29 = vmax.f32 %v8073_v59, %v8075_v20  ;;  %v8080_v41 = vmax.f32 %v8074_v28, %v8076_v11  ;;  %v8064_v26 = vsel %vm6528_vm6, %v8060_v16, %v8063_v47  ;;  %v7893_v63 = vrot.slane %v7877_v45, %v15787_v4  ;;  %v8693_v17 = vld [vmem:[#allocation2 + $0x1db] sm:$0x1]  ;;  %v9164_v28 = vld [vmem:[%s17275_s3 + $0xc0] sm:$0xff] }
 0x353   :  { %v7886_v36 = vrot.slane %v7876_v43, %v15787_v4  ;;  %v8653_v51 = vmax.f32 %v8645_v22, %v8647_v0  ;;  %v8654_v2 = vmax.f32 %v8646_v49, %v8648_v19  ;;  %v8655_v24 = vmax.f32 %v8649_v8, %v8651_v1  ;;  %v16758_v0 = vld [vmem:[#allocation2 + $0x84] sm:$0x1]  ;;  %v8691_v43 = vld [vmem:[#allocation2 + $0x1da] sm:$0x1]  ;;  %v7908_v35 = vld [vmem:[#allocation2 + $0x185] sm:$0x1]  ;;  %10967 = vmatprep.subr.mxu1 %v9164_v28 }
 0x354   :  { %7655 = vrot.lane.b32.xlu1 %v7654_v52, %s11963_s12  ;;  %v8081_v61 = vmax.f32 %v8077_v58, %v8079_v29  ;;  %v8082_v50 = vmax.f32 %v8078_v18, %v8080_v41  ;;  %v8656_v23 = vmax.f32 %v8650_v57, %v8652_v53  ;;  %v7896_v30 = vrot.slane %v7893_v63, 7  ;;  %v9148_v52 = vld [vmem:[%s17275_s3 + $0x40] sm:$0xff]  ;;  %v7910_v57 = vld [vmem:[#allocation2 + $0x194] sm:$0x1]  ;;  %v7911_v53 = vld [vmem:[#allocation2 + $0x95] sm:$0x1] }
 0x355   :  { %v8118_v37 = vmax.f32 %v8110_v42, %v8112_v32  ;;  %v8119_v25 = vmax.f32 %v8111_v46, %v8113_v15  ;;  %v8120_v39 = vmax.f32 %v8114_v9, %v8116_v62  ;;  %v8657_v59 = vmax.f32 %v8653_v51, %v8655_v24  ;;  %v7909_v32 = vld [vmem:[#allocation2 + $0x94] sm:$0x1]  ;;  %v7912_v9 = vld [vmem:[#allocation2 + $0x195] sm:$0x1]  ;;  %v8727_v15 = vld [vmem:[#allocation2 + $0xcc] sm:$0x1]  ;;  %10968 = vmatpush3.msra.mxu1 %v9148_v52 }
 0x356   :  { %8065 = vrot.lane.b32.xlu0 %v8064_v26, %s11950_s22  ;;  %v8091_v38 = vrot.slane %v8081_v61, %v15787_v4  ;;  %v8098_v44 = vrot.slane %v8082_v50, %v15787_v4  ;;  %v8658_v20 = vmax.f32 %v8654_v2, %v8656_v23  ;;  %v7897_v34 = vsel %vm6522_vm3, %v7896_v30, %v7886_v36  ;;  %v8729_v62 = vld [vmem:[#allocation2 + $0xcd] sm:$0x1]  ;;  %v8731_v26 = vld [vmem:[#allocation2 + $0xdc] sm:$0x1]  ;;  %v8728_v61 = vld [vmem:[#allocation2 + $0x1cc] sm:$0x1] }
 0x357   :  { %v8121_v31 = vmax.f32 %v8115_v7, %v8117_v13  ;;  %v8122_v16 = vmax.f32 %v8118_v37, %v8120_v39  ;;  %v8694_v22 = vmax.f32 %v8686_v10, %v8688_v21  ;;  %v7898_v55 = vsel %vm6524_vm4, %v7896_v30, %v7897_v34  ;;  %v8730_v50 = vld [vmem:[#allocation2 + $0x1cd] sm:$0x1]  ;;  %v9163_v24 = vld [vmem:[%s17275_s3 + $0xb8] sm:$0xff] }
 0x358   :  { %v8101_v3 = vrot.slane %v8098_v44, 7  ;;  %v8667_v40 = vrot.slane %v8657_v59, %v15787_v4  ;;  %v8674_v56 = vrot.slane %v8658_v20, %v15787_v4  ;;  %v7899_v11 = vsel %vm6526_vm5, %v7896_v30, %v7898_v55  ;;  %v8733_v37 = vld [vmem:[#allocation2 + $0xdd] sm:$0x1]  ;;  %v7946_v59 = vld [vmem:[#allocation2 + $0x86] sm:$0x1]  ;;  %10969 = vmatprep.subr.mxu1 %v9163_v24 }
 0x359   :  { %v8123_v8 = vmax.f32 %v8119_v25, %v8121_v31  ;;  %v8132_v1 = vrot.slane %v8122_v16, %v15787_v4  ;;  %v8695_v6 = vmax.f32 %v8687_v60, %v8689_v14  ;;  %v7900_v58 = vsel %vm6528_vm6, %v7896_v30, %v7899_v11  ;;  %v8732_v30 = vld [vmem:[#allocation2 + $0x1dc] sm:$0x1]  ;;  %v8734_v25 = vld [vmem:[#allocation2 + $0x1dd] sm:$0x1]  ;;  %v7948_v20 = vld [vmem:[#allocation2 + $0x87] sm:$0x1] }
 0x35a   :  { %v8102_v49 = vsel %vm6522_vm3, %v8101_v3, %v8091_v38  ;;  %v8677_v19 = vrot.slane %v8674_v56, 7  ;;  %v8696_v42 = vmax.f32 %v8690_v27, %v8692_v12  ;;  %7901 = vrot.lane.b32.xlu1 %v7900_v58, %s11953_s25  ;;  %v8697_v36 = vmax.f32 %v8691_v43, %v8693_v17  ;;  %v7950_v60 = vld [vmem:[#allocation2 + $0x96] sm:$0x1]  ;;  %v7947_v16 = vld [vmem:[#allocation2 + $0x186] sm:$0x1]  ;;  %v9147_v43 = vld [vmem:[%s17275_s3 + $0x38] sm:$0xff] }
 0x35b   :  { %v8103_v54 = vsel %vm6524_vm4, %v8101_v3, %v8102_v49  ;;  %v8139_v45 = vrot.slane %v8123_v8, %v15787_v4  ;;  %v7913_v47 = vmax.f32 %v16758_v0, %v16760_v5  ;;  %v7914_v46 = vmax.f32 %v7906_v48, %v7908_v35  ;;  %v7949_v12 = vld [vmem:[#allocation2 + $0x187] sm:$0x1]  ;;  %v7953_v56 = vld [vmem:[#allocation2 + $0x197] sm:$0x1]  ;;  %10970 = vmatpush3.msra.mxu1 %v9147_v43  ;;  %v8527_v43 = vld [vmem:[#allocation2 + $0x1d2] sm:$0x1] }
 0x35c   :  { %v8104_v18 = vsel %vm6526_vm5, %v8101_v3, %v8103_v54  ;;  %v8678_v29 = vsel %vm6522_vm3, %v8677_v19, %v8667_v40  ;;  %v8698_v41 = vmax.f32 %v8694_v22, %v8696_v42  ;;  %v8699_v10 = vmax.f32 %v8695_v6, %v8697_v36  ;;  %v7952_v22 = vld [vmem:[#allocation2 + $0x97] sm:$0x1]  ;;  %v7951_v40 = vld [vmem:[#allocation2 + $0x196] sm:$0x1]  ;;  %v8770_v6 = vld [vmem:[#allocation2 + $0xcf] sm:$0x1] }
 0x35d   :  { %v8105_v63 = vsel %vm6528_vm6, %v8101_v3, %v8104_v18  ;;  %v8679_v51 = vsel %vm6524_vm4, %v8677_v19, %v8678_v29  ;;  %v8142_v2 = vrot.slane %v8139_v45, 7  ;;  %v7915_v13 = vmax.f32 %v7909_v32, %v7911_v53  ;;  %v8771_v42 = vld [vmem:[#allocation2 + $0x1cf] sm:$0x1]  ;;  %v8772_v36 = vld [vmem:[#allocation2 + $0xde] sm:$0x1] }
 0x35e   :  { %8106 = vrot.lane.b32.xlu0 %v8105_v63, %s11951_s23  ;;  %v8680_v23 = vsel %vm6526_vm5, %v8677_v19, %v8679_v51  ;;  %v8708_v7 = vrot.slane %v8698_v41, %v15787_v4  ;;  %v7916_v21 = vmax.f32 %v7910_v57, %v7912_v9  ;;  %v8715_v38 = vrot.slane %v8699_v10, %v15787_v4  ;;  %v8774_v57 = vld [vmem:[#allocation2 + $0xdf] sm:$0x1]  ;;  %v8773_v18 = vld [vmem:[#allocation2 + $0x1de] sm:$0x1]  ;;  %v8317_v63 = vld [vmem:[#allocation2 + $0xa8] sm:$0x1] }
 0x35f   :  { %v8681_v39 = vsel %vm6528_vm6, %v8677_v19, %v8680_v23  ;;  %v8143_v33 = vsel %vm6522_vm3, %v8142_v2, %v8132_v1  ;;  %v8735_v44 = vmax.f32 %v8727_v15, %v8729_v62  ;;  %v7917_v27 = vmax.f32 %v7913_v47, %v7915_v13  ;;  %v8768_v1 = vld [vmem:[#allocation2 + $0xce] sm:$0x1]  ;;  %v8775_v29 = vld [vmem:[#allocation2 + $0x1df] sm:$0x1]  ;;  %v8318_v51 = vld [vmem:[#allocation2 + $0x1a8] sm:$0x1] }
 0x360   :  { %8682 = vrot.lane.b32.xlu1 %v8681_v39, %s11949_s2  ;;  %v8144_v14 = vsel %vm6524_vm4, %v8142_v2, %v8143_v33  ;;  %v7918_v34 = vmax.f32 %v7914_v46, %v7916_v21  ;;  %v8736_v31 = vmax.f32 %v8728_v61, %v8730_v50  ;;  %v8718_v5 = vrot.slane %v8715_v38, 7  ;;  %v8769_v19 = vld [vmem:[#allocation2 + $0x1ce] sm:$0x1]  ;;  %v8320_v23 = vld [vmem:[#allocation2 + $0x1a9] sm:$0x1] }
 0x361   :  { %v8145_v0 = vsel %vm6526_vm5, %v8142_v2, %v8144_v14  ;;  %v8737_v55 = vmax.f32 %v8731_v26, %v8733_v37  ;;  %v8738_v3 = vmax.f32 %v8732_v30, %v8734_v25  ;;  %v7927_v28 = vrot.slane %v7917_v27, %v15787_v4  ;;  %v8322_v25 = vld [vmem:[#allocation2 + $0x1b8] sm:$0x1]  ;;  %v8323_v39 = vld [vmem:[#allocation2 + $0xb9] sm:$0x1]  ;;  %v8523_v14 = vld [vmem:[#allocation2 + $0x1c2] sm:$0x1] }
 0x362   :  { %v8146_v17 = vsel %vm6528_vm6, %v8142_v2, %v8145_v0  ;;  %v7934_v11 = vrot.slane %v7918_v34, %v15787_v4  ;;  %v7954_v8 = vmax.f32 %v7946_v59, %v7948_v20  ;;  %v8719_v48 = vsel %vm6522_vm3, %v8718_v5, %v8708_v7  ;;  %v8319_v2 = vld [vmem:[#allocation2 + $0xa9] sm:$0x1]  ;;  %v8321_v7 = vld [vmem:[#allocation2 + $0xb8] sm:$0x1]  ;;  %v8324_v33 = vld [vmem:[#allocation2 + $0x1b9] sm:$0x1] }
 0x363   :  { %8147 = vrot.lane.b32.xlu0 %v8146_v17, %s11952_s24  ;;  %v8739_v35 = vmax.f32 %v8735_v44, %v8737_v55  ;;  %v8740_v58 = vmax.f32 %v8736_v31, %v8738_v3  ;;  %v7955_v49 = vmax.f32 %v7947_v16, %v7949_v12  ;;  %v8720_v32 = vsel %vm6524_vm4, %v8718_v5, %v8719_v48  ;;  %v8524_v27 = vld [vmem:[#allocation2 + $0xc3] sm:$0x1]  ;;  %v8526_v0 = vld [vmem:[#allocation2 + $0xd2] sm:$0x1]  ;;  %v8528_v17 = vld [vmem:[#allocation2 + $0xd3] sm:$0x1] }
 0x364   :  { %v7937_v52 = vrot.slane %v7934_v11, 7  ;;  %v7956_v54 = vmax.f32 %v7950_v60, %v7952_v22  ;;  %v7957_v45 = vmax.f32 %v7951_v40, %v7953_v56  ;;  %v8721_v53 = vsel %vm6526_vm5, %v8718_v5, %v8720_v32  ;;  %v8522_v60 = vld [vmem:[#allocation2 + $0xc2] sm:$0x1]  ;;  %v8525_v22 = vld [vmem:[#allocation2 + $0x1c3] sm:$0x1] }
 0x365   :  { %v8749_v9 = vrot.slane %v8739_v35, %v15787_v4  ;;  %v8756_v47 = vrot.slane %v8740_v58, %v15787_v4  ;;  %v8776_v41 = vmax.f32 %v8768_v1, %v8770_v6  ;;  %v8722_v46 = vsel %vm6528_vm6, %v8718_v5, %v8721_v53  ;;  %v9162_v5 = vld [vmem:[%s17275_s3 + $0xb0] sm:$0xff]  ;;  %v8358_v48 = vld [vmem:[#allocation2 + $0xaa] sm:$0x1]  ;;  %v8360_v58 = vld [vmem:[#allocation2 + $0xab] sm:$0x1] }
 0x366   :  { %v7938_v15 = vsel %vm6522_vm3, %v7937_v52, %v7927_v28  ;;  %v7958_v62 = vmax.f32 %v7954_v8, %v7956_v54  ;;  %v7959_v26 = vmax.f32 %v7955_v49, %v7957_v45  ;;  %8723 = vrot.lane.b32.xlu1 %v8722_v46, %s11950_s22  ;;  %v8777_v50 = vmax.f32 %v8769_v19, %v8771_v42  ;;  %v8529_v28 = vld [vmem:[#allocation2 + $0x1d3] sm:$0x1]  ;;  %v8359_v35 = vld [vmem:[#allocation2 + $0x1aa] sm:$0x1]  ;;  %v8362_v54 = vld [vmem:[#allocation2 + $0xba] sm:$0x1] }
 0x367   :  { %v7939_v10 = vsel %vm6524_vm4, %v7937_v52, %v7938_v15  ;;  %v8759_v61 = vrot.slane %v8756_v47, 7  ;;  %v8778_v24 = vmax.f32 %v8772_v36, %v8774_v57  ;;  %v8779_v37 = vmax.f32 %v8773_v18, %v8775_v29  ;;  %10971 = vmatprep.subr.mxu1 %v9162_v5  ;;  %v8363_v45 = vld [vmem:[#allocation2 + $0x1ba] sm:$0x1]  ;;  %v8364_v47 = vld [vmem:[#allocation2 + $0xbb] sm:$0x1]  ;;  %v9146_v29 = vld [vmem:[%s17275_s3 + $0x30] sm:$0xff] }
 0x368   :  { %v7940_v13 = vsel %vm6526_vm5, %v7937_v52, %v7939_v10  ;;  %v7968_v21 = vrot.slane %v7958_v62, %v15787_v4  ;;  %v7975_v30 = vrot.slane %v7959_v26, %v15787_v4  ;;  %v8325_v20 = vmax.f32 %v8317_v63, %v8319_v2  ;;  %v8365_v18 = vld [vmem:[#allocation2 + $0x1bb] sm:$0x1]  ;;  %v8563_v26 = vld [vmem:[#allocation2 + $0xc4] sm:$0x1]  ;;  %v8565_v63 = vld [vmem:[#allocation2 + $0xc5] sm:$0x1]  ;;  %10972 = vmatpush3.msra.mxu1 %v9146_v29 }
 0x369   :  { %v7941_v38 = vsel %vm6528_vm6, %v7937_v52, %v7940_v13  ;;  %v8760_v44 = vsel %vm6522_vm3, %v8759_v61, %v8749_v9  ;;  %v8780_v59 = vmax.f32 %v8776_v41, %v8778_v24  ;;  %v8781_v16 = vmax.f32 %v8777_v50, %v8779_v37  ;;  %v8361_v52 = vld [vmem:[#allocation2 + $0x1ab] sm:$0x1]  ;;  %v8564_v50 = vld [vmem:[#allocation2 + $0x1c4] sm:$0x1]  ;;  %v8566_v24 = vld [vmem:[#allocation2 + $0x1c5] sm:$0x1] }
 0x36a   :  { %7942 = vrot.lane.b32.xlu0 %v7941_v38, %s11954_s26  ;;  %v8761_v34 = vsel %vm6524_vm4, %v8759_v61, %v8760_v44  ;;  %v7978_v31 = vrot.slane %v7975_v30, 7  ;;  %v8326_v12 = vmax.f32 %v8318_v51, %v8320_v23  ;;  %v8327_v40 = vmax.f32 %v8321_v7, %v8323_v39  ;;  %v8567_v30 = vld [vmem:[#allocation2 + $0xd4] sm:$0x1]  ;;  %v8569_v37 = vld [vmem:[#allocation2 + $0xd5] sm:$0x1] }
 0x36b   :  { %v8762_v55 = vsel %vm6526_vm5, %v8759_v61, %v8761_v34  ;;  %v8790_v3 = vrot.slane %v8780_v59, %v15787_v4  ;;  %v8328_v56 = vmax.f32 %v8322_v25, %v8324_v33  ;;  %v8797_v1 = vrot.slane %v8781_v16, %v15787_v4  ;;  %v8568_v38 = vld [vmem:[#allocation2 + $0x1d4] sm:$0x1]  ;;  %v8570_v44 = vld [vmem:[#allocation2 + $0x1d5] sm:$0x1]  ;;  %v8399_v34 = vld [vmem:[#allocation2 + $0xac] sm:$0x1] }
 0x36c   :  { %v8763_v11 = vsel %vm6528_vm6, %v8759_v61, %v8762_v55  ;;  %v7979_v8 = vsel %vm6522_vm3, %v7978_v31, %v7968_v21  ;;  %v8530_v6 = vmax.f32 %v8522_v60, %v8524_v27  ;;  %v8329_v19 = vmax.f32 %v8325_v20, %v8327_v40  ;;  %v8401_v16 = vld [vmem:[#allocation2 + $0xad] sm:$0x1] }
 0x36d   :  { %8764 = vrot.lane.b32.xlu1 %v8763_v11, %s11951_s23  ;;  %v7980_v49 = vsel %vm6524_vm4, %v7978_v31, %v7979_v8  ;;  %v8330_v42 = vmax.f32 %v8326_v12, %v8328_v56  ;;  %v8531_v32 = vmax.f32 %v8523_v14, %v8525_v22  ;;  %v8800_v57 = vrot.slane %v8797_v1, 7  ;;  %v8402_v55 = vld [vmem:[#allocation2 + $0x1ad] sm:$0x1]  ;;  %v8405_v11 = vld [vmem:[#allocation2 + $0xbd] sm:$0x1] }
 0x36e   :  { %v7981_v36 = vsel %vm6526_vm5, %v7978_v31, %v7980_v49  ;;  %v8532_v53 = vmax.f32 %v8526_v0, %v8528_v17  ;;  %v8533_v9 = vmax.f32 %v8527_v43, %v8529_v28  ;;  %v8339_v46 = vrot.slane %v8329_v19, %v15787_v4  ;;  %v8404_v28 = vld [vmem:[#allocation2 + $0x1bc] sm:$0x1]  ;;  %v8406_v8 = vld [vmem:[#allocation2 + $0x1bd] sm:$0x1]  ;;  %v16849_v1 = vpop.permute.xlu0 %6696  ;;  %v8604_v49 = vld [vmem:[#allocation2 + $0xc6] sm:$0x1] }
 0x36f   :  { %v7982_v41 = vsel %vm6528_vm6, %v7978_v31, %v7981_v36  ;;  %v8346_v15 = vrot.slane %v8330_v42, %v15787_v4  ;;  %v8366_v62 = vmax.f32 %v8358_v48, %v8360_v58  ;;  %v8801_v51 = vsel %vm6522_vm3, %v8800_v57, %v8790_v3  ;;  %v8400_v31 = vld [vmem:[#allocation2 + $0x1ac] sm:$0x1]  ;;  %v8403_v3 = vld [vmem:[#allocation2 + $0xbc] sm:$0x1]  ;;  %v8605_v19 = vld [vmem:[#allocation2 + $0x1c6] sm:$0x1] }
 0x370   :  { %7983 = vrot.lane.b32.xlu0 %v7982_v41, %s11955_s27  ;;  %v8534_v2 = vmax.f32 %v8530_v6, %v8532_v53  ;;  %v8535_v10 = vmax.f32 %v8531_v32, %v8533_v9  ;;  %v8367_v61 = vmax.f32 %v8359_v35, %v8361_v52  ;;  %v8802_v23 = vsel %vm6524_vm4, %v8800_v57, %v8801_v51  ;;  %v8606_v42 = vld [vmem:[#allocation2 + $0xc7] sm:$0x1]  ;;  %v9161_v53 = vld [vmem:[%s17275_s3 + $0xa8] sm:$0xff]  ;;  %v8609_v41 = vld [vmem:[#allocation2 + $0x1d6] sm:$0x1] }
 0x371   :  { %v8349_v7 = vrot.slane %v8346_v15, 7  ;;  %v8368_v13 = vmax.f32 %v8362_v54, %v8364_v47  ;;  %v8369_v21 = vmax.f32 %v8363_v45, %v8365_v18  ;;  %v8803_v25 = vsel %vm6526_vm5, %v8800_v57, %v8802_v23  ;;  %v8607_v36 = vld [vmem:[#allocation2 + $0x1c7] sm:$0x1]  ;;  %v8611_v15 = vld [vmem:[#allocation2 + $0x1d7] sm:$0x1]  ;;  %10973 = vmatprep.subr.mxu1 %v9161_v53 }
 0x372   :  { %v8544_v39 = vrot.slane %v8534_v2, %v15787_v4  ;;  %v8551_v33 = vrot.slane %v8535_v10, %v15787_v4  ;;  %v8571_v59 = vmax.f32 %v8563_v26, %v8565_v63  ;;  %v8804_v20 = vsel %vm6528_vm6, %v8800_v57, %v8803_v25  ;;  %v8608_v57 = vld [vmem:[#allocation2 + $0xd6] sm:$0x1]  ;;  %v8152_v2 = vld [vmem:[#allocation2 + $0xa0] sm:$0x1]  ;;  %v8197_v53 = vld [vmem:[#allocation2 + $0x1a3] sm:$0x1] }
 0x373   :  { %v8350_v60 = vsel %vm6522_vm3, %v8349_v7, %v8339_v46  ;;  %v8370_v14 = vmax.f32 %v8366_v62, %v8368_v13  ;;  %v8371_v27 = vmax.f32 %v8367_v61, %v8369_v21  ;;  %8805 = vrot.lane.b32.xlu1 %v8804_v20, %s11952_s24  ;;  %v8572_v0 = vmax.f32 %v8564_v50, %v8566_v24  ;;  %v8610_v46 = vld [vmem:[#allocation2 + $0xd7] sm:$0x1]  ;;  %v8153_v10 = vld [vmem:[#allocation2 + $0x1a0] sm:$0x1]  ;;  %v8154_v61 = vld [vmem:[#allocation2 + $0xa1] sm:$0x1]  ;;  %v16863_v50 = vpop.permute.xlu0 %6738 }
 0x374   :  { %v8351_v12 = vsel %vm6524_vm4, %v8349_v7, %v8350_v60  ;;  %v8554_v22 = vrot.slane %v8551_v33, 7  ;;  %v8573_v5 = vmax.f32 %v8567_v30, %v8569_v37  ;;  %v8574_v17 = vmax.f32 %v8568_v38, %v8570_v44  ;;  %v8155_v21 = vld [vmem:[#allocation2 + $0x1a1] sm:$0x1]  ;;  %v8157_v30 = vld [vmem:[#allocation2 + $0xb0] sm:$0x1]  ;;  %v9145_v20 = vld [vmem:[%s17275_s3 + $0x28] sm:$0xff] }
 0x375   :  { %v8352_v40 = vsel %vm6526_vm5, %v8349_v7, %v8351_v12  ;;  %v8380_v56 = vrot.slane %v8370_v14, %v15787_v4  ;;  %v8387_v43 = vrot.slane %v8371_v27, %v15787_v4  ;;  %v8407_v58 = vmax.f32 %v8399_v34, %v8401_v16  ;;  %v8158_v37 = vld [vmem:[#allocation2 + $0x1b0] sm:$0x1]  ;;  %v8159_v44 = vld [vmem:[#allocation2 + $0xb1] sm:$0x1]  ;;  %v8977_v16 = vld [vmem:[#allocation2 + $0xe9] sm:$0x1]  ;;  %10974 = vmatpush3.msra.mxu1 %v9145_v20 }
 0x376   :  { %v8353_v6 = vsel %vm6528_vm6, %v8349_v7, %v8352_v40  ;;  %v8555_v48 = vsel %vm6522_vm3, %v8554_v22, %v8544_v39  ;;  %v8575_v35 = vmax.f32 %v8571_v59, %v8573_v5  ;;  %v8576_v54 = vmax.f32 %v8572_v0, %v8574_v17  ;;  %v8160_v59 = vld [vmem:[#allocation2 + $0x1b1] sm:$0x1]  ;;  %v9144_v20 = vld [vmem:[%s17275_s3 + $0x20] sm:$0xff] }
 0x377   :  { %8354 = vrot.lane.b32.xlu0 %v8353_v6, %s11956_s28  ;;  %v8556_v32 = vsel %vm6524_vm4, %v8554_v22, %v8555_v48  ;;  %v8390_v52 = vrot.slane %v8387_v43, 7  ;;  %v8408_v45 = vmax.f32 %v8400_v31, %v8402_v55  ;;  %v8409_v18 = vmax.f32 %v8403_v3, %v8405_v11  ;;  %v8975_v31 = vld [vmem:[#allocation2 + $0xe8] sm:$0x1]  ;;  %v8978_v3 = vld [vmem:[#allocation2 + $0x1e9] sm:$0x1]  ;;  %v16876_v40 = vpop.permute.xlu0 %6780 }
 0x378   :  { %v8557_v9 = vsel %vm6526_vm5, %v8554_v22, %v8556_v32  ;;  %v8585_v47 = vrot.slane %v8575_v35, %v15787_v4  ;;  %v8410_v29 = vmax.f32 %v8404_v28, %v8406_v8  ;;  %v8592_v63 = vrot.slane %v8576_v54, %v15787_v4  ;;  %v8976_v55 = vld [vmem:[#allocation2 + $0x1e8] sm:$0x1]  ;;  %v8979_v11 = vld [vmem:[#allocation2 + $0xf8] sm:$0x1]  ;;  %v8981_v8 = vld [vmem:[#allocation2 + $0xf9] sm:$0x1] }
 0x379   :  { %v8558_v62 = vsel %vm6528_vm6, %v8554_v22, %v8557_v9  ;;  %v8391_v26 = vsel %vm6522_vm3, %v8390_v52, %v8380_v56  ;;  %v8612_v51 = vmax.f32 %v8604_v49, %v8606_v42  ;;  %v8411_v23 = vmax.f32 %v8407_v58, %v8409_v18  ;;  %v8980_v58 = vld [vmem:[#allocation2 + $0x1f8] sm:$0x1]  ;;  %v8982_v49 = vld [vmem:[#allocation2 + $0x1f9] sm:$0x1]  ;;  %v8194_v42 = vld [vmem:[#allocation2 + $0xa2] sm:$0x1] }
 0x37a   :  { %8559 = vrot.lane.b32.xlu1 %v8558_v62, %s11953_s25  ;;  %v8392_v24 = vsel %vm6524_vm4, %v8390_v52, %v8391_v26  ;;  %v8412_v7 = vmax.f32 %v8408_v45, %v8410_v29  ;;  %v8613_v13 = vmax.f32 %v8605_v19, %v8607_v36  ;;  %v8595_v39 = vrot.slane %v8592_v63, 7  ;;  %v8195_v36 = vld [vmem:[#allocation2 + $0x1a2] sm:$0x1] }
 0x37b   :  { %v8393_v25 = vsel %vm6526_vm5, %v8390_v52, %v8392_v24  ;;  %v8614_v33 = vmax.f32 %v8608_v57, %v8610_v46  ;;  %v8615_v38 = vmax.f32 %v8609_v41, %v8611_v15  ;;  %v8421_v14 = vrot.slane %v8411_v23, %v15787_v4  ;;  %v8196_v57 = vld [vmem:[#allocation2 + $0xa3] sm:$0x1]  ;;  %v8198_v41 = vld [vmem:[#allocation2 + $0xb2] sm:$0x1] }
 0x37c   :  { %v8394_v60 = vsel %vm6528_vm6, %v8390_v52, %v8393_v25  ;;  %v8428_v27 = vrot.slane %v8412_v7, %v15787_v4  ;;  %v8161_v34 = vmax.f32 %v8152_v2, %v8154_v61  ;;  %v8596_v12 = vsel %vm6522_vm3, %v8595_v39, %v8585_v47  ;;  %v8199_v46 = vld [vmem:[#allocation2 + $0x1b2] sm:$0x1]  ;;  %v8201_v2 = vld [vmem:[#allocation2 + $0x1b3] sm:$0x1]  ;;  %v16889_v61 = vpop.permute.xlu0 %6822 }
 0x37d   :  { %8395 = vrot.lane.b32.xlu0 %v8394_v60, %s11957_s29  ;;  %v8616_v22 = vmax.f32 %v8612_v51, %v8614_v33  ;;  %v8617_v0 = vmax.f32 %v8613_v13, %v8615_v38  ;;  %v8162_v5 = vmax.f32 %v8153_v10, %v8155_v21  ;;  %v8597_v56 = vsel %vm6524_vm4, %v8595_v39, %v8596_v12  ;;  %v8200_v51 = vld [vmem:[#allocation2 + $0xb3] sm:$0x1]  ;;  %v9016_v10 = vld [vmem:[#allocation2 + $0xea] sm:$0x1]  ;;  %v9023_v12 = vld [vmem:[#allocation2 + $0x1fb] sm:$0x1] }
 0x37e   :  { %v8431_v43 = vrot.slane %v8428_v27, 7  ;;  %v8163_v17 = vmax.f32 %v8157_v30, %v8159_v44  ;;  %v8164_v28 = vmax.f32 %v8158_v37, %v8160_v59  ;;  %v8598_v6 = vsel %vm6526_vm5, %v8595_v39, %v8597_v56  ;;  %v9017_v21 = vld [vmem:[#allocation2 + $0x1ea] sm:$0x1]  ;;  %v9018_v30 = vld [vmem:[#allocation2 + $0xeb] sm:$0x1]  ;;  %v9160_v59 = vld [vmem:[%s17275_s3 + $0xa0] sm:$0xff] }
 0x37f   :  { %v8626_v48 = vrot.slane %v8616_v22, %v15787_v4  ;;  %v8633_v35 = vrot.slane %v8617_v0, %v15787_v4  ;;  %v8983_v19 = vmax.f32 %v8975_v31, %v8977_v16  ;;  %v8599_v32 = vsel %vm6528_vm6, %v8595_v39, %v8598_v6  ;;  %v9019_v37 = vld [vmem:[#allocation2 + $0x1eb] sm:$0x1]  ;;  %v9020_v44 = vld [vmem:[#allocation2 + $0xfa] sm:$0x1]  ;;  %v9022_v16 = vld [vmem:[#allocation2 + $0xfb] sm:$0x1]  ;;  %v16903_v22 = vpop.permute.xlu1 %7366  ;;  %10975 = vmatprep.subr.mxu1 %v9160_v59 }
 0x380   :  { %v8432_v52 = vsel %vm6522_vm3, %v8431_v43, %v8421_v14  ;;  %v8165_v54 = vmax.f32 %v8161_v34, %v8163_v17  ;;  %v8166_v45 = vmax.f32 %v8162_v5, %v8164_v28  ;;  %8600 = vrot.lane.b32.xlu1 %v8599_v32, %s11954_s26  ;;  %v8984_v18 = vmax.f32 %v8976_v55, %v8978_v3  ;;  %v9021_v31 = vld [vmem:[#allocation2 + $0x1fa] sm:$0x1]  ;;  %v8235_v56 = vld [vmem:[#allocation2 + $0xa4] sm:$0x1]  ;;  %v8237_v17 = vld [vmem:[#allocation2 + $0xa5] sm:$0x1] }
 0x381   :  { %v8433_v9 = vsel %vm6524_vm4, %v8431_v43, %v8432_v52  ;;  %v8636_v47 = vrot.slane %v8633_v35, 7  ;;  %v8985_v29 = vmax.f32 %v8979_v11, %v8981_v8  ;;  %v8986_v63 = vmax.f32 %v8980_v58, %v8982_v49  ;;  %10976 = vmatpush3.msra.mxu1 %v9144_v20  ;;  %v8239_v35 = vld [vmem:[#allocation2 + $0xb4] sm:$0x1]  ;;  %v8241_v52 = vld [vmem:[#allocation2 + $0xb5] sm:$0x1] }
 0x382   :  { %v8434_v15 = vsel %vm6526_vm5, %v8431_v43, %v8433_v9  ;;  %v8175_v62 = vrot.slane %v8165_v54, %v15787_v4  ;;  %v8182_v26 = vrot.slane %v8166_v45, %v15787_v4  ;;  %v8202_v13 = vmax.f32 %v8194_v42, %v8196_v57  ;;  %v8240_v58 = vld [vmem:[#allocation2 + $0x1b4] sm:$0x1]  ;;  %v8242_v54 = vld [vmem:[#allocation2 + $0x1b5] sm:$0x1]  ;;  %v16911_v45 = vpop.permute.xlu0 %6570 }
 0x383   :  { %v8435_v24 = vsel %vm6528_vm6, %v8431_v43, %v8434_v15  ;;  %v8637_v23 = vsel %vm6522_vm3, %v8636_v47, %v8626_v48  ;;  %v8987_v7 = vmax.f32 %v8983_v19, %v8985_v29  ;;  %v8988_v33 = vmax.f32 %v8984_v18, %v8986_v63  ;;  %v8236_v43 = vld [vmem:[#allocation2 + $0x1a4] sm:$0x1]  ;;  %v8238_v48 = vld [vmem:[#allocation2 + $0x1a5] sm:$0x1]  ;;  %v9059_v18 = vld [vmem:[#allocation2 + $0xed] sm:$0x1] }
 0x384   :  { %8436 = vrot.lane.b32.xlu0 %v8435_v24, %s11958_s30  ;;  %v8638_v25 = vsel %vm6524_vm4, %v8636_v47, %v8637_v23  ;;  %v8185_v39 = vrot.slane %v8182_v26, 7  ;;  %v8203_v38 = vmax.f32 %v8195_v36, %v8197_v53  ;;  %v8204_v27 = vmax.f32 %v8198_v41, %v8200_v51  ;;  %v9060_v26 = vld [vmem:[#allocation2 + $0x1ed] sm:$0x1]  ;;  %v9061_v63 = vld [vmem:[#allocation2 + $0xfc] sm:$0x1] }
 0x385   :  { %v8639_v60 = vsel %vm6526_vm5, %v8636_v47, %v8638_v25  ;;  %v8997_v14 = vrot.slane %v8987_v7, %v15787_v4  ;;  %v8205_v34 = vmax.f32 %v8199_v46, %v8201_v2  ;;  %v9004_v55 = vrot.slane %v8988_v33, %v15787_v4  ;;  %v9062_v23 = vld [vmem:[#allocation2 + $0x1fc] sm:$0x1]  ;;  %v9063_v7 = vld [vmem:[#allocation2 + $0xfd] sm:$0x1]  ;;  %v8276_v33 = vld [vmem:[#allocation2 + $0xa6] sm:$0x1] }
 0x386   :  { %v8640_v0 = vsel %vm6528_vm6, %v8636_v47, %v8639_v60  ;;  %v8186_v5 = vsel %vm6522_vm3, %v8185_v39, %v8175_v62  ;;  %v9024_v3 = vmax.f32 %v9016_v10, %v9018_v30  ;;  %v8206_v11 = vmax.f32 %v8202_v13, %v8204_v27  ;;  %v9057_v47 = vld [vmem:[#allocation2 + $0xec] sm:$0x1]  ;;  %v16919_v13 = vpop.permute.xlu1 %7407  ;;  %v9064_v25 = vld [vmem:[#allocation2 + $0x1fd] sm:$0x1]  ;;  %v8279_v27 = vld [vmem:[#allocation2 + $0x1a7] sm:$0x1] }
 0x387   :  { %8641 = vrot.lane.b32.xlu1 %v8640_v0, %s11955_s27  ;;  %v8187_v28 = vsel %vm6524_vm4, %v8185_v39, %v8186_v5  ;;  %v8207_v8 = vmax.f32 %v8203_v38, %v8205_v34  ;;  %v9025_v6 = vmax.f32 %v9017_v21, %v9019_v37  ;;  %v9007_v19 = vrot.slane %v9004_v55, 7  ;;  %v9058_v62 = vld [vmem:[#allocation2 + $0x1ec] sm:$0x1]  ;;  %v8277_v38 = vld [vmem:[#allocation2 + $0x1a6] sm:$0x1] }
 0x388   :  { %v8188_v49 = vsel %vm6526_vm5, %v8185_v39, %v8187_v28  ;;  %v9026_v42 = vmax.f32 %v9020_v44, %v9022_v16  ;;  %v9027_v32 = vmax.f32 %v9021_v31, %v9023_v12  ;;  %v8216_v57 = vrot.slane %v8206_v11, %v15787_v4  ;;  %v8280_v34 = vld [vmem:[#allocation2 + $0xb6] sm:$0x1]  ;;  %v8282_v55 = vld [vmem:[#allocation2 + $0xb7] sm:$0x1] }
 0x389   :  { %v8189_v36 = vsel %vm6528_vm6, %v8185_v39, %v8188_v49  ;;  %v8223_v53 = vrot.slane %v8207_v8, %v15787_v4  ;;  %v8243_v9 = vmax.f32 %v8235_v56, %v8237_v17  ;;  %v9008_v29 = vsel %vm6522_vm3, %v9007_v19, %v8997_v14  ;;  %v8278_v14 = vld [vmem:[#allocation2 + $0xa7] sm:$0x1]  ;;  %v8281_v5 = vld [vmem:[#allocation2 + $0x1b6] sm:$0x1]  ;;  %v8283_v11 = vld [vmem:[#allocation2 + $0x1b7] sm:$0x1] }
 0x38a   :  { %8190 = vrot.lane.b32.xlu0 %v8189_v36, %s11960_s11  ;;  %v9028_v41 = vmax.f32 %v9024_v3, %v9026_v42  ;;  %v9029_v46 = vmax.f32 %v9025_v6, %v9027_v32  ;;  %v8244_v15 = vmax.f32 %v8236_v43, %v8238_v48  ;;  %v9009_v51 = vsel %vm6524_vm4, %v9007_v19, %v9008_v29  ;;  %v16928_v3 = vpop.permute.xlu0 %6612  ;;  %v8810_v8 = vld [vmem:[#allocation2 + $0xe0] sm:$0x1]  ;;  %v8813_v42 = vld [vmem:[#allocation2 + $0x1e1] sm:$0x1]  ;;  %v8815_v32 = vld [vmem:[#allocation2 + $0xf0] sm:$0x1] }
 0x38b   :  { %v8226_v2 = vrot.slane %v8223_v53, 7  ;;  %v8245_v10 = vmax.f32 %v8239_v35, %v8241_v52  ;;  %v8246_v24 = vmax.f32 %v8240_v58, %v8242_v54  ;;  %v9010_v21 = vsel %vm6526_vm5, %v9007_v19, %v9009_v51  ;;  %v8811_v6 = vld [vmem:[#allocation2 + $0x1e0] sm:$0x1]  ;;  %v8816_v53 = vld [vmem:[#allocation2 + $0x1f0] sm:$0x1] }
 0x38c   :  { %v9038_v30 = vrot.slane %v9028_v41, %v15787_v4  ;;  %v9045_v37 = vrot.slane %v9029_v46, %v15787_v4  ;;  %v9065_v39 = vmax.f32 %v9057_v47, %v9059_v18  ;;  %v9011_v44 = vsel %vm6528_vm6, %v9007_v19, %v9010_v21  ;;  %v8812_v19 = vld [vmem:[#allocation2 + $0xe1] sm:$0x1]  ;;  %v16937_v47 = vpop.permute.xlu1 %7448 }
 0x38d   :  { %v8227_v59 = vsel %vm6522_vm3, %v8226_v2, %v8216_v57  ;;  %v8247_v20 = vmax.f32 %v8243_v9, %v8245_v10  ;;  %v8248_v60 = vmax.f32 %v8244_v15, %v8246_v24  ;;  %9012 = vrot.lane.b32.xlu1 %v9011_v44, %s11956_s28  ;;  %v9066_v12 = vmax.f32 %v9058_v62, %v9060_v26  ;;  %v8817_v9 = vld [vmem:[#allocation2 + $0xf1] sm:$0x1]  ;;  %v8440_v62 = vld [vmem:[#allocation2 + $0xae] sm:$0x1]  ;;  %v8442_v24 = vld [vmem:[#allocation2 + $0xaf] sm:$0x1] }
 0x38e   :  { %v8228_v31 = vsel %vm6524_vm4, %v8226_v2, %v8227_v59  ;;  %v9048_v16 = vrot.slane %v9045_v37, 7  ;;  %v9067_v0 = vmax.f32 %v9061_v63, %v9063_v7  ;;  %v9068_v28 = vmax.f32 %v9062_v23, %v9064_v25  ;;  %v8818_v15 = vld [vmem:[#allocation2 + $0x1f1] sm:$0x1]  ;;  %v8441_v26 = vld [vmem:[#allocation2 + $0x1ae] sm:$0x1]  ;;  %v9159_v23 = vld [vmem:[%s17275_s3 + $0x98] sm:$0xff] }
 0x38f   :  { %v8229_v56 = vsel %vm6526_vm5, %v8226_v2, %v8228_v31  ;;  %v8257_v43 = vrot.slane %v8247_v20, %v15787_v4  ;;  %v8264_v17 = vrot.slane %v8248_v60, %v15787_v4  ;;  %v8284_v49 = vmax.f32 %v8276_v33, %v8278_v14  ;;  %v9143_v7 = vld [vmem:[%s17275_s3 + $0x18] sm:$0xff]  ;;  %v16952_v44 = vpop.permute.xlu0 %6654  ;;  %10977 = vmatprep.subr.mxu1 %v9159_v23  ;;  %v8897_v23 = vld [vmem:[#allocation2 + $0xf4] sm:$0x1] }
 0x390   :  { %v8230_v48 = vsel %vm6528_vm6, %v8226_v2, %v8229_v56  ;;  %v9049_v35 = vsel %vm6522_vm3, %v9048_v16, %v9038_v30  ;;  %v9069_v58 = vmax.f32 %v9065_v39, %v9067_v0  ;;  %v9070_v36 = vmax.f32 %v9066_v12, %v9068_v28  ;;  %v8443_v39 = vld [vmem:[#allocation2 + $0x1af] sm:$0x1]  ;;  %v8444_v33 = vld [vmem:[#allocation2 + $0xbe] sm:$0x1]  ;;  %10978 = vmatpush3.msra.mxu1 %v9143_v7  ;;  %v9158_v7 = vld [vmem:[%s17275_s3 + $0x90] sm:$0xff] }
 0x391   :  { %8231 = vrot.lane.b32.xlu0 %v8230_v48, %s11961_s0  ;;  %v9050_v52 = vsel %vm6524_vm4, %v9048_v16, %v9049_v35  ;;  %v8267_v54 = vrot.slane %v8264_v17, 7  ;;  %v8285_v57 = vmax.f32 %v8277_v38, %v8279_v27  ;;  %v8286_v41 = vmax.f32 %v8280_v34, %v8282_v55  ;;  %v8445_v38 = vld [vmem:[#allocation2 + $0x1be] sm:$0x1]  ;;  %v8446_v27 = vld [vmem:[#allocation2 + $0xbf] sm:$0x1]  ;;  %10979 = vmatprep.subr.mxu1 %v9158_v7 }
 0x392   :  { %v9051_v18 = vsel %vm6526_vm5, %v9048_v16, %v9050_v52  ;;  %v9079_v29 = vrot.slane %v9069_v58, %v15787_v4  ;;  %v8287_v46 = vmax.f32 %v8281_v5, %v8283_v11  ;;  %v9086_v2 = vrot.slane %v9070_v36, %v15787_v4  ;;  %v8447_v34 = vld [vmem:[#allocation2 + $0x1bf] sm:$0x1]  ;;  %v8852_v5 = vld [vmem:[#allocation2 + $0xe2] sm:$0x1]  ;;  %v8854_v55 = vld [vmem:[#allocation2 + $0xe3] sm:$0x1] }
 0x393   :  { %v9052_v63 = vsel %vm6528_vm6, %v9048_v16, %v9051_v18  ;;  %v8268_v51 = vsel %vm6522_vm3, %v8267_v54, %v8257_v43  ;;  %v8819_v10 = vmax.f32 %v8810_v8, %v8812_v19  ;;  %v8288_v30 = vmax.f32 %v8284_v49, %v8286_v41  ;;  %v8853_v11 = vld [vmem:[#allocation2 + $0x1e2] sm:$0x1]  ;;  %v8855_v8 = vld [vmem:[#allocation2 + $0x1e3] sm:$0x1]  ;;  %v8856_v19 = vld [vmem:[#allocation2 + $0xf2] sm:$0x1] }
 0x394   :  { %9053 = vrot.lane.b32.xlu1 %v9052_v63, %s11957_s29  ;;  %v8269_v21 = vsel %vm6524_vm4, %v8267_v54, %v8268_v51  ;;  %v8289_v37 = vmax.f32 %v8285_v57, %v8287_v46  ;;  %v8820_v25 = vmax.f32 %v8811_v6, %v8813_v42  ;;  %v9089_v20 = vrot.slane %v9086_v2, 7  ;;  %v16960_v6 = vpop.permute.xlu1 %7489  ;;  %v8858_v42 = vld [vmem:[#allocation2 + $0xf3] sm:$0x1]  ;;  %v8857_v36 = vld [vmem:[#allocation2 + $0x1f2] sm:$0x1] }
 0x395   :  { %v8270_v59 = vsel %vm6526_vm5, %v8267_v54, %v8269_v21  ;;  %v8821_v60 = vmax.f32 %v8815_v32, %v8817_v9  ;;  %v8822_v14 = vmax.f32 %v8816_v53, %v8818_v15  ;;  %v8298_v16 = vrot.slane %v8288_v30, %v15787_v4  ;;  %v8859_v57 = vld [vmem:[#allocation2 + $0x1f3] sm:$0x1]  ;;  %v8893_v9 = vld [vmem:[#allocation2 + $0xe4] sm:$0x1]  ;;  %v16968_v63 = vpop.permute.xlu0 %7034 }
 0x396   :  { %v8271_v31 = vsel %vm6528_vm6, %v8267_v54, %v8270_v59  ;;  %v8305_v12 = vrot.slane %v8289_v37, %v15787_v4  ;;  %v8448_v0 = vmax.f32 %v8440_v62, %v8442_v24  ;;  %v9090_v56 = vsel %vm6522_vm3, %v9089_v20, %v9079_v29  ;;  %v8894_v15 = vld [vmem:[#allocation2 + $0x1e4] sm:$0x1]  ;;  %v8895_v62 = vld [vmem:[#allocation2 + $0xe5] sm:$0x1]  ;;  %v9142_v21 = vld [vmem:[%s17275_s3 + $0x10] sm:$0xff] }
 0x397   :  { %8272 = vrot.lane.b32.xlu0 %v8271_v31, %s11962_s21  ;;  %v8823_v43 = vmax.f32 %v8819_v10, %v8821_v60  ;;  %v8824_v17 = vmax.f32 %v8820_v25, %v8822_v14  ;;  %v8449_v28 = vmax.f32 %v8441_v26, %v8443_v39  ;;  %v9091_v48 = vsel %vm6524_vm4, %v9089_v20, %v9090_v56  ;;  %v8896_v26 = vld [vmem:[#allocation2 + $0x1e5] sm:$0x1]  ;;  %v8900_v59 = vld [vmem:[#allocation2 + $0x1f5] sm:$0x1]  ;;  %v8935_v31 = vld [vmem:[#allocation2 + $0x1e6] sm:$0x1] }
 0x398   :  { %v8308_v35 = vrot.slane %v8305_v12, 7  ;;  %v8450_v58 = vmax.f32 %v8444_v33, %v8446_v27  ;;  %v8451_v49 = vmax.f32 %v8445_v38, %v8447_v34  ;;  %v9092_v32 = vsel %vm6526_vm5, %v9089_v20, %v9091_v48  ;;  %v8898_v33 = vld [vmem:[#allocation2 + $0x1f4] sm:$0x1]  ;;  %v8899_v38 = vld [vmem:[#allocation2 + $0xf5] sm:$0x1]  ;;  %v16983_v12 = vpop.permute.xlu1 %7284  ;;  %10980 = vmatpush3.msra.mxu1 %v9142_v21 }
 0x399   :  { %v8833_v52 = vrot.slane %v8823_v43, %v15787_v4  ;;  %v8840_v54 = vrot.slane %v8824_v17, %v15787_v4  ;;  %v8860_v53 = vmax.f32 %v8852_v5, %v8854_v55  ;;  %v9093_v18 = vsel %vm6528_vm6, %v9089_v20, %v9092_v32  ;;  %v8934_v34 = vld [vmem:[#allocation2 + $0xe6] sm:$0x1]  ;;  %v8937_v43 = vld [vmem:[#allocation2 + $0x1e7] sm:$0x1]  ;;  %v8938_v17 = vld [vmem:[#allocation2 + $0xf6] sm:$0x1] }
 0x39a   :  { %v8309_v29 = vsel %vm6522_vm3, %v8308_v35, %v8298_v16  ;;  %v8452_v41 = vmax.f32 %v8448_v0, %v8450_v58  ;;  %v8453_v46 = vmax.f32 %v8449_v28, %v8451_v49  ;;  %9094 = vrot.lane.b32.xlu1 %v9093_v18, %s11958_s30  ;;  %v8861_v10 = vmax.f32 %v8853_v11, %v8855_v8  ;;  %v8936_v16 = vld [vmem:[#allocation2 + $0xe7] sm:$0x1]  ;;  %v8940_v58 = vld [vmem:[#allocation2 + $0xf7] sm:$0x1] }
 0x39b   :  { %v8310_v51 = vsel %vm6524_vm4, %v8308_v35, %v8309_v29  ;;  %v8843_v2 = vrot.slane %v8840_v54, 7  ;;  %v8862_v24 = vmax.f32 %v8856_v19, %v8858_v42  ;;  %v8863_v39 = vmax.f32 %v8857_v36, %v8859_v57  ;;  %v8941_v49 = vld [vmem:[#allocation2 + $0x1f7] sm:$0x1]  ;;  %v6487_v54 = vld [vmem:[#allocation2 + $0x100] sm:$0x1] }
 0x39c   :  { %v8311_v30 = vsel %vm6526_vm5, %v8308_v35, %v8310_v51  ;;  %v8462_v37 = vrot.slane %v8452_v41, %v15787_v4  ;;  %v8469_v25 = vrot.slane %v8453_v46, %v15787_v4  ;;  %v8901_v27 = vmax.f32 %v8893_v9, %v8895_v62  ;;  %v6489_v29 = vld [vmem:[#allocation2 + $0x101] sm:$0x1]  ;;  %v6491_v41 = vld [vmem:[#allocation2 + $0x10] sm:$0x1] }
 0x39d   :  { %v8312_v20 = vsel %vm6528_vm6, %v8308_v35, %v8311_v30  ;;  %v8844_v60 = vsel %vm6522_vm3, %v8843_v2, %v8833_v52  ;;  %v8864_v14 = vmax.f32 %v8860_v53, %v8862_v24  ;;  %v8865_v55 = vmax.f32 %v8861_v10, %v8863_v39  ;;  %v8939_v35 = vld [vmem:[#allocation2 + $0x1f6] sm:$0x1]  ;;  %v16992_v36 = vpop.permute.xlu0 %7076  ;;  %v6492_v46 = vld [vmem:[#allocation2 + $0x110] sm:$0x1]  ;;  %v6494_v10 = vld [vmem:[#allocation2 + $0x111] sm:$0x1] }
 0x39e   :  { %8313 = vrot.lane.b32.xlu0 %v8312_v20, %s11963_s12  ;;  %v8845_v0 = vsel %vm6524_vm4, %v8843_v2, %v8844_v60  ;;  %v8472_v5 = vrot.slane %v8469_v25, 7  ;;  %v8902_v56 = vmax.f32 %v8894_v15, %v8896_v26  ;;  %v8903_v8 = vmax.f32 %v8897_v23, %v8899_v38  ;;  %v6488_v38 = vld [vmem:[#allocation2 + $0x1] sm:$0x1] }
 0x39f   :  { %v8846_v28 = vsel %vm6526_vm5, %v8843_v2, %v8845_v0  ;;  %v8874_v11 = vrot.slane %v8864_v14, %v15787_v4  ;;  %v8904_v48 = vmax.f32 %v8898_v33, %v8900_v59  ;;  %v8881_v32 = vrot.slane %v8865_v55, %v15787_v4  ;;  %v17000_v21 = vpop.permute.xlu1 %7325  ;;  %v6486_v33 = vld [vmem:[#allocation2] sm:$0x1]  ;;  %v9157_v0 = vld [vmem:[%s17275_s3 + $0x88] sm:$0xff] }
 0x3a0   :  { %v8847_v19 = vsel %vm6528_vm6, %v8843_v2, %v8846_v28  ;;  %v8473_v42 = vsel %vm6522_vm3, %v8472_v5, %v8462_v37  ;;  %v8942_v52 = vmax.f32 %v8934_v34, %v8936_v16  ;;  %v8905_v53 = vmax.f32 %v8901_v27, %v8903_v8  ;;  %v6493_v2 = vld [vmem:[#allocation2 + $0x11] sm:$0x1]  ;;  %v9098_v27 = vld [vmem:[#allocation2 + $0xee] sm:$0x1]  ;;  %10981 = vmatprep.subr.mxu1 %v9157_v0 }
 0x3a1   :  { %8848 = vrot.lane.b32.xlu1 %v8847_v19, %s11960_s11  ;;  %v8474_v57 = vsel %vm6524_vm4, %v8472_v5, %v8473_v42  ;;  %v8906_v9 = vmax.f32 %v8902_v56, %v8904_v48  ;;  %v8943_v18 = vmax.f32 %v8935_v31, %v8937_v43  ;;  %v8884_v62 = vrot.slane %v8881_v32, 7  ;;  %v9099_v34 = vld [vmem:[#allocation2 + $0x1ee] sm:$0x1]  ;;  %v9100_v31 = vld [vmem:[#allocation2 + $0xef] sm:$0x1] }
 0x3a2   :  { %v8475_v15 = vsel %vm6526_vm5, %v8472_v5, %v8474_v57  ;;  %v8944_v26 = vmax.f32 %v8938_v17, %v8940_v58  ;;  %v8945_v51 = vmax.f32 %v8939_v35, %v8941_v49  ;;  %v8915_v23 = vrot.slane %v8905_v53, %v15787_v4  ;;  %v17005_v16 = vpop.permute.xlu0 %7118  ;;  %v9102_v56 = vld [vmem:[#allocation2 + $0xfe] sm:$0x1]  ;;  %v9104_v43 = vld [vmem:[#allocation2 + $0xff] sm:$0x1]  ;;  %v9141_v17 = vld [vmem:[%s17275_s3 + $0x8] sm:$0xff] }
 0x3a3   :  { %v8476_v24 = vsel %vm6528_vm6, %v8472_v5, %v8475_v15  ;;  %v8922_v7 = vrot.slane %v8906_v9, %v15787_v4  ;;  %v8885_v30 = vsel %vm6522_vm3, %v8884_v62, %v8874_v11  ;;  %v6496_v39 = vmax.f32 %v6487_v54, %v6489_v29  ;;  %v9101_v35 = vld [vmem:[#allocation2 + $0x1ef] sm:$0x1]  ;;  %v9103_v58 = vld [vmem:[#allocation2 + $0x1fe] sm:$0x1]  ;;  %v9105_v49 = vld [vmem:[#allocation2 + $0x1ff] sm:$0x1]  ;;  %v17017_v19 = vpop.permute.xlu1 %7696  ;;  %10982 = vmatpush3.msra.mxu1 %v9141_v17 }
 0x3a4   :  { %8477 = vrot.lane.b32.xlu0 %v8476_v24, %s11959_s8  ;;  %v8946_v37 = vmax.f32 %v8942_v52, %v8944_v26  ;;  %v8947_v25 = vmax.f32 %v8943_v18, %v8945_v51  ;;  %v8886_v59 = vsel %vm6524_vm4, %v8884_v62, %v8885_v30  ;;  %v6497_v60 = vmax.f32 %v6491_v41, %v6493_v2  ;;  %v9156_v29 = vld [vmem:[%s17275_s3 + $0x80] sm:$0xff] }
 0x3a5   :  { %v8925_v20 = vrot.slane %v8922_v7, 7  ;;  %v6498_v14 = vmax.f32 %v6492_v46, %v6494_v10  ;;  %v8887_v5 = vsel %vm6526_vm5, %v8884_v62, %v8886_v59  ;;  %v6495_v48 = vmax.f32 %v6486_v33, %v6488_v38  ;;  %v9140_v41 = vld [vmem:[%s17275_s3] sm:$0xff]  ;;  %10983 = vmatprep.subr.mxu1 %v9156_v29  ;;  %v7171_v33 = vld [vmem:[#allocation2 + $0x50] sm:$0x1]  ;;  %v7173_v38 = vld [vmem:[#allocation2 + $0x51] sm:$0x1] }
 0x3a6   :  { %v8963_v55 = vrot.slane %v8947_v25, %v15787_v4  ;;  %v8888_v28 = vsel %vm6528_vm6, %v8884_v62, %v8887_v5  ;;  %v8956_v32 = vrot.slane %v8946_v37, %v15787_v4  ;;  %v9108_v9 = vmax.f32 %v9102_v56, %v9104_v43  ;;  %v17024_v18 = vpop.permute.xlu0 %7160  ;;  %10984 = vmatpush3.msra.mxu1 %v9140_v41  ;;  %v7166_v25 = vld [vmem:[#allocation2 + $0x40] sm:$0x1]  ;;  %v7826_v56 = vld [vmem:[#allocation2 + $0x81] sm:$0x1] }
 0x3a7   :  { %v8926_v11 = vsel %vm6522_vm3, %v8925_v20, %v8915_v23  ;;  %v6500_v8 = vmax.f32 %v6496_v39, %v6498_v14  ;;  %8889 = vrot.lane.b32.xlu1 %v8888_v28, %s11961_s0  ;;  %v6499_v53 = vmax.f32 %v6495_v48, %v6497_v60  ;;  %v9106_v15 = vmax.f32 %v9098_v27, %v9100_v31  ;;  %v17038_v37 = vpop.permute.xlu1 %7737  ;;  %v7168_v39 = vld [vmem:[#allocation2 + $0x41] sm:$0x1]  ;;  %v7167_v60 = vld [vmem:[#allocation2 + $0x140] sm:$0x1]  ;;  %v7172_v27 = vld [vmem:[#allocation2 + $0x150] sm:$0x1] }
 0x3a8   :  { %v8927_v42 = vsel %vm6524_vm4, %v8925_v20, %v8926_v11  ;;  %v8966_v52 = vrot.slane %v8963_v55, 7  ;;  %v9107_v62 = vmax.f32 %v9099_v34, %v9101_v35  ;;  %v9109_v26 = vmax.f32 %v9103_v58, %v9105_v49  ;;  %v7169_v14 = vld [vmem:[#allocation2 + $0x141] sm:$0x1]  ;;  %v7174_v34 = vld [vmem:[#allocation2 + $0x151] sm:$0x1] }
 0x3a9   :  { %v8928_v54 = vsel %vm6526_vm5, %v8925_v20, %v8927_v42  ;;  %v6516_v57 = vrot.slane %v6500_v8, %v15787_v4  ;;  %v6509_v24 = vrot.slane %v6499_v53, %v15787_v4  ;;  %v9110_v7 = vmax.f32 %v9106_v15, %v9108_v9  ;;  %v7824_v31 = vld [vmem:[#allocation2 + $0x80] sm:$0x1]  ;;  %v7827_v43 = vld [vmem:[#allocation2 + $0x181] sm:$0x1]  ;;  %v7829_v11 = vld [vmem:[#allocation2 + $0x90] sm:$0x1] }
 0x3aa   :  { %v8967_v46 = vsel %vm6522_vm3, %v8966_v52, %v8956_v32  ;;  %v8929_v51 = vsel %vm6528_vm6, %v8925_v20, %v8928_v54  ;;  %v9111_v30 = vmax.f32 %v9107_v62, %v9109_v26  ;;  %v17041_v20 = vpop.permute.xlu0 %6866  ;;  %v7825_v55 = vld [vmem:[#allocation2 + $0x180] sm:$0x1]  ;;  %v7830_v8 = vld [vmem:[#allocation2 + $0x190] sm:$0x1]  ;;  %v7831_v49 = vld [vmem:[#allocation2 + $0x91] sm:$0x1]  ;;  %v7175_v32 = vmax.f32 %v7166_v25, %v7168_v39 }
 0x3ab   :  { %v8968_v2 = vsel %vm6524_vm4, %v8966_v52, %v8967_v46  ;;  %v6521_v10 = vrot.slane %v6516_v57, 7  ;;  %8930 = vrot.lane.b32.xlu1 %v8929_v51, %s11962_s21  ;;  %v9120_v35 = vrot.slane %v9110_v7, %v15787_v4  ;;  %v7832_v42 = vld [vmem:[#allocation2 + $0x191] sm:$0x1]  ;;  %v8482_v54 = vld [vmem:[#allocation2 + $0xc0] sm:$0x1]  ;;  %v7176_v29 = vmax.f32 %v7167_v60, %v7169_v14 }
 0x3ac   :  { %v8969_v23 = vsel %vm6526_vm5, %v8966_v52, %v8968_v2  ;;  %v9127_v5 = vrot.slane %v9111_v30, %v15787_v4  ;;  %v8484_v57 = vld [vmem:[#allocation2 + $0xc1] sm:$0x1]  ;;  %v7178_v41 = vmax.f32 %v7172_v27, %v7174_v34  ;;  %v7833_v46 = vmax.f32 %v7824_v31, %v7826_v56  ;;  %v8483_v15 = vld [vmem:[#allocation2 + $0x1c0] sm:$0x1]  ;;  %v8487_v26 = vld [vmem:[#allocation2 + $0xd0] sm:$0x1] }
 0x3ad   :  { %v6523_v59 = vsel %vm6522_vm3, %v6521_v10, %v6509_v24  ;;  %v8970_v17 = vsel %vm6528_vm6, %v8966_v52, %v8969_v23  ;;  %v7177_v52 = vmax.f32 %v7171_v33, %v7173_v38  ;;  %v8485_v62 = vld [vmem:[#allocation2 + $0x1c1] sm:$0x1]  ;;  %v7835_v24 = vmax.f32 %v7829_v11, %v7831_v49  ;;  %v8489_v7 = vld [vmem:[#allocation2 + $0xd1] sm:$0x1]  ;;  %v9203_v27 = vld [vmem:[%s17275_s3 + $0x1f8] sm:$0xff] }
 0x3ae   :  { %v6525_v0 = vsel %vm6524_vm4, %v6521_v10, %v6523_v59  ;;  %v9130_v58 = vrot.slane %v9127_v5, 7  ;;  %v7836_v23 = vmax.f32 %v7830_v8, %v7832_v42  ;;  %v8490_v30 = vld [vmem:[#allocation2 + $0x1d1] sm:$0x1]  ;;  %v7180_v33 = vmax.f32 %v7176_v29, %v7178_v41  ;;  %10988 = vmatprep.subr.mxu1 %v9203_v27 }
 0x3af   :  { %v6527_v28 = vsel %vm6526_vm5, %v6521_v10, %v6525_v0  ;;  %8971 = vrot.lane.b32.xlu1 %v8970_v17, %s11963_s12  ;;  %v7179_v39 = vmax.f32 %v7175_v32, %v7177_v52  ;;  %v8491_v38 = vmax.f32 %v8482_v54, %v8484_v57  ;;  %v8492_v14 = vmax.f32 %v8483_v15, %v8485_v62 }
 0x3b0   :  { %v6529_v48 = vsel %vm6528_vm6, %v6521_v10, %v6527_v28  ;;  %v9131_v53 = vsel %vm6522_vm3, %v9130_v58, %v9120_v35  ;;  %v17054_v9 = vpop.permute.xlu1 %7778  ;;  %v7834_v10 = vmax.f32 %v7825_v55, %v7827_v43  ;;  %v7196_v34 = vrot.slane %v7180_v33, %v15787_v4 }
 0x3b1   :  { %6532 = vst.msk [vmem:[#allocation3] sm:$0x3] %vm6531_vm7, %v6529_v48  ;;  %v9132_v51 = vsel %vm6524_vm4, %v9130_v58, %v9131_v53  ;;  %v6909_v2 = vpop.permute.xlu0 %6908  ;;  %v8493_v31 = vmax.f32 %v8487_v26, %v8489_v7  ;;  %vm6995_vm2 = vcmask 779968  }
 0x3b2   :  { %6574 = vst.msk [vmem:[#allocation3] sm:$0x3] %vm6573_vm8, %v16911_v45  ;;  %v8488_v45 = vld [vmem:[#allocation2 + $0x1d0] sm:$0x1]  ;;  %v9133_v25 = vsel %vm6526_vm5, %v9130_v58, %v9132_v51  ;;  %v7838_v60 = vmax.f32 %v7834_v10, %v7836_v23  ;;  %v7199_v55 = vrot.slane %v7196_v34, 7 }
 0x3b3   :  { %6616 = vst.msk [vmem:[#allocation3] sm:$0x3] %vm6615_vm9, %v16928_v3  ;;  %v9134_v59 = vsel %vm6528_vm6, %v9130_v58, %v9133_v25  ;;  %v7837_v3 = vmax.f32 %v7833_v46, %v7835_v24  ;;  %v8494_v0 = vmax.f32 %v8488_v45, %v8490_v30  ;;  %v8495_v56 = vmax.f32 %v8491_v38, %v8493_v31 }
 0x3b4   :  { %6658 = vst.msk [vmem:[#allocation3] sm:$0x3] %vm6657_vm10, %v16952_v44  ;;  %9135 = vrot.lane.b32.xlu1 %v9134_v59, %s11959_s8  ;;  %v17071_v44 = vpop.permute.xlu1 %7819  ;;  %v7854_v5 = vrot.slane %v7838_v60, %v15787_v4 }
 0x3b5   :  { %6700 = vst.msk [vmem:[#allocation3] sm:$0x3] %vm6699_vm11, %v16849_v1  ;;  %v6951_v1 = vpop.permute.xlu0 %6950  ;;  %v8496_v43 = vmax.f32 %v8492_v14, %v8494_v0  ;;  %v7847_v17 = vrot.slane %v7837_v3, %v15787_v4  ;;  %v8505_v49 = vrot.slane %v8495_v56, %v15787_v4  ;;  %v9186_v56 = vld [vmem:[%s17275_s3 + $0x170] sm:$0xff] }
 0x3b6   :  { %6742 = vst.msk [vmem:[#allocation3] sm:$0x3] %vm6741_vm12, %v16863_v50  ;;  %v7189_v50 = vrot.slane %v7179_v39, %v15787_v4 }
 0x3b7   :  { %6784 = vst.msk [vmem:[#allocation3] sm:$0x3] %vm17327_vm13, %v16876_v40  ;;  %v7857_v40 = vrot.slane %v7854_v5, 7  ;;  %vm7037_vm13 = vcmask 845568   ;;  %v9187_v5 = vld [vmem:[%s17275_s3 + $0x178] sm:$0xff] }
 0x3b8   :  { %6826 = vst.msk [vmem:[#allocation3] sm:$0x3] %vm17328_vm14, %v16889_v61  ;;  %v7533_v28 = vpop.permute.xlu1 %7532  ;;  %v7200_v11 = vsel %vm6522_vm3, %v7199_v55, %v7189_v50  ;;  %v8512_v61 = vrot.slane %v8496_v43, %v15787_v4  ;;  %vm7079_vm14 = vcmask 911168   ;;  %v9202_v50 = vld [vmem:[%s17275_s3 + $0x1f0] sm:$0xff]  ;;  %v9185_v43 = vld [vmem:[%s17275_s3 + $0x168] sm:$0xff] }
 0x3b9   :  { %6870 = vst.msk [vmem:[#allocation3] sm:$0x3] %vm17329_vm15, %v17041_v20  ;;  %v6993_v8 = vpop.permute.xlu0 %6992  ;;  %v7201_v48 = vsel %vm6524_vm4, %v7199_v55, %v7200_v11  ;;  %v7858_v20 = vsel %vm6522_vm3, %v7857_v40, %v7847_v17  ;;  %vm7121_vm15 = vcmask 976768   ;;  %v9200_v17 = vld [vmem:[%s17275_s3 + $0x1e0] sm:$0xff]  ;;  %v9183_v11 = vld [vmem:[%s17275_s3 + $0x158] sm:$0xff] }
 0x3ba   :  { %6912 = vst.msk [vmem:[#allocation3] sm:$0x3] %vm6911_vm0, %v6909_v2  ;;  %v7202_v35 = vsel %vm6526_vm5, %v7199_v55, %v7201_v48  ;;  %v7859_v58 = vsel %vm6524_vm4, %v7857_v40, %v7858_v20  ;;  %v8515_v42 = vrot.slane %v8512_v61, 7  ;;  %v9198_v61 = vld [vmem:[%s17275_s3 + $0x1d0] sm:$0xff]  ;;  %v9197_v48 = vld [vmem:[%s17275_s3 + $0x1c8] sm:$0xff] }
 0x3bb   :  { %6954 = vst.msk [vmem:[#allocation3] sm:$0x3] %vm17330_vm1, %v6951_v1  ;;  %v7203_v32 = vsel %vm6528_vm6, %v7199_v55, %v7202_v35  ;;  %v7860_v52 = vsel %vm6526_vm5, %v7857_v40, %v7859_v58  ;;  %vm7163_vm1 = vcmask 1042368   ;;  %v9181_v20 = vld [vmem:[%s17275_s3 + $0x148] sm:$0xff]  ;;  %v9196_v35 = vld [vmem:[%s17275_s3 + $0x1c0] sm:$0xff] }
 0x3bc   :  { %6996 = vst.msk [vmem:[#allocation3] sm:$0x3] %vm6995_vm2, %v6993_v8  ;;  %v7861_v57 = vsel %vm6528_vm6, %v7857_v40, %v7860_v52  ;;  %v8516_v53 = vsel %vm6522_vm3, %v8515_v42, %v8505_v49  ;;  %vm17648_vm3 = vcmask 451968   ;;  %v9184_v40 = vld [vmem:[%s17275_s3 + $0x160] sm:$0xff]  ;;  %v9182_v8 = vld [vmem:[%s17275_s3 + $0x150] sm:$0xff]  ;;  %v9195_v49 = vld [vmem:[%s17275_s3 + $0x1b8] sm:$0xff] }
 0x3bd   :  { %7038 = vst.msk [vmem:[#allocation3] sm:$0x3] %vm7037_vm13, %v16968_v63  ;;  %v8517_v29 = vsel %vm6524_vm4, %v8515_v42, %v8516_v53  ;;  %vm17649_vm4 = vcmask 517568   ;;  %v9180_v58 = vld [vmem:[%s17275_s3 + $0x140] sm:$0xff]  ;;  %v9178_v52 = vld [vmem:[%s17275_s3 + $0x130] sm:$0xff] }
 0x3be   :  { %7080 = vst.msk [vmem:[#allocation3] sm:$0x3] %vm7079_vm14, %v16992_v36  ;;  %v7574_v54 = vpop.permute.xlu1 %7573  ;;  %v8518_v41 = vsel %vm6526_vm5, %v8515_v42, %v8517_v29  ;;  %vm17650_vm5 = vcmask 583168   ;;  %v9192_v53 = vld [vmem:[%s17275_s3 + $0x1a0] sm:$0xff] }
 0x3bf   :  { %7205 = vst.msk [vmem:[#allocation3 + $0x2] sm:$0x3] %vm6531_vm7, %v7203_v32  ;;  %7863 = vst.msk [vmem:[#allocation3 + $0x4] sm:$0x3] %vm6531_vm7, %v7861_v57  ;;  %v8519_v36 = vsel %vm6528_vm6, %v8515_v42, %v8518_v41  ;;  %vm17651_vm6 = vcmask 714368   ;;  %v9179_v42 = vld [vmem:[%s17275_s3 + $0x138] sm:$0xff] }
 0x3c0   :  { %7122 = vst.msk [vmem:[#allocation3] sm:$0x3] %vm7121_vm15, %v17005_v16  ;;  %v7244_v63 = vpop.permute.xlu0 %7243  ;;  %v9194_v32 = vld [vmem:[%s17275_s3 + $0x1b0] sm:$0xff]  ;;  %v9177_v57 = vld [vmem:[%s17275_s3 + $0x128] sm:$0xff]  ;;  %v9176_v29 = vld [vmem:[%s17275_s3 + $0x120] sm:$0xff] }
 0x3c1   :  { %7164 = vst.msk [vmem:[#allocation3] sm:$0x3] %vm7163_vm1, %v17024_v18  ;;  %v9175_v41 = vld [vmem:[%s17275_s3 + $0x118] sm:$0xff] }
 0x3c2   :  { %7246 = vst.msk [vmem:[#allocation3 + $0x2] sm:$0x3] %vm6573_vm8, %v7244_v63  ;;  %v7615_v46 = vpop.permute.xlu1 %7614  ;;  %v9191_v63 = vld [vmem:[%s17275_s3 + $0x198] sm:$0xff] }
 0x3c3   :  { %7287 = vst.msk [vmem:[#allocation3 + $0x2] sm:$0x3] %vm6615_vm9, %v16983_v12 }
 0x3c4   :  { %8521 = vst.msk [vmem:[#allocation3 + $0x6] sm:$0x3] %vm6531_vm7, %v8519_v36  ;;  %v8025_v16 = vpop.permute.xlu0 %8024  ;;  %vm17652_vm7 = vmmov %vm17648_vm3  ;;  %v9190_v36 = vld [vmem:[%s17275_s3 + $0x190] sm:$0xff] }
 0x3c5   :  { %7328 = vst.msk [vmem:[#allocation3 + $0x2] sm:$0x3] %vm6657_vm10, %v17000_v21 }
 0x3c6   :  { %7369 = vst.msk [vmem:[#allocation3 + $0x2] sm:$0x3] %vm6699_vm11, %v16903_v22  ;;  %v7656_v12 = vpop.permute.xlu1 %7655 }
 0x3c7   :  { %7410 = vst.msk [vmem:[#allocation3 + $0x2] sm:$0x3] %vm6741_vm12, %v16919_v13 }
 0x3c8   :  { %7451 = vst.msk [vmem:[#allocation3 + $0x2] sm:$0x3] %vm17648_vm3, %v16937_v47  ;;  %v8066_v21 = vpop.permute.xlu0 %8065  ;;  %vm17653_vm3 = vmmov %vm17649_vm4 }
 0x3c9   :  { %7492 = vst.msk [vmem:[#allocation3 + $0x2] sm:$0x3] %vm17649_vm4, %v16960_v6  ;;  %vm17654_vm4 = vmmov %vm17652_vm7 }
 0x3ca   :  { %7535 = vst.msk [vmem:[#allocation3 + $0x2] sm:$0x3] %vm17650_vm5, %v7533_v28  ;;  %v9199_v28 = vld [vmem:[%s17275_s3 + $0x1d8] sm:$0xff] }
 0x3cb   :  { %7576 = vst.msk [vmem:[#allocation3 + $0x2] sm:$0x3] %vm6911_vm0, %v7574_v54  ;;  %v9193_v54 = vld [vmem:[%s17275_s3 + $0x1a8] sm:$0xff] }
 0x3cc   :  { %7617 = vst.msk [vmem:[#allocation3 + $0x2] sm:$0x3] %vm17651_vm6, %v7615_v46  ;;  %v7902_v22 = vpop.permute.xlu1 %7901  ;;  %vm17655_vm6 = vmmov %vm17653_vm3  ;;  %v9174_v46 = vld [vmem:[%s17275_s3 + $0x110] sm:$0xff] }
 0x3cd   :  { %7658 = vst.msk [vmem:[#allocation3 + $0x2] sm:$0x3] %vm6995_vm2, %v7656_v12  ;;  %v9173_v12 = vld [vmem:[%s17275_s3 + $0x108] sm:$0xff] }
 0x3ce   :  { %7699 = vst.msk [vmem:[#allocation3 + $0x2] sm:$0x3] %vm7037_vm13, %v17017_v19 }
 0x3cf   :  { %7740 = vst.msk [vmem:[#allocation3 + $0x2] sm:$0x3] %vm7079_vm14, %v17038_v37 }
 0x3d0   :  { %7904 = vst.msk [vmem:[#allocation3 + $0x4] sm:$0x3] %vm6573_vm8, %v7902_v22  ;;  %v8107_v13 = vpop.permute.xlu0 %8106  ;;  %v9172_v22 = vld [vmem:[%s17275_s3 + $0x100] sm:$0xff] }
 0x3d1   :  { %7781 = vst.msk [vmem:[#allocation3 + $0x2] sm:$0x3] %vm7121_vm15, %v17054_v9 }
 0x3d2   :  { %7822 = vst.msk [vmem:[#allocation3 + $0x2] sm:$0x3] %vm7163_vm1, %v17071_v44  ;;  %v8683_v47 = vpop.permute.xlu1 %8682 }
 0x3d5   :  { %v8148_v6 = vpop.permute.xlu0 %8147 }
 0x3d8   :  { %v8724_v18 = vpop.permute.xlu1 %8723 }
 0x3dc   :  { %v7943_v15 = vpop.permute.xlu0 %7942 }
 0x3dd   :  { %7945 = vst.msk [vmem:[#allocation3 + $0x4] sm:$0x3] %vm6615_vm9, %v7943_v15 }
 0x3df   :  { %v8765_v19 = vpop.permute.xlu1 %8764 }
 0x3e2   :  { %v7984_v62 = vpop.permute.xlu0 %7983 }
 0x3e3   :  { %7986 = vst.msk [vmem:[#allocation3 + $0x4] sm:$0x3] %vm6657_vm10, %v7984_v62 }
 0x3e4   :  { %8027 = vst.msk [vmem:[#allocation3 + $0x4] sm:$0x3] %vm6699_vm11, %v8025_v16  ;;  %v9189_v16 = vld [vmem:[%s17275_s3 + $0x188] sm:$0xff] }
 0x3e5   :  { %8068 = vst.msk [vmem:[#allocation3 + $0x4] sm:$0x3] %vm6741_vm12, %v8066_v21  ;;  %v8806_v37 = vpop.permute.xlu1 %8805  ;;  %v9188_v21 = vld [vmem:[%s17275_s3 + $0x180] sm:$0xff] }
 0x3e6   :  { %8109 = vst.msk [vmem:[#allocation3 + $0x4] sm:$0x3] %vm17652_vm7, %v8107_v13 }
 0x3e7   :  { %8150 = vst.msk [vmem:[#allocation3 + $0x4] sm:$0x3] %vm17653_vm3, %v8148_v6 }
 0x3e9   :  { %v8355_v9 = vpop.permute.xlu0 %8354 }
 0x3ec   :  { %v8560_v26 = vpop.permute.xlu1 %8559 }
 0x3ed   :  { %8562 = vst.msk [vmem:[#allocation3 + $0x6] sm:$0x3] %vm6573_vm8, %v8560_v26  ;;  %vm17656_vm8 = vcmask 714368  }
 0x3ef   :  { %v8396_v51 = vpop.permute.xlu0 %8395 }
 0x3f2   :  { %v8601_v2 = vpop.permute.xlu1 %8600 }
 0x3f3   :  { %8603 = vst.msk [vmem:[#allocation3 + $0x6] sm:$0x3] %vm6615_vm9, %v8601_v2  ;;  %vm17657_vm9 = vmmov %vm17650_vm5 }
 0x3f6   :  { %v8437_v10 = vpop.permute.xlu0 %8436 }
 0x3f9   :  { %v8642_v24 = vpop.permute.xlu1 %8641 }
 0x3fa   :  { %8644 = vst.msk [vmem:[#allocation3 + $0x6] sm:$0x3] %vm6657_vm10, %v8642_v24  ;;  %vm17658_vm10 = vmmov %vm17656_vm8 }
 0x3fb   :  { %8685 = vst.msk [vmem:[#allocation3 + $0x6] sm:$0x3] %vm6699_vm11, %v8683_v47  ;;  %vm9373_vm11 = vcmask 74752  }
 0x3fc   :  { %8726 = vst.msk [vmem:[#allocation3 + $0x6] sm:$0x3] %vm6741_vm12, %v8724_v18  ;;  %v8191_v23 = vpop.permute.xlu0 %8190  ;;  %v10367_v18 = vld [vmem:[%s17276_s4] ss:$0 sm:$0xff] }
 0x3fd   :  { %8767 = vst.msk [vmem:[#allocation3 + $0x6] sm:$0x3] %vm17654_vm4, %v8765_v19 }
 0x3fe   :  { %8193 = vst.msk [vmem:[#allocation3 + $0x4] sm:$0x3] %vm17650_vm5, %v8191_v23 }
 0x3ff   :  { %8808 = vst.msk [vmem:[#allocation3 + $0x6] sm:$0x3] %vm17655_vm6, %v8806_v37  ;;  %v9013_v45 = vpop.permute.xlu1 %9012 }
 0x403   :  { %v8232_v7 = vpop.permute.xlu0 %8231 }
 0x404   :  { %8234 = vst.msk [vmem:[#allocation3 + $0x4] sm:$0x3] %vm6911_vm0, %v8232_v7 }
 0x406   :  { %v9054_v30 = vpop.permute.xlu1 %9053 }
 0x409   :  { %v8273_v25 = vpop.permute.xlu0 %8272 }
 0x40a   :  { %8275 = vst.msk [vmem:[#allocation3 + $0x4] sm:$0x3] %vm17656_vm8, %v8273_v25 }
 0x40c   :  { %v9095_v39 = vpop.permute.xlu1 %9094 }
 0x410   :  { %v8314_v33 = vpop.permute.xlu0 %8313 }
 0x411   :  { %8316 = vst.msk [vmem:[#allocation3 + $0x4] sm:$0x3] %vm6995_vm2, %v8314_v33 }
 0x412   :  { %8357 = vst.msk [vmem:[#allocation3 + $0x4] sm:$0x3] %vm7037_vm13, %v8355_v9 }
 0x413   :  { %8398 = vst.msk [vmem:[#allocation3 + $0x4] sm:$0x3] %vm7079_vm14, %v8396_v51  ;;  %v8849_v38 = vpop.permute.xlu1 %8848 }
 0x414   :  { %8851 = vst.msk [vmem:[#allocation3 + $0x6] sm:$0x3] %vm17657_vm9, %v8849_v38 }
 0x415   :  { %8439 = vst.msk [vmem:[#allocation3 + $0x4] sm:$0x3] %vm7121_vm15, %v8437_v10 }
 0x416   :  { %v8478_v59 = vpop.permute.xlu0 %8477 }
 0x417   :  { %8480 = vst.msk [vmem:[#allocation3 + $0x4] sm:$0x3] %vm7163_vm1, %v8478_v59 }
 0x419   :  { %v8890_v3 = vpop.permute.xlu1 %8889 }
 0x41a   :  { %8892 = vst.msk [vmem:[#allocation3 + $0x6] sm:$0x3] %vm6911_vm0, %v8890_v3 }
 0x41d   :  { %v8931_v60 = vpop.permute.xlu1 %8930 }
 0x41e   :  { %8933 = vst.msk [vmem:[#allocation3 + $0x6] sm:$0x3] %vm17658_vm10, %v8931_v60 }
 0x421   :  { %v8972_v14 = vpop.permute.xlu1 %8971 }
 0x422   :  { %8974 = vst.msk [vmem:[#allocation3 + $0x6] sm:$0x3] %vm6995_vm2, %v8972_v14 }
 0x423   :  { %9015 = vst.msk [vmem:[#allocation3 + $0x6] sm:$0x3] %vm7037_vm13, %v9013_v45 }
 0x424   :  { %9056 = vst.msk [vmem:[#allocation3 + $0x6] sm:$0x3] %vm7079_vm14, %v9054_v30 }
 0x425   :  { %9097 = vst.msk [vmem:[#allocation3 + $0x6] sm:$0x3] %vm7121_vm15, %v9095_v39 }
 0x426   :  { %v9136_v27 = vpop.permute.xlu1 %9135 }
 0x427   :  { %9138 = vst.msk [vmem:[#allocation3 + $0x6] sm:$0x3] %vm7163_vm1, %v9136_v27 }
 0x42e   :  { %v9139_v44 = vld [vmem:[#allocation3] sm:$0xff] }
 0x42f   :  { %v9219_v34 = vrot.slane %v9139_v44, %v15787_v4  ;;  %v9212_v31 = vcombine.high %v9139_v44, %v9139_v44 }
 0x431   :  { %v9227_v0 = vcombine.high %v9219_v34, %v9219_v34  ;;  %v17168_v1 = vrot.slane %v9212_v31, %v15787_v4  ;;  %v9201_v4 = vld [vmem:[%s17275_s3 + $0x1e8] sm:$0xff]  ;;  %s11926_s3 = scalar_lea.vmem %s9382_s7, 32 }
 0x432   :  { %p11927_p0 = scmp.ne.s32.totalorder %s9382_s7, %s11926_s3  ;;  %p11932_p2 = scmp.lt.s32.totalorder %s11926_s3, %s11926_s3 }
 0x433   :  { %9297 = vmatprep.mubr.f32.mxu1 %v9227_v0  ;;  %v9228_v55 = vcombine.high %v17168_v1, %v17168_v1 }
 0x434   :  { %9298 = vmatmul.mubr.f32.vlgmr.msra.gmra.mxu1 %v9219_v34  ;;  %p11933_p3 = por %p11932_p2, %p11931_p1 }
 0x435   :  { %10989 = vmatpush3.msra.mxu1 %v9187_v5  ;;  %9367 = vmatprep.mubr.f32.mxu1 %v9228_v55 }
 0x436   :  { %10990 = vmatprep.subr.mxu1 %v9202_v50  ;;  %p11934_p4 = pnand %p11933_p3, %p11927_p0 }
 0x437   :  { %10991 = vmatpush3.msra.mxu1 %v9186_v56 }
 0x438   :  { %10992 = vmatprep.subr.mxu1 %v9201_v4 }
 0x439   :  { %10993 = vmatpush3.msra.mxu1 %v9185_v43 }
 0x43a   :  { %10994 = vmatprep.subr.mxu1 %v9200_v17 }
 0x43b   :  { %10995 = vmatpush3.msra.mxu1 %v9184_v40 }
 0x43c   :  { %10996 = vmatprep.subr.mxu1 %v9199_v28 }
 0x43d   :  { %10997 = vmatpush3.msra.mxu1 %v9183_v11 }
 0x43e   :  { %10998 = vmatprep.subr.mxu1 %v9198_v61 }
 0x43f   :  { %10999 = vmatpush3.msra.mxu1 %v9182_v8 }
 0x440   :  { %11000 = vmatprep.subr.mxu1 %v9197_v48 }
 0x441   :  { %11001 = vmatpush3.msra.mxu1 %v9181_v20 }
 0x442   :  { %11002 = vmatprep.subr.mxu1 %v9196_v35 }
 0x443   :  { %11003 = vmatpush3.msra.mxu1 %v9180_v58 }
 0x444   :  { %11004 = vmatprep.subr.mxu1 %v9195_v49 }
 0x445   :  { %11005 = vmatpush3.msra.mxu1 %v9179_v42 }
 0x446   :  { %11006 = vmatprep.subr.mxu1 %v9194_v32 }
 0x447   :  { %11007 = vmatpush3.msra.mxu1 %v9178_v52 }
 0x448   :  { %11008 = vmatprep.subr.mxu1 %v9193_v54 }
 0x449   :  { %11009 = vmatpush3.msra.mxu1 %v9177_v57 }
 0x44a   :  { %11010 = vmatprep.subr.mxu1 %v9192_v53 }
 0x44b   :  { %11011 = vmatpush3.msra.mxu1 %v9176_v29 }
 0x44c   :  { %11012 = vmatprep.subr.mxu1 %v9191_v63 }
 0x44d   :  { %11013 = vmatpush3.msra.mxu1 %v9175_v41 }
 0x44e   :  { %11014 = vmatprep.subr.mxu1 %v9190_v36 }
 0x44f   :  { %11015 = vmatpush3.msra.mxu1 %v9174_v46 }
 0x450   :  { %11016 = vmatprep.subr.mxu1 %v9189_v16 }
 0x451   :  { %11017 = vmatpush3.msra.mxu1 %v9173_v12 }
 0x452   :  { %11018 = vmatprep.subr.mxu1 %v9188_v21 }
 0x453   :  { %11019 = vmatpush3.msra.mxu1 %v9172_v22 }
 0x454   :  { %9368 = vmatmul.mubr.f32.vlgmr.msra.gmra.mxu1 %v17168_v1 }
 0x4f4   :  { %v10985_v13 = vpop.f32.mrf.mxu1 }
 0x4f6   :  { %v10986_v47 = vpop.f32.mrf.mxu1 }
 0x4f7   :  { %v10987_v6 = vadd.f32 %v10986_v47, %v10985_v13 }
 0x4f9   :  { %v9300_v62 = vadd.f32 %v10987_v6, %v10367_v18 }
 0x514   :  { %v11020_v15 = vpop.f32.mrf.mxu1 }
 0x516   :  { %v11021_v19 = vpop.f32.mrf.mxu1 }
 0x517   :  { %v11022_v37 = vadd.f32 %v11021_v19, %v11020_v15 }
 0x519   :  { %v9370_v9 = vadd.f32 %v11022_v37, %v9300_v62 }
 0x51b   :  { %9374 = vst.msk [vmem:[#allocation4] sm:$0x3] %vm9373_vm11, %v9370_v9 }
 0x51c   :  { %11937 = shalt.err (!%p11934_p4)
}
 0x51d   :  { %9384 = dma.vmem_to_hbm [thread:$0]  %s9382_s7, 32, %s17277_s5, [#allocation5]  }
 0x51e   :  { %11946 = dma.done.wait [#allocation5], 32  }
 0x51f   :  { %11947 = vsyncadd [#allocation5], 4294967264 }
 0x520   :  { %9388 = vsyncpa [#allocation5], 1 }

</bundles_post_ra>
